<compile_context>
chip_gen: v7x
topology: tpu7x:2x2x1
jax: 0.10.0
libtpu: 0.0.40
codegen_flags: <defaults>
</compile_context>

<pallas_src>
import functools

import jax
import jax.numpy as jnp
from jax import lax
from jax.experimental import pallas as pl
from jax.experimental.pallas import tpu as pltpu


# ----------------------------------------------------------------------------------
# Pallas kernel: one block of Bt batch elements per grid step.
# ----------------------------------------------------------------------------------
def convgru_kernel(xp_ref, hp_ref, wx_ref, whur_ref, who_ref, b_ref,
                   out_ref, hrpad_ref, *, Bt, H, W, K, P, Cin, Chid, compute_dtype):
    Wp = W + 2 * P
    Hp = H + 2 * P
    C = Chid
    cdt = compute_dtype
    # flat accumulator rows: f = i*Wp + j covers every valid output (i<H, j<W)
    n_rows = (H - 1) * Wp + W
    center = P * Wp + P                       # flat offset of pixel (0,0) in padded layout
    tail = Hp * Wp - center - n_rows
    out_tail = H * Wp - n_rows
    taps = [kh * Wp + kw for kh in range(K) for kw in range(K)]

    # Hoisted once per grid step: fused weights (already compute_dtype) + f32 bias.
    wx = wx_ref[...]                          # (K*K*Cin,  3C)  [u | r | o]
    whur = whur_ref[...]                      # (K*K*Chid, 2C)  [u | r]
    who = who_ref[...]                        # (K*K*Chid,  C)  [o]
    bias = b_ref[...]                         # (1, 3C) f32

    # Row-validity mask generated in-kernel: flat column j >= W is width-halo wrap
    # garbage (two VPU ops on a slack slot instead of a DMA'd input).
    row_id = lax.broadcasted_iota(jnp.int32, (n_rows, C), 0)
    valid = (row_id % Wp) < W

    for bi in range(Bt):
        # ---- im2col stacks: a conv tap (kh,kw) is a pure sublane-offset slice ------
        x_stack = jnp.concatenate(
            [xp_ref[bi, pl.ds(t, n_rows), :] for t in taps], axis=-1)   # (n_rows, K*K*Cin)
        h_stack = jnp.concatenate(
            [hp_ref[bi, pl.ds(t, n_rows), :] for t in taps], axis=-1)   # (n_rows, K*K*Chid)

        # ---- one wide-contraction MXU matmul per conv group (single hoisted cast) --
        acc_x3 = jnp.dot(x_stack.astype(cdt), wx,
                         preferred_element_type=jnp.float32) + bias     # (n_rows, 3C)
        acc_h2 = jnp.dot(h_stack.astype(cdt), whur,
                         preferred_element_type=jnp.float32)            # (n_rows, 2C)

        # Fused sigmoid on the 2C-wide [update | reset] block, then split.
        ur = jax.nn.sigmoid(acc_x3[:, :2 * C] + acc_h2)
        update = ur[:, :C]
        reset = ur[:, C:]

        # Interior h in the same flat row layout (kept f32: it feeds the blend).
        h_int = hp_ref[bi, pl.ds(center, n_rows), :]                    # (n_rows, C) f32

        # ---- zero-haloed (h * reset) in the flat padded scratch ---------------------
        # Wrap rows masked to zero; only the halo end-caps are explicitly re-zeroed,
        # so the scratch carries no state across grid steps (megacore safe).
        hr = jnp.where(valid, h_int * reset, 0.0)
        if center > 0:
            hrpad_ref[pl.ds(0, center), :] = jnp.zeros((center, C), jnp.float32)
        hrpad_ref[pl.ds(center, n_rows), :] = hr
        if tail > 0:
            hrpad_ref[pl.ds(center + n_rows, tail), :] = jnp.zeros((tail, C), jnp.float32)

        # ---- out gate: x contribution already sits in acc_x3[:, 2C:] ---------------
        hr_stack = jnp.concatenate(
            [hrpad_ref[pl.ds(t, n_rows), :] for t in taps], axis=-1)    # (n_rows, K*K*Chid)
        acc_o = acc_x3[:, 2 * C:] + jnp.dot(hr_stack.astype(cdt), who,
                                            preferred_element_type=jnp.float32)
        out = jnp.tanh(acc_o)

        # ---- GRU blend + single contiguous store (width-padded flat layout) --------
        new_h = h_int * (1.0 - update) + out * update
        out_ref[bi, pl.ds(0, n_rows), :] = new_h.astype(out_ref.dtype)
        if out_tail > 0:
            # NOTE: these tail rows (and the wrap columns inside [0, n_rows)) are
            # deterministic garbage derived from halo rows; the wrapper slices them
            # away — do not treat out_flat as fully valid.
            out_ref[bi, pl.ds(n_rows, out_tail), :] = jnp.zeros((out_tail, C), out_ref.dtype)


# ----------------------------------------------------------------------------------
# Wrapper
# ----------------------------------------------------------------------------------
def _pick_batch_block(B):
    """Largest divisor of B that still leaves >=2 grid steps (v7x megacore)."""
    bt = 1
    for d in range(1, B + 1):
        if B % d == 0 and (B < 2 or B // d >= 2):
            bt = d
    return bt


def convgru_cell(x_nhwc, h_nhwc, params, *, compute_dtype=jnp.bfloat16,
                 batch_block=None):
    """x_nhwc: (B,H,W,Cin) f32, h_nhwc: (B,H,W,Chid) f32 -> new hidden (B,H,W,Chid)."""
    B, H, W, Cin = x_nhwc.shape
    Chid = h_nhwc.shape[-1]
    K = params["wx_all"].shape[0]
    P = K // 2
    Hp, Wp = H + 2 * P, W + 2 * P
    Rp = Hp * Wp
    n_rows = (H - 1) * Wp + W
    R_out = H * Wp
    Bt = _pick_batch_block(B) if batch_block is None else batch_block
    assert B % Bt == 0, (B, Bt)

    # Zero-pad the spatial halo and flatten rows so a conv tap is a pure
    # sublane-offset slice inside the kernel (single fused pad+reshape in XLA).
    xp = jnp.pad(x_nhwc, ((0, 0), (P, P), (P, P), (0, 0))).reshape(B, Rp, Cin)
    hp = jnp.pad(h_nhwc, ((0, 0), (P, P), (P, P), (0, 0))).reshape(B, Rp, Chid)

    # Fused conv weights reshaped to the im2col contraction layout (kh, kw, cin)
    # and pre-cast to the MXU operand dtype (bf16 by default).
    wx_flat = params["wx_all"].reshape(K * K * Cin, 3 * Chid).astype(compute_dtype)
    whur_flat = params["wh_ur"].reshape(K * K * Chid, 2 * Chid).astype(compute_dtype)
    who_flat = params["wh_o"].reshape(K * K * Chid, Chid).astype(compute_dtype)
    b_all = params["b_all"].astype(jnp.float32)

    kernel = functools.partial(convgru_kernel, Bt=Bt, H=H, W=W, K=K, P=P,
                               Cin=Cin, Chid=Chid, compute_dtype=compute_dtype)

    grid_spec = pltpu.PrefetchScalarGridSpec(
        num_scalar_prefetch=0,
        grid=(B // Bt,),
        in_specs=[
            pl.BlockSpec((Bt, Rp, Cin), lambda b: (b, 0, 0)),                 # padded x (flat)
            pl.BlockSpec((Bt, Rp, Chid), lambda b: (b, 0, 0)),                # padded h (flat)
            pl.BlockSpec((K * K * Cin, 3 * Chid), lambda b: (0, 0)),          # fused x weights
            pl.BlockSpec((K * K * Chid, 2 * Chid), lambda b: (0, 0)),         # fused h weights (u,r)
            pl.BlockSpec((K * K * Chid, Chid), lambda b: (0, 0)),             # h weights (out gate)
            pl.BlockSpec((1, 3 * Chid), lambda b: (0, 0)),                    # fused biases
        ],
        out_specs=pl.BlockSpec((Bt, R_out, Chid), lambda b: (b, 0, 0)),
        scratch_shapes=[pltpu.VMEM((Rp, Chid), jnp.float32)],                 # padded (h*reset)
    )

    flops = int(2 * B * H * W * (Cin + Chid) * 3 * Chid * K * K)
    transcendentals = int(3 * B * H * W * Chid)
    bytes_accessed = int(4 * (xp.size + hp.size + B * R_out * Chid)
                         + (wx_flat.size + whur_flat.size + who_flat.size)
                         * jnp.dtype(compute_dtype).itemsize
                         + 4 * b_all.size)

    # VMEM residency estimate (double-buffered blocks + scratch + im2col temps);
    # cap at 64 MiB so the limit is valid on v7x as well as v5e/v6e.
    w_bytes = (wx_flat.size + whur_flat.size + who_flat.size) * jnp.dtype(compute_dtype).itemsize
    vmem_est = (2 * Bt * Rp * (Cin + Chid) * 4         # double-buffered f32 inputs
                + 2 * Bt * R_out * Chid * 4            # double-buffered output
                + Rp * Chid * 4                        # hr scratch
                + 2 * w_bytes                          # weights (double-buffered)
                + 4 * n_rows * K * K * Chid * 4)       # im2col temporaries (approx)
    vmem_limit = int(min(max(2 * vmem_est, 32 << 20), 64 << 20))

    out_flat = pl.pallas_call(
        kernel,
        out_shape=jax.ShapeDtypeStruct((B, R_out, Chid), x_nhwc.dtype),
        grid_spec=grid_spec,
        compiler_params=pltpu.CompilerParams(
            dimension_semantics=("parallel",),
            vmem_limit_bytes=vmem_limit),
        cost_estimate=pl.CostEstimate(flops=flops, transcendentals=transcendentals,
                                      bytes_accessed=bytes_accessed),
    )(xp, hp, wx_flat, whur_flat, who_flat, b_all)

    # Drop the width-halo columns: flat row f = i*Wp + j -> (i, j).
    return out_flat.reshape(B, H, Wp, Chid)[:, :, :W, :]


# ----------------------------------------------------------------------------------
# Deterministic parameter init (orthogonal rows, zero bias — same shapes as the module)
# ----------------------------------------------------------------------------------
def make_gate_weight(key, out_ch, in_ch, k):
    n = in_ch * k * k
    a = jax.random.normal(key, (n, out_ch), dtype=jnp.float32)
    q, _ = jnp.linalg.qr(a)                       # (n, out_ch), orthonormal columns
    w_oihw = q.T.reshape(out_ch, in_ch, k, k)     # torch Conv2d weight layout
    return jnp.transpose(w_oihw, (2, 3, 1, 0))    # -> HWIO (k, k, in_ch, out_ch)


def make_params(key, input_dim, hidden_dim, kernel_size):
    ku, kr, ko = jax.random.split(key, 3)
    in_ch = input_dim + hidden_dim
    w_u = make_gate_weight(ku, hidden_dim, in_ch, kernel_size)
    w_r = make_gate_weight(kr, hidden_dim, in_ch, kernel_size)
    w_o = make_gate_weight(ko, hidden_dim, in_ch, kernel_size)
    b_u = jnp.zeros((hidden_dim,), jnp.float32)
    b_r = jnp.zeros((hidden_dim,), jnp.float32)
    b_o = jnp.zeros((hidden_dim,), jnp.float32)
    params = {
        # fused packing: x-side [update | reset | out], h-side [update | reset], h-side out
        "wx_all": jnp.concatenate([w_u[:, :, :input_dim, :],
                                   w_r[:, :, :input_dim, :],
                                   w_o[:, :, :input_dim, :]], axis=-1),
        "wh_ur": jnp.concatenate([w_u[:, :, input_dim:, :],
                                  w_r[:, :, input_dim:, :]], axis=-1),
        "wh_o": w_o[:, :, input_dim:, :],
        "b_all": jnp.concatenate([b_u, b_r, b_o]).reshape(1, 3 * hidden_dim),
    }
    full = {"w_u": w_u, "w_r": w_r, "w_o": w_o, "b_u": b_u, "b_r": b_r, "b_o": b_o}
    return params, full


# ----------------------------------------------------------------------------------
# Pure-JAX reference (mirrors the PyTorch forward, NHWC)
# ----------------------------------------------------------------------------------
def ref_convgru(x, h, full_w):
    def conv(inp, w, b):
        y = lax.conv_general_dilated(
            inp, w, window_strides=(1, 1), padding="SAME",
            dimension_numbers=("NHWC", "HWIO", "NHWC"),
            precision=lax.Precision.HIGHEST)
        return y + b.reshape(1, 1, 1, -1)
    combined = jnp.concatenate([x, h], axis=-1)
    update = jax.nn.sigmoid(conv(combined, full_w["w_u"], full_w["b_u"]))
    reset = jax.nn.sigmoid(conv(combined, full_w["w_r"], full_w["b_r"]))
    out = jnp.tanh(conv(jnp.concatenate([x, h * reset], axis=-1),
                        full_w["w_o"], full_w["b_o"]))
    return h * (1.0 - update) + out * update


# ----------------------------------------------------------------------------------
if __name__ == "__main__":
    B, Cin, Chid, H, W, K = 2, 4, 32, 16, 16, 3

    key = jax.random.PRNGKey(0)
    k_x, k_h, k_p = jax.random.split(key, 3)

    # The PyTorch module consumes NCHW; generate NCHW then permute to the kernel's NHWC.
    x_nchw = jax.random.normal(k_x, (B, Cin, H, W), dtype=jnp.float32)
    h_nchw = jax.random.normal(k_h, (B, Chid, H, W), dtype=jnp.float32)
    x = jnp.transpose(x_nchw, (0, 2, 3, 1))   # (B, H, W, Cin)
    h = jnp.transpose(h_nchw, (0, 2, 3, 1))   # (B, H, W, Chid)

    params, full_w = make_params(k_p, Cin, Chid, K)
    ref = jax.block_until_ready(ref_convgru(x, h, full_w))

    # f32 MXU operands: tight validation path against the HIGHEST-precision lax.conv ref.
    new_h32 = jax.block_until_ready(convgru_cell(x, h, params, compute_dtype=jnp.float32))
    assert new_h32.shape == (B, H, W, Chid)
    err32 = float(jnp.max(jnp.abs(new_h32 - ref)))
    assert jnp.allclose(new_h32, ref, atol=1e-3, rtol=1e-3), err32

    # bf16 MXU operands (production default for v6e/v7x): loose tolerance as expected.
    new_hbf = jax.block_until_ready(convgru_cell(x, h, params))   # compute_dtype=bf16
    errbf = float(jnp.max(jnp.abs(new_hbf - ref)))
    assert jnp.allclose(new_hbf, ref, atol=8e-2, rtol=8e-2), errbf

    print("KERNEL_OK")
</pallas_src>

<mosaic_0001>
module attributes {stable_mosaic.version = 11 : i64} {
  func.func @convgru_kernel(%arg0: i32, %arg1: memref<1x324x4xf32, #tpu.memory_space<vmem>>, %arg2: memref<1x324x32xf32, #tpu.memory_space<vmem>>, %arg3: memref<36x96xf32, #tpu.memory_space<vmem>>, %arg4: memref<288x64xf32, #tpu.memory_space<vmem>>, %arg5: memref<288x32xf32, #tpu.memory_space<vmem>>, %arg6: memref<1x96xf32, #tpu.memory_space<vmem>>, %arg7: memref<1x288x32xf32, #tpu.memory_space<vmem>>, %arg8: memref<324x32xf32, #tpu.memory_space<vmem>>) attributes {dimension_semantics = [#tpu.dimension_semantics<parallel>], iteration_bounds = array<i64: 2>, scalar_prefetch = 0 : i64, scratch_operands = 1 : i64, tpu.core_type = #tpu.core_type<tc>, window_params = [{transform_indices = @transform_0, window_bounds = array<i64: 1, 324, 4>}, {transform_indices = @transform_1, window_bounds = array<i64: 1, 324, 32>}, {pipeline_mode = #tpu.pipeline_mode<synchronous>, transform_indices = @transform_2, window_bounds = array<i64: 36, 96>}, {pipeline_mode = #tpu.pipeline_mode<synchronous>, transform_indices = @transform_3, window_bounds = array<i64: 288, 64>}, {pipeline_mode = #tpu.pipeline_mode<synchronous>, transform_indices = @transform_4, window_bounds = array<i64: 288, 32>}, {pipeline_mode = #tpu.pipeline_mode<synchronous>, transform_indices = @transform_5, window_bounds = array<i64: 1, 96>}, {transform_indices = @transform_6, window_bounds = array<i64: 1, 288, 32>}]} {
    %c0 = arith.constant 0 : index
    %c0_0 = arith.constant 0 : index
    %0 = vector.load %arg3[%c0, %c0_0] : memref<36x96xf32, #tpu.memory_space<vmem>>, vector<36x96xf32>
    %c0_1 = arith.constant 0 : index
    %c0_2 = arith.constant 0 : index
    %1 = vector.load %arg4[%c0_1, %c0_2] : memref<288x64xf32, #tpu.memory_space<vmem>>, vector<288x64xf32>
    %c0_3 = arith.constant 0 : index
    %c0_4 = arith.constant 0 : index
    %2 = vector.load %arg5[%c0_3, %c0_4] : memref<288x32xf32, #tpu.memory_space<vmem>>, vector<288x32xf32>
    %c0_5 = arith.constant 0 : index
    %c0_6 = arith.constant 0 : index
    %3 = vector.load %arg6[%c0_5, %c0_6] : memref<1x96xf32, #tpu.memory_space<vmem>>, vector<1x96xf32>
    %4 = tpu.iota {dimensions = array<i32: 0>} : vector<286x32xi32>
    %c18_i32 = arith.constant 18 : i32
    %c0_i32 = arith.constant 0 : i32
    %5 = arith.cmpi eq, %c18_i32, %c0_i32 : i32
    %c1_i32 = arith.constant 1 : i32
    %6 = arith.select %5, %c1_i32, %c18_i32 : i32
    %7 = vector.broadcast %6 : i32 to vector<286x32xi32>
    %8 = arith.remsi %4, %7 : vector<286x32xi32>
    %c0_i32_7 = arith.constant 0 : i32
    %9 = vector.broadcast %c0_i32_7 : i32 to vector<286x32xi32>
    %10 = arith.cmpi ne, %8, %9 : vector<286x32xi32>
    %c0_i32_8 = arith.constant 0 : i32
    %11 = vector.broadcast %c0_i32_8 : i32 to vector<286x32xi32>
    %12 = arith.cmpi slt, %8, %11 : vector<286x32xi32>
    %c0_i32_9 = arith.constant 0 : i32
    %13 = arith.cmpi slt, %6, %c0_i32_9 : i32
    %14 = vector.broadcast %13 : i1 to vector<286x32xi1>
    %15 = vector.broadcast %14 : vector<286x32xi1> to vector<286x32xi1>
    %16 = arith.xori %12, %15 : vector<286x32xi1>
    %17 = arith.andi %16, %10 : vector<286x32xi1>
    %18 = vector.broadcast %6 : i32 to vector<286x32xi32>
    %19 = arith.addi %8, %18 : vector<286x32xi32>
    %20 = arith.select %17, %19, %8 : vector<286x32xi1>, vector<286x32xi32>
    %c16_i32 = arith.constant 16 : i32
    %21 = vector.broadcast %c16_i32 : i32 to vector<286x32xi32>
    %22 = arith.cmpi slt, %20, %21 : vector<286x32xi32>
    %c0_10 = arith.constant 0 : index
    %c0_11 = arith.constant 0 : index
    %c0_12 = arith.constant 0 : index
    %23 = vector.load %arg1[%c0_10, %c0_11, %c0_12] : memref<1x324x4xf32, #tpu.memory_space<vmem>>, vector<1x286x4xf32>
    %24 = vector.shape_cast %23 : vector<1x286x4xf32> to vector<286x4xf32>
    %c0_13 = arith.constant 0 : index
    %c1 = arith.constant 1 : index
    %c0_14 = arith.constant 0 : index
    %25 = vector.load %arg1[%c0_13, %c1, %c0_14] : memref<1x324x4xf32, #tpu.memory_space<vmem>>, vector<1x286x4xf32>
    %26 = vector.shape_cast %25 : vector<1x286x4xf32> to vector<286x4xf32>
    %c0_15 = arith.constant 0 : index
    %c2 = arith.constant 2 : index
    %c0_16 = arith.constant 0 : index
    %27 = vector.load %arg1[%c0_15, %c2, %c0_16] : memref<1x324x4xf32, #tpu.memory_space<vmem>>, vector<1x286x4xf32>
    %28 = vector.shape_cast %27 : vector<1x286x4xf32> to vector<286x4xf32>
    %c0_17 = arith.constant 0 : index
    %c18 = arith.constant 18 : index
    %c0_18 = arith.constant 0 : index
    %29 = vector.load %arg1[%c0_17, %c18, %c0_18] : memref<1x324x4xf32, #tpu.memory_space<vmem>>, vector<1x286x4xf32>
    %30 = vector.shape_cast %29 : vector<1x286x4xf32> to vector<286x4xf32>
    %c0_19 = arith.constant 0 : index
    %c19 = arith.constant 19 : index
    %c0_20 = arith.constant 0 : index
    %31 = vector.load %arg1[%c0_19, %c19, %c0_20] : memref<1x324x4xf32, #tpu.memory_space<vmem>>, vector<1x286x4xf32>
    %32 = vector.shape_cast %31 : vector<1x286x4xf32> to vector<286x4xf32>
    %c0_21 = arith.constant 0 : index
    %c20 = arith.constant 20 : index
    %c0_22 = arith.constant 0 : index
    %33 = vector.load %arg1[%c0_21, %c20, %c0_22] : memref<1x324x4xf32, #tpu.memory_space<vmem>>, vector<1x286x4xf32>
    %34 = vector.shape_cast %33 : vector<1x286x4xf32> to vector<286x4xf32>
    %c0_23 = arith.constant 0 : index
    %c36 = arith.constant 36 : index
    %c0_24 = arith.constant 0 : index
    %35 = vector.load %arg1[%c0_23, %c36, %c0_24] : memref<1x324x4xf32, #tpu.memory_space<vmem>>, vector<1x286x4xf32>
    %36 = vector.shape_cast %35 : vector<1x286x4xf32> to vector<286x4xf32>
    %c0_25 = arith.constant 0 : index
    %c37 = arith.constant 37 : index
    %c0_26 = arith.constant 0 : index
    %37 = vector.load %arg1[%c0_25, %c37, %c0_26] : memref<1x324x4xf32, #tpu.memory_space<vmem>>, vector<1x286x4xf32>
    %38 = vector.shape_cast %37 : vector<1x286x4xf32> to vector<286x4xf32>
    %c0_27 = arith.constant 0 : index
    %c38 = arith.constant 38 : index
    %c0_28 = arith.constant 0 : index
    %39 = vector.load %arg1[%c0_27, %c38, %c0_28] : memref<1x324x4xf32, #tpu.memory_space<vmem>>, vector<1x286x4xf32>
    %40 = vector.shape_cast %39 : vector<1x286x4xf32> to vector<286x4xf32>
    %41 = tpu.concatenate %24, %26, %28, %30, %32, %34, %36, %38, %40 in 1 : vector<286x4xf32>, vector<286x4xf32>, vector<286x4xf32>, vector<286x4xf32>, vector<286x4xf32>, vector<286x4xf32>, vector<286x4xf32>, vector<286x4xf32>, vector<286x4xf32> -> vector<286x36xf32>
    %c0_29 = arith.constant 0 : index
    %c0_30 = arith.constant 0 : index
    %c0_31 = arith.constant 0 : index
    %42 = vector.load %arg2[%c0_29, %c0_30, %c0_31] : memref<1x324x32xf32, #tpu.memory_space<vmem>>, vector<1x286x32xf32>
    %43 = vector.shape_cast %42 : vector<1x286x32xf32> to vector<286x32xf32>
    %c0_32 = arith.constant 0 : index
    %c1_33 = arith.constant 1 : index
    %c0_34 = arith.constant 0 : index
    %44 = vector.load %arg2[%c0_32, %c1_33, %c0_34] : memref<1x324x32xf32, #tpu.memory_space<vmem>>, vector<1x286x32xf32>
    %45 = vector.shape_cast %44 : vector<1x286x32xf32> to vector<286x32xf32>
    %c0_35 = arith.constant 0 : index
    %c2_36 = arith.constant 2 : index
    %c0_37 = arith.constant 0 : index
    %46 = vector.load %arg2[%c0_35, %c2_36, %c0_37] : memref<1x324x32xf32, #tpu.memory_space<vmem>>, vector<1x286x32xf32>
    %47 = vector.shape_cast %46 : vector<1x286x32xf32> to vector<286x32xf32>
    %c0_38 = arith.constant 0 : index
    %c18_39 = arith.constant 18 : index
    %c0_40 = arith.constant 0 : index
    %48 = vector.load %arg2[%c0_38, %c18_39, %c0_40] : memref<1x324x32xf32, #tpu.memory_space<vmem>>, vector<1x286x32xf32>
    %49 = vector.shape_cast %48 : vector<1x286x32xf32> to vector<286x32xf32>
    %c0_41 = arith.constant 0 : index
    %c19_42 = arith.constant 19 : index
    %c0_43 = arith.constant 0 : index
    %50 = vector.load %arg2[%c0_41, %c19_42, %c0_43] : memref<1x324x32xf32, #tpu.memory_space<vmem>>, vector<1x286x32xf32>
    %51 = vector.shape_cast %50 : vector<1x286x32xf32> to vector<286x32xf32>
    %c0_44 = arith.constant 0 : index
    %c20_45 = arith.constant 20 : index
    %c0_46 = arith.constant 0 : index
    %52 = vector.load %arg2[%c0_44, %c20_45, %c0_46] : memref<1x324x32xf32, #tpu.memory_space<vmem>>, vector<1x286x32xf32>
    %53 = vector.shape_cast %52 : vector<1x286x32xf32> to vector<286x32xf32>
    %c0_47 = arith.constant 0 : index
    %c36_48 = arith.constant 36 : index
    %c0_49 = arith.constant 0 : index
    %54 = vector.load %arg2[%c0_47, %c36_48, %c0_49] : memref<1x324x32xf32, #tpu.memory_space<vmem>>, vector<1x286x32xf32>
    %55 = vector.shape_cast %54 : vector<1x286x32xf32> to vector<286x32xf32>
    %c0_50 = arith.constant 0 : index
    %c37_51 = arith.constant 37 : index
    %c0_52 = arith.constant 0 : index
    %56 = vector.load %arg2[%c0_50, %c37_51, %c0_52] : memref<1x324x32xf32, #tpu.memory_space<vmem>>, vector<1x286x32xf32>
    %57 = vector.shape_cast %56 : vector<1x286x32xf32> to vector<286x32xf32>
    %c0_53 = arith.constant 0 : index
    %c38_54 = arith.constant 38 : index
    %c0_55 = arith.constant 0 : index
    %58 = vector.load %arg2[%c0_53, %c38_54, %c0_55] : memref<1x324x32xf32, #tpu.memory_space<vmem>>, vector<1x286x32xf32>
    %59 = vector.shape_cast %58 : vector<1x286x32xf32> to vector<286x32xf32>
    %60 = tpu.concatenate %43, %45, %47, %49, %51, %53, %55, %57, %59 in 1 : vector<286x32xf32>, vector<286x32xf32>, vector<286x32xf32>, vector<286x32xf32>, vector<286x32xf32>, vector<286x32xf32>, vector<286x32xf32>, vector<286x32xf32>, vector<286x32xf32> -> vector<286x288xf32>
    %cst = arith.constant dense<0.000000e+00> : vector<286x96xf32>
    %61 = tpu.matmul %41, %0, %cst {dimension_numbers = #tpu.dot_dimension_numbers<[1], [0], [0], [1], [0, 0, 1, 1], [], []>} : vector<286x36xf32>, vector<36x96xf32>, vector<286x96xf32> -> vector<286x96xf32>
    %62 = vector.broadcast %3 : vector<1x96xf32> to vector<286x96xf32>
    %63 = arith.addf %61, %62 : vector<286x96xf32>
    %cst_56 = arith.constant dense<0.000000e+00> : vector<286x64xf32>
    %64 = tpu.matmul %60, %1, %cst_56 {dimension_numbers = #tpu.dot_dimension_numbers<[1], [0], [0], [1], [0, 0, 1, 1], [], []>} : vector<286x288xf32>, vector<288x64xf32>, vector<286x64xf32> -> vector<286x64xf32>
    %65 = vector.extract_strided_slice %63 {offsets = [0, 0], sizes = [286, 64], strides = [1, 1]} : vector<286x96xf32> to vector<286x64xf32>
    %66 = arith.addf %65, %64 : vector<286x64xf32>
    %67 = arith.negf %66 : vector<286x64xf32>
    %68 = math.exp %67 : vector<286x64xf32>
    %cst_57 = arith.constant 1.000000e+00 : f32
    %69 = vector.broadcast %cst_57 : f32 to vector<286x64xf32>
    %70 = arith.addf %69, %68 : vector<286x64xf32>
    %71 = arith.divf %69, %70 : vector<286x64xf32>
    %72 = vector.extract_strided_slice %71 {offsets = [0, 0], sizes = [286, 32], strides = [1, 1]} : vector<286x64xf32> to vector<286x32xf32>
    %73 = vector.extract_strided_slice %71 {offsets = [0, 32], sizes = [286, 32], strides = [1, 1]} : vector<286x64xf32> to vector<286x32xf32>
    %c0_58 = arith.constant 0 : index
    %c19_59 = arith.constant 19 : index
    %c0_60 = arith.constant 0 : index
    %74 = vector.load %arg2[%c0_58, %c19_59, %c0_60] : memref<1x324x32xf32, #tpu.memory_space<vmem>>, vector<1x286x32xf32>
    %75 = vector.shape_cast %74 : vector<1x286x32xf32> to vector<286x32xf32>
    %76 = arith.mulf %75, %73 : vector<286x32xf32>
    %cst_61 = arith.constant 0.000000e+00 : f32
    %77 = vector.broadcast %cst_61 : f32 to vector<286x32xf32>
    %78 = arith.select %22, %76, %77 : vector<286x32xi1>, vector<286x32xf32>
    %cst_62 = arith.constant 0.000000e+00 : f32
    %79 = vector.broadcast %cst_62 : f32 to vector<19x32xf32>
    %c0_63 = arith.constant 0 : index
    %c0_64 = arith.constant 0 : index
    %80 = vector.load %arg8[%c0_63, %c0_64] : memref<324x32xf32, #tpu.memory_space<vmem>>, vector<19x32xf32>
    tpu.vector_store %arg8[%c0_63, %c0_64], %79 {strides = array<i32>} : memref<324x32xf32, #tpu.memory_space<vmem>>, vector<19x32xf32>,
    %c19_65 = arith.constant 19 : index
    %c0_66 = arith.constant 0 : index
    %81 = vector.load %arg8[%c19_65, %c0_66] : memref<324x32xf32, #tpu.memory_space<vmem>>, vector<286x32xf32>
    tpu.vector_store %arg8[%c19_65, %c0_66], %78 {strides = array<i32>} : memref<324x32xf32, #tpu.memory_space<vmem>>, vector<286x32xf32>,
    %cst_67 = arith.constant 0.000000e+00 : f32
    %82 = vector.broadcast %cst_67 : f32 to vector<19x32xf32>
    %c305 = arith.constant 305 : index
    %c0_68 = arith.constant 0 : index
    %83 = vector.load %arg8[%c305, %c0_68] : memref<324x32xf32, #tpu.memory_space<vmem>>, vector<19x32xf32>
    tpu.vector_store %arg8[%c305, %c0_68], %82 {strides = array<i32>} : memref<324x32xf32, #tpu.memory_space<vmem>>, vector<19x32xf32>,
    %c0_69 = arith.constant 0 : index
    %c0_70 = arith.constant 0 : index
    %84 = vector.load %arg8[%c0_69, %c0_70] : memref<324x32xf32, #tpu.memory_space<vmem>>, vector<286x32xf32>
    %c1_71 = arith.constant 1 : index
    %c0_72 = arith.constant 0 : index
    %85 = vector.load %arg8[%c1_71, %c0_72] : memref<324x32xf32, #tpu.memory_space<vmem>>, vector<286x32xf32>
    %c2_73 = arith.constant 2 : index
    %c0_74 = arith.constant 0 : index
    %86 = vector.load %arg8[%c2_73, %c0_74] : memref<324x32xf32, #tpu.memory_space<vmem>>, vector<286x32xf32>
    %c18_75 = arith.constant 18 : index
    %c0_76 = arith.constant 0 : index
    %87 = vector.load %arg8[%c18_75, %c0_76] : memref<324x32xf32, #tpu.memory_space<vmem>>, vector<286x32xf32>
    %c19_77 = arith.constant 19 : index
    %c0_78 = arith.constant 0 : index
    %88 = vector.load %arg8[%c19_77, %c0_78] : memref<324x32xf32, #tpu.memory_space<vmem>>, vector<286x32xf32>
    %c20_79 = arith.constant 20 : index
    %c0_80 = arith.constant 0 : index
    %89 = vector.load %arg8[%c20_79, %c0_80] : memref<324x32xf32, #tpu.memory_space<vmem>>, vector<286x32xf32>
    %c36_81 = arith.constant 36 : index
    %c0_82 = arith.constant 0 : index
    %90 = vector.load %arg8[%c36_81, %c0_82] : memref<324x32xf32, #tpu.memory_space<vmem>>, vector<286x32xf32>
    %c37_83 = arith.constant 37 : index
    %c0_84 = arith.constant 0 : index
    %91 = vector.load %arg8[%c37_83, %c0_84] : memref<324x32xf32, #tpu.memory_space<vmem>>, vector<286x32xf32>
    %c38_85 = arith.constant 38 : index
    %c0_86 = arith.constant 0 : index
    %92 = vector.load %arg8[%c38_85, %c0_86] : memref<324x32xf32, #tpu.memory_space<vmem>>, vector<286x32xf32>
    %93 = tpu.concatenate %84, %85, %86, %87, %88, %89, %90, %91, %92 in 1 : vector<286x32xf32>, vector<286x32xf32>, vector<286x32xf32>, vector<286x32xf32>, vector<286x32xf32>, vector<286x32xf32>, vector<286x32xf32>, vector<286x32xf32>, vector<286x32xf32> -> vector<286x288xf32>
    %94 = vector.extract_strided_slice %63 {offsets = [0, 64], sizes = [286, 32], strides = [1, 1]} : vector<286x96xf32> to vector<286x32xf32>
    %cst_87 = arith.constant dense<0.000000e+00> : vector<286x32xf32>
    %95 = tpu.matmul %93, %2, %cst_87 {dimension_numbers = #tpu.dot_dimension_numbers<[1], [0], [0], [1], [0, 0, 1, 1], [], []>} : vector<286x288xf32>, vector<288x32xf32>, vector<286x32xf32> -> vector<286x32xf32>
    %96 = arith.addf %94, %95 : vector<286x32xf32>
    %97 = math.tanh %96 : vector<286x32xf32>
    %cst_88 = arith.constant 1.000000e+00 : f32
    %98 = vector.broadcast %cst_88 : f32 to vector<286x32xf32>
    %99 = arith.subf %98, %72 : vector<286x32xf32>
    %100 = arith.mulf %75, %99 : vector<286x32xf32>
    %101 = arith.mulf %97, %72 : vector<286x32xf32>
    %102 = arith.addf %100, %101 : vector<286x32xf32>
    %c0_89 = arith.constant 0 : index
    %c0_90 = arith.constant 0 : index
    %c0_91 = arith.constant 0 : index
    %103 = vector.load %arg7[%c0_89, %c0_90, %c0_91] : memref<1x288x32xf32, #tpu.memory_space<vmem>>, vector<1x286x32xf32>
    %104 = vector.shape_cast %103 : vector<1x286x32xf32> to vector<286x32xf32>
    %105 = vector.shape_cast %102 : vector<286x32xf32> to vector<1x286x32xf32>
    tpu.vector_store %arg7[%c0_89, %c0_90, %c0_91], %105 {strides = array<i32>} : memref<1x288x32xf32, #tpu.memory_space<vmem>>, vector<1x286x32xf32>,
    %cst_92 = arith.constant 0.000000e+00 : f32
    %106 = vector.broadcast %cst_92 : f32 to vector<2x32xf32>
    %c0_93 = arith.constant 0 : index
    %c286 = arith.constant 286 : index
    %c0_94 = arith.constant 0 : index
    %107 = vector.load %arg7[%c0_93, %c286, %c0_94] : memref<1x288x32xf32, #tpu.memory_space<vmem>>, vector<1x2x32xf32>
    %108 = vector.shape_cast %107 : vector<1x2x32xf32> to vector<2x32xf32>
    %109 = vector.shape_cast %106 : vector<2x32xf32> to vector<1x2x32xf32>
    tpu.vector_store %arg7[%c0_93, %c286, %c0_94], %109 {strides = array<i32>} : memref<1x288x32xf32, #tpu.memory_space<vmem>>, vector<1x2x32xf32>,
    return
  }
  func.func @transform_0(%arg0: i32) -> (i32, i32, i32) {
    %c0_i32 = arith.constant 0 : i32
    %c0_i32_0 = arith.constant 0 : i32
    %c0_i32_1 = arith.constant 0 : i32
    return %arg0, %c0_i32, %c0_i32_0 : i32, i32, i32
  }
  func.func @transform_1(%arg0: i32) -> (i32, i32, i32) {
    %c0_i32 = arith.constant 0 : i32
    %c0_i32_0 = arith.constant 0 : i32
    %c0_i32_1 = arith.constant 0 : i32
    return %arg0, %c0_i32, %c0_i32_0 : i32, i32, i32
  }
  func.func @transform_2(%arg0: i32) -> (i32, i32) {
    %c0_i32 = arith.constant 0 : i32
    %c0_i32_0 = arith.constant 0 : i32
    %c0_i32_1 = arith.constant 0 : i32
    return %c0_i32, %c0_i32_0 : i32, i32
  }
  func.func @transform_3(%arg0: i32) -> (i32, i32) {
    %c0_i32 = arith.constant 0 : i32
    %c0_i32_0 = arith.constant 0 : i32
    %c0_i32_1 = arith.constant 0 : i32
    return %c0_i32, %c0_i32_0 : i32, i32
  }
  func.func @transform_4(%arg0: i32) -> (i32, i32) {
    %c0_i32 = arith.constant 0 : i32
    %c0_i32_0 = arith.constant 0 : i32
    %c0_i32_1 = arith.constant 0 : i32
    return %c0_i32, %c0_i32_0 : i32, i32
  }
  func.func @transform_5(%arg0: i32) -> (i32, i32) {
    %c0_i32 = arith.constant 0 : i32
    %c0_i32_0 = arith.constant 0 : i32
    %c0_i32_1 = arith.constant 0 : i32
    return %c0_i32, %c0_i32_0 : i32, i32
  }
  func.func @transform_6(%arg0: i32) -> (i32, i32, i32) {
    %c0_i32 = arith.constant 0 : i32
    %c0_i32_0 = arith.constant 0 : i32
    %c0_i32_1 = arith.constant 0 : i32
    return %arg0, %c0_i32, %c0_i32_0 : i32, i32, i32
  }
}

</mosaic_0001>

<bundles_post_ra>
// kernel: tpu_custom_call.1
= control target key start
LH: loop header
LB: loop body
LE: loop exit
PB: predicated region body
PF: predicated region fallthrough
CT: control target
= control target key end

     0   :  { %s10096_s21 = smov 0   ;;  %s16355_s0 = inlined_call_operand.vmem [shape: f32[2,324,4], index: 0, kind: input, shape index: {}]   ;;  %s16356_s1 = inlined_call_operand.vmem [shape: f32[2,324,32], index: 1, kind: input, shape index: {}]   ;;  %s16357_s2 = inlined_call_operand.vmem [shape: f32[36,96], index: 2, kind: input, shape index: {}]   ;;  %s16358_s3 = inlined_call_operand.vmem [shape: f32[288,64], index: 3, kind: input, shape index: {}]   ;;  %s16359_s4 = inlined_call_operand.vmem [shape: f32[288,32], index: 4, kind: input, shape index: {}]   ;;  %s16360_s5 = inlined_call_operand.vmem [shape: f32[1,96], index: 5, kind: input, shape index: {}]   ;;  %s16361_s6 = inlined_call_operand.vmem [shape: f32[2,288,32], index: 6, kind: output, shape index: {}]  }
   0x1 LB: > { %s7974_s22 = sadd.s32 4294967295, %s10047_s21   ;;  %p7978_p0 = scmp.ge.s32.totalorder %s10047_s21, 1  ;;  %s10047_s21 = sphi %s10096_s21, %s16_s21  }
   0x2   : > { %p222_p1 = scmp.lt.s32.totalorder %s10047_s21, 3 }
   0x4   : > { %p223_p2 = pnand %p7978_p0, %p222_p1 }
   0x6   : > { %226 = sbr.rel (%p223_p2) target bundleno = 2219 (0x8ab), region = 44 }
   0xd   : > { %p257_p3 = scmp.lt.s32.totalorder %s7974_s22, 1  ;;  %s10049_s27 = smov 4   ;;  %vm4028_vm0 = vcmask 1043456   ;;  %vm2343_vm1 = vcmask 31744   ;;  %vm2380_vm2 = vcmask 64512   ;;  %vm2417_vm3 = vcmask 97280  }
   0xe   : > { %s10050_s28 = smov 8   ;;  %s10051_s29 = smov 12   ;;  %vm2454_vm4 = vcmask 130048   ;;  %vm2491_vm5 = vcmask 162816   ;;  %vm2528_vm6 = vcmask 195584   ;;  %vm2565_vm7 = vcmask 228352  }
   0xf   : > { %s17224_s22 = smov (!%p257_p3, %s7974_s22), 1  ;;  %s10052_s30 = smov 16   ;;  %vm2602_vm8 = vcmask 261120   ;;  %vm3919_vm9 = vcmask 293888   ;;  %vm3731_vm10 = vcmask 523264   ;;  %vm3768_vm11 = vcmask 785408  }
  0x10   : > { %s8569_s23 = smul.u32 328, %s17224_s22  ;;  %s10053_s7 = smov 20   ;;  %vm5345_vm12 = vcmask 256000   ;;  %vm7905_vm13 = vcmask 254976  }
  0x11   : > { %s10054_s8 = smov 24   ;;  %s10055_s9 = smov 28  }
  0x12   : > { %s10112_s26 = scalar_lea.vmem %s16355_s0, %s8569_s23  ;;  %s10056_s20 = smov 32  }
  0x13   : > { %v1037_v0 = vld [vmem:[%s10112_s26 + $0x11] sm:$0xff]  ;;  %v1035_v1 = vld [vmem:[%s10112_s26 + $0x1] sm:$0xff]  ;;  %v1038_v2 = vld [vmem:[%s10112_s26 + $0x19] sm:$0xff] }
  0x14   : > { %1297 = vrot.lane.b32.xlu1 %v1037_v0, %s10049_s27  ;;  %1293 = vrot.lane.b32.xlu0 %v1035_v1, %s10049_s27  ;;  %v1036_v3 = vld [vmem:[%s10112_s26 + $0x9] sm:$0xff]  ;;  %v1039_v5 = vld [vmem:[%s10112_s26 + $0x21] sm:$0xff] }
  0x15   : > { %v1040_v4 = vld [vmem:[%s10112_s26 + $0x29] sm:$0xff]  ;;  %v1042_v6 = vld [vmem:[%s10112_s26 + $0x39] sm:$0xff]  ;;  %v1041_v7 = vld [vmem:[%s10112_s26 + $0x31] sm:$0xff] }
  0x16   : > { %v1044_v8 = vld [vmem:[%s10112_s26 + $0x49] sm:$0xff]  ;;  %v1043_v9 = vld [vmem:[%s10112_s26 + $0x41] sm:$0xff]  ;;  %v1046_v10 = vld [vmem:[%s10112_s26 + $0x59] sm:$0xff] }
  0x17   : > { %v1045_v11 = vld [vmem:[%s10112_s26 + $0x51] sm:$0xff]  ;;  %v1048_v12 = vld [vmem:[%s10112_s26 + $0x69] sm:$0xff]  ;;  %v1047_v13 = vld [vmem:[%s10112_s26 + $0x61] sm:$0xff] }
  0x18   : > { %1299 = vrot.lane.b32.xlu1 %v1038_v2, %s10049_s27  ;;  %1295 = vrot.lane.b32.xlu0 %v1036_v3, %s10049_s27  ;;  %v1050_v14 = vld [vmem:[%s10112_s26 + $0x79] sm:$0xff]  ;;  %v1049_v15 = vld [vmem:[%s10112_s26 + $0x71] sm:$0xff] }
  0x19   : > { %v1052_v16 = vld [vmem:[%s10112_s26 + $0x89] sm:$0xff]  ;;  %v1051_v17 = vld [vmem:[%s10112_s26 + $0x81] sm:$0xff]  ;;  %v1054_v18 = vld [vmem:[%s10112_s26 + $0x99] sm:$0xff] }
  0x1a   : > { %v1053_v19 = vld [vmem:[%s10112_s26 + $0x91] sm:$0xff]  ;;  %v1056_v20 = vld [vmem:[%s10112_s26 + $0xa9] sm:$0xff]  ;;  %v1055_v21 = vld [vmem:[%s10112_s26 + $0xa1] sm:$0xff] }
  0x1b   : > { %v1058_v22 = vld [vmem:[%s10112_s26 + $0xb9] sm:$0xff]  ;;  %v1057_v23 = vld [vmem:[%s10112_s26 + $0xb1] sm:$0xff]  ;;  %v1060_v24 = vld [vmem:[%s10112_s26 + $0xc9] sm:$0xff] }
  0x1c   : > { %1303 = vrot.lane.b32.xlu1 %v1040_v4, %s10049_s27  ;;  %1301 = vrot.lane.b32.xlu0 %v1039_v5, %s10049_s27  ;;  %v1059_v25 = vld [vmem:[%s10112_s26 + $0xc1] sm:$0xff]  ;;  %v1062_v26 = vld [vmem:[%s10112_s26 + $0xd9] sm:$0xff] }
  0x1d   : > { %v1061_v27 = vld [vmem:[%s10112_s26 + $0xd1] sm:$0xff]  ;;  %v1064_v28 = vld [vmem:[%s10112_s26 + $0xe9] sm:$0xff]  ;;  %v1063_v29 = vld [vmem:[%s10112_s26 + $0xe1] sm:$0xff] }
  0x1e   : > { %v1066_v30 = vld [vmem:[%s10112_s26 + $0xf9] sm:$0xff]  ;;  %v1065_v31 = vld [vmem:[%s10112_s26 + $0xf1] sm:$0xff]  ;;  %v1068_v32 = vld [vmem:[%s10112_s26 + $0x109] sm:$0xff] }
  0x1f   : > { %v1067_v33 = vld [vmem:[%s10112_s26 + $0x101] sm:$0xff]  ;;  %v1070_v34 = vld [vmem:[%s10112_s26 + $0x119] sm:$0x3f]  ;;  %v1069_v35 = vld [vmem:[%s10112_s26 + $0x111] sm:$0xff] }
  0x20   : > { %1307 = vrot.lane.b32.xlu1 %v1042_v6, %s10049_s27  ;;  %1305 = vrot.lane.b32.xlu0 %v1041_v7, %s10049_s27  ;;  %v1072_v36 = vld [vmem:[%s10112_s26 + $0xa] sm:$0xff]  ;;  %v1071_v37 = vld [vmem:[%s10112_s26 + $0x2] sm:$0xff] }
  0x21   : > { %v10191_v38 = vld [vmem:[%s10112_s26 + $0x1a] sm:$0xff]  ;;  %v10194_v39 = vld [vmem:[%s10112_s26 + $0x12] sm:$0xff]  ;;  %v10201_v40 = vld [vmem:[%s10112_s26 + $0x2a] sm:$0xff] }
  0x22   : > { %v10204_v41 = vld [vmem:[%s10112_s26 + $0x22] sm:$0xff]  ;;  %v10211_v42 = vld [vmem:[%s10112_s26 + $0x3a] sm:$0xff]  ;;  %v10214_v43 = vld [vmem:[%s10112_s26 + $0x32] sm:$0xff] }
  0x23   : > { %v10221_v44 = vld [vmem:[%s10112_s26 + $0x4a] sm:$0xff]  ;;  %v10224_v45 = vld [vmem:[%s10112_s26 + $0x42] sm:$0xff]  ;;  %v10231_v46 = vld [vmem:[%s10112_s26 + $0x5a] sm:$0xff] }
  0x24   : > { %1311 = vrot.lane.b32.xlu1 %v1044_v8, %s10049_s27  ;;  %1309 = vrot.lane.b32.xlu0 %v1043_v9, %s10049_s27  ;;  %v10234_v47 = vld [vmem:[%s10112_s26 + $0x52] sm:$0xff]  ;;  %v10241_v48 = vld [vmem:[%s10112_s26 + $0x6a] sm:$0xff] }
  0x25   : > { %v10244_v49 = vld [vmem:[%s10112_s26 + $0x62] sm:$0xff]  ;;  %v10251_v50 = vld [vmem:[%s10112_s26 + $0x7a] sm:$0xff]  ;;  %v10254_v51 = vld [vmem:[%s10112_s26 + $0x72] sm:$0xff] }
  0x26   : > { %v10261_v52 = vld [vmem:[%s10112_s26 + $0x8a] sm:$0xff]  ;;  %v10264_v53 = vld [vmem:[%s10112_s26 + $0x82] sm:$0xff]  ;;  %v10271_v54 = vld [vmem:[%s10112_s26 + $0x9a] sm:$0xff] }
  0x27   : > { %v10274_v55 = vld [vmem:[%s10112_s26 + $0x92] sm:$0xff]  ;;  %v10281_v56 = vld [vmem:[%s10112_s26 + $0xaa] sm:$0xff]  ;;  %v10284_v57 = vld [vmem:[%s10112_s26 + $0xa2] sm:$0xff] }
  0x28   : > { %1315 = vrot.lane.b32.xlu1 %v1046_v10, %s10049_s27  ;;  %1313 = vrot.lane.b32.xlu0 %v1045_v11, %s10049_s27  ;;  %v10291_v58 = vld [vmem:[%s10112_s26 + $0xba] sm:$0xff]  ;;  %v10294_v59 = vld [vmem:[%s10112_s26 + $0xb2] sm:$0xff] }
  0x29   : > { %v10305_v62 = vld [vmem:[%s10112_s26 + $0xca] sm:$0xff]  ;;  %v10308_v63 = vld [vmem:[%s10112_s26 + $0xc2] sm:$0xff]  ;;  %v10319_v2 = vld [vmem:[%s10112_s26 + $0xda] sm:$0xff] }
  0x2a   : > { %v10322_v3 = vld [vmem:[%s10112_s26 + $0xd2] sm:$0xff]  ;;  %v10333_v6 = vld [vmem:[%s10112_s26 + $0xea] sm:$0xff]  ;;  %v10336_v7 = vld [vmem:[%s10112_s26 + $0xe2] sm:$0xff] }
  0x2b   : > { %v10347_v10 = vld [vmem:[%s10112_s26 + $0xfa] sm:$0xff]  ;;  %v10350_v11 = vld [vmem:[%s10112_s26 + $0xf2] sm:$0xff] }
  0x2c   : > { %1319 = vrot.lane.b32.xlu1 %v1048_v12, %s10049_s27  ;;  %1317 = vrot.lane.b32.xlu0 %v1047_v13, %s10049_s27 }
  0x30   : > { %1323 = vrot.lane.b32.xlu1 %v1050_v14, %s10049_s27  ;;  %1321 = vrot.lane.b32.xlu0 %v1049_v15, %s10049_s27  ;;  %v10361_v14 = vld [vmem:[%s10112_s26 + $0x10a] sm:$0xff]  ;;  %v10364_v15 = vld [vmem:[%s10112_s26 + $0x102] sm:$0xff] }
  0x34   : > { %1327 = vrot.lane.b32.xlu1 %v1052_v16, %s10049_s27  ;;  %1325 = vrot.lane.b32.xlu0 %v1051_v17, %s10049_s27 }
  0x38   : > { %1331 = vrot.lane.b32.xlu1 %v1054_v18, %s10049_s27  ;;  %1329 = vrot.lane.b32.xlu0 %v1053_v19, %s10049_s27  ;;  %v1106_v18 = vld [vmem:[%s10112_s26 + $0x11a] sm:$0x3f]  ;;  %v10376_v19 = vld [vmem:[%s10112_s26 + $0x112] sm:$0xff] }
  0x3c   : > { %1335 = vrot.lane.b32.xlu1 %v1056_v20, %s10049_s27  ;;  %1333 = vrot.lane.b32.xlu0 %v1055_v21, %s10049_s27 }
  0x40   : > { %1339 = vrot.lane.b32.xlu1 %v1058_v22, %s10049_s27  ;;  %1337 = vrot.lane.b32.xlu0 %v1057_v23, %s10049_s27 }
  0x44   : > { %1343 = vrot.lane.b32.xlu1 %v1060_v24, %s10049_s27  ;;  %1341 = vrot.lane.b32.xlu0 %v1059_v25, %s10049_s27 }
  0x48   : > { %1347 = vrot.lane.b32.xlu1 %v1062_v26, %s10049_s27  ;;  %1345 = vrot.lane.b32.xlu0 %v1061_v27, %s10049_s27 }
  0x4c   : > { %1351 = vrot.lane.b32.xlu1 %v1064_v28, %s10049_s27  ;;  %1349 = vrot.lane.b32.xlu0 %v1063_v29, %s10049_s27 }
  0x50   : > { %1355 = vrot.lane.b32.xlu1 %v1066_v30, %s10049_s27  ;;  %1353 = vrot.lane.b32.xlu0 %v1065_v31, %s10049_s27 }
  0x54   : > { %1359 = vrot.lane.b32.xlu1 %v1068_v32, %s10049_s27  ;;  %1357 = vrot.lane.b32.xlu0 %v1067_v33, %s10049_s27 }
  0x58   : > { %1363 = vrot.lane.b32.xlu1 %v1070_v34, %s10049_s27  ;;  %1361 = vrot.lane.b32.xlu0 %v1069_v35, %s10049_s27  ;;  %s11352_s27 = scalar_lea.vmem %s16356_s1, %s8569_s23  ;;  %s10058_s23 = smov 64  }
  0x5c   : > { %1439 = vrot.lane.b32.xlu1 %v1072_v36, %s10050_s28  ;;  %1437 = vrot.lane.b32.xlu0 %v1071_v37, %s10050_s28 }
  0x60   : > { %1443 = vrot.lane.b32.xlu1 %v10191_v38, %s10050_s28  ;;  %1441 = vrot.lane.b32.xlu0 %v10194_v39, %s10050_s28 }
  0x64   : > { %1447 = vrot.lane.b32.xlu1 %v10201_v40, %s10050_s28  ;;  %1445 = vrot.lane.b32.xlu0 %v10204_v41, %s10050_s28 }
  0x68   : > { %1451 = vrot.lane.b32.xlu1 %v10211_v42, %s10050_s28  ;;  %1449 = vrot.lane.b32.xlu0 %v10214_v43, %s10050_s28 }
  0x6c   : > { %1455 = vrot.lane.b32.xlu1 %v10221_v44, %s10050_s28  ;;  %1453 = vrot.lane.b32.xlu0 %v10224_v45, %s10050_s28 }
  0x70   : > { %1459 = vrot.lane.b32.xlu1 %v10231_v46, %s10050_s28  ;;  %1457 = vrot.lane.b32.xlu0 %v10234_v47, %s10050_s28 }
  0x74   : > { %1463 = vrot.lane.b32.xlu1 %v10241_v48, %s10050_s28  ;;  %1461 = vrot.lane.b32.xlu0 %v10244_v49, %s10050_s28 }
  0x78   : > { %1467 = vrot.lane.b32.xlu1 %v10251_v50, %s10050_s28  ;;  %1465 = vrot.lane.b32.xlu0 %v10254_v51, %s10050_s28 }
  0x7c   : > { %1471 = vrot.lane.b32.xlu1 %v10261_v52, %s10050_s28  ;;  %1469 = vrot.lane.b32.xlu0 %v10264_v53, %s10050_s28 }
  0x80   : > { %1475 = vrot.lane.b32.xlu1 %v10271_v54, %s10050_s28  ;;  %1473 = vrot.lane.b32.xlu0 %v10274_v55, %s10050_s28 }
  0x84   : > { %1479 = vrot.lane.b32.xlu1 %v10281_v56, %s10050_s28  ;;  %1477 = vrot.lane.b32.xlu0 %v10284_v57, %s10050_s28 }
  0x86   : > { %v10296_v60 = vpop.permute.xlu1 %1297  ;;  %v10298_v61 = vpop.permute.xlu0 %1293 }
  0x88   : > { %1483 = vrot.lane.b32.xlu1 %v10291_v58, %s10050_s28  ;;  %1481 = vrot.lane.b32.xlu0 %v10294_v59, %s10050_s28 }
  0x8a   : > { %v10310_v0 = vpop.permute.xlu1 %1299  ;;  %v10312_v1 = vpop.permute.xlu0 %1295 }
  0x8c   : > { %1487 = vrot.lane.b32.xlu1 %v10305_v62, %s10050_s28  ;;  %1485 = vrot.lane.b32.xlu0 %v10308_v63, %s10050_s28 }
  0x8e   : > { %v10324_v4 = vpop.permute.xlu1 %1303  ;;  %v10326_v5 = vpop.permute.xlu0 %1301 }
  0x90   : > { %1491 = vrot.lane.b32.xlu1 %v10319_v2, %s10050_s28  ;;  %1489 = vrot.lane.b32.xlu0 %v10322_v3, %s10050_s28 }
  0x92   : > { %v10338_v8 = vpop.permute.xlu1 %1307  ;;  %v10340_v9 = vpop.permute.xlu0 %1305 }
  0x94   : > { %1495 = vrot.lane.b32.xlu1 %v10333_v6, %s10050_s28  ;;  %1493 = vrot.lane.b32.xlu0 %v10336_v7, %s10050_s28 }
  0x96   : > { %v10352_v12 = vpop.permute.xlu1 %1311  ;;  %v10354_v13 = vpop.permute.xlu0 %1309 }
  0x98   : > { %1499 = vrot.lane.b32.xlu1 %v10347_v10, %s10050_s28  ;;  %1497 = vrot.lane.b32.xlu0 %v10350_v11, %s10050_s28 }
  0x9a   : > { %v10366_v16 = vpop.permute.xlu1 %1315  ;;  %v10368_v17 = vpop.permute.xlu0 %1313 }
  0x9c   : > { %1503 = vrot.lane.b32.xlu1 %v10361_v14, %s10050_s28  ;;  %1501 = vrot.lane.b32.xlu0 %v10364_v15, %s10050_s28 }
  0x9e   : > { %v10378_v20 = vpop.permute.xlu1 %1319  ;;  %v10380_v21 = vpop.permute.xlu0 %1317 }
  0xa0   : > { %1507 = vrot.lane.b32.xlu1 %v1106_v18, %s10050_s28  ;;  %1505 = vrot.lane.b32.xlu0 %v10376_v19, %s10050_s28  ;;  %v1114_v18 = vld [vmem:[%s10112_s26 + $0x33] sm:$0xff]  ;;  %s8570_s28 = smul.u32 288, %s17224_s22 }
  0xa2   : > { %v10385_v22 = vpop.permute.xlu1 %1323  ;;  %v10387_v23 = vpop.permute.xlu0 %1321 }
  0xa4   : > { %1550 = vrot.lane.b32.xlu1 %v10191_v38, %s10051_s29  ;;  %1548 = vrot.lane.b32.xlu0 %v10194_v39, %s10051_s29 }
  0xa6   : > { %v10393_v24 = vpop.permute.xlu1 %1327  ;;  %v10395_v25 = vpop.permute.xlu0 %1325 }
  0xa8   : > { %1554 = vrot.lane.b32.xlu1 %v10201_v40, %s10051_s29  ;;  %1552 = vrot.lane.b32.xlu0 %v10204_v41, %s10051_s29 }
  0xaa   : > { %v10401_v26 = vpop.permute.xlu1 %1331  ;;  %v10403_v27 = vpop.permute.xlu0 %1329 }
  0xac   : > { %1558 = vrot.lane.b32.xlu1 %v10211_v42, %s10051_s29  ;;  %1556 = vrot.lane.b32.xlu0 %v10214_v43, %s10051_s29 }
  0xae   : > { %v10409_v28 = vpop.permute.xlu1 %1335  ;;  %v10411_v29 = vpop.permute.xlu0 %1333 }
  0xb0   : > { %1562 = vrot.lane.b32.xlu1 %v10221_v44, %s10051_s29  ;;  %1560 = vrot.lane.b32.xlu0 %v10224_v45, %s10051_s29 }
  0xb2   : > { %v10417_v30 = vpop.permute.xlu1 %1339  ;;  %v10419_v31 = vpop.permute.xlu0 %1337 }
  0xb4   : > { %1566 = vrot.lane.b32.xlu1 %v10231_v46, %s10051_s29  ;;  %1564 = vrot.lane.b32.xlu0 %v10234_v47, %s10051_s29 }
  0xb6   : > { %v10425_v32 = vpop.permute.xlu1 %1343  ;;  %v10427_v33 = vpop.permute.xlu0 %1341 }
  0xb7   : > { %16452 = vst [vmem:[#allocation3_spill] sm:$0xff] %v10427_v33 }
  0xb8   : > { %1570 = vrot.lane.b32.xlu1 %v10241_v48, %s10051_s29  ;;  %1568 = vrot.lane.b32.xlu0 %v10244_v49, %s10051_s29 }
  0xba   : > { %v10433_v34 = vpop.permute.xlu1 %1347  ;;  %v10435_v35 = vpop.permute.xlu0 %1345 }
  0xbb   : > { %16453 = vst [vmem:[#allocation4_spill] sm:$0xff] %v10433_v34  ;;  %16454 = vst [vmem:[#allocation5_spill] sm:$0xff] %v10435_v35 }
  0xbc   : > { %1574 = vrot.lane.b32.xlu1 %v10251_v50, %s10051_s29  ;;  %1572 = vrot.lane.b32.xlu0 %v10254_v51, %s10051_s29 }
  0xbe   : > { %v10441_v36 = vpop.permute.xlu1 %1351  ;;  %v10443_v37 = vpop.permute.xlu0 %1349 }
  0xbf   : > { %16455 = vst [vmem:[#allocation6_spill] sm:$0xff] %v10441_v36  ;;  %16456 = vst [vmem:[#allocation7_spill] sm:$0xff] %v10443_v37 }
  0xc0   : > { %1578 = vrot.lane.b32.xlu1 %v10261_v52, %s10051_s29  ;;  %1576 = vrot.lane.b32.xlu0 %v10264_v53, %s10051_s29 }
  0xc2   : > { %v10449_v38 = vpop.permute.xlu1 %1355  ;;  %v10451_v39 = vpop.permute.xlu0 %1353 }
  0xc3   : > { %16457 = vst [vmem:[#allocation8_spill] sm:$0xff] %v10449_v38  ;;  %16458 = vst [vmem:[#allocation9_spill] sm:$0xff] %v10451_v39 }
  0xc4   : > { %1582 = vrot.lane.b32.xlu1 %v10271_v54, %s10051_s29  ;;  %1580 = vrot.lane.b32.xlu0 %v10274_v55, %s10051_s29  ;;  %v1107_v54 = vld [vmem:[%s10112_s26 + $0x11a] sm:$0xff] }
  0xc6   : > { %v10457_v40 = vpop.permute.xlu1 %1359  ;;  %v10459_v41 = vpop.permute.xlu0 %1357 }
  0xc7   : > { %16459 = vst [vmem:[#allocation10_spill] sm:$0xff] %v10457_v40  ;;  %16460 = vst [vmem:[#allocation11_spill] sm:$0xff] %v10459_v41 }
  0xc8   : > { %1586 = vrot.lane.b32.xlu1 %v10281_v56, %s10051_s29  ;;  %1584 = vrot.lane.b32.xlu0 %v10284_v57, %s10051_s29  ;;  %v1109_v57 = vld [vmem:[%s10112_s26 + $0x12a] sm:$0x3f] }
  0xca   : > { %v10465_v42 = vpop.permute.xlu1 %1363  ;;  %v10467_v43 = vpop.permute.xlu0 %1361 }
  0xcb   : > { %16461 = vst [vmem:[#allocation12_spill] sm:$0xff] %v10465_v42  ;;  %16462 = vst [vmem:[#allocation13_spill] sm:$0xff] %v10467_v43 }
  0xcc   : > { %1590 = vrot.lane.b32.xlu1 %v10291_v58, %s10051_s29  ;;  %1588 = vrot.lane.b32.xlu0 %v10294_v59, %s10051_s29  ;;  %v1108_v58 = vld [vmem:[%s10112_s26 + $0x122] sm:$0xff] }
  0xce   : > { %v10473_v44 = vpop.permute.xlu1 %1439  ;;  %v10475_v45 = vpop.permute.xlu0 %1437 }
  0xcf   : > { %16463 = vst [vmem:[#allocation14_spill] sm:$0xff] %v10473_v44  ;;  %16464 = vst [vmem:[#allocation15_spill] sm:$0xff] %v10475_v45 }
  0xd0   : > { %1594 = vrot.lane.b32.xlu1 %v10305_v62, %s10051_s29  ;;  %1592 = vrot.lane.b32.xlu0 %v10308_v63, %s10051_s29  ;;  %v1111_v63 = vld [vmem:[%s10112_s26 + $0x1b] sm:$0xff] }
  0xd2   : > { %v10481_v46 = vpop.permute.xlu1 %1443  ;;  %v10483_v47 = vpop.permute.xlu0 %1441 }
  0xd3   : > { %16465 = vst [vmem:[#allocation16_spill] sm:$0xff] %v10481_v46  ;;  %16466 = vst [vmem:[#allocation17_spill] sm:$0xff] %v10483_v47 }
  0xd4   : > { %1598 = vrot.lane.b32.xlu1 %v10319_v2, %s10051_s29  ;;  %1596 = vrot.lane.b32.xlu0 %v10322_v3, %s10051_s29  ;;  %v1110_v2 = vld [vmem:[%s10112_s26 + $0x13] sm:$0xff] }
  0xd6   : > { %v10489_v48 = vpop.permute.xlu1 %1447  ;;  %v10491_v49 = vpop.permute.xlu0 %1445 }
  0xd7   : > { %16467 = vst [vmem:[#allocation18_spill] sm:$0xff] %v10489_v48  ;;  %16468 = vst [vmem:[#allocation19_spill] sm:$0xff] %v10491_v49 }
  0xd8   : > { %1602 = vrot.lane.b32.xlu1 %v10333_v6, %s10051_s29  ;;  %1600 = vrot.lane.b32.xlu0 %v10336_v7, %s10051_s29  ;;  %v1113_v7 = vld [vmem:[%s10112_s26 + $0x2b] sm:$0xff] }
  0xda   : > { %v10497_v50 = vpop.permute.xlu1 %1451  ;;  %v10499_v51 = vpop.permute.xlu0 %1449 }
  0xdb   : > { %16469 = vst [vmem:[#allocation20_spill] sm:$0xff] %v10497_v50  ;;  %16470 = vst [vmem:[#allocation21_spill] sm:$0xff] %v10499_v51 }
  0xdc   : > { %1606 = vrot.lane.b32.xlu1 %v10347_v10, %s10051_s29  ;;  %1604 = vrot.lane.b32.xlu0 %v10350_v11, %s10051_s29  ;;  %v1112_v10 = vld [vmem:[%s10112_s26 + $0x23] sm:$0xff] }
  0xde   : > { %v10505_v52 = vpop.permute.xlu1 %1455  ;;  %v10507_v53 = vpop.permute.xlu0 %1453 }
  0xdf   : > { %16471 = vst [vmem:[#allocation22_spill] sm:$0xff] %v10505_v52  ;;  %16472 = vst [vmem:[#allocation23_spill] sm:$0xff] %v10507_v53 }
  0xe0   : > { %1610 = vrot.lane.b32.xlu1 %v10361_v14, %s10051_s29  ;;  %1608 = vrot.lane.b32.xlu0 %v10364_v15, %s10051_s29  ;;  %v1115_v15 = vld [vmem:[%s10112_s26 + $0x3b] sm:$0xff] }
  0xe2   : > { %v10514_v55 = vpop.permute.xlu1 %1459  ;;  %v10516_v56 = vpop.permute.xlu0 %1457 }
  0xe3   : > { %16473 = vst [vmem:[#allocation24_spill] sm:$0xff] %v10514_v55  ;;  %16474 = vst [vmem:[#allocation25_spill] sm:$0xff] %v10516_v56 }
  0xe4   : > { %1614 = vrot.lane.b32.xlu1 %v1107_v54, %s10051_s29  ;;  %1612 = vrot.lane.b32.xlu0 %v10376_v19, %s10051_s29 }
  0xe6   : > { %v10523_v59 = vpop.permute.xlu1 %1463  ;;  %v10525_v62 = vpop.permute.xlu0 %1461 }
  0xe7   : > { %16475 = vst [vmem:[#allocation26_spill] sm:$0xff] %v10523_v59  ;;  %16476 = vst [vmem:[#allocation27_spill] sm:$0xff] %v10525_v62 }
  0xe8   : > { %1618 = vrot.lane.b32.xlu1 %v1109_v57, %s10051_s29  ;;  %1616 = vrot.lane.b32.xlu0 %v1108_v58, %s10051_s29  ;;  %v1117_v57 = vld [vmem:[%s10112_s26 + $0x4b] sm:$0xff]  ;;  %v1116_v58 = vld [vmem:[%s10112_s26 + $0x43] sm:$0xff] }
  0xea   : > { %v10531_v3 = vpop.permute.xlu1 %1467  ;;  %v10533_v6 = vpop.permute.xlu0 %1465 }
  0xeb   : > { %16477 = vst [vmem:[#allocation28_spill] sm:$0xff] %v10531_v3  ;;  %16478 = vst [vmem:[#allocation29_spill] sm:$0xff] %v10533_v6 }
  0xec   : > { %1694 = vrot.lane.b32.xlu1 %v1111_v63, %s10052_s30  ;;  %1692 = vrot.lane.b32.xlu0 %v1110_v2, %s10052_s30 }
  0xee   : > { %v10539_v11 = vpop.permute.xlu1 %1471  ;;  %v10541_v14 = vpop.permute.xlu0 %1469 }
  0xef   : > { %16479 = vst [vmem:[#allocation30_spill] sm:$0xff] %v10539_v11  ;;  %16480 = vst [vmem:[#allocation31_spill] sm:$0xff] %v10541_v14 }
  0xf0   : > { %1698 = vrot.lane.b32.xlu1 %v1113_v7, %s10052_s30  ;;  %1696 = vrot.lane.b32.xlu0 %v1112_v10, %s10052_s30  ;;  %v1119_v7 = vld [vmem:[%s10112_s26 + $0x5b] sm:$0xff]  ;;  %v1118_v10 = vld [vmem:[%s10112_s26 + $0x53] sm:$0xff] }
  0xf2   : > { %v10547_v19 = vpop.permute.xlu1 %1475  ;;  %v10549_v54 = vpop.permute.xlu0 %1473 }
  0xf3   : > { %16481 = vst [vmem:[#allocation32_spill] sm:$0xff] %v10547_v19  ;;  %16482 = vst [vmem:[#allocation33_spill] sm:$0xff] %v10549_v54 }
  0xf4   : > { %1702 = vrot.lane.b32.xlu1 %v1115_v15, %s10052_s30  ;;  %1700 = vrot.lane.b32.xlu0 %v1114_v18, %s10052_s30  ;;  %v1121_v18 = vld [vmem:[%s10112_s26 + $0x6b] sm:$0xff] }
  0xf6   : > { %v10555_v63 = vpop.permute.xlu1 %1479  ;;  %v10557_v2 = vpop.permute.xlu0 %1477 }
  0xf7   : > { %16483 = vst [vmem:[#allocation34_spill] sm:$0xff] %v10555_v63  ;;  %16484 = vst [vmem:[#allocation35_spill] sm:$0xff] %v10557_v2  ;;  %v1120_v63 = vld [vmem:[%s10112_s26 + $0x63] sm:$0xff] }
  0xf8   : > { %1706 = vrot.lane.b32.xlu1 %v1117_v57, %s10052_s30  ;;  %1704 = vrot.lane.b32.xlu0 %v1116_v58, %s10052_s30  ;;  %v1123_v58 = vld [vmem:[%s10112_s26 + $0x7b] sm:$0xff] }
  0xfa   : > { %v10563_v54 = vpop.permute.xlu1 %1483  ;;  %v10565_v15 = vpop.permute.xlu0 %1481 }
  0xfb   : > { %16485 = vst [vmem:[#allocation36_spill] sm:$0xff] %v10563_v54  ;;  %16486 = vst [vmem:[#allocation37_spill] sm:$0xff] %v10565_v15  ;;  %v1122_v54 = vld [vmem:[%s10112_s26 + $0x73] sm:$0xff] }
  0xfc   : > { %1710 = vrot.lane.b32.xlu1 %v1119_v7, %s10052_s30  ;;  %1708 = vrot.lane.b32.xlu0 %v1118_v10, %s10052_s30  ;;  %v1125_v10 = vld [vmem:[%s10112_s26 + $0x8b] sm:$0xff] }
  0xfe   : > { %v10571_v2 = vpop.permute.xlu1 %1487  ;;  %v10573_v57 = vpop.permute.xlu0 %1485 }
  0xff   : > { %16487 = vst [vmem:[#allocation38_spill] sm:$0xff] %v10571_v2  ;;  %16488 = vst [vmem:[#allocation39_spill] sm:$0xff] %v10573_v57  ;;  %v1124_v2 = vld [vmem:[%s10112_s26 + $0x83] sm:$0xff] }
 0x100   : > { %1714 = vrot.lane.b32.xlu1 %v1121_v18, %s10052_s30  ;;  %1712 = vrot.lane.b32.xlu0 %v1120_v63, %s10052_s30  ;;  %v1127_v63 = vld [vmem:[%s10112_s26 + $0x9b] sm:$0xff] }
 0x102   : > { %v10579_v15 = vpop.permute.xlu1 %1491  ;;  %v10581_v7 = vpop.permute.xlu0 %1489 }
 0x103   : > { %16489 = vst [vmem:[#allocation40_spill] sm:$0xff] %v10579_v15  ;;  %16490 = vst [vmem:[#allocation41_spill] sm:$0xff] %v10581_v7  ;;  %v1126_v15 = vld [vmem:[%s10112_s26 + $0x93] sm:$0xff] }
 0x104   : > { %1718 = vrot.lane.b32.xlu1 %v1123_v58, %s10052_s30  ;;  %1716 = vrot.lane.b32.xlu0 %v1122_v54, %s10052_s30  ;;  %v1129_v54 = vld [vmem:[%s10112_s26 + $0xab] sm:$0xff] }
 0x106   : > { %v10587_v57 = vpop.permute.xlu1 %1495  ;;  %v10589_v18 = vpop.permute.xlu0 %1493 }
 0x107   : > { %16491 = vst [vmem:[#allocation42_spill] sm:$0xff] %v10587_v57  ;;  %16492 = vst [vmem:[#allocation43_spill] sm:$0xff] %v10589_v18  ;;  %v1128_v57 = vld [vmem:[%s10112_s26 + $0xa3] sm:$0xff] }
 0x108   : > { %1722 = vrot.lane.b32.xlu1 %v1125_v10, %s10052_s30  ;;  %1720 = vrot.lane.b32.xlu0 %v1124_v2, %s10052_s30  ;;  %v1131_v2 = vld [vmem:[%s10112_s26 + $0xbb] sm:$0xff] }
 0x10a   : > { %v10595_v7 = vpop.permute.xlu1 %1499  ;;  %v10597_v58 = vpop.permute.xlu0 %1497 }
 0x10b   : > { %16493 = vst [vmem:[#allocation44_spill] sm:$0xff] %v10595_v7  ;;  %16494 = vst [vmem:[#allocation45_spill] sm:$0xff] %v10597_v58  ;;  %v1130_v7 = vld [vmem:[%s10112_s26 + $0xb3] sm:$0xff] }
 0x10c   : > { %1726 = vrot.lane.b32.xlu1 %v1127_v63, %s10052_s30  ;;  %1724 = vrot.lane.b32.xlu0 %v1126_v15, %s10052_s30  ;;  %v1133_v15 = vld [vmem:[%s10112_s26 + $0xcb] sm:$0xff] }
 0x10e   : > { %v10603_v18 = vpop.permute.xlu1 %1503  ;;  %v10605_v10 = vpop.permute.xlu0 %1501 }
 0x10f   : > { %16495 = vst [vmem:[#allocation46_spill] sm:$0xff] %v10603_v18  ;;  %16496 = vst [vmem:[#allocation47_spill] sm:$0xff] %v10605_v10  ;;  %v1132_v18 = vld [vmem:[%s10112_s26 + $0xc3] sm:$0xff] }
 0x110   : > { %1730 = vrot.lane.b32.xlu1 %v1129_v54, %s10052_s30  ;;  %1728 = vrot.lane.b32.xlu0 %v1128_v57, %s10052_s30  ;;  %v1135_v57 = vld [vmem:[%s10112_s26 + $0xdb] sm:$0xff] }
 0x112   : > { %v10611_v58 = vpop.permute.xlu1 %1507  ;;  %v10613_v63 = vpop.permute.xlu0 %1505 }
 0x113   : > { %16497 = vst [vmem:[#allocation48_spill] sm:$0xff] %v10611_v58  ;;  %16498 = vst [vmem:[#allocation49_spill] sm:$0xff] %v10613_v63  ;;  %v1134_v58 = vld [vmem:[%s10112_s26 + $0xd3] sm:$0xff] }
 0x114   : > { %1734 = vrot.lane.b32.xlu1 %v1131_v2, %s10052_s30  ;;  %1732 = vrot.lane.b32.xlu0 %v1130_v7, %s10052_s30  ;;  %v1137_v7 = vld [vmem:[%s10112_s26 + $0xeb] sm:$0xff] }
 0x116   : > { %v10619_v10 = vpop.permute.xlu1 %1550  ;;  %v10621_v54 = vpop.permute.xlu0 %1548 }
 0x117   : > { %16499 = vst [vmem:[#allocation50_spill] sm:$0xff] %v10619_v10  ;;  %16500 = vst [vmem:[#allocation51_spill] sm:$0xff] %v10621_v54  ;;  %v1136_v10 = vld [vmem:[%s10112_s26 + $0xe3] sm:$0xff] }
 0x118   : > { %1738 = vrot.lane.b32.xlu1 %v1133_v15, %s10052_s30  ;;  %1736 = vrot.lane.b32.xlu0 %v1132_v18, %s10052_s30  ;;  %v1139_v18 = vld [vmem:[%s10112_s26 + $0xfb] sm:$0xff] }
 0x11a   : > { %v10627_v63 = vpop.permute.xlu1 %1554  ;;  %v10629_v2 = vpop.permute.xlu0 %1552 }
 0x11b   : > { %16501 = vst [vmem:[#allocation52_spill] sm:$0xff] %v10627_v63  ;;  %16502 = vst [vmem:[#allocation53_spill] sm:$0xff] %v10629_v2  ;;  %v1138_v63 = vld [vmem:[%s10112_s26 + $0xf3] sm:$0xff] }
 0x11c   : > { %1742 = vrot.lane.b32.xlu1 %v1135_v57, %s10052_s30  ;;  %1740 = vrot.lane.b32.xlu0 %v1134_v58, %s10052_s30  ;;  %v1141_v58 = vld [vmem:[%s10112_s26 + $0x10b] sm:$0xff] }
 0x11e   : > { %v10635_v54 = vpop.permute.xlu1 %1558  ;;  %v10637_v15 = vpop.permute.xlu0 %1556 }
 0x11f   : > { %16503 = vst [vmem:[#allocation54_spill] sm:$0xff] %v10635_v54  ;;  %16504 = vst [vmem:[#allocation55_spill] sm:$0xff] %v10637_v15  ;;  %v1140_v54 = vld [vmem:[%s10112_s26 + $0x103] sm:$0xff] }
 0x120   : > { %1746 = vrot.lane.b32.xlu1 %v1137_v7, %s10052_s30  ;;  %1744 = vrot.lane.b32.xlu0 %v1136_v10, %s10052_s30  ;;  %v1143_v10 = vld [vmem:[%s10112_s26 + $0x11b] sm:$0xff] }
 0x122   : > { %v10643_v2 = vpop.permute.xlu1 %1562  ;;  %v10645_v57 = vpop.permute.xlu0 %1560 }
 0x123   : > { %16505 = vst [vmem:[#allocation56_spill] sm:$0xff] %v10643_v2  ;;  %16506 = vst [vmem:[#allocation57_spill] sm:$0xff] %v10645_v57  ;;  %v1142_v2 = vld [vmem:[%s10112_s26 + $0x113] sm:$0xff] }
 0x124   : > { %1750 = vrot.lane.b32.xlu1 %v1139_v18, %s10052_s30  ;;  %1748 = vrot.lane.b32.xlu0 %v1138_v63, %s10052_s30  ;;  %v1145_v63 = vld [vmem:[%s10112_s26 + $0x12b] sm:$0x3f]  ;;  %v1144_v18 = vld [vmem:[%s10112_s26 + $0x123] sm:$0xff] }
 0x126   : > { %v10651_v15 = vpop.permute.xlu1 %1566  ;;  %v10653_v7 = vpop.permute.xlu0 %1564 }
 0x127   : > { %16507 = vst [vmem:[#allocation58_spill] sm:$0xff] %v10651_v15  ;;  %16508 = vst [vmem:[#allocation59_spill] sm:$0xff] %v10653_v7 }
 0x128   : > { %1754 = vrot.lane.b32.xlu1 %v1141_v58, %s10052_s30  ;;  %1752 = vrot.lane.b32.xlu0 %v1140_v54, %s10052_s30  ;;  %v1147_v54 = vld [vmem:[%s10112_s26 + $0x1c] sm:$0xff]  ;;  %v1146_v58 = vld [vmem:[%s10112_s26 + $0x14] sm:$0xff] }
 0x12a   : > { %v10659_v57 = vpop.permute.xlu1 %1570  ;;  %v10661_v19 = vpop.permute.xlu0 %1568 }
 0x12b   : > { %16509 = vst [vmem:[#allocation60_spill] sm:$0xff] %v10659_v57  ;;  %16510 = vst [vmem:[#allocation61_spill] sm:$0xff] %v10661_v19 }
 0x12c   : > { %1758 = vrot.lane.b32.xlu1 %v1143_v10, %s10052_s30  ;;  %1756 = vrot.lane.b32.xlu0 %v1142_v2, %s10052_s30  ;;  %v10682_v2 = vld [vmem:[%s10112_s26 + $0x2c] sm:$0xff] }
 0x12e   : > { %v10667_v7 = vpop.permute.xlu1 %1574  ;;  %v10669_v15 = vpop.permute.xlu0 %1572 }
 0x12f   : > { %16511 = vst [vmem:[#allocation62_spill] sm:$0xff] %v10667_v7  ;;  %16512 = vst [vmem:[#allocation63_spill] sm:$0xff] %v10669_v15  ;;  %v10685_v15 = vld [vmem:[%s10112_s26 + $0x24] sm:$0xff] }
 0x130   : > { %1762 = vrot.lane.b32.xlu1 %v1145_v63, %s10052_s30  ;;  %1760 = vrot.lane.b32.xlu0 %v1144_v18, %s10052_s30 }
 0x132   : > { %v10675_v19 = vpop.permute.xlu1 %1578  ;;  %v10677_v10 = vpop.permute.xlu0 %1576 }
 0x133   : > { %16513 = vst [vmem:[#allocation64_spill] sm:$0xff] %v10675_v19  ;;  %16514 = vst [vmem:[#allocation65_spill] sm:$0xff] %v10677_v10  ;;  %v10696_v10 = vld [vmem:[%s10112_s26 + $0x3c] sm:$0xff] }
 0x134   : > { %1838 = vrot.lane.b32.xlu1 %v1147_v54, %s10053_s7  ;;  %1836 = vrot.lane.b32.xlu0 %v1146_v58, %s10053_s7  ;;  %v10699_v54 = vld [vmem:[%s10112_s26 + $0x34] sm:$0xff] }
 0x136   : > { %v10687_v63 = vpop.permute.xlu1 %1582  ;;  %v10689_v18 = vpop.permute.xlu0 %1580 }
 0x137   : > { %16515 = vst [vmem:[#allocation66_spill] sm:$0xff] %v10687_v63  ;;  %16516 = vst [vmem:[#allocation67_spill] sm:$0xff] %v10689_v18  ;;  %v10710_v18 = vld [vmem:[%s10112_s26 + $0x4c] sm:$0xff]  ;;  %v10713_v63 = vld [vmem:[%s10112_s26 + $0x44] sm:$0xff] }
 0x138   : > { %1842 = vrot.lane.b32.xlu1 %v10682_v2, %s10053_s7  ;;  %1840 = vrot.lane.b32.xlu0 %v10685_v15, %s10053_s7 }
 0x13a   : > { %v10701_v58 = vpop.permute.xlu1 %1586  ;;  %v10703_v19 = vpop.permute.xlu0 %1584 }
 0x13b   : > { %16517 = vst [vmem:[#allocation68_spill] sm:$0xff] %v10701_v58  ;;  %16518 = vst [vmem:[#allocation69_spill] sm:$0xff] %v10703_v19  ;;  %v10724_v19 = vld [vmem:[%s10112_s26 + $0x5c] sm:$0xff]  ;;  %v10727_v58 = vld [vmem:[%s10112_s26 + $0x54] sm:$0xff] }
 0x13c   : > { %1846 = vrot.lane.b32.xlu1 %v10696_v10, %s10053_s7  ;;  %1844 = vrot.lane.b32.xlu0 %v10699_v54, %s10053_s7 }
 0x13e   : > { %v10715_v7 = vpop.permute.xlu1 %1590  ;;  %v10717_v57 = vpop.permute.xlu0 %1588 }
 0x13f   : > { %16519 = vst [vmem:[#allocation70_spill] sm:$0xff] %v10715_v7  ;;  %16520 = vst [vmem:[#allocation71_spill] sm:$0xff] %v10717_v57  ;;  %v10738_v57 = vld [vmem:[%s10112_s26 + $0x6c] sm:$0xff]  ;;  %v10741_v7 = vld [vmem:[%s10112_s26 + $0x64] sm:$0xff] }
 0x140   : > { %1850 = vrot.lane.b32.xlu1 %v10710_v18, %s10053_s7  ;;  %1848 = vrot.lane.b32.xlu0 %v10713_v63, %s10053_s7 }
 0x142   : > { %v10729_v14 = vpop.permute.xlu1 %1594  ;;  %v10731_v11 = vpop.permute.xlu0 %1592 }
 0x143   : > { %16521 = vst [vmem:[#allocation72_spill] sm:$0xff] %v10729_v14  ;;  %16522 = vst [vmem:[#allocation73_spill] sm:$0xff] %v10731_v11  ;;  %v10752_v11 = vld [vmem:[%s10112_s26 + $0x7c] sm:$0xff]  ;;  %v10755_v14 = vld [vmem:[%s10112_s26 + $0x74] sm:$0xff] }
 0x144   : > { %1854 = vrot.lane.b32.xlu1 %v10724_v19, %s10053_s7  ;;  %1852 = vrot.lane.b32.xlu0 %v10727_v58, %s10053_s7 }
 0x146   : > { %v10743_v6 = vpop.permute.xlu1 %1598  ;;  %v10745_v3 = vpop.permute.xlu0 %1596 }
 0x147   : > { %16523 = vst [vmem:[#allocation74_spill] sm:$0xff] %v10743_v6  ;;  %16524 = vst [vmem:[#allocation75_spill] sm:$0xff] %v10745_v3  ;;  %v10766_v3 = vld [vmem:[%s10112_s26 + $0x8c] sm:$0xff]  ;;  %v10769_v6 = vld [vmem:[%s10112_s26 + $0x84] sm:$0xff] }
 0x148   : > { %1858 = vrot.lane.b32.xlu1 %v10738_v57, %s10053_s7  ;;  %1856 = vrot.lane.b32.xlu0 %v10741_v7, %s10053_s7 }
 0x14a   : > { %v10757_v62 = vpop.permute.xlu1 %1602  ;;  %v10759_v59 = vpop.permute.xlu0 %1600 }
 0x14b   : > { %16525 = vst [vmem:[#allocation76_spill] sm:$0xff] %v10757_v62  ;;  %16526 = vst [vmem:[#allocation77_spill] sm:$0xff] %v10759_v59  ;;  %v10780_v59 = vld [vmem:[%s10112_s26 + $0x9c] sm:$0xff]  ;;  %v10783_v62 = vld [vmem:[%s10112_s26 + $0x94] sm:$0xff] }
 0x14c   : > { %1862 = vrot.lane.b32.xlu1 %v10752_v11, %s10053_s7  ;;  %1860 = vrot.lane.b32.xlu0 %v10755_v14, %s10053_s7 }
 0x14e   : > { %v10771_v56 = vpop.permute.xlu1 %1606  ;;  %v10773_v55 = vpop.permute.xlu0 %1604 }
 0x14f   : > { %16527 = vst [vmem:[#allocation78_spill] sm:$0xff] %v10771_v56  ;;  %16528 = vst [vmem:[#allocation79_spill] sm:$0xff] %v10773_v55  ;;  %v10794_v55 = vld [vmem:[%s10112_s26 + $0xac] sm:$0xff]  ;;  %v10797_v56 = vld [vmem:[%s10112_s26 + $0xa4] sm:$0xff] }
 0x150   : > { %1866 = vrot.lane.b32.xlu1 %v10766_v3, %s10053_s7  ;;  %1864 = vrot.lane.b32.xlu0 %v10769_v6, %s10053_s7 }
 0x152   : > { %v10785_v53 = vpop.permute.xlu1 %1610  ;;  %v10787_v52 = vpop.permute.xlu0 %1608 }
 0x153   : > { %16529 = vst [vmem:[#allocation80_spill] sm:$0xff] %v10785_v53  ;;  %16530 = vst [vmem:[#allocation81_spill] sm:$0xff] %v10787_v52  ;;  %v10808_v52 = vld [vmem:[%s10112_s26 + $0xbc] sm:$0xff]  ;;  %v10811_v53 = vld [vmem:[%s10112_s26 + $0xb4] sm:$0xff] }
 0x154   : > { %1870 = vrot.lane.b32.xlu1 %v10780_v59, %s10053_s7  ;;  %1868 = vrot.lane.b32.xlu0 %v10783_v62, %s10053_s7 }
 0x156   : > { %v10799_v51 = vpop.permute.xlu1 %1614  ;;  %v10801_v50 = vpop.permute.xlu0 %1612 }
 0x157   : > { %16531 = vst [vmem:[#allocation82_spill] sm:$0xff] %v10799_v51  ;;  %16532 = vst [vmem:[#allocation83_spill] sm:$0xff] %v10801_v50  ;;  %v10822_v50 = vld [vmem:[%s10112_s26 + $0xcc] sm:$0xff]  ;;  %v10825_v51 = vld [vmem:[%s10112_s26 + $0xc4] sm:$0xff] }
 0x158   : > { %1874 = vrot.lane.b32.xlu1 %v10794_v55, %s10053_s7  ;;  %1872 = vrot.lane.b32.xlu0 %v10797_v56, %s10053_s7 }
 0x15a   : > { %v10813_v49 = vpop.permute.xlu1 %1618  ;;  %v10815_v48 = vpop.permute.xlu0 %1616 }
 0x15b   : > { %16533 = vst [vmem:[#allocation84_spill] sm:$0xff] %v10813_v49  ;;  %16534 = vst [vmem:[#allocation85_spill] sm:$0xff] %v10815_v48  ;;  %v10836_v48 = vld [vmem:[%s10112_s26 + $0xdc] sm:$0xff]  ;;  %v10839_v49 = vld [vmem:[%s10112_s26 + $0xd4] sm:$0xff] }
 0x15c   : > { %1878 = vrot.lane.b32.xlu1 %v10808_v52, %s10053_s7  ;;  %1876 = vrot.lane.b32.xlu0 %v10811_v53, %s10053_s7 }
 0x15e   : > { %v10827_v47 = vpop.permute.xlu1 %1694  ;;  %v10829_v46 = vpop.permute.xlu0 %1692 }
 0x15f   : > { %16535 = vst [vmem:[#allocation86_spill] sm:$0xff] %v10827_v47  ;;  %16536 = vst [vmem:[#allocation87_spill] sm:$0xff] %v10829_v46  ;;  %v10850_v46 = vld [vmem:[%s10112_s26 + $0xec] sm:$0xff]  ;;  %v10853_v47 = vld [vmem:[%s10112_s26 + $0xe4] sm:$0xff] }
 0x160   : > { %1882 = vrot.lane.b32.xlu1 %v10822_v50, %s10053_s7  ;;  %1880 = vrot.lane.b32.xlu0 %v10825_v51, %s10053_s7 }
 0x162   : > { %v10841_v45 = vpop.permute.xlu1 %1698  ;;  %v10843_v44 = vpop.permute.xlu0 %1696 }
 0x163   : > { %16537 = vst [vmem:[#allocation88_spill] sm:$0xff] %v10841_v45  ;;  %16538 = vst [vmem:[#allocation89_spill] sm:$0xff] %v10843_v44  ;;  %v10864_v44 = vld [vmem:[%s10112_s26 + $0xfc] sm:$0xff]  ;;  %v10867_v45 = vld [vmem:[%s10112_s26 + $0xf4] sm:$0xff] }
 0x164   : > { %1886 = vrot.lane.b32.xlu1 %v10836_v48, %s10053_s7  ;;  %1884 = vrot.lane.b32.xlu0 %v10839_v49, %s10053_s7 }
 0x166   : > { %v10855_v43 = vpop.permute.xlu1 %1702  ;;  %v10857_v42 = vpop.permute.xlu0 %1700 }
 0x167   : > { %16539 = vst [vmem:[#allocation90_spill] sm:$0xff] %v10855_v43  ;;  %16540 = vst [vmem:[#allocation91_spill] sm:$0xff] %v10857_v42  ;;  %v10878_v42 = vld [vmem:[%s10112_s26 + $0x10c] sm:$0xff]  ;;  %v10881_v43 = vld [vmem:[%s10112_s26 + $0x104] sm:$0xff] }
 0x168   : > { %1890 = vrot.lane.b32.xlu1 %v10850_v46, %s10053_s7  ;;  %1888 = vrot.lane.b32.xlu0 %v10853_v47, %s10053_s7 }
 0x16a   : > { %v10869_v41 = vpop.permute.xlu1 %1706  ;;  %v10871_v40 = vpop.permute.xlu0 %1704 }
 0x16b   : > { %16541 = vst [vmem:[#allocation92_spill] sm:$0xff] %v10869_v41  ;;  %16542 = vst [vmem:[#allocation93_spill] sm:$0xff] %v10871_v40  ;;  %v10892_v40 = vld [vmem:[%s10112_s26 + $0x11c] sm:$0xff]  ;;  %v10895_v41 = vld [vmem:[%s10112_s26 + $0x114] sm:$0xff] }
 0x16c   : > { %1894 = vrot.lane.b32.xlu1 %v10864_v44, %s10053_s7  ;;  %1892 = vrot.lane.b32.xlu0 %v10867_v45, %s10053_s7 }
 0x16e   : > { %v10883_v39 = vpop.permute.xlu1 %1710  ;;  %v10885_v38 = vpop.permute.xlu0 %1708 }
 0x16f   : > { %16543 = vst [vmem:[#allocation94_spill] sm:$0xff] %v10883_v39  ;;  %16544 = vst [vmem:[#allocation95_spill] sm:$0xff] %v10885_v38  ;;  %v1181_v38 = vld [vmem:[%s10112_s26 + $0x12c] sm:$0x3f]  ;;  %v10907_v39 = vld [vmem:[%s10112_s26 + $0x124] sm:$0xff] }
 0x170   : > { %1898 = vrot.lane.b32.xlu1 %v10878_v42, %s10053_s7  ;;  %1896 = vrot.lane.b32.xlu0 %v10881_v43, %s10053_s7 }
 0x172   : > { %v10897_v37 = vpop.permute.xlu1 %1714  ;;  %v10899_v36 = vpop.permute.xlu0 %1712 }
 0x173   : > { %16545 = vst [vmem:[#allocation96_spill] sm:$0xff] %v10897_v37  ;;  %16546 = vst [vmem:[#allocation97_spill] sm:$0xff] %v10899_v36 }
 0x174   : > { %1902 = vrot.lane.b32.xlu1 %v10892_v40, %s10053_s7  ;;  %1900 = vrot.lane.b32.xlu0 %v10895_v41, %s10053_s7 }
 0x176   : > { %v10909_v35 = vpop.permute.xlu1 %1718  ;;  %v10911_v34 = vpop.permute.xlu0 %1716 }
 0x177   : > { %16547 = vst [vmem:[#allocation98_spill] sm:$0xff] %v10909_v35  ;;  %16548 = vst [vmem:[#allocation99_spill] sm:$0xff] %v10911_v34  ;;  %v2677_v34 = vld [vmem:[%s11352_s27 + $0x11] sm:$0xff] }
 0x178   : > { %1906 = vrot.lane.b32.xlu1 %v1181_v38, %s10053_s7  ;;  %1904 = vrot.lane.b32.xlu0 %v10907_v39, %s10053_s7  ;;  %s13777_s7 = scalar_lea.vmem %s16361_s6, %s8570_s28 }
 0x17a   : > { %v10916_v37 = vpop.permute.xlu1 %1722  ;;  %v10918_v36 = vpop.permute.xlu0 %1720 }
 0x17b   : > { %16549 = vst [vmem:[#allocation100_spill] sm:$0xff] %v10916_v37  ;;  %16550 = vst [vmem:[#allocation101_spill] sm:$0xff] %v10918_v36  ;;  %v1251_v37 = vld [vmem:[%s10112_s26 + $0x116] sm:$0xff] }
 0x17c   : > { %1949 = vrot.lane.b32.xlu1 %v10682_v2, %s10054_s8  ;;  %1947 = vrot.lane.b32.xlu0 %v10685_v15, %s10054_s8 }
 0x17e   : > { %v10924_v33 = vpop.permute.xlu1 %1726  ;;  %v10926_v35 = vpop.permute.xlu0 %1724 }
 0x17f   : > { %16551 = vst [vmem:[#allocation102_spill] sm:$0xff] %v10924_v33  ;;  %16552 = vst [vmem:[#allocation103_spill] sm:$0xff] %v10926_v35  ;;  %v1223_v35 = vld [vmem:[%s10112_s26 + $0x36] sm:$0xff] }
 0x180   : > { %1953 = vrot.lane.b32.xlu1 %v10696_v10, %s10054_s8  ;;  %1951 = vrot.lane.b32.xlu0 %v10699_v54, %s10054_s8 }
 0x182   : > { %v10932_v38 = vpop.permute.xlu1 %1730  ;;  %v10934_v36 = vpop.permute.xlu0 %1728 }
 0x183   : > { %16553 = vst [vmem:[#allocation104_spill] sm:$0xff] %v10932_v38  ;;  %16554 = vst [vmem:[#allocation105_spill] sm:$0xff] %v10934_v36  ;;  %v1220_v36 = vld [vmem:[%s10112_s26 + $0x13d] sm:$0x3f] }
 0x184   : > { %1957 = vrot.lane.b32.xlu1 %v10710_v18, %s10054_s8  ;;  %1955 = vrot.lane.b32.xlu0 %v10713_v63, %s10054_s8 }
 0x186   : > { %v10940_v15 = vpop.permute.xlu1 %1734  ;;  %v10942_v2 = vpop.permute.xlu0 %1732 }
 0x187   : > { %16555 = vst [vmem:[#allocation106_spill] sm:$0xff] %v10940_v15  ;;  %16556 = vst [vmem:[#allocation107_spill] sm:$0xff] %v10942_v2 }
 0x188   : > { %1961 = vrot.lane.b32.xlu1 %v10724_v19, %s10054_s8  ;;  %1959 = vrot.lane.b32.xlu0 %v10727_v58, %s10054_s8 }
 0x18a   : > { %v10948_v10 = vpop.permute.xlu1 %1738  ;;  %v10950_v54 = vpop.permute.xlu0 %1736 }
 0x18b   : > { %16557 = vst [vmem:[#allocation108_spill] sm:$0xff] %v10948_v10  ;;  %16558 = vst [vmem:[#allocation109_spill] sm:$0xff] %v10950_v54 }
 0x18c   : > { %1965 = vrot.lane.b32.xlu1 %v10738_v57, %s10054_s8  ;;  %1963 = vrot.lane.b32.xlu0 %v10741_v7, %s10054_s8 }
 0x18e   : > { %v10956_v63 = vpop.permute.xlu1 %1742  ;;  %v10958_v18 = vpop.permute.xlu0 %1740 }
 0x18f   : > { %16559 = vst [vmem:[#allocation110_spill] sm:$0xff] %v10956_v63  ;;  %16560 = vst [vmem:[#allocation111_spill] sm:$0xff] %v10958_v18  ;;  %v1193_v18 = vld [vmem:[%s10112_s26 + $0x65] sm:$0xff] }
 0x190   : > { %1969 = vrot.lane.b32.xlu1 %v10752_v11, %s10054_s8  ;;  %1967 = vrot.lane.b32.xlu0 %v10755_v14, %s10054_s8 }
 0x192   : > { %v10964_v19 = vpop.permute.xlu1 %1746  ;;  %v10966_v58 = vpop.permute.xlu0 %1744 }
 0x193   : > { %16561 = vst [vmem:[#allocation112_spill] sm:$0xff] %v10964_v19  ;;  %16562 = vst [vmem:[#allocation113_spill] sm:$0xff] %v10966_v58  ;;  %v1191_v58 = vld [vmem:[%s10112_s26 + $0x55] sm:$0xff] }
 0x194   : > { %1973 = vrot.lane.b32.xlu1 %v10766_v3, %s10054_s8  ;;  %1971 = vrot.lane.b32.xlu0 %v10769_v6, %s10054_s8 }
 0x196   : > { %v10972_v57 = vpop.permute.xlu1 %1750  ;;  %v10974_v7 = vpop.permute.xlu0 %1748 }
 0x197   : > { %16563 = vst [vmem:[#allocation114_spill] sm:$0xff] %v10972_v57  ;;  %16564 = vst [vmem:[#allocation115_spill] sm:$0xff] %v10974_v7  ;;  %v1189_v7 = vld [vmem:[%s10112_s26 + $0x45] sm:$0xff] }
 0x198   : > { %1977 = vrot.lane.b32.xlu1 %v10780_v59, %s10054_s8  ;;  %1975 = vrot.lane.b32.xlu0 %v10783_v62, %s10054_s8 }
 0x19a   : > { %v10980_v11 = vpop.permute.xlu1 %1754  ;;  %v10982_v14 = vpop.permute.xlu0 %1752 }
 0x19b   : > { %16565 = vst [vmem:[#allocation116_spill] sm:$0xff] %v10980_v11  ;;  %16566 = vst [vmem:[#allocation117_spill] sm:$0xff] %v10982_v14  ;;  %v1187_v14 = vld [vmem:[%s10112_s26 + $0x35] sm:$0xff] }
 0x19c   : > { %1981 = vrot.lane.b32.xlu1 %v10794_v55, %s10054_s8  ;;  %1979 = vrot.lane.b32.xlu0 %v10797_v56, %s10054_s8 }
 0x19e   : > { %v10988_v3 = vpop.permute.xlu1 %1758  ;;  %v10990_v6 = vpop.permute.xlu0 %1756 }
 0x19f   : > { %16567 = vst [vmem:[#allocation118_spill] sm:$0xff] %v10988_v3  ;;  %16568 = vst [vmem:[#allocation119_spill] sm:$0xff] %v10990_v6  ;;  %v1185_v6 = vld [vmem:[%s10112_s26 + $0x25] sm:$0xff] }
 0x1a0   : > { %1985 = vrot.lane.b32.xlu1 %v10808_v52, %s10054_s8  ;;  %1983 = vrot.lane.b32.xlu0 %v10811_v53, %s10054_s8 }
 0x1a2   : > { %v10996_v59 = vpop.permute.xlu1 %1762  ;;  %v10998_v62 = vpop.permute.xlu0 %1760 }
 0x1a3   : > { %16569 = vst [vmem:[#allocation120_spill] sm:$0xff] %v10996_v59  ;;  %16570 = vst [vmem:[#allocation121_spill] sm:$0xff] %v10998_v62 }
 0x1a4   : > { %1989 = vrot.lane.b32.xlu1 %v10822_v50, %s10054_s8  ;;  %1987 = vrot.lane.b32.xlu0 %v10825_v51, %s10054_s8 }
 0x1a6   : > { %v11004_v55 = vpop.permute.xlu1 %1838  ;;  %v11006_v56 = vpop.permute.xlu0 %1836 }
 0x1a8   : > { %1993 = vrot.lane.b32.xlu1 %v10836_v48, %s10054_s8  ;;  %1991 = vrot.lane.b32.xlu0 %v10839_v49, %s10054_s8 }
 0x1aa   : > { %v11012_v52 = vpop.permute.xlu1 %1842  ;;  %v11014_v53 = vpop.permute.xlu0 %1840 }
 0x1ac   : > { %1997 = vrot.lane.b32.xlu1 %v10850_v46, %s10054_s8  ;;  %1995 = vrot.lane.b32.xlu0 %v10853_v47, %s10054_s8 }
 0x1ae   : > { %v11020_v50 = vpop.permute.xlu1 %1846  ;;  %v11022_v51 = vpop.permute.xlu0 %1844 }
 0x1af   : > { %16571 = vst [vmem:[#allocation122_spill] sm:$0xff] %v11020_v50  ;;  %16572 = vst [vmem:[#allocation123_spill] sm:$0xff] %v11022_v51  ;;  %v1013_v51 = vld [vmem:[%s10112_s26 + $0x70] sm:$0xff]  ;;  %v1016_v50 = vld [vmem:[%s10112_s26 + $0x88] sm:$0xff] }
 0x1b0   : > { %2001 = vrot.lane.b32.xlu1 %v10864_v44, %s10054_s8  ;;  %1999 = vrot.lane.b32.xlu0 %v10867_v45, %s10054_s8  ;;  %v1182_v44 = vld [vmem:[%s10112_s26 + $0x12c] sm:$0xff] }
 0x1b2   : > { %v11028_v48 = vpop.permute.xlu1 %1850  ;;  %v11030_v49 = vpop.permute.xlu0 %1848 }
 0x1b3   : > { %16573 = vst [vmem:[#allocation124_spill] sm:$0xff] %v11028_v48  ;;  %16574 = vst [vmem:[#allocation125_spill] sm:$0xff] %v11030_v49  ;;  %v2687_v49 = vld [vmem:[%s11352_s27 + $0x61] sm:$0xff]  ;;  %v2688_v48 = vld [vmem:[%s11352_s27 + $0x69] sm:$0xff] }
 0x1b4   : > { %2005 = vrot.lane.b32.xlu1 %v10878_v42, %s10054_s8  ;;  %2003 = vrot.lane.b32.xlu0 %v10881_v43, %s10054_s8  ;;  %v1184_v42 = vld [vmem:[%s10112_s26 + $0x13c] sm:$0x3f]  ;;  %v1183_v43 = vld [vmem:[%s10112_s26 + $0x134] sm:$0xff] }
 0x1b6   : > { %v11036_v46 = vpop.permute.xlu1 %1854  ;;  %v11038_v47 = vpop.permute.xlu0 %1852 }
 0x1b7   : > { %16575 = vst [vmem:[#allocation126_spill] sm:$0xff] %v11036_v46  ;;  %16576 = vst [vmem:[#allocation127_spill] sm:$0xff] %v11038_v47  ;;  %v2680_v47 = vld [vmem:[%s11352_s27 + $0x29] sm:$0xff] }
 0x1b8   : > { %2009 = vrot.lane.b32.xlu1 %v10892_v40, %s10054_s8  ;;  %2007 = vrot.lane.b32.xlu0 %v10895_v41, %s10054_s8  ;;  %v1186_v41 = vld [vmem:[%s10112_s26 + $0x2d] sm:$0xff] }
 0x1ba   : > { %v11045_v45 = vpop.permute.xlu1 %1858  ;;  %v11047_v62 = vpop.permute.xlu0 %1856 }
 0x1bb   : > { %16577 = vst [vmem:[#allocation128_spill] sm:$0xff] %v11045_v45  ;;  %16578 = vst [vmem:[#allocation129_spill] sm:$0xff] %v11047_v62  ;;  %v2678_v62 = vld [vmem:[%s11352_s27 + $0x19] sm:$0xff]  ;;  %v2675_v45 = vld [vmem:[%s11352_s27 + $0x1] sm:$0xff] }
 0x1bc   : > { %2013 = vrot.lane.b32.xlu1 %v1182_v44, %s10054_s8  ;;  %2011 = vrot.lane.b32.xlu0 %v10907_v39, %s10054_s8  ;;  %v1188_v39 = vld [vmem:[%s10112_s26 + $0x3d] sm:$0xff] }
 0x1be   : > { %v11054_v59 = vpop.permute.xlu1 %1862  ;;  %v11056_v40 = vpop.permute.xlu0 %1860 }
 0x1bf   : > { %16579 = vst [vmem:[#allocation130_spill] sm:$0xff] %v11054_v59  ;;  %16580 = vst [vmem:[#allocation131_spill] sm:$0xff] %v11056_v40  ;;  %v1249_v40 = vld [vmem:[%s10112_s26 + $0x106] sm:$0xff] }
 0x1c0   : > { %2017 = vrot.lane.b32.xlu1 %v1184_v42, %s10054_s8  ;;  %2015 = vrot.lane.b32.xlu0 %v1183_v43, %s10054_s8  ;;  %v1190_v43 = vld [vmem:[%s10112_s26 + $0x4d] sm:$0xff]  ;;  %s10059_s8 = smov 96  }
 0x1c2   : > { %v11062_v3 = vpop.permute.xlu1 %1866  ;;  %v11064_v44 = vpop.permute.xlu0 %1864 }
 0x1c3   : > { %16581 = vst [vmem:[#allocation132_spill] sm:$0xff] %v11062_v3  ;;  %16582 = vst [vmem:[#allocation133_spill] sm:$0xff] %v11064_v44  ;;  %v1221_v3 = vld [vmem:[%s10112_s26 + $0x26] sm:$0xff] }
 0x1c4   : > { %2093 = vrot.lane.b32.xlu1 %v1186_v41, %s10055_s9  ;;  %2091 = vrot.lane.b32.xlu0 %v1185_v6, %s10055_s9  ;;  %v1192_v6 = vld [vmem:[%s10112_s26 + $0x5d] sm:$0xff] }
 0x1c6   : > { %v11070_v11 = vpop.permute.xlu1 %1870  ;;  %v11072_v42 = vpop.permute.xlu0 %1868 }
 0x1c7   : > { %16583 = vst [vmem:[#allocation134_spill] sm:$0xff] %v11070_v11  ;;  %16584 = vst [vmem:[#allocation135_spill] sm:$0xff] %v11072_v42 }
 0x1c8   : > { %2097 = vrot.lane.b32.xlu1 %v1188_v39, %s10055_s9  ;;  %2095 = vrot.lane.b32.xlu0 %v1187_v14, %s10055_s9  ;;  %v1194_v14 = vld [vmem:[%s10112_s26 + $0x6d] sm:$0xff] }
 0x1ca   : > { %v11078_v57 = vpop.permute.xlu1 %1874  ;;  %v11080_v41 = vpop.permute.xlu0 %1872 }
 0x1cb   : > { %16585 = vst [vmem:[#allocation136_spill] sm:$0xff] %v11078_v57  ;;  %16586 = vst [vmem:[#allocation137_spill] sm:$0xff] %v11080_v41 }
 0x1cc   : > { %2101 = vrot.lane.b32.xlu1 %v1190_v43, %s10055_s9  ;;  %2099 = vrot.lane.b32.xlu0 %v1189_v7, %s10055_s9  ;;  %v1196_v7 = vld [vmem:[%s10112_s26 + $0x7d] sm:$0xff] }
 0x1ce   : > { %v11086_v19 = vpop.permute.xlu1 %1878  ;;  %v11088_v39 = vpop.permute.xlu0 %1876 }
 0x1cf   : > { %16587 = vst [vmem:[#allocation138_spill] sm:$0xff] %v11086_v19  ;;  %16588 = vst [vmem:[#allocation139_spill] sm:$0xff] %v11088_v39  ;;  %v1195_v19 = vld [vmem:[%s10112_s26 + $0x75] sm:$0xff] }
 0x1d0   : > { %2105 = vrot.lane.b32.xlu1 %v1192_v6, %s10055_s9  ;;  %2103 = vrot.lane.b32.xlu0 %v1191_v58, %s10055_s9  ;;  %v1198_v58 = vld [vmem:[%s10112_s26 + $0x8d] sm:$0xff] }
 0x1d2   : > { %v11094_v41 = vpop.permute.xlu1 %1882  ;;  %v11096_v43 = vpop.permute.xlu0 %1880 }
 0x1d3   : > { %16589 = vst [vmem:[#allocation140_spill] sm:$0xff] %v11094_v41  ;;  %16590 = vst [vmem:[#allocation141_spill] sm:$0xff] %v11096_v43  ;;  %v1197_v41 = vld [vmem:[%s10112_s26 + $0x85] sm:$0xff] }
 0x1d4   : > { %2109 = vrot.lane.b32.xlu1 %v1194_v14, %s10055_s9  ;;  %2107 = vrot.lane.b32.xlu0 %v1193_v18, %s10055_s9  ;;  %v1200_v18 = vld [vmem:[%s10112_s26 + $0x9d] sm:$0xff] }
 0x1d6   : > { %v11102_v39 = vpop.permute.xlu1 %1886  ;;  %v11104_v6 = vpop.permute.xlu0 %1884 }
 0x1d7   : > { %16591 = vst [vmem:[#allocation142_spill] sm:$0xff] %v11102_v39  ;;  %16592 = vst [vmem:[#allocation143_spill] sm:$0xff] %v11104_v6  ;;  %v1199_v39 = vld [vmem:[%s10112_s26 + $0x95] sm:$0xff] }
 0x1d8   : > { %2113 = vrot.lane.b32.xlu1 %v1196_v7, %s10055_s9  ;;  %2111 = vrot.lane.b32.xlu0 %v1195_v19, %s10055_s9  ;;  %v1202_v19 = vld [vmem:[%s10112_s26 + $0xad] sm:$0xff] }
 0x1da   : > { %v11110_v43 = vpop.permute.xlu1 %1890  ;;  %v11112_v14 = vpop.permute.xlu0 %1888 }
 0x1db   : > { %16593 = vst [vmem:[#allocation144_spill] sm:$0xff] %v11110_v43  ;;  %16594 = vst [vmem:[#allocation145_spill] sm:$0xff] %v11112_v14  ;;  %v1201_v43 = vld [vmem:[%s10112_s26 + $0xa5] sm:$0xff] }
 0x1dc   : > { %2117 = vrot.lane.b32.xlu1 %v1198_v58, %s10055_s9  ;;  %2115 = vrot.lane.b32.xlu0 %v1197_v41, %s10055_s9  ;;  %v1204_v41 = vld [vmem:[%s10112_s26 + $0xbd] sm:$0xff] }
 0x1de   : > { %v11118_v6 = vpop.permute.xlu1 %1894  ;;  %v11120_v7 = vpop.permute.xlu0 %1892 }
 0x1df   : > { %16595 = vst [vmem:[#allocation146_spill] sm:$0xff] %v11118_v6  ;;  %16596 = vst [vmem:[#allocation147_spill] sm:$0xff] %v11120_v7  ;;  %v1203_v6 = vld [vmem:[%s10112_s26 + $0xb5] sm:$0xff] }
 0x1e0   : > { %2121 = vrot.lane.b32.xlu1 %v1200_v18, %s10055_s9  ;;  %2119 = vrot.lane.b32.xlu0 %v1199_v39, %s10055_s9  ;;  %v1206_v39 = vld [vmem:[%s10112_s26 + $0xcd] sm:$0xff] }
 0x1e2   : > { %v11126_v14 = vpop.permute.xlu1 %1898  ;;  %v11128_v58 = vpop.permute.xlu0 %1896 }
 0x1e3   : > { %16597 = vst [vmem:[#allocation148_spill] sm:$0xff] %v11126_v14  ;;  %16598 = vst [vmem:[#allocation149_spill] sm:$0xff] %v11128_v58  ;;  %v1205_v14 = vld [vmem:[%s10112_s26 + $0xc5] sm:$0xff] }
 0x1e4   : > { %2125 = vrot.lane.b32.xlu1 %v1202_v19, %s10055_s9  ;;  %2123 = vrot.lane.b32.xlu0 %v1201_v43, %s10055_s9  ;;  %v1208_v43 = vld [vmem:[%s10112_s26 + $0xdd] sm:$0xff]  ;;  %v1207_v19 = vld [vmem:[%s10112_s26 + $0xd5] sm:$0xff] }
 0x1e6   : > { %v11134_v7 = vpop.permute.xlu1 %1902  ;;  %v11136_v18 = vpop.permute.xlu0 %1900 }
 0x1e7   : > { %16599 = vst [vmem:[#allocation150_spill] sm:$0xff] %v11134_v7  ;;  %16600 = vst [vmem:[#allocation151_spill] sm:$0xff] %v11136_v18 }
 0x1e8   : > { %2129 = vrot.lane.b32.xlu1 %v1204_v41, %s10055_s9  ;;  %2127 = vrot.lane.b32.xlu0 %v1203_v6, %s10055_s9  ;;  %v1210_v6 = vld [vmem:[%s10112_s26 + $0xed] sm:$0xff]  ;;  %v1209_v41 = vld [vmem:[%s10112_s26 + $0xe5] sm:$0xff] }
 0x1ea   : > { %v11142_v58 = vpop.permute.xlu1 %1906  ;;  %v11144_v57 = vpop.permute.xlu0 %1904 }
 0x1eb   : > { %16601 = vst [vmem:[#allocation152_spill] sm:$0xff] %v11142_v58  ;;  %16602 = vst [vmem:[#allocation153_spill] sm:$0xff] %v11144_v57 }
 0x1ec   : > { %2133 = vrot.lane.b32.xlu1 %v1206_v39, %s10055_s9  ;;  %2131 = vrot.lane.b32.xlu0 %v1205_v14, %s10055_s9  ;;  %v272_v14 = vld [vmem:[%s16357_s2] sm:$0xff]  ;;  %v273_v39 = vld [vmem:[%s16357_s2 + $0x8] sm:$0xff] }
 0x1ed   : > { %v8439_v63 = vpack.c.bf16 %v273_v39, %v272_v14  ;;  %v1214_v14 = vld [vmem:[%s10112_s26 + $0x10d] sm:$0xff]  ;;  %v1213_v39 = vld [vmem:[%s10112_s26 + $0x105] sm:$0xff] }
 0x1ee   : > { %v11150_v18 = vpop.permute.xlu1 %1949  ;;  %v11152_v7 = vpop.permute.xlu0 %1947 }
 0x1ef   : > { %8440 = vmatprep.subr.bf16.mxu0 %v8439_v63  ;;  %8559 = vmatprep.subr.bf16.mxu1 %v8439_v63 }
 0x1f0   : > { %2137 = vrot.lane.b32.xlu1 %v1208_v43, %s10055_s9  ;;  %2135 = vrot.lane.b32.xlu0 %v1207_v19, %s10055_s9  ;;  %v1212_v43 = vld [vmem:[%s10112_s26 + $0xfd] sm:$0xff]  ;;  %v1211_v19 = vld [vmem:[%s10112_s26 + $0xf5] sm:$0xff] }
 0x1f1   : > { %8442 = vmatpush3.bf16.msra.mxu0 %v8439_v63  ;;  %8562 = vmatpush3.bf16.msra.mxu1 %v8439_v63 }
 0x1f2   : > { %v11158_v58 = vpop.permute.xlu1 %1953  ;;  %v11160_v57 = vpop.permute.xlu0 %1951 }
 0x1f3   : > { %16603 = vst [vmem:[#allocation154_spill] sm:$0xff] %v11160_v57 }
 0x1f4   : > { %2141 = vrot.lane.b32.xlu1 %v1210_v6, %s10055_s9  ;;  %2139 = vrot.lane.b32.xlu0 %v1209_v41, %s10055_s9  ;;  %v274_v6 = vld [vmem:[%s16357_s2 + $0x10] sm:$0xff]  ;;  %v275_v41 = vld [vmem:[%s16357_s2 + $0x18] sm:$0xff] }
 0x1f5   : > { %v8443_v42 = vpack.c.bf16 %v275_v41, %v274_v6  ;;  %v276_v6 = vld [vmem:[%s16357_s2 + $0x20] sm:$0xf]  ;;  %v1217_v41 = vld [vmem:[%s10112_s26 + $0x125] sm:$0xff] }
 0x1f6   : > { %v11172_v54 = vpop.permute.xlu1 %1957  ;;  %v11174_v10 = vpop.permute.xlu0 %1955 }
 0x1f7   : > { %16604 = vst [vmem:[#allocation155_spill] sm:$0xff] %v11172_v54  ;;  %16605 = vst [vmem:[#allocation156_spill] sm:$0xff] %v11174_v10  ;;  %8444 = vmatprep.subr.bf16.mxu0 %v8443_v42  ;;  %8560 = vmatprep.subr.bf16.mxu1 %v8443_v42  ;;  %v1014_v10 = vld [vmem:[%s10112_s26 + $0x78] sm:$0xff] }
 0x1f8   : > { %2145 = vrot.lane.b32.xlu1 %v1212_v43, %s10055_s9  ;;  %2143 = vrot.lane.b32.xlu0 %v1211_v19, %s10055_s9  ;;  %v1216_v43 = vld [vmem:[%s10112_s26 + $0x11d] sm:$0xff]  ;;  %v1215_v19 = vld [vmem:[%s10112_s26 + $0x115] sm:$0xff] }
 0x1f9   : > { %8446 = vmatpush3.bf16.msra.mxu0 %v8443_v42  ;;  %8563 = vmatpush3.bf16.msra.mxu1 %v8443_v42  ;;  %v1218_v42 = vld [vmem:[%s10112_s26 + $0x12d] sm:$0xff] }
 0x1fa   : > { %v11186_v11 = vpop.permute.xlu1 %1961  ;;  %v11188_v2 = vpop.permute.xlu0 %1959  ;;  %8259 = vmatprep.subr.msk.mxu0 %vm4028_vm0, %v276_v6  ;;  %8561 = vmatprep.subr.msk.mxu1 %vm4028_vm0, %v276_v6 }
 0x1fb   : > { %16606 = vst [vmem:[#allocation157_spill] sm:$0xff] %v11186_v11  ;;  %16607 = vst [vmem:[#allocation158_spill] sm:$0xff] %v11188_v2  ;;  %v1008_v2 = vld [vmem:[%s10112_s26 + $0x48] sm:$0xff]  ;;  %v2690_v11 = vld [vmem:[%s11352_s27 + $0x79] sm:$0xff] }
 0x1fc   : > { %2149 = vrot.lane.b32.xlu1 %v1214_v14, %s10055_s9  ;;  %2147 = vrot.lane.b32.xlu0 %v1213_v39, %s10055_s9 }
 0x1fd   : > { %8260 = vmatpush3.msk.msra.mxu0 %vm4028_vm0, %v276_v6  ;;  %8564 = vmatpush3.msk.msra.mxu1 %vm4028_vm0, %v276_v6  ;;  %v1222_v6 = vld [vmem:[%s10112_s26 + $0x2e] sm:$0xff] }
 0x1fe   : > { %v11194_v15 = vpop.permute.xlu1 %1965  ;;  %v11196_v63 = vpop.permute.xlu0 %1963 }
 0x1ff   : > { %16608 = vst [vmem:[#allocation159_spill] sm:$0xff] %v11194_v15  ;;  %16609 = vst [vmem:[#allocation160_spill] sm:$0xff] %v11196_v63  ;;  %v2682_v63 = vld [vmem:[%s11352_s27 + $0x39] sm:$0xff]  ;;  %v2679_v15 = vld [vmem:[%s11352_s27 + $0x21] sm:$0xff] }
 0x200   : > { %2153 = vrot.lane.b32.xlu1 %v1216_v43, %s10055_s9  ;;  %2151 = vrot.lane.b32.xlu0 %v1215_v19, %s10055_s9  ;;  %v1219_v43 = vld [vmem:[%s10112_s26 + $0x135] sm:$0xff] }
 0x202   : > { %v11205_v14 = vpop.permute.xlu1 %1969  ;;  %v11207_v39 = vpop.permute.xlu0 %1967 }
 0x203   : > { %16610 = vst [vmem:[#allocation161_spill] sm:$0xff] %v11205_v14  ;;  %16611 = vst [vmem:[#allocation162_spill] sm:$0xff] %v11207_v39 }
 0x204   : > { %2157 = vrot.lane.b32.xlu1 %v1218_v42, %s10055_s9  ;;  %2155 = vrot.lane.b32.xlu0 %v1217_v41, %s10055_s9  ;;  %v1224_v41 = vld [vmem:[%s10112_s26 + $0x3e] sm:$0xff] }
 0x206   : > { %v11213_v44 = vpop.permute.xlu1 %1973  ;;  %v11215_v19 = vpop.permute.xlu0 %1971 }
 0x207   : > { %16612 = vst [vmem:[#allocation163_spill] sm:$0xff] %v11213_v44  ;;  %16613 = vst [vmem:[#allocation164_spill] sm:$0xff] %v11215_v19  ;;  %v1247_v44 = vld [vmem:[%s10112_s26 + $0xf6] sm:$0xff] }
 0x208   : > { %2161 = vrot.lane.b32.xlu1 %v1220_v36, %s10055_s9  ;;  %2159 = vrot.lane.b32.xlu0 %v1219_v43, %s10055_s9  ;;  %v1226_v43 = vld [vmem:[%s10112_s26 + $0x4e] sm:$0xff] }
 0x20a   : > { %v11221_v38 = vpop.permute.xlu1 %1977  ;;  %v11223_v42 = vpop.permute.xlu0 %1975 }
 0x20b   : > { %16614 = vst [vmem:[#allocation165_spill] sm:$0xff] %v11221_v38  ;;  %16615 = vst [vmem:[#allocation166_spill] sm:$0xff] %v11223_v42  ;;  %v1225_v42 = vld [vmem:[%s10112_s26 + $0x46] sm:$0xff] }
 0x20c   : > { %2237 = vrot.lane.b32.xlu1 %v1222_v6, %s10056_s20  ;;  %2235 = vrot.lane.b32.xlu0 %v1221_v3, %s10056_s20  ;;  %v1228_v3 = vld [vmem:[%s10112_s26 + $0x5e] sm:$0xff] }
 0x20e   : > { %v11229_v19 = vpop.permute.xlu1 %1981  ;;  %v11231_v36 = vpop.permute.xlu0 %1979 }
 0x20f   : > { %16616 = vst [vmem:[#allocation167_spill] sm:$0xff] %v11229_v19  ;;  %16617 = vst [vmem:[#allocation168_spill] sm:$0xff] %v11231_v36  ;;  %v1227_v19 = vld [vmem:[%s10112_s26 + $0x56] sm:$0xff] }
 0x210   : > { %2241 = vrot.lane.b32.xlu1 %v1224_v41, %s10056_s20  ;;  %2239 = vrot.lane.b32.xlu0 %v1223_v35, %s10056_s20  ;;  %v1230_v35 = vld [vmem:[%s10112_s26 + $0x6e] sm:$0xff] }
 0x212   : > { %v11237_v38 = vpop.permute.xlu1 %1985  ;;  %v11239_v6 = vpop.permute.xlu0 %1983 }
 0x213   : > { %16618 = vst [vmem:[#allocation169_spill] sm:$0xff] %v11237_v38  ;;  %16619 = vst [vmem:[#allocation170_spill] sm:$0xff] %v11239_v6  ;;  %v1229_v38 = vld [vmem:[%s10112_s26 + $0x66] sm:$0xff] }
 0x214   : > { %2245 = vrot.lane.b32.xlu1 %v1226_v43, %s10056_s20  ;;  %2243 = vrot.lane.b32.xlu0 %v1225_v42, %s10056_s20  ;;  %v1232_v42 = vld [vmem:[%s10112_s26 + $0x7e] sm:$0xff] }
 0x216   : > { %v11245_v36 = vpop.permute.xlu1 %1989  ;;  %v11247_v41 = vpop.permute.xlu0 %1987 }
 0x217   : > { %16620 = vst [vmem:[#allocation171_spill] sm:$0xff] %v11245_v36  ;;  %16621 = vst [vmem:[#allocation172_spill] sm:$0xff] %v11247_v41  ;;  %v1231_v36 = vld [vmem:[%s10112_s26 + $0x76] sm:$0xff] }
 0x218   : > { %2249 = vrot.lane.b32.xlu1 %v1228_v3, %s10056_s20  ;;  %2247 = vrot.lane.b32.xlu0 %v1227_v19, %s10056_s20  ;;  %v1234_v19 = vld [vmem:[%s10112_s26 + $0x8e] sm:$0xff] }
 0x21a   : > { %v11253_v6 = vpop.permute.xlu1 %1993  ;;  %v11255_v43 = vpop.permute.xlu0 %1991 }
 0x21b   : > { %16622 = vst [vmem:[#allocation173_spill] sm:$0xff] %v11253_v6  ;;  %16623 = vst [vmem:[#allocation174_spill] sm:$0xff] %v11255_v43  ;;  %v1233_v6 = vld [vmem:[%s10112_s26 + $0x86] sm:$0xff] }
 0x21c   : > { %2253 = vrot.lane.b32.xlu1 %v1230_v35, %s10056_s20  ;;  %2251 = vrot.lane.b32.xlu0 %v1229_v38, %s10056_s20  ;;  %v1236_v38 = vld [vmem:[%s10112_s26 + $0x9e] sm:$0xff] }
 0x21e   : > { %v11261_v41 = vpop.permute.xlu1 %1997  ;;  %v11263_v3 = vpop.permute.xlu0 %1995 }
 0x21f   : > { %16624 = vst [vmem:[#allocation175_spill] sm:$0xff] %v11261_v41  ;;  %16625 = vst [vmem:[#allocation176_spill] sm:$0xff] %v11263_v3  ;;  %v1235_v41 = vld [vmem:[%s10112_s26 + $0x96] sm:$0xff] }
 0x220   : > { %2257 = vrot.lane.b32.xlu1 %v1232_v42, %s10056_s20  ;;  %2255 = vrot.lane.b32.xlu0 %v1231_v36, %s10056_s20  ;;  %v1238_v36 = vld [vmem:[%s10112_s26 + $0xae] sm:$0xff] }
 0x222   : > { %v11269_v43 = vpop.permute.xlu1 %2001  ;;  %v11271_v35 = vpop.permute.xlu0 %1999 }
 0x223   : > { %16626 = vst [vmem:[#allocation177_spill] sm:$0xff] %v11269_v43  ;;  %16627 = vst [vmem:[#allocation178_spill] sm:$0xff] %v11271_v35  ;;  %v1237_v43 = vld [vmem:[%s10112_s26 + $0xa6] sm:$0xff] }
 0x224   : > { %2261 = vrot.lane.b32.xlu1 %v1234_v19, %s10056_s20  ;;  %2259 = vrot.lane.b32.xlu0 %v1233_v6, %s10056_s20  ;;  %v1240_v6 = vld [vmem:[%s10112_s26 + $0xbe] sm:$0xff] }
 0x226   : > { %v11277_v3 = vpop.permute.xlu1 %2005  ;;  %v11279_v42 = vpop.permute.xlu0 %2003 }
 0x227   : > { %16628 = vst [vmem:[#allocation179_spill] sm:$0xff] %v11277_v3  ;;  %16629 = vst [vmem:[#allocation180_spill] sm:$0xff] %v11279_v42  ;;  %v1239_v3 = vld [vmem:[%s10112_s26 + $0xb6] sm:$0xff] }
 0x228   : > { %2265 = vrot.lane.b32.xlu1 %v1236_v38, %s10056_s20  ;;  %2263 = vrot.lane.b32.xlu0 %v1235_v41, %s10056_s20  ;;  %v1242_v41 = vld [vmem:[%s10112_s26 + $0xce] sm:$0xff] }
 0x22a   : > { %v11285_v35 = vpop.permute.xlu1 %2009  ;;  %v11287_v19 = vpop.permute.xlu0 %2007 }
 0x22b   : > { %16630 = vst [vmem:[#allocation181_spill] sm:$0xff] %v11285_v35  ;;  %16631 = vst [vmem:[#allocation182_spill] sm:$0xff] %v11287_v19  ;;  %v1241_v35 = vld [vmem:[%s10112_s26 + $0xc6] sm:$0xff] }
 0x22c   : > { %2269 = vrot.lane.b32.xlu1 %v1238_v36, %s10056_s20  ;;  %2267 = vrot.lane.b32.xlu0 %v1237_v43, %s10056_s20  ;;  %v1244_v43 = vld [vmem:[%s10112_s26 + $0xde] sm:$0xff] }
 0x22e   : > { %v11293_v42 = vpop.permute.xlu1 %2013  ;;  %v11295_v38 = vpop.permute.xlu0 %2011 }
 0x22f   : > { %16632 = vst [vmem:[#allocation183_spill] sm:$0xff] %v11293_v42  ;;  %16633 = vst [vmem:[#allocation184_spill] sm:$0xff] %v11295_v38  ;;  %v1243_v42 = vld [vmem:[%s10112_s26 + $0xd6] sm:$0xff] }
 0x230   : > { %2273 = vrot.lane.b32.xlu1 %v1240_v6, %s10056_s20  ;;  %2271 = vrot.lane.b32.xlu0 %v1239_v3, %s10056_s20  ;;  %v1246_v3 = vld [vmem:[%s10112_s26 + $0xee] sm:$0xff] }
 0x232   : > { %v11301_v19 = vpop.permute.xlu1 %2017  ;;  %v11303_v36 = vpop.permute.xlu0 %2015 }
 0x233   : > { %16634 = vst [vmem:[#allocation185_spill] sm:$0xff] %v11301_v19  ;;  %16635 = vst [vmem:[#allocation186_spill] sm:$0xff] %v11303_v36  ;;  %v1245_v19 = vld [vmem:[%s10112_s26 + $0xe6] sm:$0xff] }
 0x234   : > { %2277 = vrot.lane.b32.xlu1 %v1242_v41, %s10056_s20  ;;  %2275 = vrot.lane.b32.xlu0 %v1241_v35, %s10056_s20  ;;  %v1248_v35 = vld [vmem:[%s10112_s26 + $0xfe] sm:$0xff] }
 0x236   : > { %v11309_v38 = vpop.permute.xlu1 %2093  ;;  %v11311_v6 = vpop.permute.xlu0 %2091 }
 0x238   : > { %2281 = vrot.lane.b32.xlu1 %v1244_v43, %s10056_s20  ;;  %2279 = vrot.lane.b32.xlu0 %v1243_v42, %s10056_s20  ;;  %v1250_v42 = vld [vmem:[%s10112_s26 + $0x10e] sm:$0xff] }
 0x23a   : > { %v11317_v36 = vpop.permute.xlu1 %2097  ;;  %v11319_v41 = vpop.permute.xlu0 %2095 }
 0x23b   : > { %16636 = vst [vmem:[#allocation187_spill] sm:$0xff] %v11317_v36  ;;  %16637 = vst [vmem:[#allocation188_spill] sm:$0xff] %v11319_v41  ;;  %v2693_v41 = vld [vmem:[%s11352_s27 + $0x91] sm:$0xff] }
 0x23c   : > { %2285 = vrot.lane.b32.xlu1 %v1246_v3, %s10056_s20  ;;  %2283 = vrot.lane.b32.xlu0 %v1245_v19, %s10056_s20  ;;  %v1252_v19 = vld [vmem:[%s10112_s26 + $0x11e] sm:$0xff] }
 0x23e   : > { %v11325_v33 = vpop.permute.xlu1 %2101  ;;  %v11327_v43 = vpop.permute.xlu0 %2099 }
 0x23f   : > { %16638 = vst [vmem:[#allocation189_spill] sm:$0xff] %v11325_v33  ;;  %16639 = vst [vmem:[#allocation190_spill] sm:$0xff] %v11327_v43  ;;  %v1007_v43 = vld [vmem:[%s10112_s26 + $0x40] sm:$0xff]  ;;  %v1009_v33 = vld [vmem:[%s10112_s26 + $0x50] sm:$0xff] }
 0x240   : > { %2289 = vrot.lane.b32.xlu1 %v1248_v35, %s10056_s20  ;;  %2287 = vrot.lane.b32.xlu0 %v1247_v44, %s10056_s20  ;;  %v1253_v44 = vld [vmem:[%s10112_s26 + $0x126] sm:$0xff] }
 0x242   : > { %v11333_v59 = vpop.permute.xlu1 %2105  ;;  %v11335_v3 = vpop.permute.xlu0 %2103 }
 0x243   : > { %16640 = vst [vmem:[#allocation191_spill] sm:$0xff] %v11333_v59  ;;  %16641 = vst [vmem:[#allocation192_spill] sm:$0xff] %v11335_v3  ;;  %v1006_v3 = vld [vmem:[%s10112_s26 + $0x38] sm:$0xff]  ;;  %v1005_v59 = vld [vmem:[%s10112_s26 + $0x30] sm:$0xff] }
 0x244   : > { %2293 = vrot.lane.b32.xlu1 %v1250_v42, %s10056_s20  ;;  %2291 = vrot.lane.b32.xlu0 %v1249_v40, %s10056_s20  ;;  %v1254_v40 = vld [vmem:[%s10112_s26 + $0x12e] sm:$0xff] }
 0x246   : > { %v11341_v39 = vpop.permute.xlu1 %2109  ;;  %v11343_v35 = vpop.permute.xlu0 %2107 }
 0x247   : > { %16642 = vst [vmem:[#allocation193_spill] sm:$0xff] %v11341_v39  ;;  %16643 = vst [vmem:[#allocation194_spill] sm:$0xff] %v11343_v35  ;;  %v2676_v35 = vld [vmem:[%s11352_s27 + $0x9] sm:$0xff] }
 0x248   : > { %2297 = vrot.lane.b32.xlu1 %v1252_v19, %s10056_s20  ;;  %2295 = vrot.lane.b32.xlu0 %v1251_v37, %s10056_s20  ;;  %v1256_v19 = vld [vmem:[%s10112_s26 + $0x13e] sm:$0x3f]  ;;  %v1255_v37 = vld [vmem:[%s10112_s26 + $0x136] sm:$0xff] }
 0x24a   : > { %v11356_v42 = vpop.permute.xlu1 %2113  ;;  %v11358_v14 = vpop.permute.xlu0 %2111 }
 0x24b   : > { %16644 = vst [vmem:[#allocation195_spill] sm:$0xff] %v11356_v42  ;;  %16645 = vst [vmem:[#allocation196_spill] sm:$0xff] %v11358_v14  ;;  %v8663_v14 = vpack.i.bf16 %v2676_v35, %v2675_v45  ;;  %v2685_v45 = vld [vmem:[%s11352_s27 + $0x51] sm:$0xff]  ;;  %v2686_v35 = vld [vmem:[%s11352_s27 + $0x59] sm:$0xff] }
 0x24c   : > { %2301 = vrot.lane.b32.xlu1 %v1254_v40, %s10056_s20  ;;  %2299 = vrot.lane.b32.xlu0 %v1253_v44, %s10056_s20  ;;  %v8668_v40 = vpack.i.bf16 %v2678_v62, %v2677_v34  ;;  %v2681_v44 = vld [vmem:[%s11352_s27 + $0x31] sm:$0xff]  ;;  %v8673_v62 = vpack.i.bf16 %v2680_v47, %v2679_v15  ;;  %v1000_v47 = vld [vmem:[%s10112_s26 + $0x8] sm:$0xff] }
 0x24d   : > { %v8678_v34 = vpack.i.bf16 %v2682_v63, %v2681_v44  ;;  %v1002_v15 = vld [vmem:[%s10112_s26 + $0x18] sm:$0xff]  ;;  %v1004_v63 = vld [vmem:[%s10112_s26 + $0x28] sm:$0xff]  ;;  %v8688_v44 = vpack.i.bf16 %v2686_v35, %v2685_v45 }
 0x24e   : > { %v11368_v39 = vpop.permute.xlu1 %2117  ;;  %v11370_v42 = vpop.permute.xlu0 %2115  ;;  %v11442_v36 = vsel %vm2343_vm1, %v1004_v63, %v10324_v4  ;;  %v11460_v4 = vsel %vm2343_vm1, %v1005_v59, %v10340_v9  ;;  %v1022_v63 = vld [vmem:[%s10112_s26 + $0xb8] sm:$0xff]  ;;  %v1023_v59 = vld [vmem:[%s10112_s26 + $0xc0] sm:$0xff] }
 0x24f   : > { %16646 = vst [vmem:[#allocation197_spill] sm:$0xff] %v11368_v39  ;;  %16647 = vst [vmem:[#allocation198_spill] sm:$0xff] %v11370_v42 }
 0x250   : > { %2305 = vrot.lane.b32.xlu1 %v1256_v19, %s10056_s20  ;;  %2303 = vrot.lane.b32.xlu0 %v1255_v37, %s10056_s20  ;;  %v2683_v19 = vld [vmem:[%s11352_s27 + $0x41] sm:$0xff]  ;;  %v2684_v37 = vld [vmem:[%s11352_s27 + $0x49] sm:$0xff] }
 0x252   : > { %v11378_v39 = vpop.permute.xlu1 %2121  ;;  %v11380_v42 = vpop.permute.xlu0 %2119 }
 0x253   : > { %16648 = vst [vmem:[#allocation199_spill] sm:$0xff] %v11378_v39  ;;  %16649 = vst [vmem:[#allocation200_spill] sm:$0xff] %v11380_v42  ;;  %v1001_v42 = vld [vmem:[%s10112_s26 + $0x10] sm:$0xff] }
 0x254   : > { %8669 = vrot.lane.b32.xlu1 %v8668_v40, %s10056_s20  ;;  %8664 = vrot.lane.b32.xlu0 %v8663_v14, %s10056_s20  ;;  %v999_v40 = vld [vmem:[%s10112_s26] sm:$0xff]  ;;  %v11416_v35 = vsel %vm2343_vm1, %v1001_v42, %v10296_v60  ;;  %v8693_v42 = vpack.i.bf16 %v2688_v48, %v2687_v49  ;;  %v1017_v48 = vld [vmem:[%s10112_s26 + $0x90] sm:$0xff] }
 0x255   : > { %v1003_v14 = vld [vmem:[%s10112_s26 + $0x20] sm:$0xff]  ;;  %v11423_v54 = vsel %vm2343_vm1, %v999_v40, %v10298_v61  ;;  %v11434_v61 = vsel %vm2343_vm1, %v1002_v15, %v10310_v0  ;;  %v11438_v40 = vsel %vm2343_vm1, %v1000_v47, %v10312_v1  ;;  %v1020_v49 = vld [vmem:[%s10112_s26 + $0xa8] sm:$0xff]  ;;  %v11456_v1 = vsel %vm2343_vm1, %v1006_v3, %v10338_v8  ;;  %v1025_v3 = vld [vmem:[%s10112_s26 + $0xd0] sm:$0xff] }
 0x256   : > { %v11388_v46 = vpop.permute.xlu1 %2125  ;;  %v11390_v39 = vpop.permute.xlu0 %2123  ;;  %v2691_v0 = vld [vmem:[%s11352_s27 + $0x81] sm:$0xff]  ;;  %v2692_v15 = vld [vmem:[%s11352_s27 + $0x89] sm:$0xff]  ;;  %v11468_v47 = vsel %vm2343_vm1, %v1007_v43, %v10354_v13  ;;  %v1026_v43 = vld [vmem:[%s10112_s26 + $0xd8] sm:$0xff] }
 0x257   : > { %16650 = vst [vmem:[#allocation201_spill] sm:$0xff] %v11388_v46  ;;  %16651 = vst [vmem:[#allocation202_spill] sm:$0xff] %v11390_v39  ;;  %v8683_v39 = vpack.i.bf16 %v2684_v37, %v2683_v19  ;;  %v2689_v46 = vld [vmem:[%s11352_s27 + $0x71] sm:$0xff]  ;;  %v1012_v19 = vld [vmem:[%s10112_s26 + $0x68] sm:$0xff] }
 0x258   : > { %8679 = vrot.lane.b32.xlu1 %v8678_v34, %s10056_s20  ;;  %8674 = vrot.lane.b32.xlu0 %v8673_v62, %s10056_s20  ;;  %v1010_v34 = vld [vmem:[%s10112_s26 + $0x58] sm:$0xff]  ;;  %v1011_v37 = vld [vmem:[%s10112_s26 + $0x60] sm:$0xff]  ;;  %v8698_v60 = vpack.i.bf16 %v2690_v11, %v2689_v46  ;;  %v11446_v11 = vsel %vm2343_vm1, %v1003_v14, %v10326_v5  ;;  %v11464_v5 = vsel %vm2343_vm1, %v1008_v2, %v10352_v12 }
 0x259   : > { %v1019_v46 = vld [vmem:[%s10112_s26 + $0xa0] sm:$0xff]  ;;  %v1021_v14 = vld [vmem:[%s10112_s26 + $0xb0] sm:$0xff]  ;;  %v11479_v9 = vsel %vm2343_vm1, %v1010_v34, %v10366_v16  ;;  %v11483_v12 = vsel %vm2343_vm1, %v1009_v33, %v10368_v17  ;;  %v11487_v13 = vsel %vm2343_vm1, %v1012_v19, %v10378_v20  ;;  %v11491_v2 = vsel %vm2343_vm1, %v1011_v37, %v10380_v21  ;;  %v1028_v17 = vld [vmem:[%s10112_s26 + $0xe8] sm:$0xff] }
 0x25a   : > { %v11410_v62 = vpop.permute.xlu1 %2129  ;;  %v11412_v45 = vpop.permute.xlu0 %2127  ;;  %v11498_v16 = vsel %vm2343_vm1, %v1014_v10, %v10385_v22  ;;  %v1027_v33 = vld [vmem:[%s10112_s26 + $0xe0] sm:$0xff]  ;;  %v8703_v21 = vpack.i.bf16 %v2692_v15, %v2691_v0  ;;  %v2697_v34 = vld [vmem:[%s11352_s27 + $0xb1] sm:$0xff]  ;;  %v11507_v19 = vsel %vm2343_vm1, %v1013_v51, %v10387_v23  ;;  %v11511_v22 = vsel %vm2343_vm1, %v1016_v50, %v10393_v24 }
 0x25b   : > { %16652 = vst [vmem:[#allocation203_spill] sm:$0xff] %v11410_v62  ;;  %16653 = vst [vmem:[#allocation204_spill] sm:$0xff] %v11412_v45  ;;  %v1015_v62 = vld [vmem:[%s10112_s26 + $0x80] sm:$0xff]  ;;  %v1018_v45 = vld [vmem:[%s10112_s26 + $0x98] sm:$0xff]  ;;  %v11526_v23 = vsel %vm2343_vm1, %v1017_v48, %v10403_v27  ;;  %v11530_v24 = vsel %vm2343_vm1, %v1020_v49, %v10409_v28  ;;  %v11549_v28 = vsel %vm2343_vm1, %v1021_v14, %v10419_v31 }
 0x25c   : > { %8689 = vrot.lane.b32.xlu1 %v8688_v44, %s10056_s20  ;;  %8684 = vrot.lane.b32.xlu0 %v8683_v39, %s10056_s20  ;;  %v2694_v39 = vld [vmem:[%s11352_s27 + $0x99] sm:$0xff]  ;;  %v1024_v44 = vld [vmem:[%s10112_s26 + $0xc8] sm:$0xff]  ;;  %v11515_v10 = vsel %vm2343_vm1, %v1015_v62, %v10395_v25  ;;  %v11519_v37 = vsel %vm2343_vm1, %v1018_v45, %v10401_v26  ;;  %v11534_v25 = vsel %vm2343_vm1, %v1019_v46, %v10411_v29  ;;  %v16657_v49 = vld [vmem:[#allocation4_spill] sm:$0xff] }
 0x25d   : > { %v8708_v20 = vpack.i.bf16 %v2694_v39, %v2693_v41  ;;  %v2698_v41 = vld [vmem:[%s11352_s27 + $0xb9] sm:$0xff]  ;;  %v11538_v26 = vsel %vm2343_vm1, %v1022_v63, %v10417_v30  ;;  %v1029_v51 = vld [vmem:[%s10112_s26 + $0xf0] sm:$0xff]  ;;  %v1032_v62 = vld [vmem:[%s10112_s26 + $0x108] sm:$0xff]  ;;  %v11553_v29 = vsel %vm2343_vm1, %v1024_v44, %v10425_v32  ;;  %v11561_v46 = vsel %vm2343_vm1, %v1026_v43, %v16657_v49 }
 0x25e   : > { %v11473_v57 = vpop.permute.xlu1 %2133  ;;  %v11475_v8 = vpop.permute.xlu0 %2131  ;;  %v1030_v50 = vld [vmem:[%s10112_s26 + $0xf8] sm:$0xff]  ;;  %v16656_v48 = vld [vmem:[#allocation3_spill] sm:$0xff]  ;;  %v1031_v39 = vld [vmem:[%s10112_s26 + $0x100] sm:$0xff]  ;;  %v8718_v32 = vpack.i.bf16 %v2698_v41, %v2697_v34 }
 0x25f   : > { %v11557_v30 = vsel %vm2343_vm1, %v1023_v59, %v16656_v48  ;;  %v1034_v0 = vld [vmem:[%s10112_s26 + $0x118] sm:$0x3f]  ;;  %v1033_v15 = vld [vmem:[%s10112_s26 + $0x110] sm:$0xff]  ;;  %v16659_v59 = vld [vmem:[#allocation6_spill] sm:$0xff] }
 0x260   : > { %8699 = vrot.lane.b32.xlu1 %v8698_v60, %s10056_s20  ;;  %8694 = vrot.lane.b32.xlu0 %v8693_v42, %s10056_s20  ;;  %v2695_v60 = vld [vmem:[%s11352_s27 + $0xa1] sm:$0xff]  ;;  %v2696_v42 = vld [vmem:[%s11352_s27 + $0xa9] sm:$0xff]  ;;  %v16658_v31 = vld [vmem:[#allocation5_spill] sm:$0xff]  ;;  %v11575_v43 = vsel %vm2343_vm1, %v1028_v17, %v16659_v59 }
 0x261   : > { %v11568_v63 = vsel %vm2343_vm1, %v1025_v3, %v16658_v31  ;;  %v8713_v14 = vpack.i.bf16 %v2696_v42, %v2695_v60  ;;  %v2701_v44 = vld [vmem:[%s11352_s27 + $0xd1] sm:$0xff]  ;;  %v16660_v48 = vld [vmem:[#allocation7_spill] sm:$0xff]  ;;  %v16663_v60 = vld [vmem:[#allocation10_spill] sm:$0xff] }
 0x262   : > { %v11543_v45 = vpop.permute.xlu1 %2137  ;;  %v11545_v27 = vpop.permute.xlu0 %2135  ;;  %v11579_v49 = vsel %vm2343_vm1, %v1027_v33, %v16660_v48  ;;  %v16662_v31 = vld [vmem:[#allocation9_spill] sm:$0xff]  ;;  %v2699_v34 = vld [vmem:[%s11352_s27 + $0xc1] sm:$0xff]  ;;  %v2700_v41 = vld [vmem:[%s11352_s27 + $0xc9] sm:$0xff]  ;;  %v11594_v17 = vsel %vm2343_vm1, %v1032_v62, %v16663_v60 }
 0x263   : > { %16654 = vst [vmem:[#allocation205_spill] sm:$0xff] %v11543_v45  ;;  %16655 = vst [vmem:[#allocation206_spill] sm:$0xff] %v11545_v27  ;;  %v16661_v27 = vld [vmem:[#allocation8_spill] sm:$0xff]  ;;  %v16664_v42 = vld [vmem:[#allocation11_spill] sm:$0xff] }
 0x264   : > { %8709 = vrot.lane.b32.xlu1 %v8708_v20, %s10056_s20  ;;  %8704 = vrot.lane.b32.xlu0 %v8703_v21, %s10056_s20  ;;  %v11583_v3 = vsel %vm2343_vm1, %v1030_v50, %v16661_v27  ;;  %v11587_v20 = vsel %vm2343_vm1, %v1029_v51, %v16662_v31  ;;  %v2702_v21 = vld [vmem:[%s11352_s27 + $0xd9] sm:$0xff]  ;;  %v11598_v33 = vsel %vm2343_vm1, %v1031_v39, %v16664_v42  ;;  %v16665_v59 = vld [vmem:[#allocation12_spill] sm:$0xff]  ;;  %v16670_v39 = vld [vmem:[#allocation15_spill] sm:$0xff] }
 0x265   : > { %v11602_v50 = vsel %vm2343_vm1, %v1034_v0, %v16665_v59  ;;  %v16666_v27 = vld [vmem:[#allocation13_spill] sm:$0xff]  ;;  %v16669_v45 = vld [vmem:[#allocation14_spill] sm:$0xff]  ;;  %v11620_v0 = vsel %vm2380_vm2, %v11423_v54, %v16670_v39  ;;  %v16671_v60 = vld [vmem:[#allocation16_spill] sm:$0xff]  ;;  %v8728_v54 = vpack.i.bf16 %v2702_v21, %v2701_v44 }
 0x266   : > { %v11606_v51 = vsel %vm2343_vm1, %v1033_v15, %v16666_v27  ;;  %v11608_v48 = vpop.permute.xlu1 %2141  ;;  %v11610_v31 = vpop.permute.xlu0 %2139  ;;  %v11615_v62 = vsel %vm2380_vm2, %v11438_v40, %v16669_v45  ;;  %v11625_v15 = vsel %vm2380_vm2, %v11434_v61, %v16671_v60  ;;  %v16672_v42 = vld [vmem:[#allocation17_spill] sm:$0xff]  ;;  %v16673_v27 = vld [vmem:[#allocation18_spill] sm:$0xff]  ;;  %v8723_v45 = vpack.i.bf16 %v2700_v41, %v2699_v34  ;;  %v16675_v60 = vld [vmem:[#allocation20_spill] sm:$0xff] }
 0x267   : > { %16667 = vst [vmem:[#allocation3_spill] sm:$0xff] %v11608_v48  ;;  %16668 = vst [vmem:[#allocation4_spill] sm:$0xff] %v11610_v31  ;;  %v11630_v59 = vsel %vm2380_vm2, %v11416_v35, %v16672_v42  ;;  %v11635_v40 = vsel %vm2380_vm2, %v11442_v36, %v16673_v27  ;;  %v2705_v39 = vld [vmem:[%s11352_s27 + $0xf1] sm:$0xff]  ;;  %v16674_v31 = vld [vmem:[#allocation19_spill] sm:$0xff]  ;;  %v11648_v35 = vsel %vm2380_vm2, %v11456_v1, %v16675_v60 }
 0x268   : > { %8719 = vrot.lane.b32.xlu1 %v8718_v32, %s10056_s20  ;;  %8714 = vrot.lane.b32.xlu0 %v8713_v14, %s10056_s20  ;;  %v11643_v61 = vsel %vm2380_vm2, %v11446_v11, %v16674_v31  ;;  %v16676_v42 = vld [vmem:[#allocation21_spill] sm:$0xff]  ;;  %v16677_v32 = vld [vmem:[#allocation22_spill] sm:$0xff]  ;;  %v2704_v34 = vld [vmem:[%s11352_s27 + $0xe9] sm:$0xff] }
 0x269   : > { %v11653_v36 = vsel %vm2380_vm2, %v11460_v4, %v16676_v42  ;;  %v11658_v14 = vsel %vm2380_vm2, %v11464_v5, %v16677_v32  ;;  %v2706_v44 = vld [vmem:[%s11352_s27 + $0xf9] sm:$0xff]  ;;  %v2703_v21 = vld [vmem:[%s11352_s27 + $0xe1] sm:$0xff]  ;;  %v16679_v1 = vld [vmem:[#allocation24_spill] sm:$0xff] }
 0x26a   : > { %v16678_v11 = vld [vmem:[#allocation23_spill] sm:$0xff]  ;;  %v11671_v31 = vsel %vm2380_vm2, %v11479_v9, %v16679_v1  ;;  %v16680_v4 = vld [vmem:[#allocation25_spill] sm:$0xff]  ;;  %v16681_v5 = vld [vmem:[#allocation26_spill] sm:$0xff]  ;;  %v11683_v42 = vpop.permute.xlu1 %2145 }
 0x26b   : > { %v11666_v41 = vsel %vm2380_vm2, %v11468_v47, %v16678_v11  ;;  %v11676_v27 = vsel %vm2380_vm2, %v11483_v12, %v16680_v4  ;;  %v11681_v60 = vsel %vm2380_vm2, %v11487_v13, %v16681_v5  ;;  %16682 = vst [vmem:[#allocation5_spill] sm:$0xff] %v11683_v42  ;;  %v11685_v47 = vpop.permute.xlu0 %2143  ;;  %v16684_v32 = vld [vmem:[#allocation27_spill] sm:$0xff]  ;;  %v16685_v11 = vld [vmem:[#allocation28_spill] sm:$0xff]  ;;  %v16686_v1 = vld [vmem:[#allocation29_spill] sm:$0xff] }
 0x26c   : > { %16683 = vst [vmem:[#allocation6_spill] sm:$0xff] %v11685_v47  ;;  %v11690_v9 = vsel %vm2380_vm2, %v11491_v2, %v16684_v32  ;;  %v11695_v12 = vsel %vm2380_vm2, %v11498_v16, %v16685_v11  ;;  %v11700_v13 = vsel %vm2380_vm2, %v11507_v19, %v16686_v1  ;;  %v16687_v4 = vld [vmem:[#allocation30_spill] sm:$0xff]  ;;  %8729 = vrot.lane.b32.xlu1 %v8728_v54, %s10056_s20  ;;  %v2709_v47 = vld [vmem:[%s11352_s27 + $0x111] sm:$0xff]  ;;  %v16688_v16 = vld [vmem:[#allocation31_spill] sm:$0xff] }
 0x26d   : > { %v11705_v5 = vsel %vm2380_vm2, %v11511_v22, %v16687_v4  ;;  %8724 = vrot.lane.b32.xlu0 %v8723_v45, %s10056_s20  ;;  %v8738_v2 = vpack.i.bf16 %v2706_v44, %v2705_v39  ;;  %v8733_v32 = vpack.i.bf16 %v2704_v34, %v2703_v21  ;;  %v11713_v11 = vsel %vm2380_vm2, %v11515_v10, %v16688_v16  ;;  %v16689_v19 = vld [vmem:[#allocation32_spill] sm:$0xff]  ;;  %v16690_v22 = vld [vmem:[#allocation33_spill] sm:$0xff]  ;;  %v16691_v54 = vld [vmem:[#allocation34_spill] sm:$0xff] }
 0x26e   : > { %v11718_v1 = vsel %vm2380_vm2, %v11519_v37, %v16689_v19  ;;  %v11723_v4 = vsel %vm2380_vm2, %v11526_v23, %v16690_v22  ;;  %v11728_v45 = vsel %vm2380_vm2, %v11530_v24, %v16691_v54  ;;  %v2710_v39 = vld [vmem:[%s11352_s27 + $0x119] sm:$0x3f]  ;;  %v2707_v44 = vld [vmem:[%s11352_s27 + $0x101] sm:$0xff]  ;;  %v2708_v21 = vld [vmem:[%s11352_s27 + $0x109] sm:$0xff]  ;;  %v16362_v10 = vmov 0.0|0.0  }
 0x26f   : > { %8447 = vmatprep.subr.bf16.mxu1 %v16362_v10  ;;  %v16692_v34 = vld [vmem:[#allocation35_spill] sm:$0xff]  ;;  %v16693_v16 = vld [vmem:[#allocation36_spill] sm:$0xff]  ;;  %v16694_v19 = vld [vmem:[#allocation37_spill] sm:$0xff]  ;;  %v11754_v10 = vpop.permute.xlu1 %2149 }
 0x270   : > { %v11737_v37 = vsel %vm2380_vm2, %v11534_v25, %v16692_v34  ;;  %v11742_v23 = vsel %vm2380_vm2, %v11538_v26, %v16693_v16  ;;  %v11747_v24 = vsel %vm2380_vm2, %v11549_v28, %v16694_v19  ;;  %v16695_v22 = vld [vmem:[#allocation38_spill] sm:$0xff]  ;;  %16696 = vst [vmem:[#allocation7_spill] sm:$0xff] %v11754_v10  ;;  %v11756_v25 = vpop.permute.xlu0 %2147  ;;  %v16698_v34 = vld [vmem:[#allocation39_spill] sm:$0xff]  ;;  %v16699_v16 = vld [vmem:[#allocation40_spill] sm:$0xff]  ;;  %8739 = vrot.lane.b32.xlu1 %v8738_v2, %s10056_s20 }
 0x271   : > { %v11752_v54 = vsel %vm2380_vm2, %v11553_v29, %v16695_v22  ;;  %16697 = vst [vmem:[#allocation8_spill] sm:$0xff] %v11756_v25  ;;  %v11761_v26 = vsel %vm2380_vm2, %v11557_v30, %v16698_v34  ;;  %v11766_v28 = vsel %vm2380_vm2, %v11561_v46, %v16699_v16  ;;  %v16700_v19 = vld [vmem:[#allocation41_spill] sm:$0xff]  ;;  %v16701_v22 = vld [vmem:[#allocation42_spill] sm:$0xff]  ;;  %v16702_v10 = vld [vmem:[#allocation43_spill] sm:$0xff]  ;;  %8734 = vrot.lane.b32.xlu0 %v8733_v32, %s10056_s20 }
 0x272   : > { %v11771_v29 = vsel %vm2380_vm2, %v11568_v63, %v16700_v19  ;;  %v11776_v25 = vsel %vm2380_vm2, %v11575_v43, %v16701_v22  ;;  %v11781_v30 = vsel %vm2380_vm2, %v11579_v49, %v16702_v10  ;;  %v8748_v46 = vpack.i.bf16 %v2710_v39, %v2709_v47  ;;  %v2713_v16 = vld [vmem:[%s11352_s27 + $0x12] sm:$0xff]  ;;  %v16705_v22 = vld [vmem:[#allocation46_spill] sm:$0xff]  ;;  %v16706_v2 = vld [vmem:[#allocation47_spill] sm:$0xff] }
 0x273   : > { %v8743_v34 = vpack.i.bf16 %v2708_v21, %v2707_v44  ;;  %v16703_v42 = vld [vmem:[#allocation44_spill] sm:$0xff]  ;;  %v16704_v19 = vld [vmem:[#allocation45_spill] sm:$0xff]  ;;  %v11799_v49 = vsel %vm2380_vm2, %v11594_v17, %v16705_v22  ;;  %v11804_v47 = vsel %vm2380_vm2, %v11598_v33, %v16706_v2  ;;  %v2711_v39 = vld [vmem:[%s11352_s27 + $0x2] sm:$0xff]  ;;  %v11825_v22 = vpop.permute.xlu1 %2153 }
 0x274   : > { %v11789_v63 = vsel %vm2380_vm2, %v11583_v3, %v16703_v42  ;;  %v11794_v43 = vsel %vm2380_vm2, %v11587_v20, %v16704_v19  ;;  %v2714_v32 = vld [vmem:[%s11352_s27 + $0x1a] sm:$0xff]  ;;  %v2712_v44 = vld [vmem:[%s11352_s27 + $0xa] sm:$0xff]  ;;  %16711 = vst [vmem:[#allocation9_spill] sm:$0xff] %v11825_v22  ;;  %v11827_v2 = vpop.permute.xlu0 %2151  ;;  %8749 = vrot.lane.b32.xlu1 %v8748_v46, %s10056_s20 }
 0x275   : > { %v16707_v3 = vld [vmem:[#allocation48_spill] sm:$0xff]  ;;  %v16708_v20 = vld [vmem:[#allocation49_spill] sm:$0xff]  ;;  %v16709_v17 = vld [vmem:[#allocation50_spill] sm:$0xff]  ;;  %16712 = vst [vmem:[#allocation10_spill] sm:$0xff] %v11827_v2  ;;  %8744 = vrot.lane.b32.xlu0 %v8743_v34, %s10056_s20 }
 0x276   : > { %v11812_v42 = vsel %vm2380_vm2, %v11602_v50, %v16707_v3  ;;  %v11817_v21 = vsel %vm2380_vm2, %v11606_v51, %v16708_v20  ;;  %v2419_v10 = vsel %vm2417_vm3, %v11615_v62, %v16709_v17  ;;  %v16710_v33 = vld [vmem:[#allocation51_spill] sm:$0xff]  ;;  %v16713_v50 = vld [vmem:[#allocation52_spill] sm:$0xff]  ;;  %v16714_v51 = vld [vmem:[#allocation53_spill] sm:$0xff] }
 0x277   : > { %v2418_v19 = vsel %vm2417_vm3, %v11620_v0, %v16710_v33  ;;  %v11832_v3 = vsel %vm2417_vm3, %v11625_v15, %v16713_v50  ;;  %v11837_v20 = vsel %vm2417_vm3, %v11630_v59, %v16714_v51  ;;  %v16715_v62 = vld [vmem:[#allocation54_spill] sm:$0xff]  ;;  %v16716_v17 = vld [vmem:[#allocation55_spill] sm:$0xff]  ;;  %v16717_v2 = vld [vmem:[#allocation56_spill] sm:$0xff]  ;;  %v11856_v59 = vpack.i.bf16 %v2714_v32, %v2713_v16 }
 0x278   : > { %v11842_v0 = vsel %vm2417_vm3, %v11635_v40, %v16715_v62  ;;  %v11847_v33 = vsel %vm2417_vm3, %v11643_v61, %v16716_v17  ;;  %v11852_v15 = vsel %vm2417_vm3, %v11648_v35, %v16717_v2  ;;  %v8753_v50 = vpack.i.bf16 %v2712_v44, %v2711_v39  ;;  %v2717_v40 = vld [vmem:[%s11352_s27 + $0x32] sm:$0xff]  ;;  %v16719_v61 = vld [vmem:[#allocation58_spill] sm:$0xff]  ;;  %v16720_v35 = vld [vmem:[#allocation59_spill] sm:$0xff] }
 0x279   : > { %v16718_v51 = vld [vmem:[#allocation57_spill] sm:$0xff]  ;;  %v11867_v17 = vsel %vm2417_vm3, %v11658_v14, %v16719_v61  ;;  %v11872_v46 = vsel %vm2417_vm3, %v11666_v41, %v16720_v35  ;;  %v16721_v34 = vld [vmem:[#allocation60_spill] sm:$0xff]  ;;  %v2715_v39 = vld [vmem:[%s11352_s27 + $0x22] sm:$0xff]  ;;  %8759 = vrot.lane.b32.xlu1 %v11856_v59, %s10058_s23 }
 0x27a   : > { %v11862_v62 = vsel %vm2417_vm3, %v11653_v36, %v16718_v51  ;;  %v11877_v16 = vsel %vm2417_vm3, %v11671_v31, %v16721_v34  ;;  %v2718_v32 = vld [vmem:[%s11352_s27 + $0x3a] sm:$0xff]  ;;  %v2716_v44 = vld [vmem:[%s11352_s27 + $0x2a] sm:$0xff]  ;;  %v11902_v34 = vpop.permute.xlu1 %2157  ;;  %8754 = vrot.lane.b32.xlu0 %v8753_v50, %s10058_s23 }
 0x27b   : > { %v16722_v36 = vld [vmem:[#allocation61_spill] sm:$0xff]  ;;  %v16723_v14 = vld [vmem:[#allocation62_spill] sm:$0xff]  ;;  %v16724_v41 = vld [vmem:[#allocation63_spill] sm:$0xff]  ;;  %16726 = vst [vmem:[#allocation11_spill] sm:$0xff] %v11902_v34 }
 0x27c   : > { %v11885_v2 = vsel %vm2417_vm3, %v11676_v27, %v16722_v36  ;;  %v11890_v51 = vsel %vm2417_vm3, %v11681_v60, %v16723_v14  ;;  %v11895_v61 = vsel %vm2417_vm3, %v11690_v9, %v16724_v41  ;;  %v16725_v31 = vld [vmem:[#allocation64_spill] sm:$0xff]  ;;  %v11904_v27 = vpop.permute.xlu0 %2155  ;;  %v16728_v36 = vld [vmem:[#allocation65_spill] sm:$0xff]  ;;  %v16729_v14 = vld [vmem:[#allocation66_spill] sm:$0xff] }
 0x27d   : > { %v11900_v35 = vsel %vm2417_vm3, %v11695_v12, %v16725_v31  ;;  %16727 = vst [vmem:[#allocation12_spill] sm:$0xff] %v11904_v27  ;;  %v11909_v60 = vsel %vm2417_vm3, %v11700_v13, %v16728_v36  ;;  %v11914_v9 = vsel %vm2417_vm3, %v11705_v5, %v16729_v14  ;;  %v16730_v41 = vld [vmem:[#allocation67_spill] sm:$0xff]  ;;  %v16731_v31 = vld [vmem:[#allocation68_spill] sm:$0xff]  ;;  %v16732_v13 = vld [vmem:[#allocation69_spill] sm:$0xff]  ;;  %v11934_v5 = vpack.i.bf16 %v2718_v32, %v2717_v40 }
 0x27e   : > { %v11919_v12 = vsel %vm2417_vm3, %v11713_v11, %v16730_v41  ;;  %v11924_v27 = vsel %vm2417_vm3, %v11718_v1, %v16731_v31  ;;  %v11929_v36 = vsel %vm2417_vm3, %v11723_v4, %v16732_v13  ;;  %v11936_v11 = vpack.i.bf16 %v2716_v44, %v2715_v39  ;;  %v2721_v14 = vld [vmem:[%s11352_s27 + $0x52] sm:$0xff]  ;;  %v16733_v41 = vld [vmem:[#allocation70_spill] sm:$0xff]  ;;  %v16734_v31 = vld [vmem:[#allocation71_spill] sm:$0xff] }
 0x27f   : > { %v11942_v1 = vsel %vm2417_vm3, %v11728_v45, %v16733_v41  ;;  %v11947_v4 = vsel %vm2417_vm3, %v11737_v37, %v16734_v31  ;;  %v16735_v13 = vld [vmem:[#allocation72_spill] sm:$0xff]  ;;  %v16736_v50 = vld [vmem:[#allocation73_spill] sm:$0xff]  ;;  %v2719_v39 = vld [vmem:[%s11352_s27 + $0x42] sm:$0xff]  ;;  %8769 = vrot.lane.b32.xlu1 %v11934_v5, %s10058_s23 }
 0x280   : > { %v11952_v34 = vsel %vm2417_vm3, %v11742_v23, %v16735_v13  ;;  %v11957_v40 = vsel %vm2417_vm3, %v11747_v24, %v16736_v50  ;;  %v2722_v32 = vld [vmem:[%s11352_s27 + $0x5a] sm:$0xff]  ;;  %v2720_v44 = vld [vmem:[%s11352_s27 + $0x4a] sm:$0xff]  ;;  %v11974_v24 = vpop.permute.xlu1 %2161  ;;  %v11976_v50 = vpop.permute.xlu0 %2159  ;;  %8764 = vrot.lane.b32.xlu0 %v11936_v11, %s10058_s23 }
 0x281   : > { %v16737_v45 = vld [vmem:[#allocation74_spill] sm:$0xff]  ;;  %v16738_v37 = vld [vmem:[#allocation75_spill] sm:$0xff]  ;;  %16740 = vst [vmem:[#allocation13_spill] sm:$0xff] %v11974_v24  ;;  %16741 = vst [vmem:[#allocation14_spill] sm:$0xff] %v11976_v50 }
 0x282   : > { %v11965_v41 = vsel %vm2417_vm3, %v11752_v54, %v16737_v45  ;;  %v11970_v31 = vsel %vm2417_vm3, %v11761_v26, %v16738_v37  ;;  %v16739_v23 = vld [vmem:[#allocation86_spill] sm:$0xff]  ;;  %v16742_v22 = vld [vmem:[#allocation76_spill] sm:$0xff]  ;;  %v16743_v45 = vld [vmem:[#allocation87_spill] sm:$0xff] }
 0x283   : > { %v2456_v13 = vsel %vm2454_vm4, %v2419_v10, %v16739_v23  ;;  %v11981_v54 = vsel %vm2417_vm3, %v11766_v28, %v16742_v22  ;;  %v2455_v48 = vsel %vm2454_vm4, %v2418_v19, %v16743_v45  ;;  %v11993_v28 = vpack.i.bf16 %v2722_v32, %v2721_v14  ;;  %v2725_v19 = vld [vmem:[%s11352_s27 + $0x72] sm:$0xff]  ;;  %v16745_v23 = vld [vmem:[#allocation78_spill] sm:$0xff] }
 0x284   : > { %v2493_v26 = vsel %vm2491_vm5, %v2456_v13, %v11004_v55  ;;  %v2492_v10 = vsel %vm2491_vm5, %v2455_v48, %v11006_v56  ;;  %v11995_v22 = vpack.i.bf16 %v2720_v44, %v2719_v39  ;;  %v16744_v37 = vld [vmem:[#allocation77_spill] sm:$0xff]  ;;  %v12006_v56 = vsel %vm2417_vm3, %v11776_v25, %v16745_v23  ;;  %v2723_v39 = vld [vmem:[%s11352_s27 + $0x62] sm:$0xff]  ;;  %v2724_v44 = vld [vmem:[%s11352_s27 + $0x6a] sm:$0xff]  ;;  %v2236_v23 = vpop.permute.xlu0 %2235 }
 0x285   : > { %v12001_v55 = vsel %vm2417_vm3, %v11771_v29, %v16744_v37  ;;  %v2530_v48 = vsel %vm2528_vm6, %v2493_v26, %v11150_v18  ;;  %v2529_v14 = vsel %vm2528_vm6, %v2492_v10, %v11152_v7  ;;  %v2726_v32 = vld [vmem:[%s11352_s27 + $0x7a] sm:$0xff]  ;;  %v16746_v13 = vld [vmem:[#allocation88_spill] sm:$0xff]  ;;  %v2238_v37 = vpop.permute.xlu1 %2237  ;;  %8779 = vrot.lane.b32.xlu1 %v11993_v28, %s10058_s23 }
 0x286   : > { %v2458_v29 = vsel %vm2454_vm4, %v11832_v3, %v16746_v13  ;;  %v2567_v45 = vsel %vm2565_vm7, %v2530_v48, %v11309_v38  ;;  %v2566_v25 = vsel %vm2565_vm7, %v2529_v14, %v11311_v6  ;;  %v16747_v18 = vld [vmem:[#allocation89_spill] sm:$0xff]  ;;  %8774 = vrot.lane.b32.xlu0 %v11995_v22, %s10058_s23  ;;  %v12035_v10 = vpack.i.bf16 %v2726_v32, %v2725_v19  ;;  %v16749_v13 = vld [vmem:[#allocation80_spill] sm:$0xff] }
 0x287   : > { %v2457_v7 = vsel %vm2454_vm4, %v11837_v20, %v16747_v18  ;;  %v2495_v26 = vsel %vm2491_vm5, %v2458_v29, %v11012_v52  ;;  %v2604_v3 = vsel %vm2602_vm8, %v2567_v45, %v2238_v37  ;;  %v2603_v38 = vsel %vm2602_vm8, %v2566_v25, %v2236_v23  ;;  %v2729_v48 = vld [vmem:[%s11352_s27 + $0x92] sm:$0xff]  ;;  %v16748_v52 = vld [vmem:[#allocation79_spill] sm:$0xff]  ;;  %v16750_v45 = vld [vmem:[#allocation154_spill] sm:$0xff] }
 0x288   : > { %v2494_v6 = vsel %vm2491_vm5, %v2457_v7, %v11014_v53  ;;  %v12037_v20 = vpack.i.bf16 %v2724_v44, %v2723_v39  ;;  %v12043_v14 = vsel %vm2417_vm3, %v11781_v30, %v16748_v52  ;;  %v12048_v53 = vsel %vm2417_vm3, %v11789_v63, %v16749_v13  ;;  %8261 = vmatprep.mubr.msk.f32.mxu0 %vm3919_vm9, %v2603_v38  ;;  %v2730_v32 = vld [vmem:[%s11352_s27 + $0x9a] sm:$0xff]  ;;  %v2727_v39 = vld [vmem:[%s11352_s27 + $0x82] sm:$0xff]  ;;  %v2728_v44 = vld [vmem:[%s11352_s27 + $0x8a] sm:$0xff]  ;;  %v2240_v38 = vpop.permute.xlu0 %2239 }
 0x289   : > { %v2532_v29 = vsel %vm2528_vm6, %v2495_v26, %v11158_v58  ;;  %v2531_v19 = vsel %vm2528_vm6, %v2494_v6, %v16750_v45  ;;  %v16751_v25 = vld [vmem:[#allocation81_spill] sm:$0xff]  ;;  %v16752_v37 = vld [vmem:[#allocation90_spill] sm:$0xff]  ;;  %v16753_v23 = vld [vmem:[#allocation187_spill] sm:$0xff]  ;;  %8262 = vmatmul.mubr.msk.f32.vlgmr.msra.gmra.mrb[0].mxu0 %vm3919_vm9, %v2604_v3  ;;  %v2242_v26 = vpop.permute.xlu1 %2241  ;;  %8789 = vrot.lane.b32.xlu1 %v12035_v10, %s10058_s23 }
 0x28a   : > { %v12061_v30 = vsel %vm2417_vm3, %v11794_v43, %v16751_v25  ;;  %v2460_v63 = vsel %vm2454_vm4, %v11842_v0, %v16752_v37  ;;  %v2569_v58 = vsel %vm2565_vm7, %v2532_v29, %v16753_v23  ;;  %v16754_v18 = vld [vmem:[#allocation188_spill] sm:$0xff]  ;;  %v16755_v6 = vld [vmem:[#allocation91_spill] sm:$0xff]  ;;  %v16756_v43 = vld [vmem:[#allocation122_spill] sm:$0xff]  ;;  %8784 = vrot.lane.b32.xlu0 %v12037_v20, %s10058_s23  ;;  %v12087_v25 = vpack.i.bf16 %v2728_v44, %v2727_v39 }
 0x28b   : > { %v2568_v7 = vsel %vm2565_vm7, %v2531_v19, %v16754_v18  ;;  %v2459_v52 = vsel %vm2454_vm4, %v11847_v33, %v16755_v6  ;;  %v2497_v13 = vsel %vm2491_vm5, %v2460_v63, %v16756_v43  ;;  %v2606_v0 = vsel %vm2602_vm8, %v2569_v58, %v2242_v26  ;;  %v2733_v45 = vld [vmem:[%s11352_s27 + $0xb2] sm:$0xff]  ;;  %v16757_v19 = vld [vmem:[#allocation123_spill] sm:$0xff]  ;;  %v277_v37 = vld [vmem:[%s16358_s3] sm:$0xff] }
 0x28c   : > { %v2605_v29 = vsel %vm2602_vm8, %v2568_v7, %v2240_v38  ;;  %v2496_v3 = vsel %vm2491_vm5, %v2459_v52, %v16757_v19  ;;  %v12085_v33 = vpack.i.bf16 %v2730_v32, %v2729_v48  ;;  %v278_v63 = vld [vmem:[%s16358_s3 + $0x8] sm:$0xff]  ;;  %v16758_v23 = vld [vmem:[#allocation82_spill] sm:$0xff]  ;;  %v16761_v44 = vld [vmem:[#allocation156_spill] sm:$0xff] }
 0x28d   : > { %v12098_v58 = vsel %vm2417_vm3, %v11799_v49, %v16758_v23  ;;  %v16759_v18 = vld [vmem:[#allocation83_spill] sm:$0xff]  ;;  %v2533_v7 = vsel %vm2528_vm6, %v2496_v3, %v16761_v44  ;;  %8264 = vmatprep.mubr.msk.f32.mxu0 %vm3919_vm9, %v2605_v29  ;;  %v2734_v26 = vld [vmem:[%s11352_s27 + $0xba] sm:$0xff]  ;;  %v16762_v52 = vld [vmem:[#allocation92_spill] sm:$0xff]  ;;  %v2246_v29 = vpop.permute.xlu1 %2245  ;;  %v2244_v3 = vpop.permute.xlu0 %2243 }
 0x28e   : > { %v12103_v48 = vsel %vm2417_vm3, %v11804_v47, %v16759_v18  ;;  %v16760_v32 = vld [vmem:[#allocation155_spill] sm:$0xff]  ;;  %v2462_v49 = vsel %vm2454_vm4, %v11852_v15, %v16762_v52  ;;  %v16763_v43 = vld [vmem:[#allocation93_spill] sm:$0xff]  ;;  %v16765_v23 = vld [vmem:[#allocation190_spill] sm:$0xff]  ;;  %8265 = vmatmul.mubr.msk.f32.gmra.mrb[2].mxu0 %vm3919_vm9, %v2606_v0  ;;  %v8448_v52 = vpack.c.bf16 %v278_v63, %v277_v37  ;;  %8799 = vrot.lane.b32.xlu1 %v12085_v33, %s10058_s23 }
 0x28f   : > { %v2534_v39 = vsel %vm2528_vm6, %v2497_v13, %v16760_v32  ;;  %v2731_v38 = vld [vmem:[%s11352_s27 + $0xa2] sm:$0xff]  ;;  %v2732_v6 = vld [vmem:[%s11352_s27 + $0xaa] sm:$0xff]  ;;  %v2461_v47 = vsel %vm2454_vm4, %v11862_v62, %v16763_v43  ;;  %v16764_v19 = vld [vmem:[#allocation189_spill] sm:$0xff]  ;;  %v2570_v18 = vsel %vm2565_vm7, %v2533_v7, %v16765_v23  ;;  %8794 = vrot.lane.b32.xlu0 %v12087_v25, %s10058_s23  ;;  %v12135_v0 = vpack.i.bf16 %v2734_v26, %v2733_v45 }
 0x290   : > { %v2571_v13 = vsel %vm2565_vm7, %v2534_v39, %v16764_v19  ;;  %v16766_v32 = vld [vmem:[#allocation124_spill] sm:$0xff]  ;;  %v2607_v15 = vsel %vm2602_vm8, %v2570_v18, %v2244_v3  ;;  %v16767_v39 = vld [vmem:[#allocation125_spill] sm:$0xff]  ;;  %v12137_v7 = vpack.i.bf16 %v2732_v6, %v2731_v38  ;;  %v16773_v6 = vld [vmem:[#allocation158_spill] sm:$0xff] }
 0x291   : > { %v2499_v44 = vsel %vm2491_vm5, %v2462_v49, %v16766_v32  ;;  %v2608_v50 = vsel %vm2602_vm8, %v2571_v13, %v2246_v29  ;;  %v2737_v62 = vld [vmem:[%s11352_s27 + $0xd2] sm:$0xff]  ;;  %v2498_v43 = vsel %vm2491_vm5, %v2461_v47, %v16767_v39  ;;  %8267 = vmatprep.mubr.msk.f32.mxu1 %vm3919_vm9, %v2607_v15  ;;  %v2738_v23 = vld [vmem:[%s11352_s27 + $0xda] sm:$0xff]  ;;  %v12162_v18 = vld [vmem:[%s11352_s27 + $0xc2] sm:$0xff]  ;;  %v2250_v15 = vpop.permute.xlu1 %2249 }
 0x292   : > { %v279_v49 = vld [vmem:[%s16358_s3 + $0x10] sm:$0xff]  ;;  %v280_v37 = vld [vmem:[%s16358_s3 + $0x18] sm:$0xff]  ;;  %v2535_v13 = vsel %vm2528_vm6, %v2498_v43, %v16773_v6  ;;  %v16775_v32 = vld [vmem:[#allocation95_spill] sm:$0xff]  ;;  %8268 = vmatmul.mubr.msk.f32.vlgmr.msra.gmra.mrb[0].mxu1 %vm3919_vm9, %v2608_v50  ;;  %8809 = vrot.lane.b32.xlu1 %v12135_v0, %s10058_s23  ;;  %v8818_v50 = vpack.i.bf16 %v2738_v23, %v2737_v62 }
 0x293   : > { %v16768_v63 = vld [vmem:[#allocation84_spill] sm:$0xff]  ;;  %v16770_v19 = vld [vmem:[#allocation85_spill] sm:$0xff]  ;;  %v16776_v39 = vld [vmem:[#allocation191_spill] sm:$0xff]  ;;  %8449 = vmatpush1.bf16.msra.mxu1 %v8448_v52  ;;  %8804 = vrot.lane.b32.xlu0 %v12137_v7, %s10058_s23 }
 0x294   : > { %v12148_v47 = vsel %vm2417_vm3, %v11812_v42, %v16768_v63  ;;  %v12153_v45 = vsel %vm2417_vm3, %v11817_v21, %v16770_v19  ;;  %v16772_v26 = vld [vmem:[#allocation157_spill] sm:$0xff]  ;;  %v2736_v29 = vld [vmem:[%s11352_s27 + $0xca] sm:$0xff]  ;;  %v16774_v42 = vld [vmem:[#allocation94_spill] sm:$0xff]  ;;  %v2463_v21 = vsel %vm2454_vm4, %v11872_v46, %v16775_v32  ;;  %v2248_v19 = vpop.permute.xlu0 %2247 }
 0x295   : > { %16769 = vst [vmem:[#allocation15_spill] sm:$0xff] %v12148_v47  ;;  %16771 = vst [vmem:[#allocation16_spill] sm:$0xff] %v12153_v45  ;;  %v2536_v38 = vsel %vm2528_vm6, %v2499_v44, %v16772_v26  ;;  %v2464_v3 = vsel %vm2454_vm4, %v11867_v17, %v16774_v42  ;;  %v16777_v63 = vld [vmem:[#allocation192_spill] sm:$0xff]  ;;  %v16778_v26 = vld [vmem:[#allocation126_spill] sm:$0xff] }
 0x296   : > { %v2573_v44 = vsel %vm2565_vm7, %v2536_v38, %v16776_v39  ;;  %v2572_v43 = vsel %vm2565_vm7, %v2535_v13, %v16777_v63  ;;  %v2501_v6 = vsel %vm2491_vm5, %v2464_v3, %v16778_v26  ;;  %v2741_v46 = vld [vmem:[%s11352_s27 + $0xf2] sm:$0xff]  ;;  %v8451_v38 = vpack.c.bf16 %v280_v37, %v279_v49  ;;  %v16779_v42 = vld [vmem:[#allocation127_spill] sm:$0xff]  ;;  %v281_v32 = vld [vmem:[%s16358_s3 + $0x20] sm:$0xff]  ;;  %8819 = vrot.lane.b32.xlu1 %v8818_v50, %s10058_s23 }
 0x297   : > { %v2610_v24 = vsel %vm2602_vm8, %v2573_v44, %v2250_v15  ;;  %v2609_v17 = vsel %vm2602_vm8, %v2572_v43, %v2248_v19  ;;  %v2500_v13 = vsel %vm2491_vm5, %v2463_v21, %v16779_v42  ;;  %v8813_v3 = vpack.i.bf16 %v2736_v29, %v12162_v18  ;;  %v282_v52 = vld [vmem:[%s16358_s3 + $0x28] sm:$0xff]  ;;  %v16780_v49 = vld [vmem:[#allocation96_spill] sm:$0xff]  ;;  %v2742_v23 = vld [vmem:[%s11352_s27 + $0xfa] sm:$0xff] }
 0x298   : > { %v2466_v37 = vsel %vm2454_vm4, %v11877_v16, %v16780_v49  ;;  %v16781_v21 = vld [vmem:[#allocation159_spill] sm:$0xff]  ;;  %v16782_v44 = vld [vmem:[#allocation160_spill] sm:$0xff]  ;;  %8270 = vmatprep.mubr.msk.f32.mxu1 %vm3919_vm9, %v2609_v17  ;;  %v16783_v43 = vmov 0.0|0.0   ;;  %v16784_v15 = vld [vmem:[#allocation97_spill] sm:$0xff]  ;;  %v2254_v17 = vpop.permute.xlu1 %2253 }
 0x299   : > { %v2538_v39 = vsel %vm2528_vm6, %v2501_v6, %v16781_v21  ;;  %v2537_v62 = vsel %vm2528_vm6, %v2500_v13, %v16782_v44  ;;  %v2739_v29 = vld [vmem:[%s11352_s27 + $0xe2] sm:$0xff]  ;;  %v2740_v63 = vld [vmem:[%s11352_s27 + $0xea] sm:$0xff]  ;;  %8450 = vmatprep.subr.bf16.mxu1 %v16783_v43  ;;  %v2465_v19 = vsel %vm2454_vm4, %v11885_v2, %v16784_v15  ;;  %v16786_v6 = vld [vmem:[#allocation193_spill] sm:$0xff]  ;;  %8271 = vmatmul.mubr.msk.f32.gmra.mrb[2].mxu1 %vm3919_vm9, %v2610_v24  ;;  %v2252_v21 = vpop.permute.xlu0 %2251 }
 0x29a   : > { %v16785_v26 = vld [vmem:[#allocation98_spill] sm:$0xff]  ;;  %v2575_v42 = vsel %vm2565_vm7, %v2538_v39, %v16786_v6  ;;  %v16788_v44 = vld [vmem:[#allocation128_spill] sm:$0xff]  ;;  %8452 = vmatpush1.bf16.msra.mxu1 %v8451_v38  ;;  %v8454_v39 = vpack.c.bf16 %v282_v52, %v281_v32  ;;  %v16789_v15 = vld [vmem:[#allocation129_spill] sm:$0xff]  ;;  %8814 = vrot.lane.b32.xlu0 %v8813_v3, %s10058_s23  ;;  %v8828_v24 = vpack.i.bf16 %v2742_v23, %v2741_v46 }
 0x29b   : > { %v2468_v16 = vsel %vm2454_vm4, %v11890_v51, %v16785_v26  ;;  %v16787_v13 = vld [vmem:[#allocation194_spill] sm:$0xff]  ;;  %v2503_v45 = vsel %vm2491_vm5, %v2466_v37, %v16788_v44  ;;  %v2612_v47 = vsel %vm2602_vm8, %v2575_v42, %v2254_v17  ;;  %v2745_v51 = vld [vmem:[%s11352_s27 + $0x112] sm:$0xff]  ;;  %v8823_v26 = vpack.i.bf16 %v2740_v63, %v2739_v29  ;;  %v16790_v42 = vld [vmem:[#allocation99_spill] sm:$0xff]  ;;  %8453 = vmatprep.subr.bf16.mxu1 %v16783_v43 }
 0x29c   : > { %v2574_v49 = vsel %vm2565_vm7, %v2537_v62, %v16787_v13  ;;  %v2502_v62 = vsel %vm2491_vm5, %v2465_v19, %v16789_v15  ;;  %v283_v37 = vld [vmem:[%s16358_s3 + $0x30] sm:$0xff]  ;;  %v284_v6 = vld [vmem:[%s16358_s3 + $0x38] sm:$0xff]  ;;  %v2467_v38 = vsel %vm2454_vm4, %v11895_v61, %v16790_v42  ;;  %v16792_v50 = vld [vmem:[#allocation162_spill] sm:$0xff]  ;;  %v2258_v44 = vpop.permute.xlu1 %2257  ;;  %8829 = vrot.lane.b32.xlu1 %v8828_v24, %s10058_s23 }
 0x29d   : > { %v2611_v2 = vsel %vm2602_vm8, %v2574_v49, %v2252_v21  ;;  %v16791_v32 = vld [vmem:[#allocation161_spill] sm:$0xff]  ;;  %v2539_v3 = vsel %vm2528_vm6, %v2502_v62, %v16792_v50  ;;  %v2743_v23 = vld [vmem:[%s11352_s27 + $0x102] sm:$0xff]  ;;  %v2744_v29 = vld [vmem:[%s11352_s27 + $0x10a] sm:$0xff] }
 0x29e   : > { %v2540_v52 = vsel %vm2528_vm6, %v2503_v45, %v16791_v32  ;;  %8273 = vmatprep.mubr.msk.f32.mxu1 %vm3919_vm9, %v2611_v2  ;;  %v2746_v46 = vld [vmem:[%s11352_s27 + $0x11a] sm:$0x3f]  ;;  %v16793_v63 = vld [vmem:[#allocation100_spill] sm:$0xff]  ;;  %v16795_v49 = vld [vmem:[#allocation195_spill] sm:$0xff]  ;;  %v2256_v2 = vpop.permute.xlu0 %2255  ;;  %8455 = vmatpush1.bf16.msra.mxu1 %v8454_v39  ;;  %v8457_v32 = vpack.c.bf16 %v284_v6, %v283_v37 }
 0x29f   : > { %v2470_v19 = vsel %vm2454_vm4, %v11900_v35, %v16793_v63  ;;  %v16794_v13 = vld [vmem:[#allocation101_spill] sm:$0xff]  ;;  %v2577_v45 = vsel %vm2565_vm7, %v2540_v52, %v16795_v49  ;;  %v16796_v17 = vld [vmem:[#allocation196_spill] sm:$0xff]  ;;  %8274 = vmatmul.mubr.msk.f32.gmra.mrb[4].mxu1 %vm3919_vm9, %v2612_v47  ;;  %v16797_v15 = vld [vmem:[#allocation130_spill] sm:$0xff]  ;;  %8824 = vrot.lane.b32.xlu0 %v8823_v26, %s10058_s23  ;;  %v8838_v52 = vpack.i.bf16 %v2746_v46, %v2745_v51 }
 0x2a0   : > { %v2469_v61 = vsel %vm2454_vm4, %v11909_v60, %v16794_v13  ;;  %v2576_v21 = vsel %vm2565_vm7, %v2539_v3, %v16796_v17  ;;  %v2505_v62 = vsel %vm2491_vm5, %v2468_v16, %v16797_v15  ;;  %v2614_v42 = vsel %vm2602_vm8, %v2577_v45, %v2258_v44  ;;  %v16798_v60 = vld [vmem:[#allocation131_spill] sm:$0xff]  ;;  %v285_v3 = vld [vmem:[%s16358_s3 + $0x40] sm:$0xff]  ;;  %v16801_v24 = vld [vmem:[#allocation164_spill] sm:$0xff]  ;;  %8456 = vmatprep.subr.bf16.mxu1 %v16783_v43  ;;  %v2262_v45 = vpop.permute.xlu1 %2261 }
 0x2a1   : > { %v2613_v35 = vsel %vm2602_vm8, %v2576_v21, %v2256_v2  ;;  %v2504_v50 = vsel %vm2491_vm5, %v2467_v38, %v16798_v60  ;;  %v8833_v47 = vpack.i.bf16 %v2744_v29, %v2743_v23  ;;  %v286_v16 = vld [vmem:[%s16358_s3 + $0x48] sm:$0xff]  ;;  %v16799_v63 = vld [vmem:[#allocation102_spill] sm:$0xff]  ;;  %v16803_v46 = vld [vmem:[#allocation104_spill] sm:$0xff]  ;;  %8839 = vrot.lane.b32.xlu1 %v8838_v52, %s10058_s23 }
 0x2a2   : > { %v2472_v39 = vsel %vm2454_vm4, %v11914_v9, %v16799_v63  ;;  %v16800_v37 = vld [vmem:[#allocation163_spill] sm:$0xff]  ;;  %v2541_v26 = vsel %vm2528_vm6, %v2504_v50, %v16801_v24  ;;  %8276 = vmatprep.mubr.msk.f32.mxu1 %vm3919_vm9, %v2613_v35  ;;  %v2474_v23 = vsel %vm2454_vm4, %v11924_v27, %v16803_v46  ;;  %v16804_v29 = vld [vmem:[#allocation197_spill] sm:$0xff]  ;;  %v16805_v13 = vld [vmem:[#allocation198_spill] sm:$0xff]  ;;  %v2260_v17 = vpop.permute.xlu0 %2259  ;;  %8458 = vmatpush1.bf16.msra.mxu1 %v8457_v32 }
 0x2a3   : > { %v2542_v6 = vsel %vm2528_vm6, %v2505_v62, %v16800_v37  ;;  %v16802_v51 = vld [vmem:[#allocation103_spill] sm:$0xff]  ;;  %v2578_v49 = vsel %vm2565_vm7, %v2541_v26, %v16805_v13  ;;  %8277 = vmatmul.mubr.msk.f32.gmra.mrb[6].mxu1 %vm3919_vm9, %v2614_v42  ;;  %v16806_v21 = vld [vmem:[#allocation132_spill] sm:$0xff]  ;;  %v8460_v15 = vpack.c.bf16 %v286_v16, %v285_v3  ;;  %v16807_v27 = vld [vmem:[#allocation133_spill] sm:$0xff]  ;;  %8834 = vrot.lane.b32.xlu0 %v8833_v47, %s10058_s23 }
 0x2a4   : > { %v2471_v38 = vsel %vm2454_vm4, %v11919_v12, %v16802_v51  ;;  %v2579_v9 = vsel %vm2565_vm7, %v2542_v6, %v16804_v29  ;;  %v2507_v44 = vsel %vm2491_vm5, %v2470_v19, %v16806_v21  ;;  %v2615_v12 = vsel %vm2602_vm8, %v2578_v49, %v2260_v17  ;;  %v287_v42 = vld [vmem:[%s16358_s3 + $0x50] sm:$0xff]  ;;  %v288_v19 = vld [vmem:[%s16358_s3 + $0x58] sm:$0xff]  ;;  %8459 = vmatprep.subr.bf16.mxu1 %v16783_v43  ;;  %v16811_v47 = vld [vmem:[#allocation106_spill] sm:$0xff]  ;;  %v2266_v26 = vpop.permute.xlu1 %2265 }
 0x2a5   : > { %v2616_v2 = vsel %vm2602_vm8, %v2579_v9, %v2262_v45  ;;  %v2506_v62 = vsel %vm2491_vm5, %v2469_v61, %v16807_v27  ;;  %v16808_v35 = vld [vmem:[#allocation105_spill] sm:$0xff]  ;;  %v16810_v61 = vld [vmem:[#allocation166_spill] sm:$0xff]  ;;  %8279 = vmatprep.mubr.msk.f32.mxu1 %vm3919_vm9, %v2615_v12  ;;  %v2476_v3 = vsel %vm2454_vm4, %v11942_v1, %v16811_v47  ;;  %v16812_v16 = vld [vmem:[#allocation107_spill] sm:$0xff]  ;;  %v8463_v13 = vpack.c.bf16 %v288_v19, %v287_v42 }
 0x2a6   : > { %v2473_v32 = vsel %vm2454_vm4, %v11929_v36, %v16808_v35  ;;  %v16809_v60 = vld [vmem:[#allocation165_spill] sm:$0xff]  ;;  %v2543_v52 = vsel %vm2528_vm6, %v2506_v62, %v16810_v61  ;;  %v2475_v63 = vsel %vm2454_vm4, %v11947_v4, %v16812_v16  ;;  %v16813_v37 = vld [vmem:[#allocation199_spill] sm:$0xff]  ;;  %v16814_v6 = vld [vmem:[#allocation200_spill] sm:$0xff]  ;;  %v2264_v51 = vpop.permute.xlu0 %2263  ;;  %8461 = vmatpush1.bf16.msra.mxu1 %v8460_v15  ;;  %8849 = vrot.lane.b32.xlu1 %v11936_v11, %s10059_s8 }
 0x2a7   : > { %v2544_v50 = vsel %vm2528_vm6, %v2507_v44, %v16809_v60  ;;  %v2580_v24 = vsel %vm2565_vm7, %v2543_v52, %v16814_v6  ;;  %8280 = vmatmul.mubr.msk.f32.gmra.mrb[8].mxu1 %vm3919_vm9, %v2616_v2  ;;  %v16815_v46 = vld [vmem:[#allocation134_spill] sm:$0xff]  ;;  %v16816_v4 = vld [vmem:[#allocation135_spill] sm:$0xff]  ;;  %8844 = vrot.lane.b32.xlu0 %v11856_v59, %s10059_s8  ;;  %v16817_v17 = vld [vmem:[#allocation108_spill] sm:$0xff] }
 0x2a8   : > { %v2581_v36 = vsel %vm2565_vm7, %v2544_v50, %v16813_v37  ;;  %v2509_v29 = vsel %vm2491_vm5, %v2472_v39, %v16815_v46  ;;  %v2617_v1 = vsel %vm2602_vm8, %v2580_v24, %v2264_v51  ;;  %v2508_v49 = vsel %vm2491_vm5, %v2471_v38, %v16816_v4  ;;  %v289_v39 = vld [vmem:[%s16358_s3 + $0x60] sm:$0xff]  ;;  %v290_v45 = vld [vmem:[%s16358_s3 + $0x68] sm:$0xff]  ;;  %v16819_v2 = vld [vmem:[#allocation168_spill] sm:$0xff]  ;;  %8462 = vmatprep.subr.bf16.mxu1 %v16783_v43  ;;  %v2270_v35 = vpop.permute.xlu1 %2269 }
 0x2a9   : > { %v2618_v9 = vsel %vm2602_vm8, %v2581_v36, %v2266_v26  ;;  %v2478_v21 = vsel %vm2454_vm4, %v11952_v34, %v16817_v17  ;;  %v16818_v38 = vld [vmem:[#allocation167_spill] sm:$0xff]  ;;  %v2545_v11 = vsel %vm2528_vm6, %v2508_v49, %v16819_v2  ;;  %8282 = vmatprep.mubr.msk.f32.mxu1 %vm3919_vm9, %v2617_v1  ;;  %v16820_v59 = vld [vmem:[#allocation109_spill] sm:$0xff]  ;;  %v16821_v15 = vld [vmem:[#allocation110_spill] sm:$0xff] }
 0x2aa   : > { %v2546_v44 = vsel %vm2528_vm6, %v2509_v29, %v16818_v38  ;;  %v2477_v12 = vsel %vm2454_vm4, %v11957_v40, %v16820_v59  ;;  %v12354_v27 = vsel %vm2454_vm4, %v11965_v41, %v16821_v15  ;;  %v16822_v34 = vld [vmem:[#allocation201_spill] sm:$0xff]  ;;  %v16823_v42 = vld [vmem:[#allocation202_spill] sm:$0xff]  ;;  %v2268_v60 = vpop.permute.xlu0 %2267  ;;  %v16824_v50 = vld [vmem:[#allocation136_spill] sm:$0xff]  ;;  %8464 = vmatpush1.bf16.msra.mxu1 %v8463_v13  ;;  %v8466_v41 = vpack.c.bf16 %v290_v45, %v289_v39 }
 0x2ab   : > { %v2583_v62 = vsel %vm2565_vm7, %v2546_v44, %v16822_v34  ;;  %v2582_v19 = vsel %vm2565_vm7, %v2545_v11, %v16823_v42  ;;  %8283 = vmatmul.mubr.msk.f32.gmra.mrb[10].mxu1 %vm3919_vm9, %v2618_v9  ;;  %v2511_v61 = vsel %vm2491_vm5, %v2474_v23, %v16824_v50  ;;  %v16825_v47 = vld [vmem:[#allocation137_spill] sm:$0xff]  ;;  %8859 = vrot.lane.b32.xlu1 %v11995_v22, %s10059_s8  ;;  %v291_v37 = vld [vmem:[%s16358_s3 + $0x70] sm:$0xff]  ;;  %v16826_v36 = vld [vmem:[#allocation111_spill] sm:$0xff] }
 0x2ac   : > { %v2620_v40 = vsel %vm2602_vm8, %v2583_v62, %v2270_v35  ;;  %v2619_v52 = vsel %vm2602_vm8, %v2582_v19, %v2268_v60  ;;  %v2510_v16 = vsel %vm2491_vm5, %v2473_v32, %v16825_v47  ;;  %8854 = vrot.lane.b32.xlu0 %v11934_v5, %s10059_s8  ;;  %v292_v23 = vld [vmem:[%s16358_s3 + $0x78] sm:$0xff]  ;;  %v12380_v6 = vsel %vm2454_vm4, %v11970_v31, %v16826_v36  ;;  %v16828_v22 = vld [vmem:[#allocation170_spill] sm:$0xff]  ;;  %v16829_v5 = vld [vmem:[#allocation112_spill] sm:$0xff]  ;;  %v2274_v4 = vpop.permute.xlu1 %2273 }
 0x2ad   : > { %v16827_v32 = vld [vmem:[#allocation169_spill] sm:$0xff]  ;;  %v2547_v26 = vsel %vm2528_vm6, %v2510_v16, %v16828_v22  ;;  %8285 = vmatprep.mubr.msk.f32.mxu1 %vm3919_vm9, %v2619_v52  ;;  %8465 = vmatprep.subr.bf16.mxu1 %v16783_v43  ;;  %v12391_v51 = vsel %vm2454_vm4, %v11981_v54, %v16829_v5  ;;  %v16830_v46 = vld [vmem:[#allocation138_spill] sm:$0xff]  ;;  %v16831_v31 = vld [vmem:[#allocation203_spill] sm:$0xff]  ;;  %v8469_v17 = vpack.c.bf16 %v292_v23, %v291_v37 }
 0x2ae   : > { %v2548_v24 = vsel %vm2528_vm6, %v2511_v61, %v16827_v32  ;;  %v2513_v29 = vsel %vm2491_vm5, %v2476_v3, %v16830_v46  ;;  %v16832_v1 = vld [vmem:[#allocation204_spill] sm:$0xff]  ;;  %v2272_v49 = vpop.permute.xlu0 %2271  ;;  %v309_v39 = vld [vmem:[%s16358_s3 + $0x100] sm:$0xff]  ;;  %v310_v54 = vld [vmem:[%s16358_s3 + $0x108] sm:$0xff]  ;;  %8467 = vmatpush1.bf16.msra.mxu1 %v8466_v41 }
 0x2af   : > { %v2585_v9 = vsel %vm2565_vm7, %v2548_v24, %v16831_v31  ;;  %v2584_v13 = vsel %vm2565_vm7, %v2547_v26, %v16832_v1  ;;  %8286 = vmatmul.mubr.msk.f32.gmra.mrb[12].mxu1 %vm3919_vm9, %v2620_v40  ;;  %v8495_v38 = vpack.c.bf16 %v310_v54, %v309_v39  ;;  %v16833_v44 = vld [vmem:[#allocation139_spill] sm:$0xff]  ;;  %8869 = vrot.lane.b32.xlu1 %v12037_v20, %s10059_s8  ;;  %v293_v11 = vld [vmem:[%s16358_s3 + $0x80] sm:$0xff]  ;;  %v16834_v15 = vld [vmem:[#allocation140_spill] sm:$0xff] }
 0x2b0   : > { %v2622_v3 = vsel %vm2602_vm8, %v2585_v9, %v2274_v4  ;;  %v2621_v45 = vsel %vm2602_vm8, %v2584_v13, %v2272_v49  ;;  %v2512_v2 = vsel %vm2491_vm5, %v2475_v63, %v16833_v44  ;;  %8864 = vrot.lane.b32.xlu0 %v11993_v28, %s10059_s8  ;;  %v294_v59 = vld [vmem:[%s16358_s3 + $0x88] sm:$0xff]  ;;  %v2515_v34 = vsel %vm2491_vm5, %v2478_v21, %v16834_v15  ;;  %v16836_v42 = vld [vmem:[#allocation172_spill] sm:$0xff]  ;;  %v16837_v28 = vld [vmem:[#allocation141_spill] sm:$0xff]  ;;  %v2278_v21 = vpop.permute.xlu1 %2277 }
 0x2b1   : > { %v16835_v62 = vld [vmem:[#allocation171_spill] sm:$0xff]  ;;  %v2549_v20 = vsel %vm2528_vm6, %v2512_v2, %v16836_v42  ;;  %8288 = vmatprep.mubr.msk.f32.mxu1 %vm3919_vm9, %v2621_v45  ;;  %8468 = vmatprep.subr.bf16.mxu1 %v16783_v43  ;;  %v2514_v19 = vsel %vm2491_vm5, %v2477_v12, %v16837_v28  ;;  %v8472_v52 = vpack.c.bf16 %v294_v59, %v293_v11  ;;  %v295_v12 = vld [vmem:[%s16358_s3 + $0x90] sm:$0xff]  ;;  %v296_v41 = vld [vmem:[%s16358_s3 + $0x98] sm:$0xff] }
 0x2b2   : > { %v2550_v63 = vsel %vm2528_vm6, %v2513_v29, %v16835_v62  ;;  %v2586_v60 = vsel %vm2565_vm7, %v2549_v20, %v11475_v8  ;;  %v2276_v50 = vpop.permute.xlu0 %2275  ;;  %8496 = vmatprep.subr.bf16.mxu0 %v8495_v38  ;;  %8470 = vmatpush1.bf16.msra.mxu1 %v8469_v17  ;;  %v312_v8 = vld [vmem:[%s16358_s3 + $0x118] sm:$0xff]  ;;  %v16840_v36 = vld [vmem:[#allocation174_spill] sm:$0xff]  ;;  %v16844_v39 = vld [vmem:[#allocation143_spill] sm:$0xff] }
 0x2b3   : > { %v2587_v35 = vsel %vm2565_vm7, %v2550_v63, %v11473_v57  ;;  %8289 = vmatmul.mubr.msk.f32.gmra.mrb[14].mxu1 %vm3919_vm9, %v2622_v3  ;;  %v2623_v40 = vsel %vm2602_vm8, %v2586_v60, %v2276_v50  ;;  %8498 = vmatpush3.bf16.msra.mxu0 %v8495_v38  ;;  %v311_v57 = vld [vmem:[%s16358_s3 + $0x110] sm:$0xff]  ;;  %v16838_v16 = vld [vmem:[#allocation113_spill] sm:$0xff]  ;;  %v2825_v32 = vld [vmem:[%s11352_s27 + $0x25] sm:$0xff]  ;;  %v2516_v54 = vsel %vm2491_vm5, %v12380_v6, %v16844_v39 }
 0x2b4   : > { %v2624_v61 = vsel %vm2602_vm8, %v2587_v35, %v2278_v21  ;;  %8879 = vrot.lane.b32.xlu1 %v12087_v25, %s10059_s8  ;;  %8874 = vrot.lane.b32.xlu0 %v12035_v10, %s10059_s8  ;;  %v8499_v47 = vpack.c.bf16 %v312_v8, %v311_v57  ;;  %v2481_v37 = vsel %vm2454_vm4, %v12001_v55, %v16838_v16  ;;  %v16839_v23 = vld [vmem:[#allocation173_spill] sm:$0xff]  ;;  %v16841_v24 = vld [vmem:[#allocation142_spill] sm:$0xff]  ;;  %v2282_v29 = vpop.permute.xlu1 %2281  ;;  %v298_v45 = vld [vmem:[%s16358_s3 + $0xa8] sm:$0xff] }
 0x2b5   : > { %v2552_v25 = vsel %vm2528_vm6, %v2515_v34, %v16839_v23  ;;  %v2551_v10 = vsel %vm2528_vm6, %v2514_v19, %v16840_v36  ;;  %8291 = vmatprep.mubr.msk.f32.mxu1 %vm3919_vm9, %v2623_v40  ;;  %8471 = vmatprep.subr.bf16.mxu1 %v16783_v43  ;;  %v2517_v22 = vsel %vm2491_vm5, %v12354_v27, %v16841_v24  ;;  %v16842_v26 = vld [vmem:[#allocation205_spill] sm:$0xff]  ;;  %v16843_v55 = vld [vmem:[#allocation206_spill] sm:$0xff]  ;;  %v2862_v17 = vld [vmem:[%s11352_s27 + $0x2e] sm:$0xff] }
 0x2b6   : > { %v2589_v5 = vsel %vm2565_vm7, %v2552_v25, %v16842_v26  ;;  %v2588_v46 = vsel %vm2565_vm7, %v2551_v10, %v16843_v55  ;;  %v2280_v31 = vpop.permute.xlu0 %2279  ;;  %8500 = vmatprep.subr.bf16.mxu0 %v8499_v47  ;;  %v2788_v13 = vld [vmem:[%s11352_s27 + $0x24] sm:$0xff]  ;;  %8473 = vmatpush1.bf16.msra.mxu1 %v8472_v52  ;;  %v8475_v27 = vpack.c.bf16 %v296_v41, %v295_v12  ;;  %v16847_v11 = vld [vmem:[#allocation176_spill] sm:$0xff]  ;;  %v16851_v60 = vld [vmem:[#allocation145_spill] sm:$0xff] }
 0x2b7   : > { %8292 = vmatmul.mubr.msk.f32.gmra.mrb[16].mxu1 %vm3919_vm9, %v2624_v61  ;;  %v2626_v9 = vsel %vm2602_vm8, %v2589_v5, %v2282_v29  ;;  %v2625_v1 = vsel %vm2602_vm8, %v2588_v46, %v2280_v31  ;;  %v297_v4 = vld [vmem:[%s16358_s3 + $0xa0] sm:$0xff]  ;;  %8502 = vmatpush3.bf16.msra.mxu0 %v8499_v47  ;;  %v8898_v3 = vpack.i.bf16 %v2825_v32, %v12162_v18  ;;  %v16846_v2 = vld [vmem:[#allocation175_spill] sm:$0xff]  ;;  %v2786_v59 = vld [vmem:[%s11352_s27 + $0x14] sm:$0xff] }
 0x2b8   : > { %v2861_v49 = vld [vmem:[%s11352_s27 + $0x26] sm:$0xff]  ;;  %8889 = vrot.lane.b32.xlu1 %v12137_v7, %s10059_s8  ;;  %8884 = vrot.lane.b32.xlu0 %v12085_v33, %s10059_s8  ;;  %v2554_v6 = vsel %vm2528_vm6, %v2517_v22, %v16846_v2  ;;  %v2553_v7 = vsel %vm2528_vm6, %v2516_v54, %v16847_v11  ;;  %v2787_v18 = vld [vmem:[%s11352_s27 + $0x1c] sm:$0xff]  ;;  %v16848_v15 = vld [vmem:[#allocation144_spill] sm:$0xff]  ;;  %v2286_v20 = vpop.permute.xlu1 %2285  ;;  %v2518_v21 = vsel %vm2491_vm5, %v2481_v37, %v16851_v60 }
 0x2b9   : > { %v16845_v38 = vld [vmem:[#allocation114_spill] sm:$0xff]  ;;  %8294 = vmatprep.mubr.msk.f32.mxu1 %vm3919_vm9, %v2625_v1  ;;  %v2789_v33 = vld [vmem:[%s11352_s27 + $0x2c] sm:$0xff]  ;;  %8474 = vmatprep.subr.bf16.mxu1 %v16783_v43  ;;  %v2519_v34 = vsel %vm2491_vm5, %v12391_v51, %v16848_v15  ;;  %v8478_v51 = vpack.c.bf16 %v298_v45, %v297_v4  ;;  %v8903_v61 = vpack.i.bf16 %v2787_v18, %v2786_v59  ;;  %v300_v52 = vld [vmem:[%s16358_s3 + $0xb8] sm:$0xff] }
 0x2ba   : > { %v2484_v44 = vsel %vm2454_vm4, %v12006_v56, %v16845_v38  ;;  %v16849_v62 = vld [vmem:[#allocation3_spill] sm:$0xff]  ;;  %v16850_v63 = vld [vmem:[#allocation4_spill] sm:$0xff]  ;;  %v2284_v28 = vpop.permute.xlu0 %2283  ;;  %8323 = vmatprep.mubr.msk.f32.mxu0 %vm2602_vm8, %v2861_v49  ;;  %8476 = vmatpush1.bf16.msra.mxu1 %v8475_v27  ;;  %v8908_v50 = vpack.i.bf16 %v2789_v33, %v2788_v13  ;;  %v16853_v12 = vld [vmem:[#allocation177_spill] sm:$0xff] }
 0x2bb   : > { %v2591_v56 = vsel %vm2565_vm7, %v2554_v6, %v16849_v62  ;;  %v2590_v42 = vsel %vm2565_vm7, %v2553_v7, %v16850_v63  ;;  %8295 = vmatmul.mubr.msk.f32.gmra.mrb[18].mxu1 %vm3919_vm9, %v2626_v9  ;;  %8324 = vmatmul.mubr.msk.f32.vlgmr.msra.gmra.mrb[4].mxu0 %vm2602_vm8, %v2862_v17  ;;  %v299_v40 = vld [vmem:[%s16358_s3 + $0xb0] sm:$0xff]  ;;  %v16852_v57 = vld [vmem:[#allocation115_spill] sm:$0xff]  ;;  %v2556_v41 = vsel %vm2528_vm6, %v2519_v34, %v16853_v12  ;;  %v16854_v47 = vld [vmem:[#allocation178_spill] sm:$0xff] }
 0x2bc   : > { %v2628_v19 = vsel %vm2602_vm8, %v2591_v56, %v2286_v20  ;;  %v2627_v35 = vsel %vm2602_vm8, %v2590_v42, %v2284_v28  ;;  %8899 = vrot.lane.b32.xlu1 %v8898_v3, %s10059_s8  ;;  %8894 = vrot.lane.b32.xlu0 %v12135_v0, %s10059_s8  ;;  %v2483_v8 = vsel %vm2454_vm4, %v12043_v14, %v16852_v57  ;;  %v2826_v16 = vld [vmem:[%s11352_s27 + $0x2d] sm:$0xff]  ;;  %v2827_v37 = vld [vmem:[%s11352_s27 + $0x35] sm:$0xff]  ;;  %v16857_v10 = vld [vmem:[#allocation6_spill] sm:$0xff]  ;;  %v2290_v24 = vpop.permute.xlu1 %2289 }
 0x2bd   : > { %v2555_v0 = vsel %vm2528_vm6, %v2518_v21, %v16854_v47  ;;  %8297 = vmatprep.mubr.msk.f32.mxu1 %vm3919_vm9, %v2627_v35  ;;  %8477 = vmatprep.subr.bf16.mxu1 %v16783_v43  ;;  %v16855_v23 = vld [vmem:[#allocation116_spill] sm:$0xff]  ;;  %v16856_v36 = vld [vmem:[#allocation5_spill] sm:$0xff]  ;;  %v16858_v26 = vld [vmem:[#allocation146_spill] sm:$0xff]  ;;  %v8481_v29 = vpack.c.bf16 %v300_v52, %v299_v40  ;;  %v8913_v27 = vpack.i.bf16 %v2827_v37, %v2826_v16 }
 0x2be   : > { %v2486_v25 = vsel %vm2454_vm4, %v12048_v53, %v16855_v23  ;;  %v2593_v14 = vsel %vm2565_vm7, %v2556_v41, %v16856_v36  ;;  %v2592_v32 = vsel %vm2565_vm7, %v2555_v0, %v16857_v10  ;;  %v2288_v22 = vpop.permute.xlu0 %2287  ;;  %8503 = vmatprep.subr.bf16.mxu0 %v16783_v43  ;;  %v2521_v5 = vsel %vm2491_vm5, %v2484_v44, %v16858_v26  ;;  %v2828_v46 = vld [vmem:[%s11352_s27 + $0x3d] sm:$0xff]  ;;  %v16859_v1 = vld [vmem:[#allocation147_spill] sm:$0xff]  ;;  %v16862_v17 = vld [vmem:[#allocation180_spill] sm:$0xff] }
 0x2bf   : > { %8298 = vmatmul.mubr.msk.f32.gmra.mrb[20].mxu1 %vm3919_vm9, %v2628_v19  ;;  %v2630_v55 = vsel %vm2602_vm8, %v2593_v14, %v2290_v24  ;;  %v2629_v53 = vsel %vm2602_vm8, %v2592_v32, %v2288_v22  ;;  %v301_v31 = vld [vmem:[%s16358_s3 + $0xc0] sm:$0xff]  ;;  %v2863_v9 = vld [vmem:[%s11352_s27 + $0x36] sm:$0xff]  ;;  %v2520_v13 = vsel %vm2491_vm5, %v2483_v8, %v16859_v1  ;;  %v302_v4 = vld [vmem:[%s16358_s3 + $0xc8] sm:$0xff] }
 0x2c0   : > { %8479 = vmatpush1.bf16.msra.mxu1 %v8478_v51  ;;  %8909 = vrot.lane.b32.xlu1 %v8908_v50, %s10058_s23  ;;  %v2864_v49 = vld [vmem:[%s11352_s27 + $0x3e] sm:$0xff]  ;;  %v16861_v3 = vld [vmem:[#allocation179_spill] sm:$0xff]  ;;  %v2557_v38 = vsel %vm2528_vm6, %v2520_v13, %v16862_v17  ;;  %v2790_v2 = vld [vmem:[%s11352_s27 + $0x34] sm:$0xff]  ;;  %v2294_v15 = vpop.permute.xlu1 %2293  ;;  %v8484_v63 = vpack.c.bf16 %v302_v4, %v301_v31 }
 0x2c1   : > { %8904 = vrot.lane.b32.xlu0 %v8903_v61, %s10056_s20  ;;  %v16860_v39 = vld [vmem:[#allocation117_spill] sm:$0xff]  ;;  %v2558_v45 = vsel %vm2528_vm6, %v2521_v5, %v16861_v3  ;;  %8300 = vmatprep.mubr.msk.f32.mxu1 %vm3919_vm9, %v2629_v53  ;;  %v2829_v44 = vld [vmem:[%s11352_s27 + $0x45] sm:$0xff]  ;;  %v16863_v11 = vld [vmem:[#allocation148_spill] sm:$0xff] }
 0x2c2   : > { %v2485_v54 = vsel %vm2454_vm4, %v12061_v30, %v16860_v39  ;;  %v2791_v6 = vld [vmem:[%s11352_s27 + $0x3c] sm:$0xff]  ;;  %8480 = vmatprep.subr.bf16.mxu1 %v16783_v43  ;;  %v2523_v7 = vsel %vm2491_vm5, %v2486_v25, %v16863_v11  ;;  %v16864_v33 = vld [vmem:[#allocation7_spill] sm:$0xff]  ;;  %v16865_v30 = vld [vmem:[#allocation8_spill] sm:$0xff]  ;;  %v2292_v34 = vpop.permute.xlu0 %2291  ;;  %8326 = vmatprep.mubr.msk.f32.mxu0 %vm2602_vm8, %v2863_v9  ;;  %v8928_v28 = vpack.i.bf16 %v2829_v44, %v2828_v46 }
 0x2c3   : > { %v2595_v59 = vsel %vm2565_vm7, %v2558_v45, %v16864_v33  ;;  %v2594_v18 = vsel %vm2565_vm7, %v2557_v38, %v16865_v30  ;;  %8301 = vmatmul.mubr.msk.f32.gmra.mrb[22].mxu1 %vm3919_vm9, %v2630_v55  ;;  %8327 = vmatmul.mubr.msk.f32.gmra.mrb[6].mxu0 %vm2602_vm8, %v2864_v49  ;;  %v16866_v42 = vld [vmem:[#allocation149_spill] sm:$0xff]  ;;  %v8923_v19 = vpack.i.bf16 %v2791_v6, %v2790_v2  ;;  %v303_v35 = vld [vmem:[%s16358_s3 + $0xd0] sm:$0xff]  ;;  %v16867_v60 = vld [vmem:[#allocation118_spill] sm:$0xff] }
 0x2c4   : > { %v2632_v62 = vsel %vm2602_vm8, %v2595_v59, %v2294_v15  ;;  %v2631_v56 = vsel %vm2602_vm8, %v2594_v18, %v2292_v34  ;;  %8482 = vmatpush1.bf16.msra.mxu1 %v8481_v29  ;;  %v2522_v20 = vsel %vm2491_vm5, %v2485_v54, %v16866_v42  ;;  %8919 = vrot.lane.b32.xlu1 %v8908_v50, %s10056_s20  ;;  %v304_v51 = vld [vmem:[%s16358_s3 + $0xd8] sm:$0xff]  ;;  %v16869_v50 = vld [vmem:[#allocation182_spill] sm:$0xff]  ;;  %v2793_v8 = vld [vmem:[%s11352_s27 + $0x4c] sm:$0xff]  ;;  %v2298_v36 = vpop.permute.xlu1 %2297 }
 0x2c5   : > { %8914 = vrot.lane.b32.xlu0 %v8913_v27, %s10059_s8  ;;  %v2488_v21 = vsel %vm2454_vm4, %v12098_v58, %v16867_v60  ;;  %v16868_v61 = vld [vmem:[#allocation181_spill] sm:$0xff]  ;;  %v2559_v52 = vsel %vm2528_vm6, %v2522_v20, %v16869_v50  ;;  %8303 = vmatprep.mubr.msk.f32.mxu1 %vm3919_vm9, %v2631_v56  ;;  %v2792_v57 = vld [vmem:[%s11352_s27 + $0x44] sm:$0xff]  ;;  %v16871_v47 = vld [vmem:[#allocation120_spill] sm:$0xff]  ;;  %v8487_v22 = vpack.c.bf16 %v304_v51, %v303_v35 }
 0x2c6   : > { %v2560_v40 = vsel %vm2528_vm6, %v2523_v7, %v16868_v61  ;;  %8483 = vmatprep.subr.bf16.mxu1 %v16783_v43  ;;  %v16870_v12 = vld [vmem:[#allocation119_spill] sm:$0xff]  ;;  %v16873_v16 = vld [vmem:[#allocation9_spill] sm:$0xff]  ;;  %v16874_v23 = vld [vmem:[#allocation10_spill] sm:$0xff]  ;;  %v2296_v14 = vpop.permute.xlu0 %2295  ;;  %v8938_v46 = vpack.i.bf16 %v2793_v8, %v2792_v57 }
 0x2c7   : > { %v2487_v41 = vsel %vm2454_vm4, %v12103_v48, %v16870_v12  ;;  %v16872_v0 = vld [vmem:[#allocation15_spill] sm:$0xff]  ;;  %v2597_v37 = vsel %vm2565_vm7, %v2560_v40, %v16873_v16  ;;  %v2596_v25 = vsel %vm2565_vm7, %v2559_v52, %v16874_v23  ;;  %8304 = vmatmul.mubr.msk.f32.gmra.mrb[24].mxu1 %vm3919_vm9, %v2632_v62  ;;  %v16875_v10 = vld [vmem:[#allocation150_spill] sm:$0xff]  ;;  %v16877_v9 = vld [vmem:[#allocation121_spill] sm:$0xff] }
 0x2c8   : > { %v2490_v58 = vsel %vm2454_vm4, %v16872_v0, %v16871_v47  ;;  %v2525_v32 = vsel %vm2491_vm5, %v2488_v21, %v16875_v10  ;;  %v2634_v48 = vsel %vm2602_vm8, %v2597_v37, %v2298_v36  ;;  %v2633_v24 = vsel %vm2602_vm8, %v2596_v25, %v2296_v14  ;;  %8485 = vmatpush1.bf16.msra.mxu1 %v8484_v63  ;;  %v305_v26 = vld [vmem:[%s16358_s3 + $0xe0] sm:$0xff]  ;;  %v16876_v55 = vld [vmem:[#allocation151_spill] sm:$0xff]  ;;  %v16878_v1 = vld [vmem:[#allocation16_spill] sm:$0xff]  ;;  %v2302_v11 = vpop.permute.xlu1 %2301 }
 0x2c9   : > { %v2865_v5 = vld [vmem:[%s11352_s27 + $0x46] sm:$0xff]  ;;  %v2524_v53 = vsel %vm2491_vm5, %v2487_v41, %v16876_v55  ;;  %8929 = vrot.lane.b32.xlu1 %v8928_v28, %s10059_s8  ;;  %8924 = vrot.lane.b32.xlu0 %v8923_v19, %s10058_s23  ;;  %v2866_v31 = vld [vmem:[%s11352_s27 + $0x4e] sm:$0xff]  ;;  %v2489_v13 = vsel %vm2454_vm4, %v16878_v1, %v16877_v9  ;;  %v16884_v15 = vld [vmem:[#allocation153_spill] sm:$0xff] }
 0x2ca   : > { %v306_v29 = vld [vmem:[%s16358_s3 + $0xe8] sm:$0xff]  ;;  %v16880_v49 = vld [vmem:[#allocation184_spill] sm:$0xff]  ;;  %8306 = vmatprep.mubr.msk.f32.mxu1 %vm3919_vm9, %v2633_v24  ;;  %8486 = vmatprep.subr.bf16.mxu1 %v16783_v43  ;;  %v2300_v7 = vpop.permute.xlu0 %2299  ;;  %v2832_v30 = vld [vmem:[%s11352_s27 + $0x5d] sm:$0xff]  ;;  %v2526_v34 = vsel %vm2491_vm5, %v2489_v13, %v16884_v15 }
 0x2cb   : > { %v16879_v27 = vld [vmem:[#allocation183_spill] sm:$0xff]  ;;  %v2561_v39 = vsel %vm2528_vm6, %v2524_v53, %v16880_v49  ;;  %v2831_v3 = vld [vmem:[%s11352_s27 + $0x55] sm:$0xff]  ;;  %8307 = vmatmul.mubr.msk.f32.gmra.mrb[26].mxu1 %vm3919_vm9, %v2634_v48  ;;  %8329 = vmatprep.mubr.msk.f32.mxu0 %vm2602_vm8, %v2865_v5  ;;  %v8490_v18 = vpack.c.bf16 %v306_v29, %v305_v26  ;;  %v16886_v28 = vld [vmem:[#allocation186_spill] sm:$0xff] }
 0x2cc   : > { %v2562_v4 = vsel %vm2528_vm6, %v2525_v32, %v16879_v27  ;;  %v2830_v54 = vld [vmem:[%s11352_s27 + $0x4d] sm:$0xff]  ;;  %8488 = vmatpush1.bf16.msra.mxu1 %v8487_v22  ;;  %8330 = vmatmul.mubr.msk.f32.gmra.mrb[8].mxu0 %vm2602_vm8, %v2866_v31  ;;  %v308_v63 = vld [vmem:[%s16358_s3 + $0xf8] sm:$0xff]  ;;  %v2563_v35 = vsel %vm2528_vm6, %v2526_v34, %v16886_v28  ;;  %v2833_v51 = vld [vmem:[%s11352_s27 + $0x65] sm:$0xff]  ;;  %v2306_v52 = vpop.permute.xlu1 %2305 }
 0x2cd   : > { %v16881_v45 = vld [vmem:[#allocation152_spill] sm:$0xff]  ;;  %v16882_v38 = vld [vmem:[#allocation11_spill] sm:$0xff]  ;;  %8939 = vrot.lane.b32.xlu1 %v8938_v46, %s10058_s23  ;;  %8934 = vrot.lane.b32.xlu0 %v8923_v19, %s10056_s20  ;;  %v8943_v62 = vpack.i.bf16 %v2831_v3, %v2830_v54  ;;  %v16885_v42 = vld [vmem:[#allocation185_spill] sm:$0xff]  ;;  %v8958_v0 = vpack.i.bf16 %v2833_v51, %v2832_v30 }
 0x2ce   : > { %v2527_v17 = vsel %vm2491_vm5, %v2490_v58, %v16881_v45  ;;  %v2599_v44 = vsel %vm2565_vm7, %v2562_v4, %v16882_v38  ;;  %v16883_v2 = vld [vmem:[#allocation12_spill] sm:$0xff]  ;;  %v2795_v60 = vld [vmem:[%s11352_s27 + $0x5c] sm:$0xff]  ;;  %8489 = vmatprep.subr.bf16.mxu1 %v16783_v43  ;;  %v2304_v57 = vpop.permute.xlu0 %2303  ;;  %v2796_v37 = vld [vmem:[%s11352_s27 + $0x64] sm:$0xff] }
 0x2cf   : > { %v2598_v6 = vsel %vm2565_vm7, %v2561_v39, %v16883_v2  ;;  %v2636_v33 = vsel %vm2602_vm8, %v2599_v44, %v2302_v11  ;;  %v307_v56 = vld [vmem:[%s16358_s3 + $0xf0] sm:$0xff]  ;;  %v2564_v20 = vsel %vm2528_vm6, %v2527_v17, %v16885_v42  ;;  %v16887_v21 = vld [vmem:[#allocation13_spill] sm:$0xff]  ;;  %v16888_v40 = vld [vmem:[#allocation14_spill] sm:$0xff] }
 0x2d0   : > { %v2635_v59 = vsel %vm2602_vm8, %v2598_v6, %v2300_v7  ;;  %v2794_v19 = vld [vmem:[%s11352_s27 + $0x54] sm:$0xff]  ;;  %v2601_v61 = vsel %vm2565_vm7, %v2564_v20, %v16887_v21  ;;  %v2600_v50 = vsel %vm2565_vm7, %v2563_v35, %v16888_v40  ;;  %8491 = vmatpush1.bf16.msra.mxu1 %v8490_v18  ;;  %v8493_v41 = vpack.c.bf16 %v308_v63, %v307_v56  ;;  %v2868_v16 = vld [vmem:[%s11352_s27 + $0x5e] sm:$0xff]  ;;  %v2797_v23 = vld [vmem:[%s11352_s27 + $0x6c] sm:$0xff]  ;;  %v12691_v25 = vpop.permute.xlu1 %8669 }
 0x2d1   : > { %8309 = vmatprep.mubr.msk.f32.mxu1 %vm3919_vm9, %v2635_v59  ;;  %v2638_v8 = vsel %vm2602_vm8, %v2601_v61, %v2306_v52  ;;  %v2637_v12 = vsel %vm2602_vm8, %v2600_v50, %v2304_v57  ;;  %v2867_v47 = vld [vmem:[%s11352_s27 + $0x56] sm:$0xff]  ;;  %8949 = vrot.lane.b32.xlu1 %v8938_v46, %s10056_s20  ;;  %v8953_v58 = vpack.i.bf16 %v2795_v60, %v2794_v19  ;;  %v2834_v10 = vld [vmem:[%s11352_s27 + $0x6d] sm:$0xff]  ;;  %v2837_v53 = vld [vmem:[%s11352_s27 + $0x85] sm:$0xff] }
 0x2d2   : > { %8310 = vmatmul.mubr.msk.f32.gmra.mrb[28].mxu1 %vm3919_vm9, %v2636_v33  ;;  %8944 = vrot.lane.b32.xlu0 %v8943_v62, %s10059_s8  ;;  %v12693_v36 = vpop.permute.xlu0 %8664  ;;  %v8968_v14 = vpack.i.bf16 %v2797_v23, %v2796_v37  ;;  %v2835_v32 = vld [vmem:[%s11352_s27 + $0x75] sm:$0xff]  ;;  %v2869_v22 = vld [vmem:[%s11352_s27 + $0x66] sm:$0xff]  ;;  %v2836_v55 = vld [vmem:[%s11352_s27 + $0x7d] sm:$0xff] }
 0x2d3   : > { %8312 = vmatprep.mubr.msk.f32.mxu1 %vm3919_vm9, %v2637_v12  ;;  %8492 = vmatprep.subr.bf16.mxu1 %v16783_v43  ;;  %v2870_v26 = vld [vmem:[%s11352_s27 + $0x6e] sm:$0xff]  ;;  %v8973_v5 = vpack.i.bf16 %v2835_v32, %v2834_v10  ;;  %v2799_v29 = vld [vmem:[%s11352_s27 + $0x7c] sm:$0xff]  ;;  %v8988_v1 = vpack.i.bf16 %v2837_v53, %v2836_v55  ;;  %v2800_v27 = vld [vmem:[%s11352_s27 + $0x84] sm:$0xff] }
 0x2d4   : > { %8332 = vmatprep.mubr.msk.f32.mxu0 %vm2602_vm8, %v2867_v47  ;;  %8494 = vmatpush1.bf16.msra.mxu1 %v8493_v41  ;;  %v12701_v48 = vpop.permute.xlu1 %8679  ;;  %v2798_v46 = vld [vmem:[%s11352_s27 + $0x74] sm:$0xff]  ;;  %v2801_v4 = vld [vmem:[%s11352_s27 + $0x8c] sm:$0xff]  ;;  %v2872_v45 = vld [vmem:[%s11352_s27 + $0x7e] sm:$0xff] }
 0x2d5   : > { %8333 = vmatmul.mubr.msk.f32.gmra.mrb[10].mxu0 %vm2602_vm8, %v2868_v16  ;;  %8959 = vrot.lane.b32.xlu1 %v8958_v0, %s10059_s8  ;;  %v8983_v13 = vpack.i.bf16 %v2799_v29, %v2798_v46  ;;  %v2871_v54 = vld [vmem:[%s11352_s27 + $0x76] sm:$0xff]  ;;  %v8998_v3 = vpack.i.bf16 %v2801_v4, %v2800_v27  ;;  %v2838_v17 = vld [vmem:[%s11352_s27 + $0x8d] sm:$0xff]  ;;  %v2841_v7 = vld [vmem:[%s11352_s27 + $0xa5] sm:$0xff] }
 0x2d6   : > { %8313 = vmatmul.mubr.msk.f32.gmra.mrb[30].mxu1 %vm3919_vm9, %v2638_v8  ;;  %8954 = vrot.lane.b32.xlu0 %v8953_v58, %s10058_s23  ;;  %v12703_v24 = vpop.permute.xlu0 %8674  ;;  %v2839_v38 = vld [vmem:[%s11352_s27 + $0x95] sm:$0xff]  ;;  %v2840_v11 = vld [vmem:[%s11352_s27 + $0x9d] sm:$0xff]  ;;  %v2873_v15 = vld [vmem:[%s11352_s27 + $0x86] sm:$0xff] }
 0x2d7   : > { %8335 = vmatprep.mubr.msk.f32.mxu0 %vm2602_vm8, %v2869_v22  ;;  %v9003_v6 = vpack.i.bf16 %v2839_v38, %v2838_v17  ;;  %v2802_v33 = vld [vmem:[%s11352_s27 + $0x94] sm:$0xff]  ;;  %v2803_v59 = vld [vmem:[%s11352_s27 + $0x9c] sm:$0xff]  ;;  %v9018_v34 = vpack.i.bf16 %v2841_v7, %v2840_v11  ;;  %v2804_v63 = vld [vmem:[%s11352_s27 + $0xa4] sm:$0xff] }
 0x2d8   : > { %v12714_v31 = vpop.permute.xlu1 %8689  ;;  %v9013_v62 = vpack.i.bf16 %v2803_v59, %v2802_v33  ;;  %v2874_v56 = vld [vmem:[%s11352_s27 + $0x8e] sm:$0xff]  ;;  %v2875_v61 = vld [vmem:[%s11352_s27 + $0x96] sm:$0xff]  ;;  %v2876_v52 = vld [vmem:[%s11352_s27 + $0x9e] sm:$0xff] }
 0x2d9   : > { %8969 = vrot.lane.b32.xlu1 %v8968_v14, %s10058_s23  ;;  %8336 = vmatmul.mubr.msk.f32.gmra.mrb[12].mxu0 %vm2602_vm8, %v2870_v26  ;;  %v2805_v42 = vld [vmem:[%s11352_s27 + $0xac] sm:$0xff]  ;;  %v2843_v19 = vld [vmem:[%s11352_s27 + $0xb5] sm:$0xff]  ;;  %v2844_v50 = vld [vmem:[%s11352_s27 + $0xbd] sm:$0xff] }
 0x2da   : > { %8964 = vrot.lane.b32.xlu0 %v8953_v58, %s10056_s20  ;;  %v12716_v9 = vpop.permute.xlu0 %8684  ;;  %8338 = vmatprep.mubr.msk.f32.mxu0 %vm2602_vm8, %v2871_v54  ;;  %v9028_v35 = vpack.i.bf16 %v2805_v42, %v2804_v63  ;;  %v2842_v51 = vld [vmem:[%s11352_s27 + $0xad] sm:$0xff]  ;;  %v2845_v57 = vld [vmem:[%s11352_s27 + $0xc5] sm:$0xff]  ;;  %v2807_v12 = vld [vmem:[%s11352_s27 + $0xbc] sm:$0xff] }
 0x2db   : > { %v9033_v40 = vpack.i.bf16 %v2843_v19, %v2842_v51  ;;  %v2806_v8 = vld [vmem:[%s11352_s27 + $0xb4] sm:$0xff]  ;;  %v9048_v0 = vpack.i.bf16 %v2845_v57, %v2844_v50  ;;  %v2808_v16 = vld [vmem:[%s11352_s27 + $0xc4] sm:$0xff]  ;;  %v2809_v37 = vld [vmem:[%s11352_s27 + $0xcc] sm:$0xff] }
 0x2dc   : > { %v12723_v49 = vpop.permute.xlu1 %8699  ;;  %v9043_v58 = vpack.i.bf16 %v2807_v12, %v2806_v8  ;;  %v2877_v10 = vld [vmem:[%s11352_s27 + $0xa6] sm:$0xff]  ;;  %v9058_v32 = vpack.i.bf16 %v2809_v37, %v2808_v16  ;;  %v2878_v22 = vld [vmem:[%s11352_s27 + $0xae] sm:$0xff]  ;;  %v2848_v29 = vld [vmem:[%s11352_s27 + $0xdd] sm:$0xff] }
 0x2dd   : > { %8979 = vrot.lane.b32.xlu1 %v8968_v14, %s10056_s20  ;;  %8339 = vmatmul.mubr.msk.f32.gmra.mrb[14].mxu0 %vm2602_vm8, %v2872_v45  ;;  %v2846_v26 = vld [vmem:[%s11352_s27 + $0xcd] sm:$0xff]  ;;  %v2879_v54 = vld [vmem:[%s11352_s27 + $0xb6] sm:$0xff]  ;;  %v2880_v38 = vld [vmem:[%s11352_s27 + $0xbe] sm:$0xff] }
 0x2de   : > { %8974 = vrot.lane.b32.xlu0 %v8973_v5, %s10059_s8  ;;  %v12725_v39 = vpop.permute.xlu0 %8694  ;;  %8341 = vmatprep.mubr.msk.f32.mxu0 %vm2602_vm8, %v2873_v15  ;;  %v2847_v5 = vld [vmem:[%s11352_s27 + $0xd5] sm:$0xff]  ;;  %v2813_v11 = vld [vmem:[%s11352_s27 + $0xec] sm:$0xff]  ;;  %v2852_v12 = vld [vmem:[%s11352_s27 + $0xfd] sm:$0xff] }
 0x2df   : > { %v9063_v46 = vpack.i.bf16 %v2847_v5, %v2846_v26  ;;  %v2850_v15 = vld [vmem:[%s11352_s27 + $0xed] sm:$0xff]  ;;  %v9960_v42 = vld [vmem:[%s11352_s27 + $0xda] sm:$0xff] }
 0x2e0   : > { %v12734_v44 = vpop.permute.xlu1 %8709  ;;  %v2881_v63 = vld [vmem:[%s11352_s27 + $0xc6] sm:$0xff]  ;;  %v9961_v51 = vld [vmem:[%s11352_s27 + $0xd2] sm:$0xff]  ;;  %v2815_v50 = vld [vmem:[%s11352_s27 + $0xfc] sm:$0xff] }
 0x2e1   : > { %8989 = vrot.lane.b32.xlu1 %v8988_v1, %s10059_s8  ;;  %8342 = vmatmul.mubr.msk.f32.gmra.mrb[16].mxu0 %vm2602_vm8, %v2874_v56  ;;  %v2810_v1 = vld [vmem:[%s11352_s27 + $0xd4] sm:$0xff]  ;;  %v2884_v5 = vld [vmem:[%s11352_s27 + $0xde] sm:$0xff] }
 0x2e2   : > { %8984 = vrot.lane.b32.xlu0 %v8983_v13, %s10058_s23  ;;  %v12736_v2 = vpop.permute.xlu0 %8704  ;;  %8344 = vmatprep.mubr.msk.f32.mxu0 %vm2602_vm8, %v2875_v61  ;;  %v2882_v61 = vld [vmem:[%s11352_s27 + $0xce] sm:$0xff]  ;;  %v2883_v37 = vld [vmem:[%s11352_s27 + $0xd6] sm:$0xff] }
 0x2e4   : > { %v12745_v30 = vpop.permute.xlu1 %8719 }
 0x2e5   : > { %8999 = vrot.lane.b32.xlu1 %v8998_v3, %s10058_s23  ;;  %8345 = vmatmul.mubr.msk.f32.gmra.mrb[18].mxu0 %vm2602_vm8, %v2876_v52 }
 0x2e6   : > { %8994 = vrot.lane.b32.xlu0 %v8983_v13, %s10056_s20  ;;  %v12747_v18 = vpop.permute.xlu0 %8714  ;;  %8347 = vmatprep.mubr.msk.f32.mxu0 %vm2602_vm8, %v2877_v10  ;;  %v2811_v13 = vld [vmem:[%s11352_s27 + $0xdc] sm:$0xff]  ;;  %v9962_v10 = vld [vmem:[%s11352_s27 + $0xea] sm:$0xff] }
 0x2e7   : > { %v9073_v17 = vpack.i.bf16 %v2811_v13, %v2810_v1 }
 0x2e8   : > { %v12756_v20 = vpop.permute.xlu1 %8729 }
 0x2e9   : > { %9009 = vrot.lane.b32.xlu1 %v8998_v3, %s10056_s20  ;;  %8348 = vmatmul.mubr.msk.f32.gmra.mrb[20].mxu0 %vm2602_vm8, %v2878_v22  ;;  %v9959_v3 = vld [vmem:[%s11352_s27 + $0xca] sm:$0xff]  ;;  %v9963_v22 = vld [vmem:[%s11352_s27 + $0xe2] sm:$0xff] }
 0x2ea   : > { %9004 = vrot.lane.b32.xlu0 %v9003_v6, %s10059_s8  ;;  %v12758_v28 = vpop.permute.xlu0 %8724  ;;  %v9078_v45 = vpack.i.bf16 %v9959_v3, %v2848_v29  ;;  %v2812_v6 = vld [vmem:[%s11352_s27 + $0xe4] sm:$0xff]  ;;  %8350 = vmatprep.mubr.msk.f32.mxu0 %vm2602_vm8, %v2879_v54  ;;  %v2817_v29 = vld [vmem:[%s11352_s27 + $0x10c] sm:$0xff] }
 0x2eb   : > { %v9088_v59 = vpack.i.bf16 %v2813_v11, %v2812_v6  ;;  %v2854_v3 = vld [vmem:[%s11352_s27 + $0x10d] sm:$0xff]  ;;  %v9964_v11 = vld [vmem:[%s11352_s27 + $0xfa] sm:$0xff] }
 0x2ec   : > { %v12765_v60 = vpop.permute.xlu1 %8739  ;;  %v2885_v6 = vld [vmem:[%s11352_s27 + $0xe6] sm:$0xff] }
 0x2ed   : > { %9019 = vrot.lane.b32.xlu1 %v9018_v34, %s10059_s8  ;;  %16889 = vst [vmem:[#allocation17_spill] sm:$0xff] %v12765_v60  ;;  %8351 = vmatmul.mubr.msk.f32.gmra.mrb[22].mxu0 %vm2602_vm8, %v2880_v38  ;;  %v2849_v34 = vld [vmem:[%s11352_s27 + $0xe5] sm:$0xff] }
 0x2ee   : > { %9014 = vrot.lane.b32.xlu0 %v9013_v62, %s10058_s23  ;;  %v12767_v21 = vpop.permute.xlu0 %8734  ;;  %v9093_v19 = vpack.i.bf16 %v9961_v51, %v2849_v34  ;;  %8353 = vmatprep.mubr.msk.f32.mxu0 %vm2602_vm8, %v2881_v63  ;;  %v2886_v63 = vld [vmem:[%s11352_s27 + $0xee] sm:$0xff] }
 0x2f0   : > { %v12778_v41 = vpop.permute.xlu1 %8749 }
 0x2f1   : > { %9029 = vrot.lane.b32.xlu1 %v9028_v35, %s10058_s23  ;;  %16890 = vst [vmem:[#allocation18_spill] sm:$0xff] %v12778_v41  ;;  %8354 = vmatmul.mubr.msk.f32.gmra.mrb[24].mxu0 %vm2602_vm8, %v2882_v61 }
 0x2f2   : > { %9024 = vrot.lane.b32.xlu0 %v9013_v62, %s10056_s20  ;;  %v12780_v47 = vpop.permute.xlu0 %8744  ;;  %8356 = vmatprep.mubr.msk.f32.mxu0 %vm2602_vm8, %v2883_v37  ;;  %v9966_v37 = vld [vmem:[%s11352_s27 + $0x10a] sm:$0xff] }
 0x2f3   : > { %16891 = vst [vmem:[#allocation19_spill] sm:$0xff] %v12780_v47 }
 0x2f4   : > { %v12787_v23 = vpop.permute.xlu1 %8759 }
 0x2f5   : > { %9039 = vrot.lane.b32.xlu1 %v9028_v35, %s10056_s20  ;;  %v9098_v35 = vpack.i.bf16 %v9960_v42, %v2850_v15  ;;  %8357 = vmatmul.mubr.msk.f32.gmra.mrb[26].mxu0 %vm2602_vm8, %v2884_v5  ;;  %v9965_v15 = vld [vmem:[%s11352_s27 + $0xf2] sm:$0xff]  ;;  %v2820_v5 = vld [vmem:[%s11352_s27 + $0x124] sm:$0xff] }
 0x2f6   : > { %9034 = vrot.lane.b32.xlu0 %v9033_v40, %s10059_s8  ;;  %v12789_v14 = vpop.permute.xlu0 %8754  ;;  %v2814_v40 = vld [vmem:[%s11352_s27 + $0xf4] sm:$0xff]  ;;  %8359 = vmatprep.mubr.msk.f32.mxu0 %vm2602_vm8, %v2885_v6 }
 0x2f7   : > { %v9108_v8 = vpack.i.bf16 %v2815_v50, %v2814_v40  ;;  %v2818_v42 = vld [vmem:[%s11352_s27 + $0x114] sm:$0xff]  ;;  %v2856_v40 = vld [vmem:[%s11352_s27 + $0x11d] sm:$0xff]  ;;  %v8757_v47 = vunpack.i.h.bf16 %v12789_v14 }
 0x2f8   : > { %v12798_v55 = vpop.permute.xlu1 %8769  ;;  %v2855_v50 = vld [vmem:[%s11352_s27 + $0x115] sm:$0xff]  ;;  %v2858_v6 = vld [vmem:[%s11352_s27 + $0x12d] sm:$0xff] }
 0x2f9   : > { %9049 = vrot.lane.b32.xlu1 %v9048_v0, %s10059_s8  ;;  %v2851_v0 = vld [vmem:[%s11352_s27 + $0xf5] sm:$0xff]  ;;  %8360 = vmatmul.mubr.msk.f32.gmra.mrb[28].mxu0 %vm2602_vm8, %v2886_v63 }
 0x2fa   : > { %9044 = vrot.lane.b32.xlu0 %v9043_v58, %s10058_s23  ;;  %v12800_v53 = vpop.permute.xlu0 %8764  ;;  %v9113_v26 = vpack.i.bf16 %v9963_v22, %v2851_v0  ;;  %v2887_v0 = vld [vmem:[%s11352_s27 + $0xf6] sm:$0xff] }
 0x2fb   : > { %8362 = vmatprep.mubr.msk.f32.mxu0 %vm2602_vm8, %v2887_v0  ;;  %v2824_v0 = vld [vmem:[%s11352_s27 + $0x13c] sm:$0x3f] }
 0x2fc   : > { %v12808_v27 = vpop.permute.xlu1 %8779 }
 0x2fd   : > { %9059 = vrot.lane.b32.xlu1 %v9058_v32, %s10058_s23 }
 0x2fe   : > { %9054 = vrot.lane.b32.xlu0 %v9043_v58, %s10056_s20  ;;  %v12810_v4 = vpop.permute.xlu0 %8774 }
 0x300   : > { %v12820_v7 = vpop.permute.xlu1 %8789 }
 0x301   : > { %9069 = vrot.lane.b32.xlu1 %v9058_v32, %s10056_s20  ;;  %v9118_v32 = vpack.i.bf16 %v9962_v10, %v2852_v12  ;;  %v9158_v10 = vpack.i.bf16 %v9966_v37, %v2856_v40  ;;  %v2890_v40 = vld [vmem:[%s11352_s27 + $0x10e] sm:$0xff] }
 0x302   : > { %9064 = vrot.lane.b32.xlu0 %v9063_v46, %s10059_s8  ;;  %v12822_v33 = vpop.permute.xlu0 %8784  ;;  %v2816_v46 = vld [vmem:[%s11352_s27 + $0x104] sm:$0xff]  ;;  %v2821_v37 = vld [vmem:[%s11352_s27 + $0x12c] sm:$0x3f] }
 0x303   : > { %v9128_v54 = vpack.i.bf16 %v2817_v29, %v2816_v46  ;;  %v2822_v46 = vld [vmem:[%s11352_s27 + $0x12c] sm:$0xff] }
 0x304   : > { %v12829_v62 = vpop.permute.xlu1 %8799 }
 0x305   : > { %9079 = vrot.lane.b32.xlu1 %v9078_v45, %s10059_s8  ;;  %v2853_v45 = vld [vmem:[%s11352_s27 + $0x105] sm:$0xff] }
 0x306   : > { %9074 = vrot.lane.b32.xlu0 %v9073_v17, %s10058_s23  ;;  %v12831_v56 = vpop.permute.xlu0 %8794  ;;  %v9133_v34 = vpack.i.bf16 %v9965_v15, %v2853_v45  ;;  %v2747_v45 = vld [vmem:[%s11352_s27 + $0x11a] sm:$0xff] }
 0x307   : > { %v9178_v63 = vpack.i.bf16 %v2747_v45, %v2858_v6  ;;  %v2859_v45 = vld [vmem:[%s11352_s27 + $0x135] sm:$0xff] }
 0x308   : > { %v12842_v52 = vpop.permute.xlu1 %8809 }
 0x309   : > { %9089 = vrot.lane.b32.xlu1 %v9088_v59, %s10058_s23 }
 0x30a   : > { %9084 = vrot.lane.b32.xlu0 %v9073_v17, %s10056_s20  ;;  %v12844_v57 = vpop.permute.xlu0 %8804 }
 0x30c   : > { %v12851_v58 = vpop.permute.xlu1 %8819 }
 0x30d   : > { %9099 = vrot.lane.b32.xlu1 %v9098_v35, %s10059_s8  ;;  %v2819_v35 = vld [vmem:[%s11352_s27 + $0x11c] sm:$0xff] }
 0x30e   : > { %9094 = vrot.lane.b32.xlu0 %v9093_v19, %s10059_s8  ;;  %v12853_v16 = vpop.permute.xlu0 %8814  ;;  %v9148_v61 = vpack.i.bf16 %v2819_v35, %v2818_v42  ;;  %v9968_v42 = vld [vmem:[%s11352_s27 + $0x112] sm:$0xff] }
 0x310   : > { %v12864_v1 = vpop.permute.xlu1 %8829 }
 0x311   : > { %9109 = vrot.lane.b32.xlu1 %v9108_v8, %s10058_s23  ;;  %16892 = vst [vmem:[#allocation20_spill] sm:$0xff] %v12864_v1 }
 0x312   : > { %9104 = vrot.lane.b32.xlu0 %v9088_v59, %s10056_s20  ;;  %v12866_v13 = vpop.permute.xlu0 %8824  ;;  %v9138_v59 = vpack.i.bf16 %v9964_v11, %v2854_v3  ;;  %v2857_v11 = vld [vmem:[%s11352_s27 + $0x125] sm:$0xff] }
 0x313   : > { %16893 = vst [vmem:[#allocation21_spill] sm:$0xff] %v12866_v13  ;;  %v9173_v35 = vpack.i.bf16 %v9968_v42, %v2857_v11  ;;  %v2892_v42 = vld [vmem:[%s11352_s27 + $0x11e] sm:$0xff] }
 0x314   : > { %v12873_v17 = vpop.permute.xlu1 %8839 }
 0x315   : > { %9119 = vrot.lane.b32.xlu1 %v9118_v32, %s10059_s8  ;;  %16894 = vst [vmem:[#allocation22_spill] sm:$0xff] %v12873_v17  ;;  %v9967_v32 = vld [vmem:[%s11352_s27 + $0x102] sm:$0xff] }
 0x316   : > { %9114 = vrot.lane.b32.xlu0 %v9113_v26, %s10059_s8  ;;  %v12875_v38 = vpop.permute.xlu0 %8834  ;;  %v9153_v22 = vpack.i.bf16 %v9967_v32, %v2855_v50  ;;  %v2888_v26 = vld [vmem:[%s11352_s27 + $0xfe] sm:$0xff]  ;;  %v2823_v50 = vld [vmem:[%s11352_s27 + $0x134] sm:$0xff] }
 0x317   : > { %16895 = vst [vmem:[#allocation23_spill] sm:$0xff] %v12875_v38  ;;  %8363 = vmatmul.mubr.msk.f32.gmra.mrb[30].mxu0 %vm2602_vm8, %v2888_v26  ;;  %v2749_v26 = vld [vmem:[%s11352_s27 + $0x12a] sm:$0x3f]  ;;  %v2639_v38 = vld [vmem:[%s11352_s27] sm:$0xff] }
 0x318   : > { %v12886_v51 = vpop.permute.xlu1 %8849 }
 0x319   : > { %9129 = vrot.lane.b32.xlu1 %v9128_v54, %s10058_s23 }
 0x31a   : > { %9124 = vrot.lane.b32.xlu0 %v9108_v8, %s10056_s20  ;;  %v12888_v19 = vpop.permute.xlu0 %8844 }
 0x31d   : > { %9139 = vrot.lane.b32.xlu1 %v9138_v59, %s10059_s8  ;;  %v12895_v8 = vpop.permute.xlu1 %8859 }
 0x31e   : > { %9134 = vrot.lane.b32.xlu0 %v9133_v34, %s10059_s8  ;;  %v12897_v12 = vpop.permute.xlu0 %8854  ;;  %v2889_v34 = vld [vmem:[%s11352_s27 + $0x106] sm:$0xff] }
 0x31f   : > { %8365 = vmatprep.mubr.msk.f32.mxu0 %vm2602_vm8, %v2889_v34  ;;  %v2891_v34 = vld [vmem:[%s11352_s27 + $0x116] sm:$0xff] }
 0x320   : > { %8366 = vmatmul.mubr.msk.f32.gmra.mrb[32].mxu0 %vm2602_vm8, %v2890_v40 }
 0x321   : > { %9149 = vrot.lane.b32.xlu1 %v9148_v61, %s10058_s23  ;;  %v12908_v29 = vpop.permute.xlu1 %8869  ;;  %8368 = vmatprep.mubr.msk.f32.mxu0 %vm2602_vm8, %v2891_v34 }
 0x322   : > { %9144 = vrot.lane.b32.xlu0 %v9128_v54, %s10056_s20  ;;  %v12910_v3 = vpop.permute.xlu0 %8864  ;;  %v9168_v54 = vpack.i.bf16 %v2822_v46, %v2820_v5  ;;  %v2860_v46 = vld [vmem:[%s11352_s27 + $0x13d] sm:$0x3f] }
 0x324   : > { %8369 = vmatmul.mubr.msk.f32.gmra.mrb[34].mxu0 %vm2602_vm8, %v2892_v42 }
 0x325   : > { %9159 = vrot.lane.b32.xlu1 %v9158_v10, %s10059_s8 }
 0x326   : > { %9154 = vrot.lane.b32.xlu0 %v9153_v22, %s10059_s8  ;;  %v12918_v59 = vpop.permute.xlu1 %8879  ;;  %v12920_v15 = vpop.permute.xlu0 %8874  ;;  %v9183_v22 = vpack.i.bf16 %v2821_v37, %v2820_v5  ;;  %v8666_v37 = vunpack.i.l.bf16 %v12693_v36 }
 0x329   : > { %9169 = vrot.lane.b32.xlu1 %v9168_v54, %s10058_s23  ;;  %v2748_v54 = vld [vmem:[%s11352_s27 + $0x122] sm:$0xff] }
 0x32a   : > { %9164 = vrot.lane.b32.xlu0 %v9148_v61, %s10056_s20  ;;  %v12931_v10 = vpop.permute.xlu1 %8889  ;;  %v12933_v32 = vpop.permute.xlu0 %8884  ;;  %v9188_v61 = vpack.i.bf16 %v2824_v0, %v2823_v50  ;;  %v2750_v50 = vld [vmem:[%s11352_s27 + $0x13] sm:$0xff]  ;;  %v2751_v0 = vld [vmem:[%s11352_s27 + $0x1b] sm:$0xff] }
 0x32d   : > { %9179 = vrot.lane.b32.xlu1 %v9178_v63, %s10059_s8  ;;  %v9198_v63 = vpack.i.bf16 %v2749_v26, %v2860_v46  ;;  %v8846_v26 = vunpack.i.l.bf16 %v12888_v19 }
 0x32e   : > { %9174 = vrot.lane.b32.xlu0 %v9173_v35, %s10059_s8  ;;  %v12942_v6 = vpop.permute.xlu1 %8899  ;;  %v12944_v11 = vpop.permute.xlu0 %8894  ;;  %v9193_v35 = vpack.i.bf16 %v2748_v54, %v2859_v45  ;;  %v8667_v45 = vunpack.i.h.bf16 %v12693_v36  ;;  %v2894_v36 = vld [vmem:[%s11352_s27 + $0x12e] sm:$0xff] }
 0x32f   : > { %v8902_v34 = vunpack.i.h.bf16 %v12942_v6 }
 0x331   : > { %9189 = vrot.lane.b32.xlu1 %v9188_v61, %s10058_s23  ;;  %v8756_v61 = vunpack.i.l.bf16 %v12789_v14 }
 0x332   : > { %9184 = vrot.lane.b32.xlu0 %v9183_v22, %s10056_s20  ;;  %v8910_v5 = vpop.permute.xlu1 %8909 }
 0x333   : > { %v8905_v40 = vpop.permute.xlu0 %8904  ;;  %v8911_v43 = vunpack.i.l.bf16 %v8910_v5  ;;  %v8912_v22 = vunpack.i.h.bf16 %v8910_v5 }
 0x334   : > { %v8907_v17 = vunpack.i.h.bf16 %v8905_v40  ;;  %v8906_v41 = vunpack.i.l.bf16 %v8905_v40  ;;  %v3695_v40 = vsel %vm2602_vm8, %v2639_v38, %v8666_v37  ;;  %v8847_v38 = vunpack.i.h.bf16 %v12888_v19 }
 0x335   : > { %9199 = vrot.lane.b32.xlu1 %v9198_v63, %s10059_s8  ;;  %v3732_v60 = vsel %vm3731_vm10, %v3695_v40, %v8756_v61 }
 0x336   : > { %9194 = vrot.lane.b32.xlu0 %v9193_v35, %s10059_s8  ;;  %v3805_v46 = vsel %vm2602_vm8, %v2750_v50, %v8906_v41  ;;  %v3806_v54 = vsel %vm2602_vm8, %v2751_v0, %v8907_v17  ;;  %v8920_v42 = vpop.permute.xlu1 %8919  ;;  %v2893_v35 = vld [vmem:[%s11352_s27 + $0x126] sm:$0xff]  ;;  %v3769_v14 = vsel %vm3768_vm11, %v3732_v60, %v8846_v26  ;;  %v8761_v60 = vunpack.i.l.bf16 %v12787_v23 }
 0x337   : > { %v8915_v5 = vpop.permute.xlu0 %8914  ;;  %v3841_v63 = vsel %vm3731_vm10, %v3805_v46, %v8911_v43  ;;  %v8921_v1 = vunpack.i.l.bf16 %v8920_v42  ;;  %v2752_v50 = vld [vmem:[%s11352_s27 + $0x23] sm:$0xff]  ;;  %8371 = vmatprep.mubr.msk.f32.mxu0 %vm2602_vm8, %v2893_v35  ;;  %v8922_v17 = vunpack.i.h.bf16 %v8920_v42  ;;  %v3842_v13 = vsel %vm3731_vm10, %v3806_v54, %v8912_v22  ;;  %v2753_v46 = vld [vmem:[%s11352_s27 + $0x2b] sm:$0xff] }
 0x338   : > { %v8916_v41 = vunpack.i.l.bf16 %v8915_v5  ;;  %v3877_v0 = vsel %vm3768_vm11, %v3841_v63, %v8902_v34  ;;  %v2640_v43 = vld [vmem:[%s11352_s27 + $0x8] sm:$0xff]  ;;  %8372 = vmatmul.mubr.msk.f32.gmra.mrb[36].mxu0 %vm2602_vm8, %v2894_v36  ;;  %v8671_v22 = vunpack.i.l.bf16 %v12691_v25  ;;  %v8917_v26 = vunpack.i.h.bf16 %v8915_v5  ;;  %v2641_v35 = vld [vmem:[%s11352_s27 + $0x10] sm:$0xff] }
 0x339   : > { %4449 = vmatprep.mubr.f32.mxu1 %v3877_v0  ;;  %v3807_v61 = vsel %vm2602_vm8, %v2752_v50, %v8921_v1  ;;  %v3696_v19 = vsel %vm2602_vm8, %v2640_v43, %v8667_v45  ;;  %v3808_v40 = vsel %vm2602_vm8, %v2753_v46, %v8922_v17  ;;  %v8672_v36 = vunpack.i.h.bf16 %v12691_v25  ;;  %v2754_v43 = vld [vmem:[%s11352_s27 + $0x33] sm:$0xff]  ;;  %v2896_v25 = vld [vmem:[%s11352_s27 + $0x13e] sm:$0x3f] }
 0x33a   : > { %v3878_v37 = vsel %vm3768_vm11, %v3842_v13, %v8916_v41  ;;  %4450 = vmatmul.mubr.f32.vlgmr.msra.gmra.mrb[32].mxu1 %v3769_v14  ;;  %v3733_v13 = vsel %vm3731_vm10, %v3696_v19, %v8757_v47  ;;  %v8851_v41 = vunpack.i.l.bf16 %v12886_v51  ;;  %v2895_v14 = vld [vmem:[%s11352_s27 + $0x136] sm:$0xff] }
 0x33b   : > { %v12980_v42 = vpop.permute.xlu1 %8929  ;;  %v8925_v34 = vpop.permute.xlu0 %8924  ;;  %4454 = vmatprep.mubr.f32.mxu1 %v3878_v37  ;;  %v3770_v1 = vsel %vm3768_vm11, %v3733_v13, %v8847_v38  ;;  %v3697_v38 = vsel %vm2602_vm8, %v2641_v35, %v8671_v22  ;;  %8374 = vmatprep.mubr.msk.f32.mxu0 %vm2602_vm8, %v2895_v14  ;;  %v2642_v19 = vld [vmem:[%s11352_s27 + $0x18] sm:$0xff] }
 0x33c   : > { %v8927_v54 = vunpack.i.h.bf16 %v8925_v34  ;;  %v8926_v63 = vunpack.i.l.bf16 %v8925_v34  ;;  %v8931_v45 = vunpack.i.l.bf16 %v12980_v42  ;;  %v8762_v34 = vunpack.i.h.bf16 %v12787_v23  ;;  %8375 = vmatmul.mubr.msk.f32.gmra.mrb[38].mxu0 %vm2602_vm8, %v2896_v25  ;;  %v2755_v35 = vld [vmem:[%s11352_s27 + $0x3b] sm:$0xff] }
 0x33d   : > { %v8677_v25 = vunpack.i.h.bf16 %v12703_v24 }
 0x33e   : > { %v3843_v50 = vsel %vm3731_vm10, %v3807_v61, %v8926_v63  ;;  %4455 = vmatmul.mubr.f32.gmra.mrb[34].mxu1 %v3770_v1  ;;  %v3844_v46 = vsel %vm3731_vm10, %v3808_v40, %v8927_v54  ;;  %v3734_v63 = vsel %vm3731_vm10, %v3697_v38, %v8761_v60  ;;  %v8932_v54 = vunpack.i.h.bf16 %v12980_v42  ;;  %v2643_v42 = vld [vmem:[%s11352_s27 + $0x20] sm:$0xff] }
 0x33f   : > { %v8940_v0 = vpop.permute.xlu1 %8939  ;;  %v8935_v5 = vpop.permute.xlu0 %8934  ;;  %v3879_v47 = vsel %vm3768_vm11, %v3843_v50, %v8917_v26  ;;  %v8852_v26 = vunpack.i.h.bf16 %v12886_v51  ;;  %v3771_v13 = vsel %vm3768_vm11, %v3734_v63, %v8851_v41  ;;  %v3880_v1 = vsel %vm3768_vm11, %v3844_v46, %v8931_v45  ;;  %v2756_v38 = vld [vmem:[%s11352_s27 + $0x43] sm:$0xff] }
 0x340   : > { %v8941_v17 = vunpack.i.l.bf16 %v8940_v0  ;;  %v8936_v37 = vunpack.i.l.bf16 %v8935_v5  ;;  %4459 = vmatprep.mubr.f32.mxu1 %v3879_v47  ;;  %v8937_v61 = vunpack.i.h.bf16 %v8935_v5  ;;  %v8676_v60 = vunpack.i.l.bf16 %v12703_v24  ;;  %v2757_v24 = vld [vmem:[%s11352_s27 + $0x4b] sm:$0xff] }
 0x341   : > { %v8942_v50 = vunpack.i.h.bf16 %v8940_v0  ;;  %v3698_v51 = vsel %vm2602_vm8, %v2642_v19, %v8672_v36  ;;  %v8766_v5 = vunpack.i.l.bf16 %v12800_v53  ;;  %v8767_v19 = vunpack.i.h.bf16 %v12800_v53 }
 0x342   : > { %v3809_v22 = vsel %vm2602_vm8, %v2754_v43, %v8936_v37  ;;  %4460 = vmatmul.mubr.f32.gmra.mrb[36].mxu1 %v3771_v13  ;;  %v3735_v43 = vsel %vm3731_vm10, %v3698_v51, %v8762_v34  ;;  %v3810_v14 = vsel %vm2602_vm8, %v2755_v35, %v8937_v61  ;;  %v8856_v37 = vunpack.i.l.bf16 %v12897_v12 }
 0x343   : > { %v8950_v40 = vpop.permute.xlu1 %8949  ;;  %4464 = vmatprep.mubr.f32.mxu1 %v3880_v1  ;;  %v3845_v41 = vsel %vm3731_vm10, %v3809_v22, %v8941_v17  ;;  %v3772_v45 = vsel %vm3768_vm11, %v3735_v43, %v8852_v26  ;;  %v3699_v61 = vsel %vm2602_vm8, %v2643_v42, %v8676_v60  ;;  %v3846_v63 = vsel %vm3731_vm10, %v3810_v14, %v8942_v50  ;;  %v2644_v22 = vld [vmem:[%s11352_s27 + $0x28] sm:$0xff]  ;;  %v2645_v42 = vld [vmem:[%s11352_s27 + $0x30] sm:$0xff] }
 0x344   : > { %v8945_v23 = vpop.permute.xlu0 %8944  ;;  %v8951_v47 = vunpack.i.l.bf16 %v8950_v40  ;;  %v3881_v46 = vsel %vm3768_vm11, %v3845_v41, %v8932_v54  ;;  %v8952_v26 = vunpack.i.h.bf16 %v8950_v40  ;;  %v3736_v13 = vsel %vm3731_vm10, %v3699_v61, %v8766_v5 }
 0x345   : > { %v8946_v0 = vunpack.i.l.bf16 %v8945_v23  ;;  %v8857_v1 = vunpack.i.h.bf16 %v12897_v12  ;;  %v3773_v54 = vsel %vm3768_vm11, %v3736_v13, %v8856_v37  ;;  %v8947_v51 = vunpack.i.h.bf16 %v8945_v23 }
 0x346   : > { %4465 = vmatmul.mubr.f32.gmra.mrb[38].mxu1 %v3772_v45  ;;  %v3811_v35 = vsel %vm2602_vm8, %v2756_v38, %v8951_v47  ;;  %v8681_v40 = vunpack.i.l.bf16 %v12701_v48  ;;  %v3700_v5 = vsel %vm2602_vm8, %v2644_v22, %v8677_v25  ;;  %v8771_v47 = vunpack.i.l.bf16 %v12798_v55  ;;  %v2758_v38 = vld [vmem:[%s11352_s27 + $0x53] sm:$0xff] }
 0x347   : > { %v13021_v36 = vpop.permute.xlu1 %8959  ;;  %4469 = vmatprep.mubr.f32.mxu1 %v3881_v46  ;;  %v3882_v53 = vsel %vm3768_vm11, %v3846_v63, %v8946_v0  ;;  %v3737_v23 = vsel %vm3731_vm10, %v3700_v5, %v8767_v19  ;;  %v3812_v14 = vsel %vm2602_vm8, %v2757_v24, %v8952_v26  ;;  %v8861_v37 = vunpack.i.l.bf16 %v12895_v8  ;;  %v2759_v24 = vld [vmem:[%s11352_s27 + $0x5b] sm:$0xff] }
 0x348   : > { %v8955_v17 = vpop.permute.xlu0 %8954  ;;  %v3774_v45 = vsel %vm3768_vm11, %v3737_v23, %v8857_v1  ;;  %v8961_v0 = vunpack.i.l.bf16 %v13021_v36  ;;  %v3701_v63 = vsel %vm2602_vm8, %v2645_v42, %v8681_v40  ;;  %v8772_v26 = vunpack.i.h.bf16 %v12798_v55 }
 0x349   : > { %v8956_v34 = vunpack.i.l.bf16 %v8955_v17  ;;  %v8957_v41 = vunpack.i.h.bf16 %v8955_v17  ;;  %v3738_v22 = vsel %vm3731_vm10, %v3701_v63, %v8771_v47  ;;  %v8866_v42 = vunpack.i.l.bf16 %v12910_v3 }
 0x34a   : > { %4470 = vmatmul.mubr.f32.gmra.mrb[40].mxu1 %v3773_v54  ;;  %v8862_v54 = vunpack.i.h.bf16 %v12895_v8 }
 0x34b   : > { %v13034_v60 = vpop.permute.xlu1 %8969  ;;  %4474 = vmatprep.mubr.f32.mxu1 %v3882_v53  ;;  %v3847_v12 = vsel %vm3731_vm10, %v3811_v35, %v8956_v34  ;;  %v8682_v34 = vunpack.i.h.bf16 %v12701_v48  ;;  %v3848_v19 = vsel %vm3731_vm10, %v3812_v14, %v8957_v41  ;;  %v2646_v35 = vld [vmem:[%s11352_s27 + $0x38] sm:$0xff]  ;;  %v3775_v48 = vsel %vm3768_vm11, %v3738_v22, %v8861_v37  ;;  %v2648_v22 = vld [vmem:[%s11352_s27 + $0x48] sm:$0xff] }
 0x34c   : > { %v8965_v50 = vpop.permute.xlu0 %8964  ;;  %v3883_v25 = vsel %vm3768_vm11, %v3847_v12, %v8947_v51  ;;  %v8971_v61 = vunpack.i.l.bf16 %v13034_v60  ;;  %v8962_v51 = vunpack.i.h.bf16 %v13021_v36  ;;  %v3884_v55 = vsel %vm3768_vm11, %v3848_v19, %v8961_v0 }
 0x34d   : > { %v8966_v43 = vunpack.i.l.bf16 %v8965_v50  ;;  %v8967_v13 = vunpack.i.h.bf16 %v8965_v50  ;;  %v8686_v50 = vunpack.i.l.bf16 %v12716_v9  ;;  %v8972_v41 = vunpack.i.h.bf16 %v13034_v60  ;;  %v2760_v60 = vld [vmem:[%s11352_s27 + $0x63] sm:$0xff] }
 0x34e   : > { %4475 = vmatmul.mubr.f32.gmra.mrb[42].mxu1 %v3774_v45  ;;  %v3702_v8 = vsel %vm2602_vm8, %v2646_v35, %v8682_v34  ;;  %v8776_v12 = vunpack.i.l.bf16 %v12810_v4  ;;  %v8777_v19 = vunpack.i.h.bf16 %v12810_v4 }
 0x34f   : > { %v13048_v17 = vpop.permute.xlu1 %8979  ;;  %4479 = vmatprep.mubr.f32.mxu1 %v3883_v25  ;;  %v3813_v1 = vsel %vm2602_vm8, %v2758_v38, %v8966_v43  ;;  %v3739_v47 = vsel %vm3731_vm10, %v3702_v8, %v8772_v26  ;;  %v2647_v43 = vld [vmem:[%s11352_s27 + $0x40] sm:$0xff]  ;;  %v3814_v23 = vsel %vm2602_vm8, %v2759_v24, %v8967_v13  ;;  %v8687_v25 = vunpack.i.h.bf16 %v12716_v9 }
 0x350   : > { %v13050_v46 = vpop.permute.xlu0 %8974  ;;  %v3849_v5 = vsel %vm3731_vm10, %v3813_v1, %v8971_v61  ;;  %v8981_v36 = vunpack.i.l.bf16 %v13048_v17  ;;  %v3776_v14 = vsel %vm3768_vm11, %v3739_v47, %v8862_v54  ;;  %v3703_v61 = vsel %vm2602_vm8, %v2647_v43, %v8686_v50  ;;  %v2761_v54 = vld [vmem:[%s11352_s27 + $0x6b] sm:$0xff] }
 0x351   : > { %v8976_v37 = vunpack.i.l.bf16 %v13050_v46  ;;  %v3885_v0 = vsel %vm3768_vm11, %v3849_v5, %v8962_v51  ;;  %v3850_v63 = vsel %vm3731_vm10, %v3814_v23, %v8972_v41  ;;  %v8982_v26 = vunpack.i.h.bf16 %v13048_v17  ;;  %v2649_v5 = vld [vmem:[%s11352_s27 + $0x50] sm:$0xff] }
 0x352   : > { %4480 = vmatmul.mubr.f32.gmra.mrb[44].mxu1 %v3775_v48  ;;  %v3740_v13 = vsel %vm3731_vm10, %v3703_v61, %v8776_v12  ;;  %v3815_v35 = vsel %vm2602_vm8, %v2760_v60, %v8981_v36  ;;  %v8867_v1 = vunpack.i.h.bf16 %v12910_v3  ;;  %v8977_v48 = vunpack.i.h.bf16 %v13050_v46 }
 0x353   : > { %v13065_v53 = vpop.permute.xlu1 %8989  ;;  %4484 = vmatprep.mubr.f32.mxu1 %v3884_v55  ;;  %v3777_v9 = vsel %vm3768_vm11, %v3740_v13, %v8866_v42  ;;  %v3886_v17 = vsel %vm3768_vm11, %v3850_v63, %v8976_v37  ;;  %v8691_v51 = vunpack.i.l.bf16 %v12714_v31  ;;  %v3704_v3 = vsel %vm2602_vm8, %v2648_v22, %v8687_v25 }
 0x354   : > { %v8985_v40 = vpop.permute.xlu0 %8984  ;;  %v8781_v41 = vunpack.i.l.bf16 %v12808_v27  ;;  %v3741_v8 = vsel %vm3731_vm10, %v3704_v3, %v8777_v19  ;;  %v3816_v12 = vsel %vm2602_vm8, %v2761_v54, %v8982_v26  ;;  %v8871_v36 = vunpack.i.l.bf16 %v12908_v29  ;;  %v2650_v19 = vld [vmem:[%s11352_s27 + $0x58] sm:$0xff] }
 0x355   : > { %v8986_v34 = vunpack.i.l.bf16 %v8985_v40  ;;  %v8987_v55 = vunpack.i.h.bf16 %v8985_v40  ;;  %v3778_v47 = vsel %vm3768_vm11, %v3741_v8, %v8867_v1  ;;  %v2762_v40 = vld [vmem:[%s11352_s27 + $0x73] sm:$0xff]  ;;  %v8991_v43 = vunpack.i.l.bf16 %v13065_v53 }
 0x356   : > { %4485 = vmatmul.mubr.f32.gmra.mrb[46].mxu1 %v3776_v14  ;;  %v8692_v60 = vunpack.i.h.bf16 %v12714_v31  ;;  %v8872_v13 = vunpack.i.h.bf16 %v12908_v29  ;;  %v8992_v1 = vunpack.i.h.bf16 %v13065_v53  ;;  %v8696_v54 = vunpack.i.l.bf16 %v12725_v39 }
 0x357   : > { %v13081_v45 = vpop.permute.xlu1 %8999  ;;  %4489 = vmatprep.mubr.f32.mxu1 %v3885_v0  ;;  %v3851_v50 = vsel %vm3731_vm10, %v3815_v35, %v8986_v34  ;;  %v3705_v0 = vsel %vm2602_vm8, %v2649_v5, %v8691_v51  ;;  %v3852_v25 = vsel %vm3731_vm10, %v3816_v12, %v8987_v55  ;;  %v8782_v34 = vunpack.i.h.bf16 %v12808_v27  ;;  %v2763_v35 = vld [vmem:[%s11352_s27 + $0x7b] sm:$0xff]  ;;  %v2764_v5 = vld [vmem:[%s11352_s27 + $0x83] sm:$0xff] }
 0x358   : > { %v13083_v38 = vpop.permute.xlu0 %8994  ;;  %v3887_v14 = vsel %vm3768_vm11, %v3851_v50, %v8977_v48  ;;  %v9001_v37 = vunpack.i.l.bf16 %v13081_v45  ;;  %v3742_v63 = vsel %vm3731_vm10, %v3705_v0, %v8781_v41  ;;  %v9002_v29 = vunpack.i.h.bf16 %v13081_v45  ;;  %v2651_v50 = vld [vmem:[%s11352_s27 + $0x60] sm:$0xff] }
 0x359   : > { %v8996_v46 = vunpack.i.l.bf16 %v13083_v38  ;;  %v8997_v61 = vunpack.i.h.bf16 %v13083_v38  ;;  %v3779_v31 = vsel %vm3768_vm11, %v3742_v63, %v8871_v36  ;;  %v3888_v38 = vsel %vm3768_vm11, %v3852_v25, %v8991_v43  ;;  %v2652_v63 = vld [vmem:[%s11352_s27 + $0x68] sm:$0xff] }
 0x35a   : > { %4490 = vmatmul.mubr.f32.gmra.mrb[48].mxu1 %v3777_v9  ;;  %v8786_v53 = vunpack.i.l.bf16 %v12822_v33  ;;  %v8697_v43 = vunpack.i.h.bf16 %v12725_v39  ;;  %v8787_v25 = vunpack.i.h.bf16 %v12822_v33  ;;  %v8877_v39 = vunpack.i.h.bf16 %v12920_v15 }
 0x35b   : > { %v13098_v24 = vpop.permute.xlu1 %9009  ;;  %4494 = vmatprep.mubr.f32.mxu1 %v3886_v17  ;;  %v3817_v26 = vsel %vm2602_vm8, %v2762_v40, %v8996_v46  ;;  %v3706_v17 = vsel %vm2602_vm8, %v2650_v19, %v8692_v60  ;;  %v3818_v41 = vsel %vm2602_vm8, %v2763_v35, %v8997_v61  ;;  %v8876_v46 = vunpack.i.l.bf16 %v12920_v15 }
 0x35c   : > { %v13100_v4 = vpop.permute.xlu0 %9004  ;;  %v13130_v22 = vpop.f32.mrb[0].mxu0  ;;  %v3853_v51 = vsel %vm3731_vm10, %v3817_v26, %v9001_v37  ;;  %v9011_v55 = vunpack.i.l.bf16 %v13098_v24  ;;  %v3743_v3 = vsel %vm3731_vm10, %v3706_v17, %v8782_v34  ;;  %v3707_v37 = vsel %vm2602_vm8, %v2651_v50, %v8696_v54 }
 0x35d   : > { %v13135_v9 = vpop.f32.mrb[1].mxu0  ;;  %v3780_v45 = vsel %vm3768_vm11, %v3743_v3, %v8872_v13  ;;  %v9006_v12 = vunpack.i.l.bf16 %v13100_v4  ;;  %v3889_v40 = vsel %vm3768_vm11, %v3853_v51, %v8992_v1  ;;  %v3854_v0 = vsel %vm3731_vm10, %v3818_v41, %v9002_v29 }
 0x35e   : > { %4495 = vmatmul.mubr.f32.gmra.mrb[50].mxu1 %v3778_v47  ;;  %v9012_v34 = vunpack.i.h.bf16 %v13098_v24  ;;  %v3744_v61 = vsel %vm3731_vm10, %v3707_v37, %v8786_v53  ;;  %v3819_v19 = vsel %vm2602_vm8, %v2764_v5, %v9011_v55  ;;  %v9007_v35 = vunpack.i.h.bf16 %v13100_v4  ;;  %v2653_v55 = vld [vmem:[%s11352_s27 + $0x70] sm:$0xff] }
 0x35f   : > { %v13115_v23 = vpop.permute.xlu1 %9019  ;;  %4499 = vmatprep.mubr.f32.mxu1 %v3887_v14  ;;  %v3781_v13 = vsel %vm3768_vm11, %v3744_v61, %v8876_v46  ;;  %v3890_v24 = vsel %vm3768_vm11, %v3854_v0, %v9006_v12  ;;  %v3708_v29 = vsel %vm2602_vm8, %v2652_v63, %v8697_v43  ;;  %v8791_v4 = vunpack.i.l.bf16 %v12820_v7  ;;  %v2766_v46 = vld [vmem:[%s11352_s27 + $0x93] sm:$0xff] }
 0x360   : > { %v13117_v42 = vpop.permute.xlu0 %9014  ;;  %v3745_v53 = vsel %vm3731_vm10, %v3708_v29, %v8787_v25  ;;  %v8881_v50 = vunpack.i.l.bf16 %v12918_v59  ;;  %v8702_v43 = vunpack.i.h.bf16 %v12723_v49 }
 0x361   : > { %v13152_v8 = vpop.f32.mrb[2].mxu0  ;;  %v9016_v14 = vunpack.i.l.bf16 %v13117_v42  ;;  %v9017_v15 = vunpack.i.h.bf16 %v13117_v42  ;;  %v3782_v42 = vsel %vm3768_vm11, %v3745_v53, %v8877_v39 }
 0x362   : > { %4500 = vmatmul.mubr.f32.gmra.mrb[52].mxu1 %v3779_v31  ;;  %v13157_v36 = vpop.f32.mrb[3].mxu0  ;;  %v2765_v31 = vld [vmem:[%s11352_s27 + $0x8b] sm:$0xff] }
 0x363   : > { %v13137_v27 = vpop.permute.xlu1 %9029  ;;  %4504 = vmatprep.mubr.f32.mxu1 %v3888_v38  ;;  %v8701_v38 = vunpack.i.l.bf16 %v12723_v49  ;;  %v3855_v17 = vsel %vm3731_vm10, %v3819_v19, %v9016_v14  ;;  %v3820_v3 = vsel %vm2602_vm8, %v2765_v31, %v9012_v34  ;;  %v8792_v34 = vunpack.i.h.bf16 %v12820_v7  ;;  %v2654_v19 = vld [vmem:[%s11352_s27 + $0x78] sm:$0xff] }
 0x364   : > { %v13142_v48 = vpop.permute.xlu0 %9024  ;;  %v9031_v14 = vunpack.i.l.bf16 %v13137_v27  ;;  %v3856_v25 = vsel %vm3731_vm10, %v3820_v3, %v9017_v15  ;;  %v8882_v49 = vunpack.i.h.bf16 %v12918_v59  ;;  %v8706_v15 = vunpack.i.l.bf16 %v12736_v2 }
 0x365   : > { %v13174_v26 = vpop.f32.mrb[0].mxu1  ;;  %v9026_v51 = vunpack.i.l.bf16 %v13142_v48  ;;  %v3709_v0 = vsel %vm2602_vm8, %v2653_v55, %v8701_v38  ;;  %v9027_v61 = vunpack.i.h.bf16 %v13142_v48  ;;  %v9032_v59 = vunpack.i.h.bf16 %v13137_v27  ;;  %v2655_v55 = vld [vmem:[%s11352_s27 + $0x80] sm:$0xff] }
 0x366   : > { %4505 = vmatmul.mubr.f32.gmra.mrb[54].mxu1 %v3780_v45  ;;  %v13179_v1 = vpop.f32.mrb[1].mxu1  ;;  %v9021_v45 = vunpack.i.l.bf16 %v13115_v23  ;;  %v3746_v63 = vsel %vm3731_vm10, %v3709_v0, %v8791_v4  ;;  %v8707_v0 = vunpack.i.h.bf16 %v12736_v2  ;;  %v8887_v2 = vunpack.i.h.bf16 %v12933_v32 }
 0x367   : > { %v13159_v47 = vpop.permute.xlu1 %9039  ;;  %4509 = vmatprep.mubr.f32.mxu1 %v3889_v40  ;;  %v3891_v40 = vsel %vm3768_vm11, %v3855_v17, %v9007_v35  ;;  %v3821_v39 = vsel %vm2602_vm8, %v2766_v46, %v9026_v51  ;;  %v3783_v31 = vsel %vm3768_vm11, %v3746_v63, %v8881_v50  ;;  %v2767_v35 = vld [vmem:[%s11352_s27 + $0x9b] sm:$0xff]  ;;  %v3710_v17 = vsel %vm2602_vm8, %v2654_v19, %v8702_v43  ;;  %v2768_v46 = vld [vmem:[%s11352_s27 + $0xa3] sm:$0xff] }
 0x368   : > { %v13164_v60 = vpop.permute.xlu0 %9034  ;;  %v3892_v48 = vsel %vm3768_vm11, %v3856_v25, %v9021_v45  ;;  %v3857_v4 = vsel %vm3731_vm10, %v3821_v39, %v9031_v14  ;;  %v9041_v51 = vunpack.i.l.bf16 %v13159_v47  ;;  %v3747_v53 = vsel %vm3731_vm10, %v3710_v17, %v8792_v34  ;;  %v2769_v17 = vld [vmem:[%s11352_s27 + $0xab] sm:$0xff] }
 0x369   : > { %v3822_v3 = vsel %vm2602_vm8, %v2767_v35, %v9027_v61  ;;  %v8886_v50 = vunpack.i.l.bf16 %v12933_v32  ;;  %v3784_v27 = vsel %vm3768_vm11, %v3747_v53, %v8882_v49  ;;  %v9036_v45 = vunpack.i.l.bf16 %v13164_v60 }
 0x36a   : > { %4510 = vmatmul.mubr.f32.gmra.mrb[56].mxu1 %v3781_v13  ;;  %v3711_v61 = vsel %vm2602_vm8, %v2655_v55, %v8706_v15  ;;  %v3858_v63 = vsel %vm3731_vm10, %v3822_v3, %v9032_v59  ;;  %v8797_v19 = vunpack.i.h.bf16 %v12831_v56  ;;  %v9042_v39 = vunpack.i.h.bf16 %v13159_v47 }
 0x36b   : > { %v13181_v33 = vpop.permute.xlu1 %9049  ;;  %4514 = vmatprep.mubr.f32.mxu1 %v3890_v24  ;;  %v9022_v24 = vunpack.i.h.bf16 %v13115_v23  ;;  %v8796_v23 = vunpack.i.l.bf16 %v12831_v56  ;;  %v3823_v35 = vsel %vm2602_vm8, %v2768_v46, %v9041_v51  ;;  %v9037_v15 = vunpack.i.h.bf16 %v13164_v60 }
 0x36c   : > { %v13186_v54 = vpop.permute.xlu0 %9044  ;;  %v13196_v41 = vpop.f32.mrb[2].mxu1  ;;  %v3894_v47 = vsel %vm3768_vm11, %v3858_v63, %v9036_v45  ;;  %v8801_v60 = vunpack.i.l.bf16 %v12829_v62  ;;  %v8891_v46 = vunpack.i.l.bf16 %v12931_v10 }
 0x36d   : > { %v13201_v5 = vpop.f32.mrb[3].mxu1  ;;  %v3893_v14 = vsel %vm3768_vm11, %v3857_v4, %v9022_v24  ;;  %v9046_v25 = vunpack.i.l.bf16 %v13186_v54  ;;  %v3748_v49 = vsel %vm3731_vm10, %v3711_v61, %v8796_v23  ;;  %v8711_v4 = vunpack.i.l.bf16 %v12734_v44 }
 0x36e   : > { %4515 = vmatmul.mubr.f32.gmra.mrb[58].mxu1 %v3782_v42  ;;  %v9047_v32 = vunpack.i.h.bf16 %v13186_v54 }
 0x36f   : > { %v13203_v12 = vpop.permute.xlu1 %9059  ;;  %4519 = vmatprep.mubr.f32.mxu1 %v3891_v40  ;;  %v3859_v53 = vsel %vm3731_vm10, %v3823_v35, %v9046_v25 }
 0x370   : > { %v13208_v37 = vpop.permute.xlu0 %9054  ;;  %v3895_v63 = vsel %vm3768_vm11, %v3859_v53, %v9037_v15 }
 0x371   : > { %v9056_v55 = vunpack.i.l.bf16 %v13208_v37 }
 0x372   : > { %v13218_v13 = vpop.f32.mrb[4].mxu1  ;;  %4520 = vmatmul.mubr.f32.gmra.mrb[60].mxu1 %v3783_v31  ;;  %v2656_v31 = vld [vmem:[%s11352_s27 + $0x88] sm:$0xff] }
 0x373   : > { %v13223_v38 = vpop.f32.mrb[5].mxu1  ;;  %v13225_v7 = vpop.permute.xlu1 %9069  ;;  %4524 = vmatprep.mubr.f32.mxu1 %v3892_v48  ;;  %v3785_v48 = vsel %vm3768_vm11, %v3748_v49, %v8886_v50  ;;  %v3712_v51 = vsel %vm2602_vm8, %v2656_v31, %v8707_v0  ;;  %v2657_v50 = vld [vmem:[%s11352_s27 + $0x90] sm:$0xff]  ;;  %v9051_v0 = vunpack.i.l.bf16 %v13181_v33 }
 0x374   : > { %v13230_v29 = vpop.permute.xlu0 %9064  ;;  %v3749_v3 = vsel %vm3731_vm10, %v3712_v51, %v8797_v19  ;;  %v8712_v19 = vunpack.i.h.bf16 %v12734_v44  ;;  %v3713_v31 = vsel %vm2602_vm8, %v2657_v50, %v8711_v4  ;;  %v8892_v44 = vunpack.i.h.bf16 %v12931_v10 }
 0x375   : > { %v3786_v54 = vsel %vm3768_vm11, %v3749_v3, %v8887_v2  ;;  %v8802_v2 = vunpack.i.h.bf16 %v12829_v62  ;;  %v2771_v3 = vld [vmem:[%s11352_s27 + $0xbb] sm:$0xff]  ;;  %v9052_v4 = vunpack.i.h.bf16 %v13181_v33  ;;  %v9071_v33 = vunpack.i.l.bf16 %v13225_v7 }
 0x376   : > { %v13240_v42 = vpop.f32.mrb[6].mxu1  ;;  %4525 = vmatmul.mubr.f32.gmra.mrb[62].mxu1 %v3784_v27  ;;  %v3824_v27 = vsel %vm2602_vm8, %v2769_v17, %v9042_v39  ;;  %v9061_v39 = vunpack.i.l.bf16 %v13203_v12  ;;  %v3750_v17 = vsel %vm3731_vm10, %v3713_v31, %v8801_v60  ;;  %v9062_v60 = vunpack.i.h.bf16 %v13203_v12  ;;  %v2772_v31 = vld [vmem:[%s11352_s27 + $0xc3] sm:$0xff] }
 0x377   : > { %v13245_v40 = vpop.f32.mrb[7].mxu1  ;;  %v13247_v43 = vpop.permute.xlu1 %9079  ;;  %4529 = vmatprep.mubr.f32.mxu1 %v3893_v14  ;;  %v2770_v14 = vld [vmem:[%s11352_s27 + $0xb3] sm:$0xff]  ;;  %v3860_v35 = vsel %vm3731_vm10, %v3824_v27, %v9047_v32  ;;  %v3787_v53 = vsel %vm3768_vm11, %v3750_v17, %v8891_v46  ;;  %v8806_v27 = vunpack.i.l.bf16 %v12844_v57  ;;  %v8896_v12 = vunpack.i.l.bf16 %v12944_v11 }
 0x378   : > { %v13252_v34 = vpop.permute.xlu0 %9074  ;;  %v3825_v15 = vsel %vm2602_vm8, %v2770_v14, %v9056_v55  ;;  %v3896_v62 = vsel %vm3768_vm11, %v3860_v35, %v9051_v0  ;;  %v2659_v14 = vld [vmem:[%s11352_s27 + $0xa0] sm:$0xff] }
 0x379   : > { %v3861_v50 = vsel %vm3731_vm10, %v3825_v15, %v9061_v39  ;;  %v9066_v39 = vunpack.i.l.bf16 %v13230_v29 }
 0x37a   : > { %v13262_v24 = vpop.f32.mrb[8].mxu1  ;;  %4530 = vmatmul.mubr.f32.gmra.mrb[64].mxu1 %v3785_v48  ;;  %v9057_v48 = vunpack.i.h.bf16 %v13208_v37  ;;  %v8716_v37 = vunpack.i.l.bf16 %v12747_v18  ;;  %v3897_v17 = vsel %vm3768_vm11, %v3861_v50, %v9052_v4  ;;  %v3827_v4 = vsel %vm2602_vm8, %v2772_v31, %v9071_v33 }
 0x37b   : > { %v13267_v59 = vpop.f32.mrb[9].mxu1  ;;  %v13269_v56 = vpop.permute.xlu1 %9089  ;;  %4534 = vmatprep.mubr.f32.mxu1 %v3894_v47  ;;  %v2658_v47 = vld [vmem:[%s11352_s27 + $0x98] sm:$0xff]  ;;  %v8721_v33 = vunpack.i.l.bf16 %v12745_v30 }
 0x37c   : > { %v13274_v23 = vpop.permute.xlu0 %9084  ;;  %v3714_v10 = vsel %vm2602_vm8, %v2658_v47, %v8712_v19  ;;  %v3826_v0 = vsel %vm2602_vm8, %v2771_v3, %v9057_v48  ;;  %v9076_v48 = vunpack.i.l.bf16 %v13252_v34  ;;  %v3715_v15 = vsel %vm2602_vm8, %v2659_v14, %v8716_v37  ;;  %v2773_v37 = vld [vmem:[%s11352_s27 + $0xcb] sm:$0xff] }
 0x37d   : > { %v9072_v3 = vunpack.i.h.bf16 %v13225_v7 }
 0x37e   : > { %v13284_v45 = vpop.f32.mrb[10].mxu1  ;;  %4535 = vmatmul.mubr.f32.gmra.mrb[66].mxu1 %v3786_v54  ;;  %v3751_v54 = vsel %vm3731_vm10, %v3714_v10, %v8802_v2  ;;  %v8717_v2 = vunpack.i.h.bf16 %v12747_v18  ;;  %v2660_v10 = vld [vmem:[%s11352_s27 + $0xa8] sm:$0xff]  ;;  %v8897_v18 = vunpack.i.h.bf16 %v12944_v11  ;;  %v9077_v11 = vunpack.i.h.bf16 %v13252_v34 }
 0x37f   : > { %v13289_v25 = vpop.f32.mrb[11].mxu1  ;;  %v13291_v61 = vpop.permute.xlu1 %9099  ;;  %4539 = vmatprep.mubr.f32.mxu1 %v3895_v63  ;;  %v3788_v19 = vsel %vm3768_vm11, %v3751_v54, %v8892_v44  ;;  %v3862_v44 = vsel %vm3731_vm10, %v3826_v0, %v9062_v60  ;;  %v9067_v60 = vunpack.i.h.bf16 %v13230_v29  ;;  %v8811_v29 = vunpack.i.l.bf16 %v12842_v52 }
 0x380   : > { %v13296_v49 = vpop.permute.xlu0 %9094  ;;  %v3716_v0 = vsel %vm2602_vm8, %v2660_v10, %v8717_v2 }
 0x382   : > { %v13306_v51 = vpop.f32.mrb[12].mxu1  ;;  %4540 = vmatmul.mubr.f32.gmra.mrb[68].mxu1 %v3787_v53  ;;  %v8807_v53 = vunpack.i.h.bf16 %v12844_v57  ;;  %v9086_v57 = vunpack.i.l.bf16 %v13274_v23 }
 0x383   : > { %v13311_v32 = vpop.f32.mrb[13].mxu1  ;;  %4544 = vmatprep.mubr.f32.mxu1 %v3896_v62  ;;  %v13322_v46 = vpop.permute.xlu1 %9109  ;;  %v3752_v62 = vsel %vm3731_vm10, %v3715_v15, %v8806_v27  ;;  %v3898_v27 = vsel %vm3768_vm11, %v3862_v44, %v9066_v39  ;;  %v3828_v15 = vsel %vm2602_vm8, %v2773_v37, %v9072_v3  ;;  %v9091_v39 = vunpack.i.l.bf16 %v13269_v56 }
 0x384   : > { %v13316_v55 = vpop.permute.xlu0 %9104  ;;  %v3789_v54 = vsel %vm3768_vm11, %v3752_v62, %v8896_v12  ;;  %v3863_v12 = vsel %vm3731_vm10, %v3827_v4, %v9076_v48  ;;  %v3753_v31 = vsel %vm3731_vm10, %v3716_v0, %v8807_v53  ;;  %v8901_v62 = vunpack.i.l.bf16 %v12942_v6 }
 0x385   : > { %v3790_v2 = vsel %vm3768_vm11, %v3753_v31, %v8897_v18  ;;  %v9081_v48 = vunpack.i.l.bf16 %v13247_v43  ;;  %v3899_v53 = vsel %vm3768_vm11, %v3863_v12, %v9067_v60  ;;  %v8722_v6 = vunpack.i.h.bf16 %v12745_v30 }
 0x386   : > { %v13328_v63 = vpop.f32.mrb[14].mxu1  ;;  %4545 = vmatmul.mubr.f32.gmra.mrb[70].mxu1 %v3788_v19  ;;  %v2774_v19 = vld [vmem:[%s11352_s27 + $0xd3] sm:$0xff]  ;;  %v8812_v18 = vunpack.i.h.bf16 %v12842_v52  ;;  %v9096_v0 = vunpack.i.l.bf16 %v13296_v49 }
 0x387   : > { %v13333_v35 = vpop.f32.mrb[15].mxu1  ;;  %4549 = vmatprep.mubr.f32.mxu1 %v3897_v17  ;;  %v13354_v14 = vpop.permute.xlu1 %9119  ;;  %v2661_v17 = vld [vmem:[%s11352_s27 + $0xb0] sm:$0xff]  ;;  %v3829_v3 = vsel %vm2602_vm8, %v2774_v19, %v9086_v57  ;;  %v2662_v57 = vld [vmem:[%s11352_s27 + $0xb8] sm:$0xff]  ;;  %v9106_v19 = vunpack.i.l.bf16 %v13316_v55 }
 0x388   : > { %v13338_v47 = vpop.permute.xlu0 %9114  ;;  %v3717_v4 = vsel %vm2602_vm8, %v2661_v17, %v8721_v33  ;;  %v9082_v33 = vunpack.i.h.bf16 %v13247_v43  ;;  %v3865_v52 = vsel %vm3731_vm10, %v3829_v3, %v9091_v39  ;;  %v8816_v39 = vunpack.i.l.bf16 %v12853_v16 }
 0x389   : > { %v3754_v60 = vsel %vm3731_vm10, %v3717_v4, %v8811_v29  ;;  %v3901_v4 = vsel %vm3768_vm11, %v3865_v52, %v9096_v0 }
 0x38a   : > { %v13348_v50 = vpop.f32.mrb[16].mxu1  ;;  %4550 = vmatmul.mubr.f32.gmra.mrb[72].mxu1 %v3789_v54  ;;  %v3864_v54 = vsel %vm3731_vm10, %v3828_v15, %v9077_v11  ;;  %v3791_v11 = vsel %vm3768_vm11, %v3754_v60, %v8901_v62  ;;  %v8726_v15 = vunpack.i.l.bf16 %v12758_v28  ;;  %v3718_v62 = vsel %vm2602_vm8, %v2662_v57, %v8722_v6  ;;  %v2663_v60 = vld [vmem:[%s11352_s27 + $0xc0] sm:$0xff] }
 0x38b   : > { %v13356_v7 = vpop.f32.mrb[17].mxu1  ;;  %4554 = vmatprep.mubr.f32.mxu1 %v3898_v27  ;;  %v9087_v27 = vunpack.i.h.bf16 %v13274_v23  ;;  %v13388_v31 = vpop.permute.xlu1 %9129  ;;  %v2775_v23 = vld [vmem:[%s11352_s27 + $0xdb] sm:$0xff]  ;;  %v3900_v29 = vsel %vm3768_vm11, %v3864_v54, %v9081_v48  ;;  %v3755_v3 = vsel %vm3731_vm10, %v3718_v62, %v8812_v18  ;;  %v9097_v48 = vunpack.i.h.bf16 %v13296_v49 }
 0x38c   : > { %v13370_v44 = vpop.permute.xlu0 %9124  ;;  %v9111_v54 = vunpack.i.l.bf16 %v13322_v46  ;;  %v9101_v6 = vunpack.i.l.bf16 %v13291_v61  ;;  %v3719_v49 = vsel %vm2602_vm8, %v2663_v60, %v8726_v15  ;;  %v9116_v62 = vunpack.i.l.bf16 %v13338_v47 }
 0x38e   : > { %v13372_v34 = vpop.f32.mrb[18].mxu1  ;;  %4555 = vmatmul.mubr.f32.gmra.mrb[74].mxu1 %v3790_v2  ;;  %v13383_v37 = vpop.f32.mrb[4].mxu0  ;;  %v9092_v2 = vunpack.i.h.bf16 %v13269_v56 }
 0x38f   : > { %v13376_v10 = vpop.f32.mrb[19].mxu1  ;;  %4559 = vmatprep.mubr.f32.mxu1 %v3899_v53  ;;  %v13392_v30 = vpop.f32.mrb[5].mxu0  ;;  %v2776_v53 = vld [vmem:[%s11352_s27 + $0xe3] sm:$0xff] }
 0x390   : > { %v13406_v43 = vpop.permute.xlu0 %9134  ;;  %v13421_v57 = vpop.permute.xlu1 %9139  ;;  %v3831_v18 = vsel %vm2602_vm8, %v2776_v53, %v9106_v19 }
 0x392   : > { %v13395_v12 = vpop.f32.mrb[20].mxu1  ;;  %4560 = vmatmul.mubr.f32.gmra.mrb[76].mxu1 %v3791_v11  ;;  %v3830_v11 = vsel %vm2602_vm8, %v2775_v23, %v9087_v27  ;;  %v8727_v27 = vunpack.i.h.bf16 %v12758_v28  ;;  %v9107_v23 = vunpack.i.h.bf16 %v13316_v55  ;;  %v9102_v28 = vunpack.i.h.bf16 %v13291_v61  ;;  %v2777_v55 = vld [vmem:[%s11352_s27 + $0xeb] sm:$0xff] }
 0x393   : > { %16896 = vst [vmem:[#allocation24_spill] sm:$0xff] %v13395_v12  ;;  %v13401_v17 = vpop.f32.mrb[21].mxu1  ;;  %4564 = vmatprep.mubr.f32.mxu1 %v3900_v29  ;;  %v3792_v29 = vsel %vm3768_vm11, %v3755_v3, %v9082_v33  ;;  %v3866_v0 = vsel %vm3731_vm10, %v3830_v11, %v9092_v2  ;;  %v8817_v33 = vunpack.i.h.bf16 %v12853_v16  ;;  %v3756_v3 = vsel %vm3731_vm10, %v3719_v49, %v8816_v39 }
 0x394   : > { %16897 = vst [vmem:[#allocation25_spill] sm:$0xff] %v13401_v17  ;;  %v13439_v53 = vpop.permute.xlu0 %9144  ;;  %v3793_v2 = vsel %vm3768_vm11, %v3756_v3, %v9097_v48  ;;  %v3867_v16 = vsel %vm3731_vm10, %v3831_v18, %v9111_v54  ;;  %v3902_v39 = vsel %vm3768_vm11, %v3866_v0, %v9101_v6  ;;  %v8731_v11 = vunpack.i.l.bf16 %v12756_v20  ;;  %v13455_v3 = vpop.permute.xlu1 %9149 }
 0x395   : > { %v9112_v61 = vunpack.i.h.bf16 %v13322_v46  ;;  %v8821_v48 = vunpack.i.l.bf16 %v12851_v58  ;;  %v3903_v18 = vsel %vm3768_vm11, %v3867_v16, %v9116_v62  ;;  %v9117_v6 = vunpack.i.h.bf16 %v13338_v47 }
 0x396   : > { %v13417_v56 = vpop.f32.mrb[22].mxu1  ;;  %4565 = vmatmul.mubr.f32.gmra.mrb[78].mxu1 %v3792_v29  ;;  %v13429_v52 = vpop.f32.mrb[6].mxu0  ;;  %v2664_v29 = vld [vmem:[%s11352_s27 + $0xc8] sm:$0xff]  ;;  %v9131_v0 = vunpack.i.l.bf16 %v13388_v31  ;;  %v8732_v62 = vunpack.i.h.bf16 %v12756_v20 }
 0x397   : > { %16898 = vst [vmem:[#allocation26_spill] sm:$0xff] %v13417_v56  ;;  %v13423_v12 = vpop.f32.mrb[23].mxu1  ;;  %4569 = vmatprep.mubr.f32.mxu1 %v3901_v4  ;;  %v13436_v19 = vpop.f32.mrb[7].mxu0  ;;  %v9126_v4 = vunpack.i.l.bf16 %v13370_v44  ;;  %v3720_v49 = vsel %vm2602_vm8, %v2664_v29, %v8727_v27  ;;  %v9121_v29 = vunpack.i.l.bf16 %v13354_v14 }
 0x398   : > { %16899 = vst [vmem:[#allocation27_spill] sm:$0xff] %v13423_v12  ;;  %v3757_v54 = vsel %vm3731_vm10, %v3720_v49, %v8817_v33  ;;  %v9127_v49 = vunpack.i.h.bf16 %v13370_v44  ;;  %v9146_v44 = vunpack.i.l.bf16 %v13439_v53 }
 0x399   : > { %v3794_v27 = vsel %vm3768_vm11, %v3757_v54, %v9102_v28  ;;  %v8822_v28 = vunpack.i.h.bf16 %v12851_v58  ;;  %v9136_v54 = vunpack.i.l.bf16 %v13406_v43  ;;  %v2779_v58 = vld [vmem:[%s11352_s27 + $0xfb] sm:$0xff] }
 0x39a   : > { %v13441_v15 = vpop.f32.mrb[24].mxu1  ;;  %4570 = vmatmul.mubr.f32.gmra.mrb[80].mxu1 %v3793_v2  ;;  %v3832_v2 = vsel %vm2602_vm8, %v2777_v55, %v9107_v23  ;;  %v13471_v23 = vpop.permute.xlu0 %9154 }
 0x39b   : > { %16900 = vst [vmem:[#allocation28_spill] sm:$0xff] %v13441_v15  ;;  %v13447_v60 = vpop.f32.mrb[25].mxu1  ;;  %4574 = vmatprep.mubr.f32.mxu1 %v3902_v39  ;;  %v2778_v15 = vld [vmem:[%s11352_s27 + $0xf3] sm:$0xff]  ;;  %v3868_v16 = vsel %vm3731_vm10, %v3832_v2, %v9112_v61  ;;  %v13491_v61 = vpop.permute.xlu1 %9159 }
 0x39c   : > { %16901 = vst [vmem:[#allocation29_spill] sm:$0xff] %v13447_v60  ;;  %v2665_v60 = vld [vmem:[%s11352_s27 + $0xd0] sm:$0xff]  ;;  %v3833_v33 = vsel %vm2602_vm8, %v2778_v15, %v9126_v4  ;;  %v2666_v4 = vld [vmem:[%s11352_s27 + $0xd8] sm:$0xff] }
 0x39d   : > { %v3721_v47 = vsel %vm2602_vm8, %v2665_v60, %v8731_v11  ;;  %v3869_v11 = vsel %vm3731_vm10, %v3833_v33, %v9131_v0 }
 0x39e   : > { %v13463_v46 = vpop.f32.mrb[26].mxu1  ;;  %4575 = vmatmul.mubr.f32.gmra.mrb[82].mxu1 %v3794_v27  ;;  %v3758_v15 = vsel %vm3731_vm10, %v3721_v47, %v8821_v48  ;;  %v3904_v48 = vsel %vm3768_vm11, %v3868_v16, %v9121_v29  ;;  %v8736_v47 = vunpack.i.l.bf16 %v12767_v21  ;;  %v9151_v29 = vunpack.i.l.bf16 %v13455_v3  ;;  %v13507_v16 = vpop.permute.xlu0 %9164 }
 0x39f   : > { %16902 = vst [vmem:[#allocation30_spill] sm:$0xff] %v13463_v46  ;;  %v13467_v39 = vpop.f32.mrb[27].mxu1  ;;  %4579 = vmatprep.mubr.f32.mxu1 %v3903_v18  ;;  %v13475_v55 = vpop.f32.mrb[8].mxu0  ;;  %v9122_v18 = vunpack.i.h.bf16 %v13354_v14  ;;  %v3795_v60 = vsel %vm3768_vm11, %v3758_v15, %v9117_v6  ;;  %v9132_v14 = vunpack.i.h.bf16 %v13388_v31  ;;  %v3722_v6 = vsel %vm2602_vm8, %v2666_v4, %v8732_v62  ;;  %v2780_v15 = vld [vmem:[%s11352_s27 + $0x103] sm:$0xff] }
 0x3a0   : > { %16903 = vst [vmem:[#allocation31_spill] sm:$0xff] %v13467_v39  ;;  %v13482_v20 = vpop.f32.mrb[9].mxu0  ;;  %v3759_v33 = vsel %vm3731_vm10, %v3722_v6, %v8822_v28  ;;  %v3905_v46 = vsel %vm3768_vm11, %v3869_v11, %v9136_v54  ;;  %v2667_v39 = vld [vmem:[%s11352_s27 + $0xe0] sm:$0xff]  ;;  %v9141_v4 = vunpack.i.l.bf16 %v13421_v57  ;;  %v3835_v28 = vsel %vm2602_vm8, %v2780_v15, %v9146_v44  ;;  %v2668_v15 = vld [vmem:[%s11352_s27 + $0xe8] sm:$0xff] }
 0x3a1   : > { %v3796_v62 = vsel %vm3768_vm11, %v3759_v33, %v9122_v18  ;;  %v9147_v18 = vunpack.i.h.bf16 %v13439_v53  ;;  %v9156_v6 = vunpack.i.l.bf16 %v13471_v23  ;;  %v13524_v33 = vpop.permute.xlu1 %9169  ;;  %v9166_v53 = vunpack.i.l.bf16 %v13507_v16 }
 0x3a2   : > { %4580 = vmatmul.mubr.f32.gmra.mrb[84].mxu1 %v3795_v60  ;;  %v9137_v60 = vunpack.i.h.bf16 %v13406_v43  ;;  %v3723_v43 = vsel %vm2602_vm8, %v2667_v39, %v8736_v47 }
 0x3a3   : > { %4584 = vmatprep.mubr.f32.mxu1 %v3904_v48 }
 0x3a5   : > { %v13485_v27 = vpop.f32.mrb[28].mxu1 }
 0x3a6   : > { %16904 = vst [vmem:[#allocation32_spill] sm:$0xff] %v13485_v27  ;;  %v13493_v2 = vpop.f32.mrb[29].mxu1  ;;  %v16906_v27 = vld [vmem:[#allocation21_spill] sm:$0xff]  ;;  %4585 = vmatmul.mubr.f32.gmra.mrb[86].mxu1 %v3796_v62 }
 0x3a7   : > { %16905 = vst [vmem:[#allocation33_spill] sm:$0xff] %v13493_v2  ;;  %v8826_v0 = vunpack.i.l.bf16 %v16906_v27  ;;  %v3834_v2 = vsel %vm2602_vm8, %v2779_v58, %v9127_v49  ;;  %v8737_v49 = vunpack.i.h.bf16 %v12767_v21  ;;  %4589 = vmatprep.mubr.f32.mxu1 %v3905_v46  ;;  %v8827_v58 = vunpack.i.h.bf16 %v16906_v27  ;;  %v2781_v27 = vld [vmem:[%s11352_s27 + $0x10b] sm:$0xff] }
 0x3a8   : > { %v3870_v54 = vsel %vm3731_vm10, %v3834_v2, %v9132_v14  ;;  %v13519_v11 = vpop.f32.mrb[10].mxu0  ;;  %v9142_v46 = vunpack.i.h.bf16 %v13421_v57  ;;  %v3871_v2 = vsel %vm3731_vm10, %v3835_v28, %v9151_v29  ;;  %v16909_v14 = vld [vmem:[#allocation17_spill] sm:$0xff] }
 0x3a9   : > { %v13509_v31 = vpop.f32.mrb[30].mxu1  ;;  %v3760_v44 = vsel %vm3731_vm10, %v3723_v43, %v8826_v0  ;;  %v13528_v21 = vpop.f32.mrb[11].mxu0  ;;  %v3906_v47 = vsel %vm3768_vm11, %v3870_v54, %v9141_v4  ;;  %v8741_v62 = vunpack.i.l.bf16 %v16909_v14  ;;  %v9152_v0 = vunpack.i.h.bf16 %v13455_v3 }
 0x3aa   : > { %16907 = vst [vmem:[#allocation34_spill] sm:$0xff] %v13509_v31  ;;  %v13513_v48 = vpop.f32.mrb[31].mxu1  ;;  %v3797_v39 = vsel %vm3768_vm11, %v3760_v44, %v9137_v60  ;;  %v13538_v43 = vpop.permute.xlu0 %9174  ;;  %v3724_v57 = vsel %vm2602_vm8, %v2668_v15, %v8737_v49  ;;  %v16910_v31 = vld [vmem:[#allocation20_spill] sm:$0xff]  ;;  %v3907_v28 = vsel %vm3768_vm11, %v3871_v2, %v9156_v6  ;;  %v9157_v4 = vunpack.i.h.bf16 %v13471_v23 }
 0x3ab   : > { %16908 = vst [vmem:[#allocation35_spill] sm:$0xff] %v13513_v48  ;;  %4590 = vmatmul.mubr.f32.gmra.mrb[88].mxu1 %v3797_v39  ;;  %v2782_v48 = vld [vmem:[%s11352_s27 + $0x113] sm:$0xff]  ;;  %v8831_v60 = vunpack.i.l.bf16 %v16910_v31  ;;  %v3761_v29 = vsel %vm3731_vm10, %v3724_v57, %v8827_v58  ;;  %v3836_v39 = vsel %vm2602_vm8, %v2781_v27, %v9147_v18  ;;  %v9171_v54 = vunpack.i.l.bf16 %v13524_v33  ;;  %v13553_v15 = vpop.permute.xlu1 %9179 }
 0x3ac   : > { %4594 = vmatprep.mubr.f32.mxu1 %v3906_v47  ;;  %v2669_v44 = vld [vmem:[%s11352_s27 + $0xf0] sm:$0xff]  ;;  %v3798_v3 = vsel %vm3768_vm11, %v3761_v29, %v9142_v46  ;;  %v13550_v47 = vpop.f32.mrb[12].mxu0  ;;  %v9161_v49 = vunpack.i.l.bf16 %v13491_v61  ;;  %v3837_v58 = vsel %vm2602_vm8, %v2782_v48, %v9166_v53  ;;  %v8742_v18 = vunpack.i.h.bf16 %v16909_v14 }
 0x3ad   : > { %v13556_v6 = vpop.f32.mrb[13].mxu0  ;;  %v3725_v23 = vsel %vm2602_vm8, %v2669_v44, %v8741_v62  ;;  %v3872_v2 = vsel %vm3731_vm10, %v3836_v39, %v9152_v0  ;;  %v8832_v46 = vunpack.i.h.bf16 %v16910_v31  ;;  %v9167_v27 = vunpack.i.h.bf16 %v13507_v16  ;;  %v16911_v16 = vld [vmem:[#allocation19_spill] sm:$0xff] }
 0x3ae   : > { %v9176_v57 = vunpack.i.l.bf16 %v13538_v43  ;;  %v3762_v29 = vsel %vm3731_vm10, %v3725_v23, %v8831_v60  ;;  %v9162_v48 = vunpack.i.h.bf16 %v13491_v61  ;;  %v9185_v53 = vpop.permute.xlu0 %9184  ;;  %v3873_v62 = vsel %vm3731_vm10, %v3837_v58, %v9171_v54  ;;  %v2784_v23 = vld [vmem:[%s11352_s27 + $0x123] sm:$0xff] }
 0x3af   : > { %4595 = vmatmul.mubr.f32.gmra.mrb[90].mxu1 %v3798_v3  ;;  %v2670_v3 = vld [vmem:[%s11352_s27 + $0xf8] sm:$0xff]  ;;  %v3799_v14 = vsel %vm3768_vm11, %v3762_v29, %v9157_v4  ;;  %v9186_v0 = vunpack.i.l.bf16 %v9185_v53  ;;  %v3908_v31 = vsel %vm3768_vm11, %v3872_v2, %v9161_v49  ;;  %v8746_v44 = vunpack.i.l.bf16 %v16911_v16  ;;  %v16912_v61 = vld [vmem:[#allocation23_spill] sm:$0xff]  ;;  %v9190_v12 = vpop.permute.xlu1 %9189  ;;  %v2671_v58 = vld [vmem:[%s11352_s27 + $0x100] sm:$0xff] }
 0x3b0   : > { %4599 = vmatprep.mubr.f32.mxu1 %v3907_v28  ;;  %v2783_v28 = vld [vmem:[%s11352_s27 + $0x11b] sm:$0xff]  ;;  %v9172_v39 = vunpack.i.h.bf16 %v13524_v33  ;;  %v3726_v60 = vsel %vm2602_vm8, %v2670_v3, %v8742_v18  ;;  %v8836_v56 = vunpack.i.l.bf16 %v16912_v61  ;;  %v3909_v54 = vsel %vm3768_vm11, %v3873_v62, %v9176_v57 }
 0x3b1   : > { %v3763_v4 = vsel %vm3731_vm10, %v3726_v60, %v8832_v46  ;;  %v3838_v29 = vsel %vm2602_vm8, %v2783_v28, %v9167_v27  ;;  %v9177_v49 = vunpack.i.h.bf16 %v13538_v43  ;;  %v9191_v2 = vunpack.i.l.bf16 %v9190_v12 }
 0x3b2   : > { %v3800_v33 = vsel %vm3768_vm11, %v3763_v4, %v9162_v48  ;;  %v9181_v18 = vunpack.i.l.bf16 %v13553_v15  ;;  %v9187_v3 = vunpack.i.h.bf16 %v9185_v53  ;;  %v3839_v46 = vsel %vm2602_vm8, %v2784_v23, %v9186_v0  ;;  %v9195_v62 = vpop.permute.xlu0 %9194  ;;  %v2785_v48 = vld [vmem:[%s11352_s27 + $0x12b] sm:$0x3f] }
 0x3b3   : > { %4600 = vmatmul.mubr.f32.gmra.mrb[92].mxu1 %v3799_v14  ;;  %v13582_v14 = vpop.f32.mrb[14].mxu0  ;;  %v8747_v57 = vunpack.i.h.bf16 %v16911_v16  ;;  %v3727_v43 = vsel %vm2602_vm8, %v2671_v58, %v8746_v44  ;;  %v3874_v27 = vsel %vm3731_vm10, %v3838_v29, %v9172_v39  ;;  %v8837_v28 = vunpack.i.h.bf16 %v16912_v61  ;;  %v2672_v53 = vld [vmem:[%s11352_s27 + $0x108] sm:$0xff]  ;;  %v9200_v61 = vpop.permute.xlu1 %9199  ;;  %v16914_v29 = vld [vmem:[#allocation22_spill] sm:$0xff] }
 0x3b4   : > { %4604 = vmatprep.mubr.f32.mxu1 %v3908_v31  ;;  %v13586_v31 = vpop.f32.mrb[15].mxu0  ;;  %v9196_v60 = vunpack.i.l.bf16 %v9195_v62  ;;  %v3764_v4 = vsel %vm3731_vm10, %v3727_v43, %v8836_v56  ;;  %v9182_v0 = vunpack.i.h.bf16 %v13553_v15  ;;  %v9192_v23 = vunpack.i.h.bf16 %v9190_v12 }
 0x3b5   : > { %v3875_v16 = vsel %vm3731_vm10, %v3839_v46, %v9191_v2  ;;  %v3910_v44 = vsel %vm3768_vm11, %v3874_v27, %v9181_v18  ;;  %v3840_v39 = vsel %vm2602_vm8, %v2785_v48, %v9187_v3  ;;  %v3728_v56 = vsel %vm2602_vm8, %v2672_v53, %v8747_v57  ;;  %v13608_v46 = vpop.f32.mrb[16].mxu0 }
 0x3b6   : > { %v8841_v43 = vunpack.i.l.bf16 %v16914_v29  ;;  %v9201_v17 = vunpack.i.l.bf16 %v9200_v61  ;;  %v3765_v12 = vsel %vm3731_vm10, %v3728_v56, %v8837_v28  ;;  %v3911_v15 = vsel %vm3768_vm11, %v3875_v16, %v9196_v60  ;;  %v13610_v27 = vpop.f32.mrb[17].mxu0 }
 0x3b7   : > { %4605 = vmatmul.mubr.f32.gmra.mrb[94].mxu1 %v3800_v33  ;;  %v3801_v33 = vsel %vm3768_vm11, %v3764_v4, %v9177_v49  ;;  %v2673_v49 = vld [vmem:[%s11352_s27 + $0x110] sm:$0xff]  ;;  %v9197_v2 = vunpack.i.h.bf16 %v9195_v62  ;;  %v3802_v18 = vsel %vm3768_vm11, %v3765_v12, %v9182_v0  ;;  %v3876_v3 = vsel %vm3731_vm10, %v3840_v39, %v9192_v23  ;;  %v2674_v4 = vld [vmem:[%s11352_s27 + $0x118] sm:$0x3f] }
 0x3b8   : > { %4609 = vmatprep.mubr.f32.mxu1 %v3909_v54  ;;  %v16913_v54 = vld [vmem:[#allocation18_spill] sm:$0xff]  ;;  %v8842_v28 = vunpack.i.h.bf16 %v16914_v29  ;;  %v3912_v62 = vsel %vm3768_vm11, %v3876_v3, %v9201_v17  ;;  %v9202_v53 = vunpack.i.h.bf16 %v9200_v61 }
 0x3b9   : > { %v8751_v58 = vunpack.i.l.bf16 %v16913_v54  ;;  %v8752_v57 = vunpack.i.h.bf16 %v16913_v54 }
 0x3bb   : > { %4610 = vmatmul.mubr.f32.gmra.mrb[96].mxu1 %v3801_v33  ;;  %v3729_v48 = vsel %vm2602_vm8, %v2673_v49, %v8751_v58  ;;  %v3730_v23 = vsel %vm2602_vm8, %v2674_v4, %v8752_v57 }
 0x3bc   : > { %4614 = vmatprep.mubr.f32.mxu1 %v3910_v44  ;;  %v3766_v60 = vsel %vm3731_vm10, %v3729_v48, %v8841_v43  ;;  %v3767_v33 = vsel %vm3731_vm10, %v3730_v23, %v8842_v28  ;;  %v13622_v44 = vpop.f32.mrb[18].mxu0 }
 0x3bd   : > { %v3803_v0 = vsel %vm3768_vm11, %v3766_v60, %v9197_v2  ;;  %v3804_v16 = vsel %vm3768_vm11, %v3767_v33, %v9202_v53  ;;  %v13624_v39 = vpop.f32.mrb[19].mxu0  ;;  %v13661_v60 = vld [vmem:[%s16360_s5] ss:$0 sm:$0xff] }
 0x3be   : > { %v13626_v54 = vpop.f32.mrb[20].mxu0 }
 0x3bf   : > { %4615 = vmatmul.mubr.f32.gmra.mrb[98].mxu1 %v3802_v18  ;;  %v13628_v17 = vpop.f32.mrb[21].mxu0 }
 0x3c0   : > { %4619 = vmatprep.mubr.f32.mxu1 %v3911_v15  ;;  %v13630_v58 = vpop.f32.mrb[22].mxu0 }
 0x3c1   : > { %v13632_v61 = vpop.f32.mrb[23].mxu0 }
 0x3c3   : > { %4620 = vmatmul.mubr.f32.gmra.mrb[100].mxu1 %v3803_v0  ;;  %v13669_v0 = vadd.f32 %v13661_v60, %v13135_v9 }
 0x3c4   : > { %4624 = vmatprep.mubr.f32.mxu1 %v3912_v62  ;;  %v13634_v56 = vpop.f32.mrb[24].mxu0 }
 0x3c5   : > { %v13636_v29 = vpop.f32.mrb[25].mxu0  ;;  %16923 = vst [vmem:[#allocation44_spill] sm:$0xff] %v13669_v0 }
 0x3c7   : > { %4625 = vmatmul.mubr.f32.gmra.mrb[102].mxu1 %v3804_v16 }
 0x3c8   : > { %v13638_v43 = vpop.f32.mrb[26].mxu0 }
 0x3c9   : > { %v13640_v12 = vpop.f32.mrb[27].mxu0 }
 0x3cc   : > { %v13642_v15 = vpop.f32.mrb[28].mxu0 }
 0x3cd   : > { %v13644_v49 = vpop.f32.mrb[29].mxu0 }
 0x3ea   : > { %v13646_v2 = vpop.f32.mrb[30].mxu0 }
 0x3eb   : > { %16915 = vst [vmem:[#allocation36_spill] sm:$0xff] %v13646_v2  ;;  %v13648_v18 = vpop.f32.mrb[31].mxu0 }
 0x3ec   : > { %16916 = vst [vmem:[#allocation37_spill] sm:$0xff] %v13648_v18 }
 0x3f3   : > { %v13650_v3 = vpop.f32.mrb[32].mxu0 }
 0x3f4   : > { %16917 = vst [vmem:[#allocation38_spill] sm:$0xff] %v13650_v3  ;;  %v13652_v57 = vpop.f32.mrb[33].mxu0 }
 0x3f5   : > { %16918 = vst [vmem:[#allocation39_spill] sm:$0xff] %v13652_v57 }
 0x3f7   : > { %v13654_v48 = vpop.f32.mrb[34].mxu0 }
 0x3f8   : > { %16919 = vst [vmem:[#allocation40_spill] sm:$0xff] %v13654_v48  ;;  %v13656_v28 = vpop.f32.mrb[35].mxu0 }
 0x3f9   : > { %16920 = vst [vmem:[#allocation41_spill] sm:$0xff] %v13656_v28  ;;  %v13675_v28 = vadd.f32 %v13130_v22, %v13661_v60 }
 0x3fb   : > { %16924 = vst [vmem:[#allocation45_spill] sm:$0xff] %v13675_v28 }
 0x40b   : > { %v13663_v62 = vpop.f32.mrb[36].mxu0 }
 0x40c   : > { %16921 = vst [vmem:[#allocation42_spill] sm:$0xff] %v13663_v62  ;;  %v13665_v4 = vpop.f32.mrb[37].mxu0 }
 0x40d   : > { %16922 = vst [vmem:[#allocation43_spill] sm:$0xff] %v13665_v4  ;;  %v4451_v53 = vpop.f32.mrb[32].mxu1 }
 0x40e   : > { %v4697_v23 = vadd.f32 %v13392_v30, %v4451_v53  ;;  %v4453_v33 = vpop.f32.mrb[33].mxu1  ;;  %v13685_v30 = vadd.f32 %v13661_v60, %v13157_v36 }
 0x40f   : > { %v13679_v2 = vpop.f32.mrb[38].mxu0 }
 0x410   : > { %v4875_v16 = vadd.f32 %v4697_v23, %v13669_v0  ;;  %v13681_v18 = vpop.f32.mrb[39].mxu0  ;;  %16925 = vst [vmem:[#allocation46_spill] sm:$0xff] %v13685_v30 }
 0x411   : > { %v4456_v48 = vpop.f32.mrb[34].mxu1 }
 0x412   : > { %v8056_v3 = vmul.f32 -1.442695, %v4875_v16  ;;  %v4702_v62 = vadd.f32 %v13383_v37, %v4456_v48  ;;  %v4458_v57 = vpop.f32.mrb[35].mxu1 }
 0x414   : > { %9743 = vpow2.f32 %v8056_v3  ;;  %v4876_v4 = vadd.f32 %v4702_v62, %v13675_v28  ;;  %v13691_v3 = vadd.f32 %v13152_v8, %v13661_v60 }
 0x415   : > { %v4461_v9 = vpop.f32.mrb[36].mxu1 }
 0x416   : > { %v8057_v53 = vmul.f32 -1.442695, %v4876_v4  ;;  %v4707_v22 = vadd.f32 %v13436_v19, %v4461_v9  ;;  %v4463_v23 = vpop.f32.mrb[37].mxu1  ;;  %16926 = vst [vmem:[#allocation47_spill] sm:$0xff] %v13691_v3  ;;  %v13697_v19 = vadd.f32 %v13661_v60, %v13179_v1 }
 0x418   : > { %9745 = vpow2.f32 %v8057_v53  ;;  %v4877_v37 = vadd.f32 %v4707_v22, %v13685_v30  ;;  %16927 = vst [vmem:[#allocation48_spill] sm:$0xff] %v13697_v19 }
 0x419   : > { %v4466_v57 = vpop.f32.mrb[38].mxu1 }
 0x41a   : > { %v8058_v48 = vmul.f32 -1.442695, %v4877_v37  ;;  %v4712_v62 = vadd.f32 %v13429_v52, %v4466_v57  ;;  %v4468_v33 = vpop.f32.mrb[39].mxu1  ;;  %v13703_v57 = vadd.f32 %v13174_v26, %v13661_v60 }
 0x41c   : > { %9747 = vpow2.f32 %v8058_v48  ;;  %v4878_v36 = vadd.f32 %v4712_v62, %v13691_v3  ;;  %16928 = vst [vmem:[#allocation49_spill] sm:$0xff] %v13703_v57 }
 0x41d   : > { %v4471_v16 = vpop.f32.mrb[40].mxu1 }
 0x41e   : > { %v9744_v4 = vpop.eup %9743  ;;  %v8059_v9 = vmul.f32 -1.442695, %v4878_v36  ;;  %v4717_v53 = vadd.f32 %v13482_v20, %v4471_v16  ;;  %v4473_v22 = vpop.f32.mrb[41].mxu1 }
 0x41f   : > { %v5019_v23 = vadd.f32 1.0, %v9744_v4  ;;  %v13709_v4 = vadd.f32 %v13661_v60, %v13201_v5 }
 0x420   : > { %9749 = vpow2.f32 %v8059_v9  ;;  %v4879_v8 = vadd.f32 %v4717_v53, %v13697_v19 }
 0x421   : > { %9751 = vrcp.f32 %v5019_v23  ;;  %v4476_v52 = vpop.f32.mrb[42].mxu1  ;;  %16929 = vst [vmem:[#allocation50_spill] sm:$0xff] %v13709_v4  ;;  %v10060_v23 = vmov 0.0  }
 0x422   : > { %v9746_v37 = vpop.eup %9745  ;;  %v8060_v48 = vmul.f32 -1.442695, %v4879_v8  ;;  %v4722_v62 = vadd.f32 %v13475_v55, %v4476_v52  ;;  %v4478_v1 = vpop.f32.mrb[43].mxu1  ;;  %5343 = vst.msk [vmem:[#allocation2] sm:$0xff] %vm2602_vm8, %v10060_v23  ;;  %5344 = vst.msk [vmem:[#allocation2 + $0x8] sm:$0xff] %vm2602_vm8, %v10060_v23  ;;  %v13723_v8 = vadd.f32 %v13196_v41, %v13661_v60 }
 0x423   : > { %v5020_v33 = vadd.f32 1.0, %v9746_v37  ;;  %5384 = vst.msk [vmem:[#allocation2 + $0x131] sm:$0xff] %vm2602_vm8, %v10060_v23  ;;  %5385 = vst.msk [vmem:[#allocation2 + $0x139] sm:$0xff] %vm2602_vm8, %v10060_v23 }
 0x424   : > { %9753 = vpow2.f32 %v8060_v48  ;;  %v4880_v20 = vadd.f32 %v4722_v62, %v13703_v57  ;;  %16930 = vst [vmem:[#allocation51_spill] sm:$0xff] %v13723_v8  ;;  %5346 = vst.msk [vmem:[#allocation2 + $0x10] sm:$0x7] %vm5345_vm12, %v10060_v23 }
 0x425   : > { %9755 = vrcp.f32 %v5020_v33  ;;  %v4481_v36 = vpop.f32.mrb[44].mxu1  ;;  %5386 = vst.msk [vmem:[#allocation2 + $0x141] sm:$0x7] %vm5345_vm12, %v10060_v23 }
 0x426   : > { %v9748_v16 = vpop.eup %9747  ;;  %v8061_v9 = vmul.f32 -1.442695, %v4880_v20  ;;  %v4727_v53 = vadd.f32 %v13528_v21, %v4481_v36  ;;  %v4483_v26 = vpop.f32.mrb[45].mxu1  ;;  %7906 = vst.msk [vmem:[%s13777_s7 + $0x11e] sm:$0x3] %vm7905_vm13, %v10060_v23 }
 0x427   : > { %v5021_v22 = vadd.f32 1.0, %v9748_v16 }
 0x428   : > { %9757 = vpow2.f32 %v8061_v9  ;;  %v4881_v55 = vadd.f32 %v4727_v53, %v13709_v4 }
 0x429   : > { %9759 = vrcp.f32 %v5021_v22  ;;  %v4486_v5 = vpop.f32.mrb[46].mxu1 }
 0x42a   : > { %v9750_v21 = vpop.eup %9749  ;;  %v8062_v52 = vmul.f32 -1.442695, %v4881_v55  ;;  %v4732_v37 = vadd.f32 %v13519_v11, %v4486_v5  ;;  %v4488_v48 = vpop.f32.mrb[47].mxu1  ;;  %v13735_v11 = vadd.f32 %v13661_v60, %v13223_v38  ;;  %v13745_v38 = vadd.f32 %v13218_v13, %v13661_v60 }
 0x42b   : > { %v13726_v62 = vpop.eup %9751  ;;  %v5022_v1 = vadd.f32 1.0, %v9750_v21  ;;  %v13755_v13 = vadd.f32 %v13661_v60, %v13245_v40  ;;  %v13765_v40 = vadd.f32 %v13240_v42, %v13661_v60 }
 0x42c   : > { %9761 = vpow2.f32 %v8062_v52  ;;  %v4882_v33 = vadd.f32 %v4732_v37, %v13723_v8  ;;  %5163 = vrot.lane.b32.xlu0 %v13726_v62, %s10059_s8  ;;  %16931 = vst [vmem:[#allocation52_spill] sm:$0xff] %v13735_v11  ;;  %16932 = vst [vmem:[#allocation53_spill] sm:$0xff] %v13745_v38 }
 0x42d   : > { %9763 = vrcp.f32 %v5022_v1  ;;  %v4491_v41 = vpop.f32.mrb[48].mxu1  ;;  %16933 = vst [vmem:[#allocation54_spill] sm:$0xff] %v13755_v13  ;;  %16934 = vst [vmem:[#allocation55_spill] sm:$0xff] %v13765_v40 }
 0x42e   : > { %v9754_v20 = vpop.eup %9753  ;;  %v8063_v36 = vmul.f32 -1.442695, %v4882_v33  ;;  %v4737_v16 = vadd.f32 %v13556_v6, %v4491_v41  ;;  %v4493_v9 = vpop.f32.mrb[49].mxu1 }
 0x42f   : > { %v13738_v53 = vpop.eup %9755  ;;  %v5023_v26 = vadd.f32 1.0, %v9754_v20 }
 0x430   : > { %9765 = vpow2.f32 %v8063_v36  ;;  %v4883_v22 = vadd.f32 %v4737_v16, %v13735_v11  ;;  %5165 = vrot.lane.b32.xlu1 %v13738_v53, %s10059_s8 }
 0x431   : > { %9767 = vrcp.f32 %v5023_v26  ;;  %v4496_v55 = vpop.f32.mrb[50].mxu1 }
 0x432   : > { %v9758_v5 = vpop.eup %9757  ;;  %v8064_v21 = vmul.f32 -1.442695, %v4883_v22  ;;  %v4742_v6 = vadd.f32 %v13550_v47, %v4496_v55  ;;  %v4498_v52 = vpop.f32.mrb[51].mxu1 }
 0x433   : > { %v13748_v37 = vpop.eup %9759  ;;  %v5024_v48 = vadd.f32 1.0, %v9758_v5 }
 0x434   : > { %9769 = vpow2.f32 %v8064_v21  ;;  %v4884_v1 = vadd.f32 %v4742_v6, %v13745_v38  ;;  %5167 = vrot.lane.b32.xlu0 %v13748_v37, %s10059_s8 }
 0x435   : > { %9771 = vrcp.f32 %v5024_v48  ;;  %v4501_v33 = vpop.f32.mrb[52].mxu1 }
 0x436   : > { %v9762_v41 = vpop.eup %9761  ;;  %v8065_v20 = vmul.f32 -1.442695, %v4884_v1  ;;  %v4747_v47 = vadd.f32 %v13586_v31, %v4501_v33  ;;  %v4503_v36 = vpop.f32.mrb[53].mxu1  ;;  %v13783_v1 = vadd.f32 %v13661_v60, %v13267_v59  ;;  %v13793_v59 = vadd.f32 %v13262_v24, %v13661_v60 }
 0x437   : > { %v13758_v16 = vpop.eup %9763  ;;  %v5025_v9 = vadd.f32 1.0, %v9762_v41  ;;  %v13803_v24 = vadd.f32 %v13661_v60, %v13289_v25  ;;  %v13813_v25 = vadd.f32 %v13284_v45, %v13661_v60  ;;  %v13823_v45 = vadd.f32 %v13661_v60, %v13311_v32 }
 0x438   : > { %9773 = vpow2.f32 %v8065_v20  ;;  %v4885_v26 = vadd.f32 %v4747_v47, %v13755_v13  ;;  %5169 = vrot.lane.b32.xlu1 %v13758_v16, %s10059_s8  ;;  %16935 = vst [vmem:[#allocation56_spill] sm:$0xff] %v13783_v1  ;;  %16936 = vst [vmem:[#allocation57_spill] sm:$0xff] %v13793_v59  ;;  %v13833_v32 = vadd.f32 %v13306_v51, %v13661_v60 }
 0x439   : > { %9775 = vrcp.f32 %v5025_v9  ;;  %v4506_v22 = vpop.f32.mrb[54].mxu1  ;;  %16937 = vst [vmem:[#allocation58_spill] sm:$0xff] %v13803_v24  ;;  %16938 = vst [vmem:[#allocation59_spill] sm:$0xff] %v13813_v25  ;;  %v13843_v51 = vadd.f32 %v13661_v60, %v13333_v35  ;;  %v13853_v35 = vadd.f32 %v13328_v63, %v13661_v60  ;;  %v13863_v63 = vadd.f32 %v13661_v60, %v13356_v7 }
 0x43a   : > { %v9766_v55 = vpop.eup %9765  ;;  %v8066_v5 = vmul.f32 -1.442695, %v4885_v26  ;;  %v4752_v31 = vadd.f32 %v13582_v14, %v4506_v22  ;;  %v4508_v21 = vpop.f32.mrb[55].mxu1  ;;  %16939 = vst [vmem:[#allocation60_spill] sm:$0xff] %v13823_v45  ;;  %16940 = vst [vmem:[#allocation61_spill] sm:$0xff] %v13833_v32  ;;  %v13873_v7 = vadd.f32 %v13348_v50, %v13661_v60  ;;  %v13883_v50 = vadd.f32 %v13661_v60, %v13376_v10 }
 0x43b   : > { %v13769_v6 = vpop.eup %9767  ;;  %v5026_v52 = vadd.f32 1.0, %v9766_v55  ;;  %16941 = vst [vmem:[#allocation62_spill] sm:$0xff] %v13843_v51  ;;  %16942 = vst [vmem:[#allocation63_spill] sm:$0xff] %v13853_v35 }
 0x43c   : > { %9777 = vpow2.f32 %v8066_v5  ;;  %v4886_v48 = vadd.f32 %v4752_v31, %v13765_v40  ;;  %5171 = vrot.lane.b32.xlu0 %v13769_v6, %s10059_s8  ;;  %16943 = vst [vmem:[#allocation64_spill] sm:$0xff] %v13863_v63  ;;  %16944 = vst [vmem:[#allocation65_spill] sm:$0xff] %v13873_v7 }
 0x43d   : > { %9779 = vrcp.f32 %v5026_v52  ;;  %v4511_v42 = vpop.f32.mrb[56].mxu1  ;;  %16946 = vst [vmem:[#allocation67_spill] sm:$0xff] %v13883_v50 }
 0x43e   : > { %v9770_v14 = vpop.eup %9769  ;;  %v8067_v33 = vmul.f32 -1.442695, %v4886_v48  ;;  %v4757_v41 = vadd.f32 %v13610_v27, %v4511_v42  ;;  %v4513_v20 = vpop.f32.mrb[57].mxu1 }
 0x43f   : > { %v13786_v47 = vpop.eup %9771  ;;  %v5027_v36 = vadd.f32 1.0, %v9770_v14 }
 0x440   : > { %9781 = vpow2.f32 %v8067_v33  ;;  %v4887_v9 = vadd.f32 %v4757_v41, %v13783_v1  ;;  %5173 = vrot.lane.b32.xlu1 %v13786_v47, %s10059_s8 }
 0x441   : > { %9783 = vrcp.f32 %v5027_v36  ;;  %v4516_v23 = vpop.f32.mrb[58].mxu1 }
 0x442   : > { %v9774_v26 = vpop.eup %9773  ;;  %v8068_v22 = vmul.f32 -1.442695, %v4887_v9  ;;  %v4762_v27 = vadd.f32 %v13608_v46, %v4516_v23  ;;  %v4518_v55 = vpop.f32.mrb[59].mxu1 }
 0x443   : > { %v13796_v5 = vpop.eup %9775  ;;  %v5028_v31 = vadd.f32 1.0, %v9774_v26 }
 0x444   : > { %9785 = vpow2.f32 %v8068_v22  ;;  %v4888_v21 = vadd.f32 %v4762_v27, %v13793_v59  ;;  %5175 = vrot.lane.b32.xlu0 %v13796_v5, %s10059_s8 }
 0x445   : > { %9787 = vrcp.f32 %v5028_v31  ;;  %v4521_v52 = vpop.f32.mrb[60].mxu1 }
 0x446   : > { %v9778_v48 = vpop.eup %9777  ;;  %v8069_v42 = vmul.f32 -1.442695, %v4888_v21  ;;  %v4767_v46 = vadd.f32 %v13624_v39, %v4521_v52  ;;  %v4523_v14 = vpop.f32.mrb[61].mxu1 }
 0x447   : > { %v13806_v33 = vpop.eup %9779  ;;  %v5029_v41 = vadd.f32 1.0, %v9778_v48 }
 0x448   : > { %9789 = vpow2.f32 %v8069_v42  ;;  %v4889_v20 = vadd.f32 %v4767_v46, %v13803_v24  ;;  %5177 = vrot.lane.b32.xlu1 %v13806_v33, %s10059_s8 }
 0x449   : > { %9791 = vrcp.f32 %v5029_v41  ;;  %v4526_v36 = vpop.f32.mrb[62].mxu1 }
 0x44a   : > { %v9782_v9 = vpop.eup %9781  ;;  %v8070_v23 = vmul.f32 -1.442695, %v4889_v20  ;;  %v4772_v39 = vadd.f32 %v13622_v44, %v4526_v36  ;;  %v4528_v26 = vpop.f32.mrb[63].mxu1 }
 0x44b   : > { %v13816_v22 = vpop.eup %9783  ;;  %v5030_v27 = vadd.f32 1.0, %v9782_v9 }
 0x44c   : > { %9793 = vpow2.f32 %v8070_v23  ;;  %v4890_v55 = vadd.f32 %v4772_v39, %v13813_v25  ;;  %5179 = vrot.lane.b32.xlu0 %v13816_v22, %s10059_s8 }
 0x44d   : > { %9795 = vrcp.f32 %v5030_v27  ;;  %v4531_v31 = vpop.f32.mrb[64].mxu1 }
 0x44e   : > { %v9786_v21 = vpop.eup %9785  ;;  %v8071_v52 = vmul.f32 -1.442695, %v4890_v55  ;;  %v4777_v44 = vadd.f32 %v13628_v17, %v4531_v31  ;;  %v4533_v48 = vpop.f32.mrb[65].mxu1 }
 0x44f   : > { %v13826_v42 = vpop.eup %9787  ;;  %v5031_v46 = vadd.f32 1.0, %v9786_v21 }
 0x450   : > { %9797 = vpow2.f32 %v8071_v52  ;;  %v4891_v14 = vadd.f32 %v4777_v44, %v13823_v45  ;;  %5181 = vrot.lane.b32.xlu1 %v13826_v42, %s10059_s8 }
 0x451   : > { %9799 = vrcp.f32 %v5031_v46  ;;  %v4536_v41 = vpop.f32.mrb[66].mxu1 }
 0x452   : > { %v9790_v20 = vpop.eup %9789  ;;  %v8072_v36 = vmul.f32 -1.442695, %v4891_v14  ;;  %v4782_v17 = vadd.f32 %v13626_v54, %v4536_v41  ;;  %v4538_v9 = vpop.f32.mrb[67].mxu1 }
 0x453   : > { %v13836_v23 = vpop.eup %9791  ;;  %v5032_v39 = vadd.f32 1.0, %v9790_v20 }
 0x454   : > { %9801 = vpow2.f32 %v8072_v36  ;;  %v4892_v26 = vadd.f32 %v4782_v17, %v13833_v32  ;;  %5183 = vrot.lane.b32.xlu0 %v13836_v23, %s10059_s8 }
 0x455   : > { %9803 = vrcp.f32 %v5032_v39  ;;  %v4541_v27 = vpop.f32.mrb[68].mxu1 }
 0x456   : > { %v9794_v55 = vpop.eup %9793  ;;  %v8073_v31 = vmul.f32 -1.442695, %v4892_v26  ;;  %v4787_v54 = vadd.f32 %v13632_v61, %v4541_v27  ;;  %v4543_v21 = vpop.f32.mrb[69].mxu1 }
 0x457   : > { %v13846_v52 = vpop.eup %9795  ;;  %v5033_v44 = vadd.f32 1.0, %v9794_v55 }
 0x458   : > { %9805 = vpow2.f32 %v8073_v31  ;;  %v4893_v48 = vadd.f32 %v4787_v54, %v13843_v51  ;;  %5185 = vrot.lane.b32.xlu1 %v13846_v52, %s10059_s8 }
 0x459   : > { %9807 = vrcp.f32 %v5033_v44  ;;  %v4546_v46 = vpop.f32.mrb[70].mxu1 }
 0x45a   : > { %v9798_v14 = vpop.eup %9797  ;;  %v8074_v41 = vmul.f32 -1.442695, %v4893_v48  ;;  %v4792_v61 = vadd.f32 %v13630_v58, %v4546_v46  ;;  %v4548_v20 = vpop.f32.mrb[71].mxu1 }
 0x45b   : > { %v13856_v36 = vpop.eup %9799  ;;  %v5034_v17 = vadd.f32 1.0, %v9798_v14 }
 0x45c   : > { %9809 = vpow2.f32 %v8074_v41  ;;  %v4894_v9 = vadd.f32 %v4792_v61, %v13853_v35  ;;  %5187 = vrot.lane.b32.xlu0 %v13856_v36, %s10059_s8  ;;  %v16974_v35 = vld [vmem:[#allocation41_spill] sm:$0xff] }
 0x45d   : > { %9811 = vrcp.f32 %v5034_v17  ;;  %v4551_v39 = vpop.f32.mrb[72].mxu1 }
 0x45e   : > { %v9802_v26 = vpop.eup %9801  ;;  %v8075_v27 = vmul.f32 -1.442695, %v4894_v9  ;;  %v4797_v58 = vadd.f32 %v13636_v29, %v4551_v39  ;;  %v4553_v55 = vpop.f32.mrb[73].mxu1 }
 0x45f   : > { %v13866_v31 = vpop.eup %9803  ;;  %v5035_v54 = vadd.f32 1.0, %v9802_v26  ;;  %v345_v55 = vld [vmem:[%s16359_s4 + $0x100] sm:$0xff] }
 0x460   : > { %9813 = vpow2.f32 %v8075_v27  ;;  %v4895_v21 = vadd.f32 %v4797_v58, %v13863_v63  ;;  %5189 = vrot.lane.b32.xlu1 %v13866_v31, %s10059_s8 }
 0x461   : > { %9815 = vrcp.f32 %v5035_v54  ;;  %v4556_v44 = vpop.f32.mrb[74].mxu1  ;;  %v346_v54 = vld [vmem:[%s16359_s4 + $0x108] sm:$0xff] }
 0x462   : > { %v9806_v48 = vpop.eup %9805  ;;  %v8076_v46 = vmul.f32 -1.442695, %v4895_v21  ;;  %v4802_v29 = vadd.f32 %v13634_v56, %v4556_v44  ;;  %v4558_v14 = vpop.f32.mrb[75].mxu1  ;;  %v13899_v44 = vadd.f32 %v13372_v34, %v13661_v60 }
 0x463   : > { %v13876_v41 = vpop.eup %9807  ;;  %v5036_v61 = vadd.f32 1.0, %v9806_v48  ;;  %v13902_v14 = vpack.c.bf16 %v346_v54, %v345_v55 }
 0x464   : > { %16945 = vst [vmem:[#allocation66_spill] sm:$0xff] %v13876_v41  ;;  %9817 = vpow2.f32 %v8076_v46  ;;  %v4896_v20 = vadd.f32 %v4802_v29, %v13873_v7  ;;  %5191 = vrot.lane.b32.xlu0 %v13876_v41, %s10059_s8  ;;  %16948 = vst [vmem:[#allocation69_spill] sm:$0xff] %v13899_v44 }
 0x465   : > { %9819 = vrcp.f32 %v5036_v61  ;;  %v4561_v17 = vpop.f32.mrb[76].mxu1  ;;  %8565 = vmatprep.subr.bf16.mxu1 %v13902_v14 }
 0x466   : > { %v9810_v9 = vpop.eup %9809  ;;  %v8077_v39 = vmul.f32 -1.442695, %v4896_v20  ;;  %v4807_v56 = vadd.f32 %v13640_v12, %v4561_v17  ;;  %v4563_v26 = vpop.f32.mrb[77].mxu1  ;;  %v347_v17 = vld [vmem:[%s16359_s4 + $0x110] sm:$0xff]  ;;  %8567 = vmatpush3.bf16.msra.mxu1 %v13902_v14 }
 0x467   : > { %v13886_v27 = vpop.eup %9811  ;;  %v5037_v58 = vadd.f32 1.0, %v9810_v9  ;;  %v348_v9 = vld [vmem:[%s16359_s4 + $0x118] sm:$0xff] }
 0x468   : > { %16947 = vst [vmem:[#allocation68_spill] sm:$0xff] %v13886_v27  ;;  %9821 = vpow2.f32 %v8077_v39  ;;  %v4897_v21 = vadd.f32 %v4807_v56, %v13883_v50  ;;  %5193 = vrot.lane.b32.xlu1 %v13886_v27, %s10059_s8  ;;  %v16950_v26 = vld [vmem:[#allocation25_spill] sm:$0xff] }
 0x469   : > { %9823 = vrcp.f32 %v5037_v58  ;;  %v4566_v10 = vpop.f32.mrb[78].mxu1  ;;  %v13921_v58 = vadd.f32 %v13661_v60, %v16950_v26  ;;  %v350_v26 = vlaneseq }
 0x46a   : > { %v9814_v12 = vpop.eup %9813  ;;  %v8078_v48 = vmul.f32 -1.442695, %v4897_v21  ;;  %v4812_v46 = vadd.f32 %v13638_v43, %v4566_v10  ;;  %v4568_v29 = vpop.f32.mrb[79].mxu1  ;;  %v13916_v43 = vpack.c.bf16 %v348_v9, %v347_v17 }
 0x46b   : > { %v13904_v61 = vpop.eup %9815  ;;  %v5038_v20 = vadd.f32 1.0, %v9814_v12  ;;  %16951 = vst [vmem:[#allocation71_spill] sm:$0xff] %v13921_v58 }
 0x46c   : > { %16949 = vst [vmem:[#allocation70_spill] sm:$0xff] %v13904_v61  ;;  %9825 = vpow2.f32 %v8078_v48  ;;  %v4898_v34 = vadd.f32 %v4812_v46, %v13899_v44  ;;  %5195 = vrot.lane.b32.xlu0 %v13904_v61, %s10059_s8  ;;  %8566 = vmatprep.subr.bf16.mxu1 %v13916_v43 }
 0x46d   : > { %9827 = vrcp.f32 %v5038_v20  ;;  %v4571_v39 = vpop.f32.mrb[80].mxu1  ;;  %8568 = vmatpush3.bf16.msra.mxu1 %v13916_v43  ;;  %v16953_v20 = vld [vmem:[#allocation24_spill] sm:$0xff] }
 0x46e   : > { %v9818_v56 = vpop.eup %9817  ;;  %v8079_v55 = vmul.f32 -1.442695, %v4898_v34  ;;  %v4817_v54 = vadd.f32 %v13644_v49, %v4571_v39  ;;  %v4573_v21 = vpop.f32.mrb[81].mxu1  ;;  %v13933_v49 = vadd.f32 %v16953_v20, %v13661_v60 }
 0x46f   : > { %v13925_v10 = vpop.eup %9819  ;;  %v5039_v12 = vadd.f32 1.0, %v9818_v56 }
 0x470   : > { %16952 = vst [vmem:[#allocation72_spill] sm:$0xff] %v13925_v10  ;;  %9829 = vpow2.f32 %v8079_v55  ;;  %v4899_v48 = vadd.f32 %v4817_v54, %v13921_v58  ;;  %5197 = vrot.lane.b32.xlu1 %v13925_v10, %s10059_s8  ;;  %16954 = vst [vmem:[#allocation73_spill] sm:$0xff] %v13933_v49 }
 0x471   : > { %9831 = vrcp.f32 %v5039_v12  ;;  %v4576_v46 = vpop.f32.mrb[82].mxu1  ;;  %v16956_v12 = vld [vmem:[#allocation27_spill] sm:$0xff] }
 0x472   : > { %v9822_v29 = vpop.eup %9821  ;;  %v8080_v17 = vmul.f32 -1.442695, %v4899_v48  ;;  %v4822_v9 = vadd.f32 %v13642_v15, %v4576_v46  ;;  %v4578_v34 = vpop.f32.mrb[83].mxu1  ;;  %v13943_v20 = vadd.f32 %v13661_v60, %v16956_v12  ;;  %v16958_v15 = vld [vmem:[#allocation37_spill] sm:$0xff]  ;;  %v16960_v12 = vld [vmem:[#allocation26_spill] sm:$0xff] }
 0x473   : > { %v13936_v39 = vpop.eup %9823  ;;  %v5040_v56 = vadd.f32 1.0, %v9822_v29 }
 0x474   : > { %16955 = vst [vmem:[#allocation74_spill] sm:$0xff] %v13936_v39  ;;  %9833 = vpow2.f32 %v8080_v17  ;;  %v4900_v55 = vadd.f32 %v4822_v9, %v13933_v49  ;;  %5199 = vrot.lane.b32.xlu0 %v13936_v39, %s10059_s8  ;;  %16957 = vst [vmem:[#allocation75_spill] sm:$0xff] %v13943_v20  ;;  %v13948_v17 = vshrl.u32 %v350_v26, 7 }
 0x475   : > { %9835 = vrcp.f32 %v5040_v56  ;;  %v4581_v54 = vpop.f32.mrb[84].mxu1 }
 0x476   : > { %v9826_v21 = vpop.eup %9825  ;;  %v8081_v48 = vmul.f32 -1.442695, %v4900_v55  ;;  %v4827_v46 = vadd.f32 %v16958_v15, %v4581_v54  ;;  %v4583_v34 = vpop.f32.mrb[85].mxu1  ;;  %v13955_v55 = vadd.f32 %v16960_v12, %v13661_v60  ;;  %v16962_v15 = vld [vmem:[#allocation36_spill] sm:$0xff]  ;;  %v13986_v7 = vadd.s32 16, %v13948_v17 }
 0x477   : > { %v13946_v58 = vpop.eup %9827  ;;  %v5041_v29 = vadd.f32 1.0, %v9826_v21  ;;  %v14322_v3 = vadd.s32 104, %v13948_v17 }
 0x478   : > { %16959 = vst [vmem:[#allocation86_spill] sm:$0xff] %v13946_v58  ;;  %9837 = vpow2.f32 %v8081_v48  ;;  %v4901_v9 = vadd.f32 %v4827_v46, %v13943_v20  ;;  %5201 = vrot.lane.b32.xlu1 %v13946_v58, %s10059_s8  ;;  %16961 = vst [vmem:[#allocation76_spill] sm:$0xff] %v13955_v55  ;;  %v13961_v48 = vmul.u32.u64.low 3817748708, %v13948_v17  ;;  %v13962_v46 = vmul.u32.u64.high 3817748708, %v13948_v17, %v13961_v48 }
 0x479   : > { %9839 = vrcp.f32 %v5041_v29  ;;  %v4586_v56 = vpop.f32.mrb[86].mxu1 }
 0x47a   : > { %v9830_v49 = vpop.eup %9829  ;;  %v8082_v54 = vmul.f32 -1.442695, %v4901_v9  ;;  %v4832_v34 = vadd.f32 %v16962_v15, %v4586_v56  ;;  %v4588_v50 = vpop.f32.mrb[87].mxu1  ;;  %v16964_v9 = vld [vmem:[#allocation29_spill] sm:$0xff]  ;;  %v16966_v15 = vld [vmem:[#allocation39_spill] sm:$0xff] }
 0x47b   : > { %v13958_v21 = vpop.eup %9831  ;;  %v5042_v26 = vadd.f32 1.0, %v9830_v49  ;;  %v13969_v56 = vadd.f32 %v13661_v60, %v16964_v9 }
 0x47c   : > { %16963 = vst [vmem:[#allocation87_spill] sm:$0xff] %v13958_v21  ;;  %9841 = vpow2.f32 %v8082_v54  ;;  %v4902_v29 = vadd.f32 %v4832_v34, %v13955_v55  ;;  %5203 = vrot.lane.b32.xlu0 %v13958_v21, %s10059_s8  ;;  %v13975_v54 = vadd.s32 8, %v13948_v17 }
 0x47d   : > { %9843 = vrcp.f32 %v5042_v26  ;;  %16965 = vst [vmem:[#allocation77_spill] sm:$0xff] %v13969_v56 }
 0x47e   : > { %v4591_v12 = vpop.f32.mrb[88].mxu1  ;;  %v9834_v20 = vpop.eup %9833  ;;  %v8083_v50 = vmul.f32 -1.442695, %v4902_v29  ;;  %v16968_v29 = vld [vmem:[#allocation28_spill] sm:$0xff] }
 0x47f   : > { %v4837_v49 = vadd.f32 %v16966_v15, %v4591_v12  ;;  %v4593_v44 = vpop.f32.mrb[89].mxu1  ;;  %v13972_v63 = vpop.eup %9835  ;;  %v5043_v48 = vadd.f32 1.0, %v9834_v20  ;;  %v13982_v55 = vadd.f32 %v16968_v29, %v13661_v60  ;;  %v16970_v12 = vld [vmem:[#allocation38_spill] sm:$0xff] }
 0x480   : > { %16967 = vst [vmem:[#allocation78_spill] sm:$0xff] %v13972_v63  ;;  %9845 = vpow2.f32 %v8083_v50  ;;  %5205 = vrot.lane.b32.xlu1 %v13972_v63, %s10059_s8 }
 0x481   : > { %v4903_v34 = vadd.f32 %v4837_v49, %v13969_v56  ;;  %9847 = vrcp.f32 %v5043_v48  ;;  %16969 = vst [vmem:[#allocation88_spill] sm:$0xff] %v13982_v55  ;;  %v393_v56 = vshrl.u32 %v13962_v46, 4 }
 0x482   : > { %v4596_v26 = vpop.f32.mrb[90].mxu1  ;;  %v9838_v9 = vpop.eup %9837  ;;  %v13992_v48 = vmul.u32.u64.low 3817748708, %v13975_v54  ;;  %v13993_v51 = vmul.u32.u64.high 3817748708, %v13975_v54, %v13992_v48 }
 0x483   : > { %v8084_v44 = vmul.f32 -1.442695, %v4903_v34  ;;  %v4842_v15 = vadd.f32 %v16970_v12, %v4596_v26  ;;  %v4598_v20 = vpop.f32.mrb[91].mxu1  ;;  %v13988_v50 = vpop.eup %9839  ;;  %v5044_v49 = vadd.f32 1.0, %v9838_v9  ;;  %v16972_v34 = vld [vmem:[#allocation31_spill] sm:$0xff] }
 0x484   : > { %16971 = vst [vmem:[#allocation89_spill] sm:$0xff] %v13988_v50  ;;  %5207 = vrot.lane.b32.xlu0 %v13988_v50, %s10059_s8  ;;  %v14000_v26 = vadd.f32 %v13661_v60, %v16972_v34  ;;  %v14004_v32 = vmul.u32.u64.low 3817748708, %v13986_v7  ;;  %v14005_v48 = vmul.u32.u64.high 3817748708, %v13986_v7, %v14004_v32 }
 0x485   : > { %9849 = vpow2.f32 %v8084_v44  ;;  %v4904_v29 = vadd.f32 %v4842_v15, %v13982_v55  ;;  %v394_v55 = vmul.u32 18, %v393_v56  ;;  %v16976_v32 = vld [vmem:[#allocation30_spill] sm:$0xff] }
 0x486   : > { %16973 = vst [vmem:[#allocation79_spill] sm:$0xff] %v14000_v26  ;;  %9851 = vrcp.f32 %v5044_v49  ;;  %v4601_v12 = vpop.f32.mrb[92].mxu1  ;;  %v9842_v20 = vpop.eup %9841  ;;  %v14013_v49 = vadd.s32 24, %v13948_v17  ;;  %v14020_v34 = vadd.f32 %v16976_v32, %v13661_v60  ;;  %v415_v13 = vshrl.u32 %v14005_v48, 4 }
 0x487   : > { %v8085_v9 = vmul.f32 -1.442695, %v4904_v29  ;;  %v4847_v46 = vadd.f32 %v16974_v35, %v4601_v12  ;;  %v4603_v45 = vpop.f32.mrb[93].mxu1  ;;  %v14007_v44 = vpop.eup %9843  ;;  %v5045_v15 = vadd.f32 1.0, %v9842_v20  ;;  %v16978_v12 = vld [vmem:[#allocation40_spill] sm:$0xff]  ;;  %v14026_v25 = vsub.s32 %v13948_v17, %v394_v55 }
 0x488   : > { %16975 = vst [vmem:[#allocation80_spill] sm:$0xff] %v14007_v44  ;;  %5209 = vrot.lane.b32.xlu1 %v14007_v44, %s10059_s8  ;;  %v14016_v45 = vadd.s32 32, %v13948_v17  ;;  %16977 = vst [vmem:[#allocation154_spill] sm:$0xff] %v14020_v34 }
 0x489   : > { %9853 = vpow2.f32 %v8085_v9  ;;  %v4905_v24 = vadd.f32 %v4847_v46, %v14000_v26  ;;  %vm783_vm14 = vcmp.ne.s32.totalorder %v14026_v25, 0  ;;  %vm819_vm15 = vcmp.lt.s32.totalorder %v14026_v25, 0 }
 0x48a   : > { %9855 = vrcp.f32 %v5045_v15  ;;  %v4606_v35 = vpop.f32.mrb[94].mxu1  ;;  %v9846_v29 = vpop.eup %9845  ;;  %v404_v15 = vshrl.u32 %v13993_v51, 4  ;;  %vm14068_vm0 = vmand %vm819_vm15, %vm783_vm14 }
 0x48b   : > { %v8086_v56 = vmul.f32 -1.442695, %v4905_v24  ;;  %v4852_v20 = vadd.f32 %v16978_v12, %v4606_v35  ;;  %v4608_v9 = vpop.f32.mrb[95].mxu1  ;;  %v14023_v46 = vpop.eup %9847  ;;  %v5046_v26 = vadd.f32 1.0, %v9846_v29 }
 0x48c   : > { %16979 = vst [vmem:[#allocation81_spill] sm:$0xff] %v14023_v46  ;;  %5211 = vrot.lane.b32.xlu0 %v14023_v46, %s10059_s8  ;;  %v14033_v32 = vmul.u32.u64.low 3817748708, %v14013_v49  ;;  %v14034_v24 = vmul.u32.u64.high 3817748708, %v14013_v49, %v14033_v32  ;;  %v14037_v12 = vmul.u32.u64.low 3817748708, %v14016_v45  ;;  %v14038_v29 = vmul.u32.u64.high 3817748708, %v14016_v45, %v14037_v12  ;;  %v16980_v9 = vld [vmem:[#allocation33_spill] sm:$0xff] }
 0x48d   : > { %9857 = vpow2.f32 %v8086_v56  ;;  %v4906_v1 = vadd.f32 %v4852_v20, %v14020_v34  ;;  %v14042_v51 = vadd.f32 %v13661_v60, %v16980_v9  ;;  %v16982_v20 = vld [vmem:[#allocation43_spill] sm:$0xff] }
 0x48e   : > { %9859 = vrcp.f32 %v5046_v26  ;;  %v4611_v35 = vpop.f32.mrb[96].mxu1  ;;  %v14050_v26 = vadd.s32 40, %v13948_v17  ;;  %v426_v19 = vshrl.u32 %v14034_v24, 4 }
 0x48f   : > { %v9850_v55 = vpop.eup %9849  ;;  %16981 = vst [vmem:[#allocation90_spill] sm:$0xff] %v14042_v51  ;;  %v8087_v56 = vmul.f32 -1.442695, %v4906_v1  ;;  %v4857_v34 = vadd.f32 %v16982_v20, %v4611_v35  ;;  %v4613_v59 = vpop.f32.mrb[97].mxu1  ;;  %v405_v1 = vmul.u32 18, %v404_v15  ;;  %v16986_v20 = vld [vmem:[#allocation42_spill] sm:$0xff] }
 0x490   : > { %v14046_v40 = vpop.eup %9851  ;;  %v5047_v32 = vadd.f32 1.0, %v9850_v55  ;;  %v16984_v59 = vld [vmem:[#allocation32_spill] sm:$0xff] }
 0x491   : > { %16983 = vst [vmem:[#allocation187_spill] sm:$0xff] %v14046_v40  ;;  %9861 = vpow2.f32 %v8087_v56  ;;  %v4907_v12 = vadd.f32 %v4857_v34, %v14042_v51  ;;  %5213 = vrot.lane.b32.xlu1 %v14046_v40, %s10059_s8  ;;  %v14058_v48 = vadd.f32 %v16984_v59, %v13661_v60  ;;  %v891_v56 = vadd.s32 18, %v14026_v25 }
 0x492   : > { %9863 = vrcp.f32 %v5047_v32  ;;  %v4616_v35 = vpop.f32.mrb[98].mxu1  ;;  %v416_v34 = vmul.u32 18, %v415_v13  ;;  %v16990_v13 = vld [vmem:[#allocation34_spill] sm:$0xff] }
 0x493   : > { %16985 = vst [vmem:[#allocation188_spill] sm:$0xff] %v14058_v48  ;;  %v9854_v55 = vpop.eup %9853  ;;  %v8088_v9 = vmul.f32 -1.442695, %v4907_v12  ;;  %v4862_v11 = vadd.f32 %v16986_v20, %v4616_v35  ;;  %v4618_v38 = vpop.f32.mrb[99].mxu1  ;;  %v14073_v32 = vmul.u32.u64.low 3817748708, %v14050_v26  ;;  %v14074_v12 = vmul.u32.u64.high 3817748708, %v14050_v26, %v14073_v32 }
 0x494   : > { %v14062_v51 = vpop.eup %9855  ;;  %v5048_v4 = vadd.f32 1.0, %v9854_v55  ;;  %v14077_v38 = vadd.s32 48, %v13948_v17  ;;  %v14081_v59 = vadd.f32 %v16990_v13, %v13661_v60  ;;  %v14087_v55 = vsub.s32 %v13975_v54, %v405_v1  ;;  %v16992_v20 = vld [vmem:[#allocation35_spill] sm:$0xff] }
 0x495   : > { %16987 = vst [vmem:[#allocation91_spill] sm:$0xff] %v14062_v51  ;;  %9865 = vpow2.f32 %v8088_v9  ;;  %v4908_v35 = vadd.f32 %v4862_v11, %v14058_v48  ;;  %5215 = vrot.lane.b32.xlu0 %v14062_v51, %s10059_s8  ;;  %v14091_v8 = vadd.f32 %v13661_v60, %v16992_v20  ;;  %v437_v13 = vshrl.u32 %v14038_v29, 4  ;;  %v5387_v51 = vld [vmem:[#allocation2] sm:$0xff] }
 0x496   : > { %16991 = vst [vmem:[#allocation122_spill] sm:$0xff] %v14081_v59  ;;  %9867 = vrcp.f32 %v5048_v4  ;;  %v4621_v32 = vpop.f32.mrb[100].mxu1  ;;  %v927_v54 = vsel %vm14068_vm0, %v891_v56, %v14026_v25  ;;  %v14100_v1 = vadd.s32 56, %v13948_v17  ;;  %v14105_v20 = vsub.s32 %v13986_v7, %v416_v34 }
 0x497   : > { %16993 = vst [vmem:[#allocation123_spill] sm:$0xff] %v14091_v8  ;;  %v9858_v57 = vpop.eup %9857  ;;  %v8089_v9 = vmul.f32 -1.442695, %v4908_v35  ;;  %v4867_v11 = vadd.f32 %v13681_v18, %v4621_v32  ;;  %v4623_v48 = vpop.f32.mrb[101].mxu1  ;;  %v14108_v24 = vmul.u32.u64.low 3817748708, %v14077_v38  ;;  %v14109_v29 = vmul.u32.u64.high 3817748708, %v14077_v38, %v14108_v24 }
 0x498   : > { %v14102_v60 = vpop.eup %9859  ;;  %v5049_v4 = vadd.f32 1.0, %v9858_v57  ;;  %vm784_vm1 = vcmp.ne.s32.totalorder %v14087_v55, 0  ;;  %vm820_vm2 = vcmp.lt.s32.totalorder %v14087_v55, 0  ;;  %v892_v57 = vadd.s32 18, %v14087_v55 }
 0x499   : > { %16994 = vst [vmem:[#allocation82_spill] sm:$0xff] %v14102_v60  ;;  %9869 = vpow2.f32 %v8089_v9  ;;  %v4909_v18 = vadd.f32 %v4867_v11, %v14091_v8  ;;  %5217 = vrot.lane.b32.xlu1 %v14102_v60, %s10059_s8  ;;  %v427_v7 = vmul.u32 18, %v426_v19  ;;  %v438_v48 = vmul.u32 18, %v437_v13  ;;  %vm14124_vm3 = vmand %vm820_vm2, %vm784_vm1 }
 0x49a   : > { %9871 = vrcp.f32 %v5049_v4  ;;  %v4626_v25 = vpop.f32.mrb[102].mxu1  ;;  %v14119_v32 = vmul.u32.u64.low 3817748708, %v14100_v1  ;;  %v14120_v9 = vmul.u32.u64.high 3817748708, %v14100_v1, %v14119_v32  ;;  %vm785_vm4 = vcmp.ne.s32.totalorder %v14105_v20, 0 }
 0x49b   : > { %v9862_v56 = vpop.eup %9861  ;;  %v8090_v34 = vmul.f32 -1.442695, %v4909_v18  ;;  %v4872_v15 = vadd.f32 %v13679_v2, %v4626_v25  ;;  %v4628_v35 = vpop.f32.mrb[103].mxu1  ;;  %v448_v19 = vshrl.u32 %v14074_v12, 4  ;;  %vm821_vm5 = vcmp.lt.s32.totalorder %v14105_v20, 0 }
 0x49c   : > { %v14122_v11 = vpop.eup %9863  ;;  %v5050_v24 = vadd.f32 1.0, %v9862_v56  ;;  %v14135_v13 = vadd.s32 64, %v13948_v17  ;;  %vm14137_vm6 = vcmp.lt.s32.totalorder %v927_v54, 16  ;;  %v14142_v18 = vsub.s32 %v14013_v49, %v427_v7  ;;  %vm14158_vm7 = vmand %vm821_vm5, %vm785_vm4 }
 0x49d   : > { %16995 = vst [vmem:[#allocation83_spill] sm:$0xff] %v14122_v11  ;;  %9873 = vpow2.f32 %v8090_v34  ;;  %v4910_v2 = vadd.f32 %v4872_v15, %v14081_v59  ;;  %5219 = vrot.lane.b32.xlu0 %v14122_v11, %s10059_s8  ;;  %v928_v34 = vsel %vm14124_vm3, %v892_v57, %v14087_v55  ;;  %v893_v15 = vadd.s32 18, %v14105_v20 }
 0x49e   : > { %9875 = vrcp.f32 %v5050_v24  ;;  %v5164_v56 = vpop.permute.xlu0 %5163  ;;  %v14149_v35 = vsub.s32 %v14016_v45, %v438_v48  ;;  %v9969_v24 = vld [vmem:[%s11352_s27 + $0x13] sm:$0xff]  ;;  %v449_v8 = vmul.u32 18, %v448_v19  ;;  %v459_v55 = vshrl.u32 %v14109_v29, 4 }
 0x49f   : > { %v9866_v12 = vpop.eup %9865  ;;  %v8091_v25 = vmul.f32 -1.442695, %v4910_v2  ;;  %v5271_v59 = vmul.f32 %v9969_v24, %v5164_v56  ;;  %v14166_v45 = vmul.u32.u64.low 3817748708, %v14135_v13  ;;  %v14167_v57 = vmul.u32.u64.high 3817748708, %v14135_v13, %v14166_v45 }
 0x4a0   : > { %v14151_v32 = vpop.eup %9867  ;;  %v5051_v54 = vadd.f32 1.0, %v9866_v12  ;;  %v14170_v7 = vadd.s32 72, %v13948_v17  ;;  %vm786_vm9 = vcmp.ne.s32.totalorder %v14142_v18, 0  ;;  %vm822_vm12 = vcmp.lt.s32.totalorder %v14142_v18, 0 }
 0x4a1   : > { %17000 = vst [vmem:[#allocation155_spill] sm:$0xff] %v14151_v32  ;;  %9877 = vpow2.f32 %v8091_v25  ;;  %5221 = vrot.lane.b32.xlu1 %v14151_v32, %s10059_s8  ;;  %v5307_v48 = vsel %vm14137_vm6, %v5271_v59, 0.0  ;;  %vm14177_vm13 = vcmp.lt.s32.totalorder %v928_v34, 16  ;;  %v929_v12 = vsel %vm14158_vm7, %v893_v15, %v14105_v20  ;;  %vm14197_vm0 = vmand %vm822_vm12, %vm786_vm9 }
 0x4a2   : > { %9879 = vrcp.f32 %v5051_v54  ;;  %5347 = vst.msk [vmem:[#allocation2 + $0x13] sm:$0xff] %vm2602_vm8, %v5307_v48  ;;  %v5166_v2 = vpop.permute.xlu1 %5165  ;;  %v894_v25 = vadd.s32 18, %v14142_v18  ;;  %v470_v59 = vshrl.u32 %v14120_v9, 4  ;;  %v9970_v54 = vld [vmem:[%s11352_s27 + $0x1b] sm:$0xff]  ;;  %vm787_vm14 = vcmp.ne.s32.totalorder %v14149_v35, 0 }
 0x4a3   : > { %v9870_v29 = vpop.eup %9869  ;;  %v5272_v24 = vmul.f32 %v9970_v54, %v5166_v2  ;;  %vm823_vm15 = vcmp.lt.s32.totalorder %v14149_v35, 0  ;;  %v14202_v9 = vsub.s32 %v14050_v26, %v449_v8  ;;  %v460_v34 = vmul.u32 18, %v459_v55 }
 0x4a4   : > { %v14186_v4 = vpop.eup %9871  ;;  %v5052_v56 = vadd.f32 1.0, %v9870_v29  ;;  %v14205_v15 = vmul.u32.u64.low 3817748708, %v14170_v7  ;;  %v14206_v49 = vmul.u32.u64.high 3817748708, %v14170_v7, %v14205_v15  ;;  %v14211_v48 = vadd.s32 80, %v13948_v17  ;;  %vm14229_vm2 = vmand %vm823_vm15, %vm787_vm14 }
 0x4a5   : > { %17005 = vst [vmem:[#allocation156_spill] sm:$0xff] %v14186_v4  ;;  %5223 = vrot.lane.b32.xlu0 %v14186_v4, %s10059_s8  ;;  %v5308_v45 = vsel %vm14177_vm13, %v5272_v24, 0.0  ;;  %vm14214_vm1 = vcmp.lt.s32.totalorder %v929_v12, 16  ;;  %v895_v8 = vadd.s32 18, %v14149_v35  ;;  %v471_v55 = vmul.u32 18, %v470_v59  ;;  %v9971_v15 = vld [vmem:[%s11352_s27 + $0x23] sm:$0xff] }
 0x4a6   : > { %9881 = vrcp.f32 %v5052_v56  ;;  %5348 = vst.msk [vmem:[#allocation2 + $0x1b] sm:$0xff] %vm2602_vm8, %v5308_v45  ;;  %v5168_v26 = vpop.permute.xlu0 %5167  ;;  %v930_v24 = vsel %vm14197_vm0, %v894_v25, %v14142_v18  ;;  %v14234_v45 = vadd.s32 88, %v13948_v17  ;;  %vm788_vm3 = vcmp.ne.s32.totalorder %v14202_v9, 0 }
 0x4a7   : > { %v9874_v29 = vpop.eup %9873  ;;  %v5273_v19 = vmul.f32 %v9971_v15, %v5168_v26  ;;  %vm824_vm4 = vcmp.lt.s32.totalorder %v14202_v9, 0  ;;  %v14241_v18 = vsub.s32 %v14077_v38, %v460_v34  ;;  %v481_v25 = vshrl.u32 %v14167_v57, 4 }
 0x4a8   : > { %v14219_v54 = vpop.eup %9875  ;;  %v5053_v56 = vadd.f32 1.0, %v9874_v29  ;;  %v14247_v20 = vmul.u32.u64.low 3817748708, %v14211_v48  ;;  %v14248_v29 = vmul.u32.u64.high 3817748708, %v14211_v48, %v14247_v20  ;;  %vm14251_vm5 = vcmp.lt.s32.totalorder %v930_v24, 16  ;;  %vm14275_vm6 = vmand %vm824_vm4, %vm788_vm3 }
 0x4a9   : > { %17010 = vst [vmem:[#allocation92_spill] sm:$0xff] %v14219_v54  ;;  %5225 = vrot.lane.b32.xlu1 %v14219_v54, %s10059_s8  ;;  %v5309_v59 = vsel %vm14214_vm1, %v5273_v19, 0.0  ;;  %v931_v38 = vsel %vm14229_vm2, %v895_v8, %v14149_v35  ;;  %v896_v57 = vadd.s32 18, %v14202_v9  ;;  %v14260_v34 = vsub.s32 %v14100_v1, %v471_v55  ;;  %v9972_v19 = vld [vmem:[%s11352_s27 + $0x2b] sm:$0xff] }
 0x4aa   : > { %9883 = vrcp.f32 %v5053_v56  ;;  %5349 = vst.msk [vmem:[#allocation2 + $0x23] sm:$0xff] %vm2602_vm8, %v5309_v59  ;;  %v5170_v30 = vpop.permute.xlu1 %5169  ;;  %v14266_v24 = vmul.u32.u64.low 3817748708, %v14234_v45  ;;  %v14267_v20 = vmul.u32.u64.high 3817748708, %v14234_v45, %v14266_v24  ;;  %v482_v35 = vmul.u32 18, %v481_v25 }
 0x4ab   : > { %v9878_v26 = vpop.eup %9877  ;;  %v5274_v59 = vmul.f32 %v9972_v19, %v5170_v30  ;;  %v492_v8 = vshrl.u32 %v14206_v49, 4  ;;  %v14281_v30 = vadd.s32 96, %v13948_v17  ;;  %vm789_vm7 = vcmp.ne.s32.totalorder %v14241_v18, 0  ;;  %v9973_v49 = vld [vmem:[%s11352_s27 + $0x33] sm:$0xff]  ;;  %v5424_v24 = vld [vmem:[#allocation2 + $0x9] sm:$0xff] }
 0x4ac   : > { %v14262_v2 = vpop.eup %9879  ;;  %v5054_v56 = vadd.f32 1.0, %v9878_v26  ;;  %vm825_vm9 = vcmp.lt.s32.totalorder %v14241_v18, 0  ;;  %vm14288_vm12 = vcmp.lt.s32.totalorder %v931_v38, 16  ;;  %v932_v15 = vsel %vm14275_vm6, %v896_v57, %v14202_v9 }
 0x4ad   : > { %17015 = vst [vmem:[#allocation93_spill] sm:$0xff] %v14262_v2  ;;  %5227 = vrot.lane.b32.xlu0 %v14262_v2, %s10059_s8  ;;  %v5310_v55 = vsel %vm14251_vm5, %v5274_v59, 0.0  ;;  %v5423_v59 = vld [vmem:[#allocation2 + $0x1] sm:$0xff]  ;;  %vm790_vm13 = vcmp.ne.s32.totalorder %v14260_v34, 0  ;;  %vm14306_vm14 = vmand %vm825_vm9, %vm789_vm7  ;;  %v14311_v9 = vsub.s32 %v14135_v13, %v482_v35  ;;  %v493_v57 = vmul.u32 18, %v492_v8 }
 0x4ae   : > { %9885 = vrcp.f32 %v5054_v56  ;;  %5350 = vst.msk [vmem:[#allocation2 + $0x2b] sm:$0xff] %vm2602_vm8, %v5310_v55  ;;  %v5172_v25 = vpop.permute.xlu0 %5171  ;;  %v897_v56 = vadd.s32 18, %v14241_v18  ;;  %v14314_v1 = vmul.u32.u64.low 3817748708, %v14281_v30  ;;  %v14315_v55 = vmul.u32.u64.high 3817748708, %v14281_v30, %v14314_v1 }
 0x4af   : > { %v5275_v19 = vmul.f32 %v9973_v49, %v5172_v25  ;;  %vm826_vm15 = vcmp.lt.s32.totalorder %v14260_v34, 0  ;;  %v503_v49 = vshrl.u32 %v14248_v29, 4  ;;  %vm14325_vm0 = vcmp.lt.s32.totalorder %v932_v15, 16  ;;  %v9974_v1 = vld [vmem:[%s11352_s27 + $0x3b] sm:$0xff] }
 0x4b0   : > { %v14292_v26 = vpop.eup %9881  ;;  %v9203_v8 = vpack.i.bf16 %v5424_v24, %v5423_v59  ;;  %v898_v29 = vadd.s32 18, %v14260_v34  ;;  %v514_v28 = vshrl.u32 %v14267_v20, 4  ;;  %vm14341_vm1 = vmand %vm826_vm15, %vm790_vm13  ;;  %vm791_vm2 = vcmp.ne.s32.totalorder %v14311_v9, 0 }
 0x4b1   : > { %17020 = vst [vmem:[#allocation189_spill] sm:$0xff] %v14292_v26  ;;  %5229 = vrot.lane.b32.xlu1 %v14292_v26, %s10059_s8  ;;  %v5311_v25 = vsel %vm14288_vm12, %v5275_v19, 0.0  ;;  %v933_v19 = vsel %vm14306_vm14, %v897_v56, %v14241_v18  ;;  %vm827_vm3 = vcmp.lt.s32.totalorder %v14311_v9, 0  ;;  %v14348_v18 = vsub.s32 %v14170_v7, %v493_v57  ;;  %v9975_v57 = vld [vmem:[%s11352_s27 + $0x43] sm:$0xff] }
 0x4b2   : > { %5351 = vst.msk [vmem:[#allocation2 + $0x33] sm:$0xff] %vm2602_vm8, %v5311_v25  ;;  %v5174_v35 = vpop.permute.xlu1 %5173  ;;  %v14351_v56 = vadd.s32 112, %v13948_v17  ;;  %v504_v59 = vmul.u32 18, %v503_v49  ;;  %v14356_v24 = vmul.u32.u64.low 3817748708, %v14322_v3  ;;  %v14357_v38 = vmul.u32.u64.high 3817748708, %v14322_v3, %v14356_v24  ;;  %v5426_v49 = vld [vmem:[#allocation2 + $0x19] sm:$0xff]  ;;  %vm14378_vm5 = vmand %vm827_vm3, %vm791_vm2 }
 0x4b3   : > { %v5276_v12 = vmul.f32 %v9974_v1, %v5174_v35  ;;  %vm14360_vm4 = vcmp.lt.s32.totalorder %v933_v19, 16  ;;  %v934_v13 = vsel %vm14341_vm1, %v898_v29, %v14260_v34  ;;  %v515_v24 = vmul.u32 18, %v514_v28  ;;  %v9976_v25 = vld [vmem:[%s11352_s27 + $0x4b] sm:$0xff] }
 0x4b4   : > { %v14329_v0 = vpop.eup %9883  ;;  %v525_v34 = vshrl.u32 %v14315_v55, 4  ;;  %v14384_v29 = vmul.u32.u64.low 3817748708, %v14351_v56  ;;  %v14385_v15 = vmul.u32.u64.high 3817748708, %v14351_v56, %v14384_v29  ;;  %v14388_v28 = vadd.s32 120, %v13948_v17 }
 0x4b5   : > { %17025 = vst [vmem:[#allocation190_spill] sm:$0xff] %v14329_v0  ;;  %5231 = vrot.lane.b32.xlu0 %v14329_v0, %s10059_s8  ;;  %v5312_v20 = vsel %vm14325_vm0, %v5276_v12, 0.0  ;;  %v5428_v12 = vld [vmem:[#allocation2 + $0x29] sm:$0xff]  ;;  %v899_v0 = vadd.s32 18, %v14311_v9  ;;  %vm792_vm6 = vcmp.ne.s32.totalorder %v14348_v18, 0  ;;  %vm828_vm7 = vcmp.lt.s32.totalorder %v14348_v18, 0 }
 0x4b6   : > { %5352 = vst.msk [vmem:[#allocation2 + $0x3b] sm:$0xff] %vm2602_vm8, %v5312_v20  ;;  %v5176_v35 = vpop.permute.xlu0 %5175  ;;  %v5425_v20 = vld [vmem:[#allocation2 + $0x11] sm:$0xff]  ;;  %vm14398_vm9 = vcmp.lt.s32.totalorder %v934_v13, 16  ;;  %v900_v4 = vadd.s32 18, %v14348_v18  ;;  %vm14416_vm12 = vmand %vm828_vm7, %vm792_vm6  ;;  %v526_v13 = vmul.u32 18, %v525_v34  ;;  %v14821_v11 = vadd.s32 232, %v13948_v17 }
 0x4b7   : > { %v5277_v1 = vmul.f32 %v9975_v57, %v5176_v35  ;;  %v5427_v35 = vld [vmem:[#allocation2 + $0x21] sm:$0xff]  ;;  %v14395_v57 = vsub.s32 %v14211_v48, %v504_v59  ;;  %v935_v26 = vsel %vm14378_vm5, %v899_v0, %v14311_v9  ;;  %v14408_v48 = vsub.s32 %v14234_v45, %v515_v24 }
 0x4b8   : > { %v14364_v7 = vpop.eup %9885  ;;  %v9213_v2 = vpack.i.bf16 %v5428_v12, %v5427_v35  ;;  %v14421_v0 = vmul.u32.u64.low 3817748708, %v14388_v28  ;;  %v14422_v9 = vmul.u32.u64.high 3817748708, %v14388_v28, %v14421_v0  ;;  %v14425_v45 = vadd.s32 128, %v13948_v17 }
 0x4b9   : > { %17030 = vst [vmem:[#allocation124_spill] sm:$0xff] %v14364_v7  ;;  %5233 = vrot.lane.b32.xlu1 %v14364_v7, %s10059_s8  ;;  %9204 = vrot.lane.b32.xlu0 %v9203_v8, %s10056_s20  ;;  %v5313_v8 = vsel %vm14360_vm4, %v5277_v1, 0.0  ;;  %v9208_v7 = vpack.i.bf16 %v5426_v49, %v5425_v20  ;;  %vm793_vm13 = vcmp.ne.s32.totalorder %v14395_v57, 0  ;;  %vm829_vm14 = vcmp.lt.s32.totalorder %v14395_v57, 0  ;;  %v9978_v0 = vld [vmem:[%s11352_s27 + $0x5b] sm:$0xff] }
 0x4ba   : > { %5353 = vst.msk [vmem:[#allocation2 + $0x43] sm:$0xff] %vm2602_vm8, %v5313_v8  ;;  %v5178_v29 = vpop.permute.xlu1 %5177  ;;  %v536_v12 = vshrl.u32 %v14357_v38, 4  ;;  %vm14433_vm15 = vcmp.lt.s32.totalorder %v935_v26, 16  ;;  %v9977_v8 = vld [vmem:[%s11352_s27 + $0x53] sm:$0xff]  ;;  %v936_v35 = vsel %vm14416_vm12, %v900_v4, %v14348_v18  ;;  %v901_v55 = vadd.s32 18, %v14395_v57  ;;  %vm14444_vm1 = vmand %vm829_vm14, %vm793_vm13 }
 0x4bb   : > { %v5278_v1 = vmul.f32 %v9976_v25, %v5178_v29  ;;  %vm794_vm0 = vcmp.ne.s32.totalorder %v14408_v48, 0  ;;  %v14449_v38 = vsub.s32 %v14281_v30, %v526_v13  ;;  %v547_v29 = vshrl.u32 %v14385_v15, 4  ;;  %v9979_v30 = vld [vmem:[%s11352_s27 + $0x63] sm:$0xff] }
 0x4bc   : > { %vm830_vm2 = vcmp.lt.s32.totalorder %v14408_v48, 0  ;;  %v537_v18 = vmul.u32 18, %v536_v12  ;;  %v14460_v59 = vadd.s32 136, %v13948_v17  ;;  %vm14463_vm3 = vcmp.lt.s32.totalorder %v936_v35, 16 }
 0x4bd   : > { %9209 = vrot.lane.b32.xlu1 %v9208_v7, %s10056_s20  ;;  %9214 = vrot.lane.b32.xlu0 %v9213_v2, %s10056_s20  ;;  %v5314_v7 = vsel %vm14398_vm9, %v5278_v1, 0.0  ;;  %v5429_v2 = vld [vmem:[#allocation2 + $0x31] sm:$0xff]  ;;  %v5430_v49 = vld [vmem:[#allocation2 + $0x39] sm:$0xff]  ;;  %v14453_v25 = vmul.u32.u64.low 3817748708, %v14425_v45  ;;  %v14454_v1 = vmul.u32.u64.high 3817748708, %v14425_v45, %v14453_v25  ;;  %v14468_v13 = vadd.s32 144, %v13948_v17  ;;  %vm14477_vm4 = vmand %vm830_vm2, %vm794_vm0 }
 0x4be   : > { %5354 = vst.msk [vmem:[#allocation2 + $0x4b] sm:$0xff] %vm2602_vm8, %v5314_v7  ;;  %v5180_v19 = vpop.permute.xlu0 %5179  ;;  %v9218_v34 = vpack.i.bf16 %v5430_v49, %v5429_v2  ;;  %v937_v2 = vsel %vm14444_vm1, %v901_v55, %v14395_v57  ;;  %v902_v49 = vadd.s32 18, %v14408_v48  ;;  %vm795_vm5 = vcmp.ne.s32.totalorder %v14449_v38, 0 }
 0x4bf   : > { %v5279_v20 = vmul.f32 %v9977_v8, %v5180_v19  ;;  %vm831_vm6 = vcmp.lt.s32.totalorder %v14449_v38, 0  ;;  %v548_v24 = vmul.u32 18, %v547_v29  ;;  %v558_v19 = vshrl.u32 %v14422_v9, 4 }
 0x4c0   : > { %v14488_v35 = vmul.u32.u64.low 3817748708, %v14460_v59  ;;  %v14489_v55 = vmul.u32.u64.high 3817748708, %v14460_v59, %v14488_v35  ;;  %vm14492_vm7 = vcmp.lt.s32.totalorder %v937_v2, 16  ;;  %vm14510_vm9 = vmand %vm831_vm6, %vm795_vm5 }
 0x4c1   : > { %9219 = vrot.lane.b32.xlu1 %v9218_v34, %s10056_s20  ;;  %v5315_v4 = vsel %vm14433_vm15, %v5279_v20, 0.0  ;;  %v5431_v57 = vld [vmem:[#allocation2 + $0x41] sm:$0xff]  ;;  %v538_v20 = vsub.s32 %v14322_v3, %v537_v18  ;;  %v938_v3 = vsel %vm14477_vm4, %v902_v49, %v14408_v48  ;;  %v903_v18 = vadd.s32 18, %v14449_v38 }
 0x4c2   : > { %5355 = vst.msk [vmem:[#allocation2 + $0x53] sm:$0xff] %vm2602_vm8, %v5315_v4  ;;  %v5182_v15 = vpop.permute.xlu1 %5181  ;;  %v14497_v9 = vmul.u32.u64.low 3817748708, %v14468_v13  ;;  %v14498_v4 = vmul.u32.u64.high 3817748708, %v14468_v13, %v14497_v9  ;;  %v559_v2 = vmul.u32 18, %v558_v19  ;;  %v14519_v49 = vadd.s32 152, %v13948_v17 }
 0x4c3   : > { %v5280_v7 = vmul.f32 %v9978_v0, %v5182_v15  ;;  %vm796_vm12 = vcmp.ne.s32.totalorder %v538_v20, 0  ;;  %vm832_vm13 = vcmp.lt.s32.totalorder %v538_v20, 0  ;;  %vm14522_vm14 = vcmp.lt.s32.totalorder %v938_v3, 16 }
 0x4c4   : > { %v14531_v19 = vadd.s32 160, %v13948_v17  ;;  %vm14533_vm15 = vmand %vm832_vm13, %vm796_vm12  ;;  %v14538_v26 = vsub.s32 %v14388_v28, %v559_v2 }
 0x4c5   : > { %v5316_v34 = vsel %vm14463_vm3, %v5280_v7, 0.0  ;;  %v5432_v8 = vld [vmem:[#allocation2 + $0x49] sm:$0xff]  ;;  %v549_v7 = vsub.s32 %v14351_v56, %v548_v24  ;;  %v904_v24 = vadd.s32 18, %v538_v20 }
 0x4c6   : > { %5356 = vst.msk [vmem:[#allocation2 + $0x5b] sm:$0xff] %vm2602_vm8, %v5316_v34  ;;  %v5184_v29 = vpop.permute.xlu0 %5183  ;;  %v9223_v25 = vpack.i.bf16 %v5432_v8, %v5431_v57  ;;  %v569_v34 = vshrl.u32 %v14454_v1, 4  ;;  %v9980_v8 = vld [vmem:[%s11352_s27 + $0x6b] sm:$0xff]  ;;  %v939_v1 = vsel %vm14510_vm9, %v903_v18, %v14449_v38  ;;  %vm798_vm4 = vcmp.ne.s32.totalorder %v14538_v26, 0 }
 0x4c7   : > { %v5281_v15 = vmul.f32 %v9979_v30, %v5184_v29  ;;  %vm797_vm0 = vcmp.ne.s32.totalorder %v549_v7, 0  ;;  %vm833_vm1 = vcmp.lt.s32.totalorder %v549_v7, 0  ;;  %v580_v30 = vshrl.u32 %v14489_v55, 4 }
 0x4c8   : > { %9224 = vrot.lane.b32.xlu0 %v9223_v25, %s10056_s20  ;;  %v570_v29 = vmul.u32 18, %v569_v34  ;;  %vm14548_vm2 = vcmp.lt.s32.totalorder %v939_v1, 16  ;;  %v905_v2 = vadd.s32 18, %v549_v7  ;;  %v591_v34 = vshrl.u32 %v14498_v4, 4  ;;  %vm14558_vm3 = vmand %vm833_vm1, %vm797_vm0 }
 0x4c9   : > { %v5317_v48 = vsel %vm14492_vm7, %v5281_v15, 0.0  ;;  %v5433_v9 = vld [vmem:[#allocation2 + $0x51] sm:$0xff]  ;;  %v14544_v15 = vmul.u32.u64.low 3817748708, %v14519_v49  ;;  %v14545_v3 = vmul.u32.u64.high 3817748708, %v14519_v49, %v14544_v15  ;;  %v940_v55 = vsel %vm14533_vm15, %v904_v24, %v538_v20 }
 0x4ca   : > { %5357 = vst.msk [vmem:[#allocation2 + $0x63] sm:$0xff] %vm2602_vm8, %v5317_v48  ;;  %v5186_v57 = vpop.permute.xlu1 %5185  ;;  %v9981_v48 = vld [vmem:[%s11352_s27 + $0x73] sm:$0xff]  ;;  %vm834_vm5 = vcmp.lt.s32.totalorder %v14538_v26, 0  ;;  %v14570_v4 = vsub.s32 %v14425_v45, %v570_v29  ;;  %v14573_v20 = vadd.s32 168, %v13948_v17  ;;  %v581_v24 = vmul.u32 18, %v580_v30 }
 0x4cb   : > { %v5282_v56 = vmul.f32 %v9980_v8, %v5186_v57  ;;  %vm14578_vm6 = vcmp.lt.s32.totalorder %v940_v55, 16  ;;  %v906_v45 = vadd.s32 18, %v14538_v26  ;;  %v592_v29 = vmul.u32 18, %v591_v34  ;;  %vm14588_vm7 = vmand %vm834_vm5, %vm798_vm4 }
 0x4cc   : > { %v14593_v30 = vadd.s32 176, %v13948_v17  ;;  %vm799_vm9 = vcmp.ne.s32.totalorder %v14570_v4, 0  ;;  %vm835_vm12 = vcmp.lt.s32.totalorder %v14570_v4, 0  ;;  %v602_v55 = vshrl.u32 %v14545_v3, 4 }
 0x4cd   : > { %v5318_v25 = vsel %vm14522_vm14, %v5282_v56, 0.0  ;;  %v5434_v38 = vld [vmem:[#allocation2 + $0x59] sm:$0xff]  ;;  %v14563_v8 = vmul.u32.u64.low 3817748708, %v14531_v19  ;;  %v14564_v56 = vmul.u32.u64.high 3817748708, %v14531_v19, %v14563_v8  ;;  %v907_v35 = vadd.s32 18, %v14570_v4  ;;  %vm14622_vm14 = vmand %vm835_vm12, %vm799_vm9 }
 0x4ce   : > { %5358 = vst.msk [vmem:[#allocation2 + $0x6b] sm:$0xff] %vm2602_vm8, %v5318_v25  ;;  %v5188_v28 = vpop.permute.xlu0 %5187  ;;  %v9228_v0 = vpack.i.bf16 %v5434_v38, %v5433_v9  ;;  %v941_v9 = vsel %vm14558_vm3, %v905_v2, %v549_v7  ;;  %v9982_v38 = vld [vmem:[%s11352_s27 + $0x7b] sm:$0xff] }
 0x4cf   : > { %v5283_v12 = vmul.f32 %v9981_v48, %v5188_v28  ;;  %v14598_v7 = vmul.u32.u64.low 3817748708, %v14573_v20  ;;  %v14599_v28 = vmul.u32.u64.high 3817748708, %v14573_v20, %v14598_v7  ;;  %vm14603_vm13 = vcmp.lt.s32.totalorder %v941_v9, 16  ;;  %v9983_v9 = vld [vmem:[%s11352_s27 + $0x83] sm:$0xff] }
 0x4d0   : > { %9229 = vrot.lane.b32.xlu1 %v9228_v0, %s10056_s20  ;;  %v613_v3 = vshrl.u32 %v14564_v56, 4  ;;  %v943_v18 = vsel %vm14622_vm14, %v907_v35, %v14570_v4  ;;  %v14658_v4 = vadd.s32 192, %v13948_v17 }
 0x4d1   : > { %v5319_v1 = vsel %vm14548_vm2, %v5283_v12, 0.0  ;;  %v5435_v34 = vld [vmem:[#allocation2 + $0x61] sm:$0xff]  ;;  %v582_v12 = vsub.s32 %v14460_v59, %v581_v24  ;;  %vm14666_vm5 = vcmp.lt.s32.totalorder %v943_v18, 16 }
 0x4d2   : > { %5359 = vst.msk [vmem:[#allocation2 + $0x73] sm:$0xff] %vm2602_vm8, %v5319_v1  ;;  %v5190_v25 = vpop.permute.xlu1 %5189  ;;  %v942_v1 = vsel %vm14588_vm7, %v906_v45, %v14538_v26  ;;  %v14628_v26 = vmul.u32.u64.low 3817748708, %v14593_v30  ;;  %v14629_v24 = vmul.u32.u64.high 3817748708, %v14593_v30, %v14628_v26  ;;  %v614_v2 = vmul.u32 18, %v613_v3 }
 0x4d3   : > { %v5284_v15 = vmul.f32 %v9982_v38, %v5190_v25  ;;  %v14615_v25 = vsub.s32 %v14468_v13, %v592_v29  ;;  %v14633_v13 = vadd.s32 184, %v13948_v17  ;;  %vm800_vm15 = vcmp.ne.s32.totalorder %v582_v12, 0 }
 0x4d4   : > { %vm836_vm0 = vcmp.lt.s32.totalorder %v582_v12, 0  ;;  %v603_v29 = vmul.u32 18, %v602_v55  ;;  %vm14638_vm1 = vcmp.lt.s32.totalorder %v942_v1, 16  ;;  %v908_v7 = vadd.s32 18, %v582_v12 }
 0x4d5   : > { %v5320_v0 = vsel %vm14578_vm6, %v5284_v15, 0.0  ;;  %v5436_v48 = vld [vmem:[#allocation2 + $0x69] sm:$0xff]  ;;  %vm801_vm2 = vcmp.ne.s32.totalorder %v14615_v25, 0  ;;  %vm837_vm3 = vcmp.lt.s32.totalorder %v14615_v25, 0  ;;  %vm14648_vm4 = vmand %vm836_vm0, %vm800_vm15  ;;  %v624_v55 = vshrl.u32 %v14599_v28, 4 }
 0x4d6   : > { %5360 = vst.msk [vmem:[#allocation2 + $0x7b] sm:$0xff] %vm2602_vm8, %v5320_v0  ;;  %v5192_v57 = vpop.permute.xlu0 %5191  ;;  %v9233_v8 = vpack.i.bf16 %v5436_v48, %v5435_v34  ;;  %v9984_v0 = vld [vmem:[%s11352_s27 + $0x8b] sm:$0xff]  ;;  %v909_v26 = vadd.s32 18, %v14615_v25  ;;  %v944_v15 = vsel %vm14648_vm4, %v908_v7, %v582_v12  ;;  %vm14678_vm6 = vmand %vm837_vm3, %vm801_vm2  ;;  %v635_v18 = vshrl.u32 %v14629_v24, 4 }
 0x4d7   : > { %v5285_v38 = vmul.f32 %v9983_v9, %v5192_v57  ;;  %v14696_v7 = vadd.s32 200, %v13948_v17  ;;  %vm14699_vm12 = vcmp.lt.s32.totalorder %v944_v15, 16 }
 0x4d8   : > { %9234 = vrot.lane.b32.xlu0 %v9233_v8, %s10056_s20  ;;  %v14654_v57 = vmul.u32.u64.low 3817748708, %v14633_v13  ;;  %v14655_v8 = vmul.u32.u64.high 3817748708, %v14633_v13, %v14654_v57 }
 0x4d9   : > { %v5321_v45 = vsel %vm14603_vm13, %v5285_v38, 0.0  ;;  %v5437_v35 = vld [vmem:[#allocation2 + $0x71] sm:$0xff]  ;;  %v14663_v38 = vsub.s32 %v14519_v49, %v603_v29  ;;  %v14683_v29 = vsub.s32 %v14531_v19, %v614_v2  ;;  %v945_v2 = vsel %vm14678_vm6, %v909_v26, %v14615_v25  ;;  %v314_v26 = vld [vmem:[%s16359_s4 + $0x8] sm:$0xff] }
 0x4da   : > { %5361 = vst.msk [vmem:[#allocation2 + $0x83] sm:$0xff] %vm2602_vm8, %v5321_v45  ;;  %v5194_v56 = vpop.permute.xlu1 %5193  ;;  %v9985_v45 = vld [vmem:[%s11352_s27 + $0x93] sm:$0xff]  ;;  %v14719_v25 = vadd.s32 208, %v13948_v17  ;;  %vm14734_vm0 = vcmp.lt.s32.totalorder %v945_v2, 16 }
 0x4db   : > { %v5286_v34 = vmul.f32 %v9984_v0, %v5194_v56  ;;  %v625_v0 = vmul.u32 18, %v624_v55  ;;  %vm802_vm7 = vcmp.ne.s32.totalorder %v14663_v38, 0  ;;  %vm838_vm9 = vcmp.lt.s32.totalorder %v14663_v38, 0  ;;  %v9986_v55 = vld [vmem:[%s11352_s27 + $0x9b] sm:$0xff] }
 0x4dc   : > { %vm803_vm13 = vcmp.ne.s32.totalorder %v14683_v29, 0  ;;  %vm14709_vm14 = vmand %vm838_vm9, %vm802_vm7  ;;  %vm839_vm15 = vcmp.lt.s32.totalorder %v14683_v29, 0 }
 0x4dd   : > { %v5322_v1 = vsel %vm14638_vm1, %v5286_v34, 0.0  ;;  %v5438_v9 = vld [vmem:[#allocation2 + $0x79] sm:$0xff]  ;;  %v14688_v34 = vmul.u32.u64.low 3817748708, %v14658_v4  ;;  %v14689_v48 = vmul.u32.u64.high 3817748708, %v14658_v4, %v14688_v34  ;;  %v14715_v59 = vsub.s32 %v14573_v20, %v625_v0  ;;  %vm14747_vm1 = vmand %vm839_vm15, %vm803_vm13 }
 0x4de   : > { %5362 = vst.msk [vmem:[#allocation2 + $0x8b] sm:$0xff] %vm2602_vm8, %v5322_v1  ;;  %v5196_v28 = vpop.permute.xlu0 %5195  ;;  %v9238_v3 = vpack.i.bf16 %v5438_v9, %v5437_v35  ;;  %v910_v1 = vadd.s32 18, %v14663_v38  ;;  %v636_v35 = vmul.u32 18, %v635_v18 }
 0x4df   : > { %v5287_v56 = vmul.f32 %v9985_v45, %v5196_v28  ;;  %v646_v28 = vshrl.u32 %v14655_v8, 4  ;;  %v14730_v20 = vmul.u32.u64.low 3817748708, %v14696_v7  ;;  %v14731_v49 = vmul.u32.u64.high 3817748708, %v14696_v7, %v14730_v20 }
 0x4e0   : > { %9239 = vrot.lane.b32.xlu1 %v9238_v3, %s10056_s20  ;;  %v313_v3 = vld [vmem:[%s16359_s4] sm:$0xff]  ;;  %v14752_v2 = vsub.s32 %v14593_v30, %v636_v35  ;;  %vm804_vm2 = vcmp.ne.s32.totalorder %v14715_v59, 0  ;;  %vm840_vm3 = vcmp.lt.s32.totalorder %v14715_v59, 0  ;;  %v315_v20 = vld [vmem:[%s16359_s4 + $0x10] sm:$0xff] }
 0x4e1   : > { %v5323_v12 = vsel %vm14666_vm5, %v5287_v56, 0.0  ;;  %v5439_v56 = vld [vmem:[#allocation2 + $0x81] sm:$0xff]  ;;  %v8504_v8 = vpack.c.bf16 %v314_v26, %v313_v3  ;;  %v657_v3 = vshrl.u32 %v14689_v48, 4  ;;  %v17081_v26 = vmov 0.0|0.0   ;;  %vm14792_vm6 = vmand %vm840_vm3, %vm804_vm2 }
 0x4e2   : > { %5363 = vst.msk [vmem:[#allocation2 + $0x93] sm:$0xff] %vm2602_vm8, %v5323_v12  ;;  %v5198_v24 = vpop.permute.xlu1 %5197  ;;  %v911_v12 = vadd.s32 18, %v14683_v29  ;;  %v647_v30 = vmul.u32 18, %v646_v28  ;;  %v316_v28 = vld [vmem:[%s16359_s4 + $0x18] sm:$0xff]  ;;  %vm805_vm5 = vcmp.ne.s32.totalorder %v14752_v2, 0  ;;  %vm841_vm7 = vcmp.lt.s32.totalorder %v14752_v2, 0 }
 0x4e3   : > { %v5288_v57 = vmul.f32 %v9986_v55, %v5198_v24  ;;  %v9987_v24 = vld [vmem:[%s11352_s27 + $0xa3] sm:$0xff]  ;;  %v946_v55 = vsel %vm14709_vm14, %v910_v1, %v14663_v38  ;;  %8505 = vmatpush1.bf16.msra.mxu0 %v8504_v8  ;;  %v14757_v9 = vmul.u32.u64.low 3817748708, %v14719_v25  ;;  %v14758_v38 = vmul.u32.u64.high 3817748708, %v14719_v25, %v14757_v9  ;;  %v9988_v8 = vld [vmem:[%s11352_s27 + $0xab] sm:$0xff] }
 0x4e4   : > { %v14761_v1 = vadd.s32 216, %v13948_v17  ;;  %8506 = vmatprep.subr.bf16.mxu0 %v17081_v26  ;;  %vm14769_vm4 = vcmp.lt.s32.totalorder %v946_v55, 16  ;;  %v317_v55 = vld [vmem:[%s16359_s4 + $0x20] sm:$0xff]  ;;  %v913_v54 = vadd.s32 18, %v14752_v2 }
 0x4e5   : > { %v5324_v45 = vsel %vm14699_vm12, %v5288_v57, 0.0  ;;  %v5440_v15 = vld [vmem:[#allocation2 + $0x89] sm:$0xff]  ;;  %vm14832_vm12 = vmand %vm841_vm7, %vm805_vm5 }
 0x4e6   : > { %5364 = vst.msk [vmem:[#allocation2 + $0x9b] sm:$0xff] %vm2602_vm8, %v5324_v45  ;;  %v5200_v0 = vpop.permute.xlu0 %5199  ;;  %v9243_v34 = vpack.i.bf16 %v5440_v15, %v5439_v56  ;;  %v947_v56 = vsel %vm14747_vm1, %v911_v12, %v14683_v29  ;;  %v14777_v15 = vadd.s32 224, %v13948_v17  ;;  %v658_v12 = vmul.u32 18, %v657_v3  ;;  %v318_v57 = vld [vmem:[%s16359_s4 + $0x28] sm:$0xff] }
 0x4e7   : > { %v5289_v19 = vmul.f32 %v9987_v24, %v5200_v0  ;;  %v912_v0 = vadd.s32 18, %v14715_v59  ;;  %v14810_v3 = vsub.s32 %v14633_v13, %v647_v30  ;;  %vm14815_vm9 = vcmp.lt.s32.totalorder %v947_v56, 16  ;;  %v9989_v13 = vld [vmem:[%s11352_s27 + $0xb3] sm:$0xff]  ;;  %v322_v56 = vld [vmem:[%s16359_s4 + $0x48] sm:$0xff] }
 0x4e8   : > { %9244 = vrot.lane.b32.xlu0 %v9243_v34, %s10056_s20  ;;  %v8507_v34 = vpack.c.bf16 %v316_v28, %v315_v20  ;;  %v668_v28 = vshrl.u32 %v14731_v49, 4  ;;  %v679_v29 = vshrl.u32 %v14758_v38, 4  ;;  %v949_v38 = vsel %vm14832_vm12, %v913_v54, %v14752_v2 }
 0x4e9   : > { %v5325_v45 = vsel %vm14734_vm0, %v5289_v19, 0.0  ;;  %v14798_v24 = vmul.u32.u64.low 3817748708, %v14761_v1  ;;  %v14799_v19 = vmul.u32.u64.high 3817748708, %v14761_v1, %v14798_v24  ;;  %v948_v30 = vsel %vm14792_vm6, %v912_v0, %v14715_v59 }
 0x4ea   : > { %5365 = vst.msk [vmem:[#allocation2 + $0xa3] sm:$0xff] %vm2602_vm8, %v5325_v45  ;;  %v5202_v35 = vpop.permute.xlu1 %5201  ;;  %8508 = vmatpush1.bf16.msra.mxu0 %v8507_v34  ;;  %vm806_vm13 = vcmp.ne.s32.totalorder %v14810_v3, 0  ;;  %vm842_vm14 = vcmp.lt.s32.totalorder %v14810_v3, 0  ;;  %vm14850_vm15 = vcmp.lt.s32.totalorder %v948_v30, 16  ;;  %v14872_v54 = vadd.s32 240, %v13948_v17  ;;  %v321_v30 = vld [vmem:[%s16359_s4 + $0x40] sm:$0xff] }
 0x4eb   : > { %v5290_v18 = vmul.f32 %v9988_v8, %v5202_v35  ;;  %v5441_v35 = vld [vmem:[#allocation2 + $0x91] sm:$0xff]  ;;  %v8510_v8 = vpack.c.bf16 %v318_v57, %v317_v55  ;;  %8509 = vmatprep.subr.bf16.mxu0 %v17081_v26  ;;  %v14837_v34 = vmul.u32.u64.low 3817748708, %v14777_v15  ;;  %v14838_v55 = vmul.u32.u64.high 3817748708, %v14777_v15, %v14837_v34  ;;  %vm14878_vm0 = vmand %vm842_vm14, %vm806_vm13 }
 0x4ec   : > { %v14842_v57 = vsub.s32 %v14658_v4, %v658_v12  ;;  %vm14898_vm3 = vcmp.lt.s32.totalorder %v949_v38, 16 }
 0x4ed   : > { %v5326_v9 = vsel %vm14769_vm4, %v5290_v18, 0.0  ;;  %v5623_v45 = vld [vmem:[#allocation2 + $0x96] sm:$0xff]  ;;  %v701_v38 = vshrl.u32 %v14838_v55, 4  ;;  %v14930_v55 = vadd.s32 248, %v13948_v17 }
 0x4ee   : > { %v5442_v20 = vld [vmem:[#allocation2 + $0x99] sm:$0xff]  ;;  %5366 = vst.msk [vmem:[#allocation2 + $0xab] sm:$0xff] %vm2602_vm8, %v5326_v9  ;;  %8406 = vmatprep.mubr.msk.f32.mxu1 %vm2602_vm8, %v5623_v45  ;;  %v5204_v48 = vpop.permute.xlu0 %5203  ;;  %v669_v9 = vmul.u32 18, %v668_v28  ;;  %8511 = vmatpush1.bf16.msra.mxu0 %v8510_v8  ;;  %vm807_vm1 = vcmp.ne.s32.totalorder %v14842_v57, 0  ;;  %vm843_vm2 = vcmp.lt.s32.totalorder %v14842_v57, 0  ;;  %v915_v45 = vadd.s32 18, %v14842_v57 }
 0x4ef   : > { %v9248_v18 = vpack.i.bf16 %v5442_v20, %v5441_v35  ;;  %v5291_v49 = vmul.f32 %v9989_v13, %v5204_v48  ;;  %v14859_v12 = vmul.u32.u64.low 3817748708, %v14821_v11  ;;  %v14860_v35 = vmul.u32.u64.high 3817748708, %v14821_v11, %v14859_v12  ;;  %8512 = vmatprep.subr.bf16.mxu0 %v17081_v26  ;;  %v319_v20 = vld [vmem:[%s16359_s4 + $0x30] sm:$0xff]  ;;  %v320_v28 = vld [vmem:[%s16359_s4 + $0x38] sm:$0xff]  ;;  %vm14912_vm4 = vmand %vm843_vm2, %vm807_vm1 }
 0x4f0   : > { %v9990_v8 = vld [vmem:[%s11352_s27 + $0xbb] sm:$0xff]  ;;  %v914_v48 = vadd.s32 18, %v14810_v3  ;;  %v8513_v2 = vpack.c.bf16 %v320_v28, %v319_v20  ;;  %v680_v13 = vmul.u32 18, %v679_v29  ;;  %v14894_v12 = vsub.s32 %v14696_v7, %v669_v9 }
 0x4f1   : > { %9249 = vrot.lane.b32.xlu1 %v9248_v18, %s10056_s20  ;;  %v5327_v59 = vsel %vm14815_vm9, %v5291_v49, 0.0  ;;  %v5624_v0 = vld [vmem:[#allocation2 + $0x9e] sm:$0xff]  ;;  %v690_v49 = vshrl.u32 %v14799_v19, 4  ;;  %v8516_v19 = vpack.c.bf16 %v322_v56, %v321_v30 }
 0x4f2   : > { %5367 = vst.msk [vmem:[#allocation2 + $0xb3] sm:$0xff] %vm2602_vm8, %v5327_v59  ;;  %v5206_v4 = vpop.permute.xlu1 %5205  ;;  %8407 = vmatmul.mubr.msk.f32.vlgmr.msra.gmra.mrb[104].mxu1 %vm2602_vm8, %v5624_v0  ;;  %v5443_v0 = vld [vmem:[#allocation2 + $0xa1] sm:$0xff]  ;;  %8514 = vmatpush1.bf16.msra.mxu0 %v8513_v2  ;;  %v950_v7 = vsel %vm14878_vm0, %v914_v48, %v14810_v3  ;;  %v14919_v2 = vsub.s32 %v14719_v25, %v680_v13  ;;  %v14922_v56 = vmul.u32.u64.low 3817748708, %v14872_v54  ;;  %v14923_v18 = vmul.u32.u64.high 3817748708, %v14872_v54, %v14922_v56 }
 0x4f3   : > { %v5292_v24 = vmul.f32 %v9990_v8, %v5206_v4  ;;  %8515 = vmatprep.subr.bf16.mxu0 %v17081_v26  ;;  %v9991_v8 = vld [vmem:[%s11352_s27 + $0xc3] sm:$0xff]  ;;  %v691_v30 = vmul.u32 18, %v690_v49  ;;  %vm808_vm5 = vcmp.ne.s32.totalorder %v14894_v12, 0  ;;  %vm844_vm6 = vcmp.lt.s32.totalorder %v14894_v12, 0 }
 0x4f4   : > { %vm14933_vm7 = vcmp.lt.s32.totalorder %v950_v7, 16  ;;  %v951_v49 = vsel %vm14912_vm4, %v915_v45, %v14842_v57  ;;  %v916_v29 = vadd.s32 18, %v14894_v12  ;;  %vm14958_vm9 = vmand %vm844_vm6, %vm808_vm5  ;;  %vm809_vm12 = vcmp.ne.s32.totalorder %v14919_v2, 0 }
 0x4f5   : > { %v5328_v34 = vsel %vm14850_vm15, %v5292_v24, 0.0  ;;  %v5625_v59 = vld [vmem:[#allocation2 + $0xa6] sm:$0xff]  ;;  %vm845_vm13 = vcmp.lt.s32.totalorder %v14919_v2, 0  ;;  %v702_v45 = vmul.u32 18, %v701_v38  ;;  %vm14981_vm14 = vcmp.lt.s32.totalorder %v951_v49, 16 }
 0x4f6   : > { %v5444_v4 = vld [vmem:[#allocation2 + $0xa9] sm:$0xff]  ;;  %5368 = vst.msk [vmem:[#allocation2 + $0xbb] sm:$0xff] %vm2602_vm8, %v5328_v34  ;;  %8409 = vmatprep.mubr.msk.f32.mxu1 %vm2602_vm8, %v5625_v59  ;;  %v5208_v20 = vpop.permute.xlu0 %5207  ;;  %8517 = vmatpush1.bf16.msra.mxu0 %v8516_v19  ;;  %v712_v34 = vshrl.u32 %v14860_v35, 4  ;;  %vm14995_vm15 = vmand %vm845_vm13, %vm809_vm12 }
 0x4f7   : > { %v9253_v28 = vpack.i.bf16 %v5444_v4, %v5443_v0  ;;  %v5293_v24 = vmul.f32 %v9991_v8, %v5208_v20  ;;  %8518 = vmatprep.subr.bf16.mxu0 %v17081_v26  ;;  %v323_v59 = vld [vmem:[%s16359_s4 + $0x50] sm:$0xff]  ;;  %v324_v0 = vld [vmem:[%s16359_s4 + $0x58] sm:$0xff]  ;;  %v14952_v20 = vadd.s32 256, %v13948_v17  ;;  %v325_v8 = vld [vmem:[%s16359_s4 + $0x60] sm:$0xff] }
 0x4f8   : > { %v9992_v4 = vld [vmem:[%s11352_s27 + $0xcb] sm:$0xff]  ;;  %v8519_v57 = vpack.c.bf16 %v324_v0, %v323_v59  ;;  %v917_v59 = vadd.s32 18, %v14919_v2  ;;  %v713_v0 = vmul.u32 18, %v712_v34  ;;  %v15004_v34 = vsub.s32 %v14777_v15, %v702_v45 }
 0x4f9   : > { %9254 = vrot.lane.b32.xlu0 %v9253_v28, %s10056_s20  ;;  %v5329_v3 = vsel %vm14898_vm3, %v5293_v24, 0.0  ;;  %v5626_v48 = vld [vmem:[#allocation2 + $0xae] sm:$0xff]  ;;  %v14965_v28 = vsub.s32 %v14761_v1, %v691_v30 }
 0x4fa   : > { %5369 = vst.msk [vmem:[#allocation2 + $0xc3] sm:$0xff] %vm2602_vm8, %v5329_v3  ;;  %v5210_v13 = vpop.permute.xlu1 %5209  ;;  %8410 = vmatmul.mubr.msk.f32.gmra.mrb[106].mxu1 %vm2602_vm8, %v5626_v48  ;;  %v326_v24 = vld [vmem:[%s16359_s4 + $0x68] sm:$0xff]  ;;  %v5445_v56 = vld [vmem:[#allocation2 + $0xb1] sm:$0xff]  ;;  %v14976_v48 = vmul.u32.u64.low 3817748708, %v14930_v55  ;;  %v14977_v1 = vmul.u32.u64.high 3817748708, %v14930_v55, %v14976_v48  ;;  %8520 = vmatpush1.bf16.msra.mxu0 %v8519_v57  ;;  %v952_v57 = vsel %vm14958_vm9, %v916_v29, %v14894_v12  ;;  %v953_v45 = vsel %vm14995_vm15, %v917_v59, %v14919_v2 }
 0x4fb   : > { %v5294_v19 = vmul.f32 %v9992_v4, %v5210_v13  ;;  %v8522_v38 = vpack.c.bf16 %v326_v24, %v325_v8  ;;  %8521 = vmatprep.subr.bf16.mxu0 %v17081_v26  ;;  %v9993_v4 = vld [vmem:[%s11352_s27 + $0xd3] sm:$0xff]  ;;  %v15000_v8 = vadd.s32 264, %v13948_v17  ;;  %v723_v24 = vshrl.u32 %v14923_v18, 4 }
 0x4fc   : > { %v15008_v12 = vmul.u32.u64.low 3817748708, %v14952_v20  ;;  %v15009_v29 = vmul.u32.u64.high 3817748708, %v14952_v20, %v15008_v12  ;;  %vm810_vm0 = vcmp.ne.s32.totalorder %v14965_v28, 0  ;;  %vm846_vm1 = vcmp.lt.s32.totalorder %v14965_v28, 0  ;;  %v328_v48 = vld [vmem:[%s16359_s4 + $0x78] sm:$0xff] }
 0x4fd   : > { %v5330_v7 = vsel %vm14933_vm7, %v5294_v19, 0.0  ;;  %v5627_v9 = vld [vmem:[#allocation2 + $0xb6] sm:$0xff]  ;;  %vm15016_vm2 = vcmp.lt.s32.totalorder %v952_v57, 16  ;;  %vm15044_vm3 = vmand %vm846_vm1, %vm810_vm0  ;;  %vm811_vm4 = vcmp.ne.s32.totalorder %v15004_v34, 0  ;;  %vm847_vm5 = vcmp.lt.s32.totalorder %v15004_v34, 0 }
 0x4fe   : > { %v5446_v3 = vld [vmem:[#allocation2 + $0xb9] sm:$0xff]  ;;  %5370 = vst.msk [vmem:[#allocation2 + $0xcb] sm:$0xff] %vm2602_vm8, %v5330_v7  ;;  %8412 = vmatprep.mubr.msk.f32.mxu1 %vm2602_vm8, %v5627_v9  ;;  %v5212_v25 = vpop.permute.xlu0 %5211  ;;  %8523 = vmatpush1.bf16.msra.mxu0 %v8522_v38  ;;  %v918_v9 = vadd.s32 18, %v14965_v28  ;;  %v724_v59 = vmul.u32 18, %v723_v24  ;;  %vm15064_vm6 = vcmp.lt.s32.totalorder %v953_v45, 16  ;;  %vm15080_vm9 = vmand %vm847_vm5, %vm811_vm4 }
 0x4ff   : > { %v9258_v13 = vpack.i.bf16 %v5446_v3, %v5445_v56  ;;  %v5295_v19 = vmul.f32 %v9993_v4, %v5212_v25  ;;  %v15026_v56 = vsub.s32 %v14821_v11, %v713_v0  ;;  %8524 = vmatprep.subr.bf16.mxu0 %v17081_v26  ;;  %v327_v3 = vld [vmem:[%s16359_s4 + $0x70] sm:$0xff]  ;;  %v9994_v38 = vld [vmem:[%s11352_s27 + $0xdb] sm:$0xff]  ;;  %v330_v4 = vld [vmem:[%s16359_s4 + $0x88] sm:$0xff] }
 0x500   : > { %v15037_v25 = vmul.u32.u64.low 3817748708, %v15000_v8  ;;  %v15038_v2 = vmul.u32.u64.high 3817748708, %v15000_v8, %v15037_v25  ;;  %v329_v0 = vld [vmem:[%s16359_s4 + $0x80] sm:$0xff] }
 0x501   : > { %9259 = vrot.lane.b32.xlu1 %v9258_v13, %s10056_s20  ;;  %v5331_v35 = vsel %vm14981_vm14, %v5295_v19, 0.0  ;;  %v5628_v7 = vld [vmem:[#allocation2 + $0xbe] sm:$0xff]  ;;  %v8525_v13 = vpack.c.bf16 %v328_v48, %v327_v3  ;;  %v8528_v24 = vpack.c.bf16 %v330_v4, %v329_v0  ;;  %vm812_vm7 = vcmp.ne.s32.totalorder %v15026_v56, 0 }
 0x502   : > { %5371 = vst.msk [vmem:[#allocation2 + $0xd3] sm:$0xff] %vm2602_vm8, %v5331_v35  ;;  %8413 = vmatmul.mubr.msk.f32.gmra.mrb[108].mxu1 %vm2602_vm8, %v5628_v7  ;;  %v5447_v49 = vld [vmem:[#allocation2 + $0xc1] sm:$0xff]  ;;  %v734_v35 = vshrl.u32 %v14977_v1, 4  ;;  %v15060_v7 = vadd.s32 272, %v13948_v17  ;;  %v954_v1 = vsel %vm15044_vm3, %v918_v9, %v14965_v28  ;;  %vm848_vm12 = vcmp.lt.s32.totalorder %v15026_v56, 0 }
 0x503   : > { %v5214_v18 = vpop.permute.xlu1 %5213  ;;  %8526 = vmatpush1.bf16.msra.mxu0 %v8525_v13  ;;  %v9995_v48 = vld [vmem:[%s11352_s27 + $0xe3] sm:$0xff]  ;;  %v15086_v25 = vsub.s32 %v14872_v54, %v724_v59  ;;  %v745_v28 = vshrl.u32 %v15009_v29, 4  ;;  %v15090_v9 = vadd.s32 280, %v13948_v17  ;;  %vm15099_vm13 = vcmp.lt.s32.totalorder %v954_v1, 16  ;;  %v9996_v17 = vld [vmem:[%s11352_s27 + $0xeb] sm:$0xff]  ;;  %vm15121_vm14 = vmand %vm848_vm12, %vm812_vm7 }
 0x504   : > { %v5296_v30 = vmul.f32 %v9994_v38, %v5214_v18  ;;  %8527 = vmatprep.subr.bf16.mxu0 %v17081_v26  ;;  %v735_v0 = vmul.u32 18, %v734_v35  ;;  %v331_v35 = vld [vmem:[%s16359_s4 + $0x90] sm:$0xff]  ;;  %v5520_v27 = vld [vmem:[#allocation2 + $0xc3] sm:$0xff] }
 0x505   : > { %v5629_v57 = vld [vmem:[#allocation2 + $0xc6] sm:$0xff]  ;;  %vm813_vm15 = vcmp.ne.s32.totalorder %v15086_v25, 0  ;;  %vm849_vm0 = vcmp.lt.s32.totalorder %v15086_v25, 0 }
 0x506   : > { %v5332_v19 = vsel %vm15016_vm2, %v5296_v30, 0.0  ;;  %v5448_v12 = vld [vmem:[#allocation2 + $0xc9] sm:$0xff]  ;;  %8415 = vmatprep.mubr.msk.f32.mxu1 %vm2602_vm8, %v5629_v57  ;;  %v919_v30 = vadd.s32 18, %v15004_v34  ;;  %v15136_v45 = vsub.s32 %v14930_v55, %v735_v0  ;;  %v921_v0 = vadd.s32 18, %v15086_v25  ;;  %vm15159_vm2 = vmand %vm849_vm0, %vm813_vm15 }
 0x507   : > { %5372 = vst.msk [vmem:[#allocation2 + $0xdb] sm:$0xff] %vm2602_vm8, %v5332_v19  ;;  %v5216_v15 = vpop.permute.xlu0 %5215  ;;  %v9263_v3 = vpack.i.bf16 %v5448_v12, %v5447_v49  ;;  %v15095_v4 = vmul.u32.u64.low 3817748708, %v15060_v7  ;;  %v15096_v19 = vmul.u32.u64.high 3817748708, %v15060_v7, %v15095_v4  ;;  %8529 = vmatpush1.bf16.msra.mxu0 %v8528_v24  ;;  %v920_v49 = vadd.s32 18, %v15026_v56  ;;  %v332_v24 = vld [vmem:[%s16359_s4 + $0x98] sm:$0xff] }
 0x508   : > { %v5297_v38 = vmul.f32 %v9995_v48, %v5216_v15  ;;  %8530 = vmatprep.subr.bf16.mxu0 %v17081_v26  ;;  %v955_v57 = vsel %vm15080_vm9, %v919_v30, %v15004_v34  ;;  %v756_v12 = vshrl.u32 %v15038_v2, 4  ;;  %v746_v34 = vmul.u32 18, %v745_v28  ;;  %v333_v15 = vld [vmem:[%s16359_s4 + $0xa0] sm:$0xff] }
 0x509   : > { %9264 = vrot.lane.b32.xlu0 %v9263_v3, %s10056_s20  ;;  %v5630_v11 = vld [vmem:[#allocation2 + $0xce] sm:$0xff]  ;;  %v8531_v2 = vpack.c.bf16 %v332_v24, %v331_v35  ;;  %vm15144_vm1 = vcmp.lt.s32.totalorder %v955_v57, 16  ;;  %v956_v55 = vsel %vm15121_vm14, %v920_v49, %v15026_v56  ;;  %vm814_vm3 = vcmp.ne.s32.totalorder %v15136_v45, 0 }
 0x50a   : > { %v5333_v13 = vsel %vm15064_vm6, %v5297_v38, 0.0  ;;  %8416 = vmatmul.mubr.msk.f32.gmra.mrb[110].mxu1 %vm2602_vm8, %v5630_v11  ;;  %v334_v3 = vld [vmem:[%s16359_s4 + $0xa8] sm:$0xff]  ;;  %v5449_v1 = vld [vmem:[#allocation2 + $0xd1] sm:$0xff]  ;;  %v15164_v35 = vsub.s32 %v14952_v20, %v746_v34  ;;  %v757_v24 = vmul.u32 18, %v756_v12  ;;  %vm850_vm4 = vcmp.lt.s32.totalorder %v15136_v45, 0  ;;  %v9998_v20 = vld [vmem:[%s11352_s27 + $0xfb] sm:$0xff] }
 0x50b   : > { %5373 = vst.msk [vmem:[#allocation2 + $0xe3] sm:$0xff] %vm2602_vm8, %v5333_v13  ;;  %v5218_v29 = vpop.permute.xlu1 %5217  ;;  %v15139_v28 = vmul.u32.u64.low 3817748708, %v15090_v9  ;;  %v15140_v13 = vmul.u32.u64.high 3817748708, %v15090_v9, %v15139_v28  ;;  %8532 = vmatpush1.bf16.msra.mxu0 %v8531_v2  ;;  %v767_v18 = vshrl.u32 %v15096_v19, 4  ;;  %vm15172_vm5 = vcmp.lt.s32.totalorder %v956_v55, 16  ;;  %v335_v19 = vld [vmem:[%s16359_s4 + $0xb0] sm:$0xff]  ;;  %vm15193_vm6 = vmand %vm850_vm4, %vm814_vm3 }
 0x50c   : > { %v5298_v59 = vmul.f32 %v9996_v17, %v5218_v29  ;;  %v8534_v29 = vpack.c.bf16 %v334_v3, %v333_v15  ;;  %v9997_v17 = vld [vmem:[%s11352_s27 + $0xf3] sm:$0xff]  ;;  %8533 = vmatprep.subr.bf16.mxu0 %v17081_v26  ;;  %v957_v34 = vsel %vm15159_vm2, %v921_v0, %v15086_v25  ;;  %v922_v3 = vadd.s32 18, %v15136_v45  ;;  %v338_v28 = vld [vmem:[%s16359_s4 + $0xc8] sm:$0xff] }
 0x50d   : > { %vm815_vm7 = vcmp.ne.s32.totalorder %v15164_v35, 0  ;;  %vm851_vm9 = vcmp.lt.s32.totalorder %v15164_v35, 0  ;;  %v15200_v25 = vsub.s32 %v15000_v8, %v757_v24  ;;  %v778_v8 = vshrl.u32 %v15140_v13, 4  ;;  %v9999_v24 = vld [vmem:[%s11352_s27 + $0x103] sm:$0xff] }
 0x50e   : > { %v5334_v48 = vsel %vm15099_vm13, %v5298_v59, 0.0  ;;  %v5631_v38 = vld [vmem:[#allocation2 + $0xd6] sm:$0xff]  ;;  %vm15213_vm12 = vcmp.lt.s32.totalorder %v957_v34, 16  ;;  %v923_v13 = vadd.s32 18, %v15164_v35  ;;  %vm15228_vm13 = vmand %vm851_vm9, %vm815_vm7 }
 0x50f   : > { %v5450_v30 = vld [vmem:[#allocation2 + $0xd9] sm:$0xff]  ;;  %5374 = vst.msk [vmem:[#allocation2 + $0xeb] sm:$0xff] %vm2602_vm8, %v5334_v48  ;;  %8418 = vmatprep.mubr.msk.f32.mxu1 %vm2602_vm8, %v5631_v38  ;;  %v5220_v4 = vpop.permute.xlu0 %5219  ;;  %8535 = vmatpush1.bf16.msra.mxu0 %v8534_v29  ;;  %vm816_vm14 = vcmp.ne.s32.totalorder %v15200_v25, 0  ;;  %vm852_vm15 = vcmp.lt.s32.totalorder %v15200_v25, 0  ;;  %v339_v38 = vld [vmem:[%s16359_s4 + $0xd0] sm:$0xff] }
 0x510   : > { %v9268_v54 = vpack.i.bf16 %v5450_v30, %v5449_v1  ;;  %v5299_v59 = vmul.f32 %v9997_v17, %v5220_v4  ;;  %8536 = vmatprep.subr.bf16.mxu0 %v17081_v26  ;;  %v336_v48 = vld [vmem:[%s16359_s4 + $0xb8] sm:$0xff]  ;;  %v337_v30 = vld [vmem:[%s16359_s4 + $0xc0] sm:$0xff]  ;;  %v768_v17 = vmul.u32 18, %v767_v18 }
 0x511   : > { %v8537_v1 = vpack.c.bf16 %v336_v48, %v335_v19  ;;  %v8540_v57 = vpack.c.bf16 %v338_v28, %v337_v30  ;;  %v959_v48 = vsel %vm15228_vm13, %v923_v13, %v15164_v35 }
 0x512   : > { %9269 = vrot.lane.b32.xlu1 %v9268_v54, %s10056_s20  ;;  %v5335_v56 = vsel %vm15144_vm1, %v5299_v59, 0.0  ;;  %v5632_v49 = vld [vmem:[#allocation2 + $0xde] sm:$0xff]  ;;  %vm15261_vm1 = vmand %vm852_vm15, %vm816_vm14  ;;  %vm15272_vm4 = vcmp.lt.s32.totalorder %v959_v48, 16  ;;  %vm5382_vm15 = vcmask 259072  }
 0x513   : > { %5375 = vst.msk [vmem:[#allocation2 + $0xf3] sm:$0xff] %vm2602_vm8, %v5335_v56  ;;  %v5222_v15 = vpop.permute.xlu1 %5221  ;;  %8419 = vmatmul.mubr.msk.f32.gmra.mrb[112].mxu1 %vm2602_vm8, %v5632_v49  ;;  %v5451_v54 = vld [vmem:[#allocation2 + $0xe1] sm:$0xff]  ;;  %8538 = vmatpush1.bf16.msra.mxu0 %v8537_v1  ;;  %v958_v49 = vsel %vm15193_vm6, %v922_v3, %v15136_v45  ;;  %v10000_v3 = vld [vmem:[%s11352_s27 + $0x10b] sm:$0xff]  ;;  %v340_v1 = vld [vmem:[%s16359_s4 + $0xd8] sm:$0xff] }
 0x514   : > { %v5300_v12 = vmul.f32 %v9998_v20, %v5222_v15  ;;  %8539 = vmatprep.subr.bf16.mxu0 %v17081_v26  ;;  %v15237_v15 = vsub.s32 %v15060_v7, %v768_v17  ;;  %v779_v20 = vmul.u32 18, %v778_v8  ;;  %vm15240_vm0 = vcmp.lt.s32.totalorder %v958_v49, 16  ;;  %v344_v48 = vld [vmem:[%s16359_s4 + $0xf8] sm:$0xff] }
 0x515   : > { %v924_v7 = vadd.s32 18, %v15200_v25  ;;  %v8543_v35 = vpack.c.bf16 %v340_v1, %v339_v38  ;;  %v5596_v32 = vld [vmem:[#allocation2 + $0xdd] sm:$0xff] }
 0x516   : > { %v5336_v11 = vsel %vm15172_vm5, %v5300_v12, 0.0  ;;  %v5633_v4 = vld [vmem:[#allocation2 + $0xe6] sm:$0xff]  ;;  %vm817_vm2 = vcmp.ne.s32.totalorder %v15237_v15, 0  ;;  %vm853_vm3 = vcmp.lt.s32.totalorder %v15237_v15, 0 }
 0x517   : > { %v5452_v29 = vld [vmem:[#allocation2 + $0xe9] sm:$0xff]  ;;  %5376 = vst.msk [vmem:[#allocation2 + $0xfb] sm:$0xff] %vm2602_vm8, %v5336_v11  ;;  %8421 = vmatprep.mubr.msk.f32.mxu1 %vm2602_vm8, %v5633_v4  ;;  %v5224_v55 = vpop.permute.xlu0 %5223  ;;  %8541 = vmatpush1.bf16.msra.mxu0 %v8540_v57  ;;  %v960_v57 = vsel %vm15261_vm1, %v924_v7, %v15200_v25  ;;  %vm15293_vm5 = vmand %vm853_vm3, %vm817_vm2 }
 0x518   : > { %v9273_v0 = vpack.i.bf16 %v5452_v29, %v5451_v54  ;;  %v5301_v56 = vmul.f32 %v9999_v24, %v5224_v55  ;;  %8542 = vmatprep.subr.bf16.mxu0 %v17081_v26  ;;  %v780_v29 = vsub.s32 %v15090_v9, %v779_v20  ;;  %v10001_v55 = vld [vmem:[%s11352_s27 + $0x113] sm:$0xff]  ;;  %v925_v24 = vadd.s32 18, %v15237_v15  ;;  %v341_v9 = vld [vmem:[%s16359_s4 + $0xe0] sm:$0xff] }
 0x519   : > { %vm15300_vm9 = vcmp.lt.s32.totalorder %v960_v57, 16  ;;  %v10002_v20 = vld [vmem:[%s11352_s27 + $0x11b] sm:$0xff]  ;;  %v5537_v7 = vld [vmem:[#allocation2 + $0x2c] sm:$0xff] }
 0x51a   : > { %9274 = vrot.lane.b32.xlu0 %v9273_v0, %s10056_s20  ;;  %v5337_v45 = vsel %vm15213_vm12, %v5301_v56, 0.0  ;;  %v5634_v2 = vld [vmem:[#allocation2 + $0xee] sm:$0xff]  ;;  %vm818_vm6 = vcmp.ne.s32.totalorder %v780_v29, 0  ;;  %vm854_vm7 = vcmp.lt.s32.totalorder %v780_v29, 0  ;;  %v5597_v21 = vld [vmem:[#allocation2 + $0xe5] sm:$0xff] }
 0x51b   : > { %5377 = vst.msk [vmem:[#allocation2 + $0x103] sm:$0xff] %vm2602_vm8, %v5337_v45  ;;  %v5226_v34 = vpop.permute.xlu1 %5225  ;;  %8422 = vmatmul.mubr.msk.f32.gmra.mrb[114].mxu1 %vm2602_vm8, %v5634_v2  ;;  %v5453_v4 = vld [vmem:[#allocation2 + $0xf1] sm:$0xff]  ;;  %8544 = vmatpush1.bf16.msra.mxu0 %v8543_v35  ;;  %v342_v56 = vld [vmem:[%s16359_s4 + $0xe8] sm:$0xff]  ;;  %vm15316_vm12 = vmand %vm854_vm7, %vm818_vm6 }
 0x51c   : > { %v5302_v19 = vmul.f32 %v10000_v3, %v5226_v34  ;;  %8545 = vmatprep.subr.bf16.mxu0 %v17081_v26  ;;  %v8546_v49 = vpack.c.bf16 %v342_v56, %v341_v9  ;;  %v961_v34 = vsel %vm15293_vm5, %v925_v24, %v15237_v15  ;;  %v926_v3 = vadd.s32 18, %v780_v29  ;;  %v5534_v24 = vld [vmem:[#allocation2 + $0x14] sm:$0xff] }
 0x51d   : > { %vm15324_vm13 = vcmp.lt.s32.totalorder %v961_v34, 16 }
 0x51e   : > { %v5338_v28 = vsel %vm15240_vm0, %v5302_v19, 0.0  ;;  %v5635_v11 = vld [vmem:[#allocation2 + $0xf6] sm:$0xff]  ;;  %v962_v17 = vsel %vm15316_vm12, %v926_v3, %v780_v29 }
 0x51f   : > { %v5454_v54 = vld [vmem:[#allocation2 + $0xf9] sm:$0xff]  ;;  %5378 = vst.msk [vmem:[#allocation2 + $0x10b] sm:$0xff] %vm2602_vm8, %v5338_v28  ;;  %8424 = vmatprep.mubr.msk.f32.mxu1 %vm2602_vm8, %v5635_v11  ;;  %v5228_v8 = vpop.permute.xlu0 %5227  ;;  %8547 = vmatpush1.bf16.msra.mxu0 %v8546_v49  ;;  %v343_v19 = vld [vmem:[%s16359_s4 + $0xf0] sm:$0xff]  ;;  %vm15336_vm14 = vcmp.lt.s32.totalorder %v962_v17, 16 }
 0x520   : > { %v9278_v59 = vpack.i.bf16 %v5454_v54, %v5453_v4  ;;  %v5303_v0 = vmul.f32 %v10001_v55, %v5228_v8  ;;  %8548 = vmatprep.subr.bf16.mxu0 %v17081_v26  ;;  %v8549_v38 = vpack.c.bf16 %v344_v48, %v343_v19  ;;  %v10003_v4 = vld [vmem:[%s11352_s27 + $0x123] sm:$0xff]  ;;  %v10004_v49 = vld [vmem:[%s11352_s27 + $0x12b] sm:$0x3f]  ;;  %v5538_v26 = vld [vmem:[#allocation2 + $0x34] sm:$0xff] }
 0x521   : > { %v5459_v8 = vld [vmem:[#allocation2 + $0x2] sm:$0xff]  ;;  %v5574_v19 = vld [vmem:[#allocation2 + $0x2d] sm:$0xff] }
 0x522   : > { %9279 = vrot.lane.b32.xlu1 %v9278_v59, %s10056_s20  ;;  %v5339_v13 = vsel %vm15272_vm4, %v5303_v0, 0.0  ;;  %v5636_v18 = vld [vmem:[#allocation2 + $0xfe] sm:$0xff]  ;;  %v5460_v48 = vld [vmem:[#allocation2 + $0xa] sm:$0xff] }
 0x523   : > { %5379 = vst.msk [vmem:[#allocation2 + $0x113] sm:$0xff] %vm2602_vm8, %v5339_v13  ;;  %v5230_v2 = vpop.permute.xlu1 %5229  ;;  %8425 = vmatmul.mubr.msk.f32.gmra.mrb[116].mxu1 %vm2602_vm8, %v5636_v18  ;;  %v5455_v30 = vld [vmem:[#allocation2 + $0x101] sm:$0xff]  ;;  %8550 = vmatpush1.bf16.msra.mxu0 %v8549_v38 }
 0x524   : > { %v5304_v12 = vmul.f32 %v10002_v20, %v5230_v2  ;;  %v5536_v59 = vld [vmem:[#allocation2 + $0x24] sm:$0xff]  ;;  %8552 = vmatprep.subr.bf16.mxu0 %v13902_v14  ;;  %v5535_v20 = vld [vmem:[#allocation2 + $0x1c] sm:$0xff] }
 0x525   : > { %v9293_v56 = vpack.i.bf16 %v5459_v8, %v5536_v59  ;;  %v5573_v18 = vld [vmem:[#allocation2 + $0x25] sm:$0xff]  ;;  %v9303_v34 = vpack.i.bf16 %v5536_v59, %v5535_v20  ;;  %v5539_v8 = vld [vmem:[#allocation2 + $0x3c] sm:$0xff] }
 0x526   : > { %v5340_v15 = vsel %vm15300_vm9, %v5304_v12, 0.0  ;;  %v5637_v1 = vld [vmem:[#allocation2 + $0x106] sm:$0xff]  ;;  %v5461_v12 = vld [vmem:[#allocation2 + $0x12] sm:$0xff] }
 0x527   : > { %v5456_v35 = vld [vmem:[#allocation2 + $0x109] sm:$0xff]  ;;  %5380 = vst.msk [vmem:[#allocation2 + $0x11b] sm:$0xff] %vm2602_vm8, %v5340_v15  ;;  %8427 = vmatprep.mubr.msk.f32.mxu1 %vm2602_vm8, %v5637_v1  ;;  %v5232_v28 = vpop.permute.xlu0 %5231  ;;  %v9298_v3 = vpack.i.bf16 %v5461_v12, %v5573_v18  ;;  %v5462_v15 = vld [vmem:[#allocation2 + $0x1a] sm:$0xff]  ;;  %v9318_v17 = vpack.i.bf16 %v5461_v12, %v5538_v26 }
 0x528   : > { %v9283_v11 = vpack.i.bf16 %v5456_v35, %v5455_v30  ;;  %v5305_v54 = vmul.f32 %v10003_v4, %v5232_v28  ;;  %v9313_v1 = vpack.i.bf16 %v5462_v15, %v5574_v19  ;;  %v9308_v30 = vpack.i.bf16 %v5460_v48, %v5537_v7  ;;  %v5575_v35 = vld [vmem:[#allocation2 + $0x35] sm:$0xff]  ;;  %v5463_v4 = vld [vmem:[#allocation2 + $0x22] sm:$0xff]  ;;  %v5578_v18 = vld [vmem:[#allocation2 + $0x4d] sm:$0xff] }
 0x529   : > { %v9333_v59 = vpack.i.bf16 %v5462_v15, %v5539_v8  ;;  %v5467_v19 = vld [vmem:[#allocation2 + $0x42] sm:$0xff] }
 0x52a   : > { %9284 = vrot.lane.b32.xlu0 %v9283_v11, %s10056_s20  ;;  %v5341_v55 = vsel %vm15324_vm13, %v5305_v54, 0.0  ;;  %v5638_v0 = vld [vmem:[#allocation2 + $0x10e] sm:$0xff]  ;;  %v9323_v54 = vpack.i.bf16 %v5463_v4, %v5575_v35  ;;  %v5580_v35 = vld [vmem:[#allocation2 + $0x5d] sm:$0xff] }
 0x52b   : > { %v5457_v57 = vld [vmem:[#allocation2 + $0x111] sm:$0xff]  ;;  %5381 = vst.msk [vmem:[#allocation2 + $0x123] sm:$0xff] %vm2602_vm8, %v5341_v55  ;;  %v5234_v29 = vpop.permute.xlu1 %5233  ;;  %8428 = vmatmul.mubr.msk.f32.gmra.mrb[118].mxu1 %vm2602_vm8, %v5638_v0  ;;  %v9328_v55 = vpack.i.bf16 %v5538_v26, %v5537_v7  ;;  %v5540_v0 = vld [vmem:[#allocation2 + $0x44] sm:$0xff] }
 0x52c   : > { %v9288_v25 = vpack.i.bf16 %v5534_v24, %v5457_v57  ;;  %v5306_v13 = vmul.f32 %v10004_v49, %v5234_v29  ;;  %v5576_v57 = vld [vmem:[#allocation2 + $0x3d] sm:$0xff]  ;;  %v5464_v24 = vld [vmem:[#allocation2 + $0x2a] sm:$0xff]  ;;  %v9343_v9 = vpack.i.bf16 %v5463_v4, %v5540_v0  ;;  %v9353_v49 = vpack.i.bf16 %v5540_v0, %v5539_v8 }
 0x52d   : > { %v9338_v29 = vpack.i.bf16 %v5464_v24, %v5576_v57  ;;  %v5468_v26 = vld [vmem:[#allocation2 + $0x4a] sm:$0xff]  ;;  %v5470_v0 = vld [vmem:[#allocation2 + $0x5a] sm:$0xff] }
 0x52e   : > { %9294 = vrot.lane.b32.xlu0 %v9293_v56, %s10058_s23  ;;  %9289 = vrot.lane.b32.xlu1 %v9288_v25, %s10056_s20  ;;  %v5342_v45 = vsel %vm15336_vm14, %v5306_v13, 0.0  ;;  %v5639_v2 = vld [vmem:[#allocation2 + $0x116] sm:$0xff]  ;;  %v5577_v56 = vld [vmem:[#allocation2 + $0x45] sm:$0xff] }
 0x52f   : > { %5383 = vst.msk [vmem:[#allocation2 + $0x12b] sm:$0x3f] %vm5382_vm15, %v5342_v45  ;;  %8430 = vmatprep.mubr.msk.f32.mxu1 %vm2602_vm8, %v5639_v2  ;;  %v5465_v25 = vld [vmem:[#allocation2 + $0x32] sm:$0xff]  ;;  %v5466_v2 = vld [vmem:[#allocation2 + $0x3a] sm:$0xff]  ;;  %v5581_v4 = vld [vmem:[#allocation2 + $0x65] sm:$0xff] }
 0x530   : > { %v9348_v13 = vpack.i.bf16 %v5465_v25, %v5577_v56  ;;  %v5541_v45 = vld [vmem:[#allocation2 + $0x4c] sm:$0xff]  ;;  %v9363_v20 = vpack.i.bf16 %v5466_v2, %v5578_v18  ;;  %v5471_v56 = vld [vmem:[#allocation2 + $0x62] sm:$0xff] }
 0x531   : > { %v9358_v12 = vpack.i.bf16 %v5464_v24, %v5541_v45 }
 0x532   : > { %9304 = vrot.lane.b32.xlu0 %v9303_v34, %s10056_s20  ;;  %9299 = vrot.lane.b32.xlu1 %v9298_v3, %s10059_s8  ;;  %v5640_v38 = vld [vmem:[#allocation2 + $0x11e] sm:$0xff]  ;;  %v5579_v34 = vld [vmem:[#allocation2 + $0x55] sm:$0xff] }
 0x533   : > { %8431 = vmatmul.mubr.msk.f32.gmra.mrb[120].mxu1 %vm2602_vm8, %v5640_v38  ;;  %v5542_v3 = vld [vmem:[#allocation2 + $0x54] sm:$0xff]  ;;  %v9373_v48 = vpack.i.bf16 %v5467_v19, %v5579_v34  ;;  %v5543_v38 = vld [vmem:[#allocation2 + $0x5c] sm:$0xff] }
 0x534   : > { %v9368_v7 = vpack.i.bf16 %v5465_v25, %v5542_v3  ;;  %v9383_v15 = vpack.i.bf16 %v5466_v2, %v5543_v38  ;;  %v5548_v2 = vld [vmem:[#allocation2 + $0x84] sm:$0xff] }
 0x535   : > { %v9443_v34 = vpack.i.bf16 %v5471_v56, %v5548_v2 }
 0x536   : > { %9314 = vrot.lane.b32.xlu0 %v9313_v1, %s10059_s8  ;;  %9309 = vrot.lane.b32.xlu1 %v9308_v30, %s10058_s23  ;;  %v5641_v28 = vld [vmem:[#allocation2 + $0x126] sm:$0xff]  ;;  %v5642_v11 = vld [vmem:[#allocation2 + $0x12e] sm:$0xff]  ;;  %v9378_v1 = vpack.i.bf16 %v5542_v3, %v5541_v45 }
 0x537   : > { %8433 = vmatprep.mubr.msk.f32.mxu1 %vm2602_vm8, %v5641_v28  ;;  %v5544_v30 = vld [vmem:[#allocation2 + $0x64] sm:$0xff] }
 0x538   : > { %8434 = vmatmul.mubr.msk.f32.gmra.mrb[122].mxu1 %vm2602_vm8, %v5642_v11  ;;  %v9393_v28 = vpack.i.bf16 %v5467_v19, %v5544_v30  ;;  %v9388_v11 = vpack.i.bf16 %v5468_v26, %v5580_v35  ;;  %v5585_v19 = vld [vmem:[#allocation2 + $0x85] sm:$0xff] }
 0x53a   : > { %9324 = vrot.lane.b32.xlu0 %v9323_v54, %s10059_s8  ;;  %9319 = vrot.lane.b32.xlu1 %v9318_v17, %s10058_s23  ;;  %v5469_v54 = vld [vmem:[#allocation2 + $0x52] sm:$0xff]  ;;  %v9403_v17 = vpack.i.bf16 %v5544_v30, %v5543_v38  ;;  %v5474_v30 = vld [vmem:[#allocation2 + $0x7a] sm:$0xff] }
 0x53b   : > { %v9398_v8 = vpack.i.bf16 %v5469_v54, %v5581_v4  ;;  %v5475_v4 = vld [vmem:[#allocation2 + $0x82] sm:$0xff] }
 0x53e   : > { %9334 = vrot.lane.b32.xlu0 %v9333_v59, %s10058_s23  ;;  %9329 = vrot.lane.b32.xlu1 %v9328_v55, %s10056_s20  ;;  %v5582_v59 = vld [vmem:[#allocation2 + $0x6d] sm:$0xff] }
 0x53f   : > { %v5545_v55 = vld [vmem:[#allocation2 + $0x6c] sm:$0xff]  ;;  %v9413_v57 = vpack.i.bf16 %v5470_v0, %v5582_v59 }
 0x540   : > { %v9408_v24 = vpack.i.bf16 %v5468_v26, %v5545_v55 }
 0x542   : > { %9344 = vrot.lane.b32.xlu0 %v9343_v9, %s10058_s23  ;;  %9339 = vrot.lane.b32.xlu1 %v9338_v29, %s10059_s8  ;;  %v5583_v9 = vld [vmem:[#allocation2 + $0x75] sm:$0xff] }
 0x543   : > { %v5546_v29 = vld [vmem:[#allocation2 + $0x74] sm:$0xff]  ;;  %v9423_v25 = vpack.i.bf16 %v5471_v56, %v5583_v9  ;;  %v5476_v9 = vld [vmem:[#allocation2 + $0x8a] sm:$0xff] }
 0x544   : > { %v9428_v45 = vpack.i.bf16 %v5546_v29, %v5545_v55 }
 0x546   : > { %9354 = vrot.lane.b32.xlu0 %v9353_v49, %s10056_s20  ;;  %9349 = vrot.lane.b32.xlu1 %v9348_v13, %s10059_s8  ;;  %v9418_v49 = vpack.i.bf16 %v5469_v54, %v5546_v29  ;;  %v5547_v13 = vld [vmem:[#allocation2 + $0x7c] sm:$0xff] }
 0x547   : > { %v9433_v18 = vpack.i.bf16 %v5470_v0, %v5547_v13  ;;  %v5552_v0 = vld [vmem:[#allocation2 + $0xa4] sm:$0xff] }
 0x548   : > { %v9493_v29 = vpack.i.bf16 %v5475_v4, %v5552_v0 }
 0x54a   : > { %9364 = vrot.lane.b32.xlu0 %v9363_v20, %s10059_s8  ;;  %9359 = vrot.lane.b32.xlu1 %v9358_v12, %s10058_s23  ;;  %v5584_v20 = vld [vmem:[#allocation2 + $0x7d] sm:$0xff]  ;;  %v5472_v12 = vld [vmem:[#allocation2 + $0x6a] sm:$0xff] }
 0x54b   : > { %v9438_v3 = vpack.i.bf16 %v5472_v12, %v5584_v20  ;;  %v5590_v20 = vld [vmem:[#allocation2 + $0xad] sm:$0xff] }
 0x54e   : > { %9374 = vrot.lane.b32.xlu0 %v9373_v48, %s10059_s8  ;;  %9369 = vrot.lane.b32.xlu1 %v9368_v7, %s10058_s23  ;;  %v5473_v48 = vld [vmem:[#allocation2 + $0x72] sm:$0xff]  ;;  %v9453_v7 = vpack.i.bf16 %v5548_v2, %v5547_v13 }
 0x54f   : > { %v9448_v38 = vpack.i.bf16 %v5473_v48, %v5585_v19  ;;  %v5477_v13 = vld [vmem:[#allocation2 + $0x92] sm:$0xff] }
 0x552   : > { %9384 = vrot.lane.b32.xlu0 %v9383_v15, %s10058_s23  ;;  %9379 = vrot.lane.b32.xlu1 %v9378_v1, %s10056_s20  ;;  %v5586_v15 = vld [vmem:[#allocation2 + $0x8d] sm:$0xff] }
 0x553   : > { %v5549_v1 = vld [vmem:[#allocation2 + $0x8c] sm:$0xff]  ;;  %v9463_v35 = vpack.i.bf16 %v5474_v30, %v5586_v15  ;;  %v5554_v15 = vld [vmem:[#allocation2 + $0xb4] sm:$0xff] }
 0x554   : > { %v9458_v26 = vpack.i.bf16 %v5472_v12, %v5549_v1  ;;  %v5553_v12 = vld [vmem:[#allocation2 + $0xac] sm:$0xff] }
 0x556   : > { %9394 = vrot.lane.b32.xlu0 %v9393_v28, %s10058_s23  ;;  %9389 = vrot.lane.b32.xlu1 %v9388_v11, %s10059_s8  ;;  %v5587_v28 = vld [vmem:[#allocation2 + $0x95] sm:$0xff] }
 0x557   : > { %v5550_v11 = vld [vmem:[#allocation2 + $0x94] sm:$0xff]  ;;  %v9473_v54 = vpack.i.bf16 %v5475_v4, %v5587_v28  ;;  %v9518_v28 = vpack.i.bf16 %v5477_v13, %v5554_v15 }
 0x558   : > { %v9478_v55 = vpack.i.bf16 %v5550_v11, %v5549_v1  ;;  %v5479_v1 = vld [vmem:[#allocation2 + $0xa2] sm:$0xff] }
 0x55a   : > { %9404 = vrot.lane.b32.xlu0 %v9403_v17, %s10056_s20  ;;  %9399 = vrot.lane.b32.xlu1 %v9398_v8, %s10059_s8  ;;  %v9468_v17 = vpack.i.bf16 %v5473_v48, %v5550_v11  ;;  %v5551_v8 = vld [vmem:[#allocation2 + $0x9c] sm:$0xff] }
 0x55b   : > { %v9483_v59 = vpack.i.bf16 %v5474_v30, %v5551_v8  ;;  %v5555_v11 = vld [vmem:[#allocation2 + $0xbc] sm:$0xff] }
 0x55e   : > { %9414 = vrot.lane.b32.xlu0 %v9413_v57, %s10059_s8  ;;  %9409 = vrot.lane.b32.xlu1 %v9408_v24, %s10058_s23  ;;  %v5588_v57 = vld [vmem:[#allocation2 + $0x9d] sm:$0xff]  ;;  %v15387_v24 = vpop.permute.xlu0 %9204 }
 0x55f   : > { %v9488_v56 = vpack.i.bf16 %v5476_v9, %v5588_v57  ;;  %v9207_v63 = vunpack.i.h.bf16 %v15387_v24 }
 0x562   : > { %9424 = vrot.lane.b32.xlu0 %v9423_v25, %s10059_s8  ;;  %9419 = vrot.lane.b32.xlu1 %v9418_v49, %s10058_s23  ;;  %v5589_v25 = vld [vmem:[#allocation2 + $0xa5] sm:$0xff]  ;;  %v15391_v49 = vpop.permute.xlu1 %9209 }
 0x563   : > { %v9498_v2 = vpack.i.bf16 %v5477_v13, %v5589_v25  ;;  %v5593_v25 = vld [vmem:[#allocation2 + $0xc5] sm:$0xff]  ;;  %v5481_v13 = vld [vmem:[#allocation2 + $0xb2] sm:$0xff] }
 0x566   : > { %9434 = vrot.lane.b32.xlu0 %v9433_v18, %s10058_s23  ;;  %9429 = vrot.lane.b32.xlu1 %v9428_v45, %s10056_s20  ;;  %v15395_v18 = vpop.permute.xlu0 %9214  ;;  %v9503_v45 = vpack.i.bf16 %v5552_v0, %v5551_v8  ;;  %v9528_v8 = vpack.i.bf16 %v5554_v15, %v5553_v12  ;;  %v5480_v0 = vld [vmem:[#allocation2 + $0xaa] sm:$0xff] }
 0x56a   : > { %9444 = vrot.lane.b32.xlu0 %v9443_v34, %s10058_s23  ;;  %9439 = vrot.lane.b32.xlu1 %v9438_v3, %s10059_s8  ;;  %v5478_v34 = vld [vmem:[#allocation2 + $0x9a] sm:$0xff]  ;;  %v15399_v3 = vpop.permute.xlu1 %9219  ;;  %v15401_v19 = vpop.permute.xlu0 %9224 }
 0x56b   : > { %v9513_v48 = vpack.i.bf16 %v5478_v34, %v5590_v20 }
 0x56e   : > { %9454 = vrot.lane.b32.xlu0 %v9453_v7, %s10056_s20  ;;  %9449 = vrot.lane.b32.xlu1 %v9448_v38, %s10059_s8  ;;  %v9508_v7 = vpack.i.bf16 %v5476_v9, %v5553_v12  ;;  %v5591_v38 = vld [vmem:[#allocation2 + $0xb5] sm:$0xff]  ;;  %v15405_v30 = vpop.permute.xlu1 %9229  ;;  %v9548_v12 = vpack.i.bf16 %v5481_v13, %v5593_v25 }
 0x572   : > { %9464 = vrot.lane.b32.xlu0 %v9463_v35, %s10059_s8  ;;  %9459 = vrot.lane.b32.xlu1 %v9458_v26, %s10058_s23  ;;  %v15407_v35 = vpop.permute.xlu0 %9234  ;;  %v9523_v26 = vpack.i.bf16 %v5479_v1, %v5591_v38  ;;  %v15411_v4 = vpop.permute.xlu1 %9239 }
 0x576   : > { %9474 = vrot.lane.b32.xlu0 %v9473_v54, %s10059_s8  ;;  %9469 = vrot.lane.b32.xlu1 %v9468_v17, %s10058_s23  ;;  %v15413_v54 = vpop.permute.xlu0 %9244  ;;  %v9533_v17 = vpack.i.bf16 %v5478_v34, %v5555_v11  ;;  %v15417_v57 = vpop.permute.xlu1 %9249  ;;  %v5594_v34 = vld [vmem:[#allocation2 + $0xcd] sm:$0xff] }
 0x57a   : > { %9484 = vrot.lane.b32.xlu0 %v9483_v59, %s10058_s23  ;;  %9479 = vrot.lane.b32.xlu1 %v9478_v55, %s10056_s20  ;;  %v5556_v59 = vld [vmem:[#allocation2 + $0xc4] sm:$0xff]  ;;  %v15419_v9 = vpop.permute.xlu0 %9254 }
 0x57b   : > { %v5592_v55 = vld [vmem:[#allocation2 + $0xbd] sm:$0xff]  ;;  %v9553_v20 = vpack.i.bf16 %v5556_v59, %v5555_v11 }
 0x57c   : > { %v5483_v11 = vld [vmem:[#allocation2 + $0xc2] sm:$0xff] }
 0x57e   : > { %9494 = vrot.lane.b32.xlu0 %v9493_v29, %s10058_s23  ;;  %9489 = vrot.lane.b32.xlu1 %v9488_v56, %s10059_s8  ;;  %v9543_v29 = vpack.i.bf16 %v5479_v1, %v5556_v59  ;;  %v9538_v56 = vpack.i.bf16 %v5480_v0, %v5592_v55 }
 0x582   : > { %9504 = vrot.lane.b32.xlu0 %v9503_v45, %s10056_s20  ;;  %9499 = vrot.lane.b32.xlu1 %v9498_v2, %s10059_s8  ;;  %v15423_v45 = vpop.permute.xlu1 %9259  ;;  %v15425_v2 = vpop.permute.xlu0 %9264 }
 0x586   : > { %9514 = vrot.lane.b32.xlu0 %v9513_v48, %s10059_s8  ;;  %9509 = vrot.lane.b32.xlu1 %v9508_v7, %s10058_s23  ;;  %v5557_v48 = vld [vmem:[#allocation2 + $0xcc] sm:$0xff]  ;;  %v5482_v7 = vld [vmem:[#allocation2 + $0xba] sm:$0xff]  ;;  %v15429_v38 = vpop.permute.xlu1 %9269 }
 0x587   : > { %v9563_v1 = vpack.i.bf16 %v5482_v7, %v5594_v34  ;;  %v9206_v34 = vunpack.i.l.bf16 %v15387_v24 }
 0x589   : > { %v6443_v40 = vsel %vm2602_vm8, %v5387_v51, %v9206_v34  ;;  %v5388_v51 = vld [vmem:[#allocation2 + $0x8] sm:$0xff] }
 0x58a   : > { %9524 = vrot.lane.b32.xlu0 %v9523_v26, %s10059_s8  ;;  %9519 = vrot.lane.b32.xlu1 %v9518_v28, %s10058_s23  ;;  %v9558_v26 = vpack.i.bf16 %v5480_v0, %v5557_v48  ;;  %v5595_v28 = vld [vmem:[#allocation2 + $0xd5] sm:$0xff] }
 0x58b   : > { %v9573_v55 = vpack.i.bf16 %v5483_v11, %v5595_v28 }
 0x58c   : > { %v15431_v15 = vpop.permute.xlu0 %9274 }
 0x58e   : > { %9534 = vrot.lane.b32.xlu0 %v9533_v17, %s10058_s23  ;;  %9529 = vrot.lane.b32.xlu1 %v9528_v8, %s10056_s20  ;;  %v5558_v17 = vld [vmem:[#allocation2 + $0xd4] sm:$0xff] }
 0x592   : > { %9544 = vrot.lane.b32.xlu0 %v9543_v29, %s10058_s23  ;;  %9539 = vrot.lane.b32.xlu1 %v9538_v56, %s10059_s8  ;;  %v9568_v29 = vpack.i.bf16 %v5481_v13, %v5558_v17  ;;  %v5559_v56 = vld [vmem:[#allocation2 + $0xdc] sm:$0xff]  ;;  %v5498_v13 = vld [vmem:[#allocation2 + $0x13] sm:$0xff] }
 0x594   : > { %v15435_v8 = vpop.permute.xlu1 %9279 }
 0x596   : > { %9554 = vrot.lane.b32.xlu0 %v9553_v20, %s10056_s20  ;;  %9549 = vrot.lane.b32.xlu1 %v9548_v12, %s10059_s8  ;;  %v9583_v20 = vpack.i.bf16 %v5482_v7, %v5559_v56  ;;  %v9578_v12 = vpack.i.bf16 %v5558_v17, %v5557_v48 }
 0x59a   : > { %9564 = vrot.lane.b32.xlu0 %v9563_v1, %s10059_s8  ;;  %9559 = vrot.lane.b32.xlu1 %v9558_v26, %s10058_s23  ;;  %v5560_v26 = vld [vmem:[#allocation2 + $0xe4] sm:$0xff] }
 0x59b   : > { %v9593_v48 = vpack.i.bf16 %v5483_v11, %v5560_v26  ;;  %v15456_v11 = vld [vmem:[#allocation2 + $0xd2] sm:$0xff]  ;;  %v9603_v24 = vpack.i.bf16 %v5560_v26, %v5559_v56 }
 0x59c   : > { %v15437_v59 = vpop.permute.xlu0 %9284 }
 0x59e   : > { %9574 = vrot.lane.b32.xlu0 %v9573_v55, %s10059_s8  ;;  %9569 = vrot.lane.b32.xlu1 %v9568_v29, %s10058_s23  ;;  %v5484_v55 = vld [vmem:[#allocation2 + $0xca] sm:$0xff] }
 0x59f   : > { %v9588_v17 = vpack.i.bf16 %v5484_v55, %v5596_v32 }
 0x5a0   : > { %v15441_v25 = vpop.permute.xlu1 %9289  ;;  %v9295_v0 = vpop.permute.xlu0 %9294 }
 0x5a1   : > { %v9292_v1 = vunpack.i.h.bf16 %v15441_v25  ;;  %v9297_v60 = vunpack.i.h.bf16 %v9295_v0  ;;  %v9296_v28 = vunpack.i.l.bf16 %v9295_v0 }
 0x5a2   : > { %9584 = vrot.lane.b32.xlu0 %v9583_v20, %s10058_s23  ;;  %9579 = vrot.lane.b32.xlu1 %v9578_v12, %s10056_s20 }
 0x5a3   : > { %v6551_v29 = vsel %vm2602_vm8, %v5498_v13, %v9292_v1  ;;  %v6479_v12 = vsel %vm3731_vm10, %v6443_v40, %v9297_v60  ;;  %v9598_v13 = vpack.i.bf16 %v15456_v11, %v5597_v21  ;;  %v5598_v40 = vld [vmem:[#allocation2 + $0xed] sm:$0xff]  ;;  %v6444_v21 = vsel %vm2602_vm8, %v5388_v51, %v9207_v63 }
 0x5a4   : > { %v9300_v46 = vpop.permute.xlu1 %9299  ;;  %v9305_v7 = vpop.permute.xlu0 %9304  ;;  %v6587_v20 = vsel %vm3731_vm10, %v6551_v29, %v9296_v28  ;;  %v5499_v28 = vld [vmem:[#allocation2 + $0x1b] sm:$0xff]  ;;  %v15459_v60 = vld [vmem:[#allocation2 + $0xec] sm:$0xff] }
 0x5a5   : > { %v9302_v50 = vunpack.i.h.bf16 %v9300_v46  ;;  %v9301_v44 = vunpack.i.l.bf16 %v9300_v46  ;;  %v9306_v0 = vunpack.i.l.bf16 %v9305_v7  ;;  %v5486_v29 = vld [vmem:[#allocation2 + $0xda] sm:$0xff] }
 0x5a6   : > { %9594 = vrot.lane.b32.xlu0 %v9593_v48, %s10058_s23  ;;  %9589 = vrot.lane.b32.xlu1 %v9588_v17, %s10059_s8 }
 0x5a7   : > { %v6623_v1 = vsel %vm3768_vm11, %v6587_v20, %v9301_v44  ;;  %v6515_v32 = vsel %vm3768_vm11, %v6479_v12, %v9302_v50  ;;  %v9211_v50 = vunpack.i.l.bf16 %v15391_v49  ;;  %v9307_v44 = vunpack.i.h.bf16 %v9305_v7 }
 0x5a8   : > { %v9310_v46 = vpop.permute.xlu1 %9309  ;;  %v9315_v34 = vpop.permute.xlu0 %9314  ;;  %6831 = vmatprep.mubr.f32.mxu0 %v6623_v1  ;;  %v6552_v56 = vsel %vm2602_vm8, %v5499_v28, %v9306_v0  ;;  %v9613_v7 = vpack.i.bf16 %v5486_v29, %v5598_v40  ;;  %v5487_v28 = vld [vmem:[#allocation2 + $0xe2] sm:$0xff] }
 0x5a9   : > { %v9312_v48 = vunpack.i.h.bf16 %v9310_v46  ;;  %v9311_v39 = vunpack.i.l.bf16 %v9310_v46  ;;  %v9317_v17 = vunpack.i.h.bf16 %v9315_v34  ;;  %v9316_v58 = vunpack.i.l.bf16 %v9315_v34  ;;  %6832 = vmatmul.mubr.f32.vlgmr.msra.gmra.mrb[40].mxu0 %v6515_v32 }
 0x5aa   : > { %9604 = vrot.lane.b32.xlu0 %v9603_v24, %s10056_s20  ;;  %9599 = vrot.lane.b32.xlu1 %v9598_v13, %s10059_s8  ;;  %v9608_v46 = vpack.i.bf16 %v5484_v55, %v15459_v60  ;;  %v5389_v24 = vld [vmem:[#allocation2 + $0x10] sm:$0xff]  ;;  %v5500_v13 = vld [vmem:[#allocation2 + $0x23] sm:$0xff] }
 0x5ab   : > { %v6588_v26 = vsel %vm3731_vm10, %v6552_v56, %v9311_v39  ;;  %v6480_v20 = vsel %vm3731_vm10, %v6444_v21, %v9312_v48  ;;  %8554 = vmatpush3.bf16.msra.mxu0 %v13902_v14  ;;  %v5599_v48 = vld [vmem:[#allocation2 + $0xf5] sm:$0xff]  ;;  %v6445_v55 = vsel %vm2602_vm8, %v5389_v24, %v9211_v50  ;;  %v9216_v24 = vunpack.i.l.bf16 %v15395_v18 }
 0x5ac   : > { %v9320_v12 = vpop.permute.xlu1 %9319  ;;  %v9325_v1 = vpop.permute.xlu0 %9324  ;;  %v6624_v32 = vsel %vm3768_vm11, %v6588_v26, %v9316_v58  ;;  %v6516_v34 = vsel %vm3768_vm11, %v6480_v20, %v9317_v17  ;;  %8556 = vmatprep.subr.bf16.mxu0 %v13916_v43  ;;  %v5562_v14 = vld [vmem:[#allocation2 + $0xf4] sm:$0xff]  ;;  %v6553_v58 = vsel %vm2602_vm8, %v5500_v13, %v9307_v44  ;;  %v9623_v20 = vpack.i.bf16 %v5487_v28, %v5599_v48 }
 0x5ad   : > { %v9322_v63 = vunpack.i.h.bf16 %v9320_v12  ;;  %v9321_v0 = vunpack.i.l.bf16 %v9320_v12  ;;  %v9327_v39 = vunpack.i.h.bf16 %v9325_v1  ;;  %v9326_v51 = vunpack.i.l.bf16 %v9325_v1  ;;  %6836 = vmatprep.mubr.f32.mxu0 %v6624_v32  ;;  %v15484_v32 = vld [vmem:[#allocation2 + $0xfc] sm:$0xff] }
 0x5ae   : > { %9614 = vrot.lane.b32.xlu0 %v9613_v7, %s10059_s8  ;;  %9609 = vrot.lane.b32.xlu1 %v9608_v46, %s10058_s23  ;;  %v9618_v12 = vpack.i.bf16 %v15456_v11, %v5562_v14  ;;  %v9212_v44 = vunpack.i.h.bf16 %v15391_v49  ;;  %v9633_v49 = vpack.i.bf16 %v5486_v29, %v15484_v32 }
 0x5af   : > { %6837 = vmatmul.mubr.f32.gmra.mrb[42].mxu0 %v6516_v34  ;;  %v6589_v17 = vsel %vm3731_vm10, %v6553_v58, %v9321_v0  ;;  %v6481_v40 = vsel %vm3731_vm10, %v6445_v55, %v9322_v63  ;;  %v5501_v34 = vld [vmem:[#allocation2 + $0x2b] sm:$0xff]  ;;  %v9628_v0 = vpack.i.bf16 %v5562_v14, %v15459_v60 }
 0x5b0   : > { %v9330_v56 = vpop.permute.xlu1 %9329  ;;  %v9335_v21 = vpop.permute.xlu0 %9334  ;;  %v6625_v26 = vsel %vm3768_vm11, %v6589_v17, %v9326_v51  ;;  %v6517_v1 = vsel %vm3768_vm11, %v6481_v40, %v9327_v39  ;;  %8558 = vmatpush3.bf16.msra.mxu0 %v13916_v43  ;;  %v5390_v39 = vld [vmem:[#allocation2 + $0x18] sm:$0xff]  ;;  %v5564_v55 = vld [vmem:[#allocation2 + $0x104] sm:$0xff] }
 0x5b1   : > { %v9331_v50 = vunpack.i.l.bf16 %v9330_v56  ;;  %6841 = vmatprep.mubr.f32.mxu0 %v6625_v26  ;;  %v9337_v7 = vunpack.i.h.bf16 %v9335_v21  ;;  %v9336_v46 = vunpack.i.l.bf16 %v9335_v21  ;;  %v9332_v51 = vunpack.i.h.bf16 %v9330_v56  ;;  %v5600_v17 = vld [vmem:[#allocation2 + $0xfd] sm:$0xff]  ;;  %v5488_v56 = vld [vmem:[#allocation2 + $0xea] sm:$0xff] }
 0x5b2   : > { %9624 = vrot.lane.b32.xlu0 %v9623_v20, %s10059_s8  ;;  %9619 = vrot.lane.b32.xlu1 %v9618_v12, %s10058_s23  ;;  %v6446_v58 = vsel %vm2602_vm8, %v5390_v39, %v9212_v44  ;;  %v9638_v44 = vpack.i.bf16 %v5488_v56, %v5600_v17 }
 0x5b3   : > { %6842 = vmatmul.mubr.f32.gmra.mrb[44].mxu0 %v6517_v1  ;;  %v6554_v11 = vsel %vm2602_vm8, %v5501_v34, %v9331_v50  ;;  %v6482_v29 = vsel %vm3731_vm10, %v6446_v58, %v9337_v7  ;;  %v9643_v1 = vpack.i.bf16 %v5487_v28, %v5564_v55  ;;  %v5502_v50 = vld [vmem:[#allocation2 + $0x33] sm:$0xff]  ;;  %v5391_v34 = vld [vmem:[#allocation2 + $0x20] sm:$0xff] }
 0x5b4   : > { %v9340_v63 = vpop.permute.xlu1 %9339  ;;  %v9345_v43 = vpop.permute.xlu0 %9344  ;;  %v6590_v26 = vsel %vm3731_vm10, %v6554_v11, %v9336_v46  ;;  %v6555_v46 = vsel %vm2602_vm8, %v5502_v50, %v9332_v51  ;;  %v6447_v7 = vsel %vm2602_vm8, %v5391_v34, %v9216_v24  ;;  %v5601_v11 = vld [vmem:[#allocation2 + $0x105] sm:$0xff]  ;;  %v5489_v51 = vld [vmem:[#allocation2 + $0xf2] sm:$0xff] }
 0x5b5   : > { %v9342_v13 = vunpack.i.h.bf16 %v9340_v63  ;;  %v9341_v48 = vunpack.i.l.bf16 %v9340_v63  ;;  %v9347_v40 = vunpack.i.h.bf16 %v9345_v43  ;;  %v9346_v21 = vunpack.i.l.bf16 %v9345_v43 }
 0x5b6   : > { %9634 = vrot.lane.b32.xlu0 %v9633_v49, %s10058_s23  ;;  %9629 = vrot.lane.b32.xlu1 %v9628_v0, %s10056_s20  ;;  %v9217_v49 = vunpack.i.h.bf16 %v15395_v18  ;;  %v9653_v18 = vpack.i.bf16 %v5564_v55, %v15484_v32  ;;  %v9648_v17 = vpack.i.bf16 %v5489_v51, %v5601_v11 }
 0x5b7   : > { %v6626_v60 = vsel %vm3768_vm11, %v6590_v26, %v9341_v48  ;;  %v6518_v14 = vsel %vm3768_vm11, %v6482_v29, %v9342_v13  ;;  %v6591_v28 = vsel %vm3731_vm10, %v6555_v46, %v9346_v21  ;;  %v6483_v39 = vsel %vm3731_vm10, %v6447_v7, %v9347_v40  ;;  %v5392_v26 = vld [vmem:[#allocation2 + $0x28] sm:$0xff]  ;;  %v5503_v21 = vld [vmem:[#allocation2 + $0x3b] sm:$0xff] }
 0x5b8   : > { %v9350_v20 = vpop.permute.xlu1 %9349  ;;  %v15499_v12 = vpop.permute.xlu0 %9354  ;;  %6846 = vmatprep.mubr.f32.mxu0 %v6626_v60  ;;  %v15512_v40 = vld [vmem:[#allocation2 + $0x10c] sm:$0xff]  ;;  %v6448_v55 = vsel %vm2602_vm8, %v5392_v26, %v9217_v49  ;;  %v5504_v49 = vld [vmem:[#allocation2 + $0x43] sm:$0xff] }
 0x5b9   : > { %v9352_v63 = vunpack.i.h.bf16 %v9350_v20  ;;  %v9351_v43 = vunpack.i.l.bf16 %v9350_v20  ;;  %6847 = vmatmul.mubr.f32.gmra.mrb[46].mxu0 %v6518_v14  ;;  %v9356_v0 = vunpack.i.l.bf16 %v15499_v12  ;;  %v9357_v50 = vunpack.i.h.bf16 %v15499_v12 }
 0x5ba   : > { %9644 = vrot.lane.b32.xlu0 %v9643_v1, %s10058_s23  ;;  %9639 = vrot.lane.b32.xlu1 %v9638_v44, %s10059_s8  ;;  %v5602_v1 = vld [vmem:[#allocation2 + $0x10d] sm:$0xff]  ;;  %v9221_v44 = vunpack.i.l.bf16 %v15399_v3  ;;  %v9658_v12 = vpack.i.bf16 %v5488_v56, %v15512_v40 }
 0x5bb   : > { %v6627_v13 = vsel %vm3768_vm11, %v6591_v28, %v9351_v43  ;;  %v6519_v48 = vsel %vm3768_vm11, %v6483_v39, %v9352_v63  ;;  %v6556_v32 = vsel %vm2602_vm8, %v5503_v21, %v9356_v0  ;;  %v5490_v63 = vld [vmem:[#allocation2 + $0xfa] sm:$0xff]  ;;  %v6557_v26 = vsel %vm2602_vm8, %v5504_v49, %v9357_v50 }
 0x5bc   : > { %v9360_v58 = vpop.permute.xlu1 %9359  ;;  %v9365_v24 = vpop.permute.xlu0 %9364  ;;  %6851 = vmatprep.mubr.f32.mxu0 %v6627_v13  ;;  %v9663_v28 = vpack.i.bf16 %v5490_v63, %v5602_v1  ;;  %v5603_v13 = vld [vmem:[#allocation2 + $0x115] sm:$0xff]  ;;  %v9222_v21 = vunpack.i.h.bf16 %v15399_v3 }
 0x5bd   : > { %v9362_v29 = vunpack.i.h.bf16 %v9360_v58  ;;  %v9361_v60 = vunpack.i.l.bf16 %v9360_v58  ;;  %v9367_v14 = vunpack.i.h.bf16 %v9365_v24  ;;  %v9366_v20 = vunpack.i.l.bf16 %v9365_v24  ;;  %6852 = vmatmul.mubr.f32.gmra.mrb[48].mxu0 %v6519_v48  ;;  %v15534_v50 = vld [vmem:[#allocation2 + $0x11c] sm:$0xff] }
 0x5be   : > { %9654 = vrot.lane.b32.xlu0 %v9653_v18, %s10056_s20  ;;  %9649 = vrot.lane.b32.xlu1 %v9648_v17, %s10059_s8  ;;  %v5566_v18 = vld [vmem:[#allocation2 + $0x114] sm:$0xff] }
 0x5bf   : > { %v6592_v34 = vsel %vm3731_vm10, %v6556_v32, %v9361_v60  ;;  %v6484_v43 = vsel %vm3731_vm10, %v6448_v55, %v9362_v29  ;;  %v5393_v17 = vld [vmem:[#allocation2 + $0x30] sm:$0xff]  ;;  %v5491_v29 = vld [vmem:[#allocation2 + $0x102] sm:$0xff] }
 0x5c0   : > { %v9370_v46 = vpop.permute.xlu1 %9369  ;;  %v9375_v7 = vpop.permute.xlu0 %9374  ;;  %v6628_v11 = vsel %vm3768_vm11, %v6592_v34, %v9366_v20  ;;  %v6520_v39 = vsel %vm3768_vm11, %v6484_v43, %v9367_v14  ;;  %v6449_v56 = vsel %vm2602_vm8, %v5393_v17, %v9221_v44  ;;  %v9673_v14 = vpack.i.bf16 %v5491_v29, %v5603_v13 }
 0x5c1   : > { %v9372_v48 = vunpack.i.h.bf16 %v9370_v46  ;;  %v9371_v58 = vunpack.i.l.bf16 %v9370_v46  ;;  %v9377_v0 = vunpack.i.h.bf16 %v9375_v7  ;;  %v9376_v24 = vunpack.i.l.bf16 %v9375_v7  ;;  %6856 = vmatprep.mubr.f32.mxu0 %v6628_v11  ;;  %v5505_v11 = vld [vmem:[#allocation2 + $0x4b] sm:$0xff] }
 0x5c2   : > { %9664 = vrot.lane.b32.xlu0 %v9663_v28, %s10059_s8  ;;  %9659 = vrot.lane.b32.xlu1 %v9658_v12, %s10058_s23  ;;  %v9668_v34 = vpack.i.bf16 %v5489_v51, %v5566_v18  ;;  %v5394_v12 = vld [vmem:[#allocation2 + $0x38] sm:$0xff]  ;;  %v9678_v13 = vpack.i.bf16 %v5566_v18, %v15512_v40 }
 0x5c3   : > { %6857 = vmatmul.mubr.f32.gmra.mrb[50].mxu0 %v6520_v39  ;;  %v6593_v60 = vsel %vm3731_vm10, %v6557_v26, %v9371_v58  ;;  %v6485_v20 = vsel %vm3731_vm10, %v6449_v56, %v9372_v48  ;;  %v9683_v48 = vpack.i.bf16 %v5490_v63, %v15534_v50  ;;  %v6450_v58 = vsel %vm2602_vm8, %v5394_v12, %v9222_v21  ;;  %v5604_v56 = vld [vmem:[#allocation2 + $0x11d] sm:$0xff] }
 0x5c4   : > { %v9380_v1 = vpop.permute.xlu1 %9379  ;;  %v9385_v32 = vpop.permute.xlu0 %9384  ;;  %v6629_v55 = vsel %vm3768_vm11, %v6593_v60, %v9376_v24  ;;  %v6521_v43 = vsel %vm3768_vm11, %v6485_v20, %v9377_v0  ;;  %v9226_v0 = vunpack.i.l.bf16 %v15401_v19  ;;  %v5568_v60 = vld [vmem:[#allocation2 + $0x124] sm:$0xff] }
 0x5c5   : > { %v9381_v46 = vunpack.i.l.bf16 %v9380_v1  ;;  %6861 = vmatprep.mubr.f32.mxu0 %v6629_v55  ;;  %v9387_v44 = vunpack.i.h.bf16 %v9385_v32  ;;  %v9386_v7 = vunpack.i.l.bf16 %v9385_v32  ;;  %v15538_v3 = vpop.f32.mrb[104].mxu1  ;;  %v9382_v24 = vunpack.i.h.bf16 %v9380_v1  ;;  %v15553_v1 = vld [vmem:[#allocation2 + $0x10a] sm:$0xff] }
 0x5c6   : > { %9674 = vrot.lane.b32.xlu0 %v9673_v14, %s10059_s8  ;;  %9669 = vrot.lane.b32.xlu1 %v9668_v34, %s10058_s23  ;;  %v15541_v51 = vpop.f32.mrb[105].mxu1  ;;  %v9227_v32 = vunpack.i.h.bf16 %v15401_v19  ;;  %v9688_v34 = vpack.i.bf16 %v15553_v1, %v5604_v56 }
 0x5c7   : > { %6862 = vmatmul.mubr.f32.gmra.mrb[52].mxu0 %v6521_v43  ;;  %v6558_v28 = vsel %vm2602_vm8, %v5505_v11, %v9381_v46  ;;  %v6486_v63 = vsel %vm3731_vm10, %v6450_v58, %v9387_v44  ;;  %v9693_v43 = vpack.i.bf16 %v5491_v29, %v5568_v60  ;;  %v5506_v46 = vld [vmem:[#allocation2 + $0x53] sm:$0xff]  ;;  %v5395_v11 = vld [vmem:[#allocation2 + $0x40] sm:$0xff] }
 0x5c8   : > { %v9390_v39 = vpop.permute.xlu1 %9389  ;;  %v9395_v26 = vpop.permute.xlu0 %9394  ;;  %v6594_v40 = vsel %vm3731_vm10, %v6558_v28, %v9386_v7  ;;  %v6559_v44 = vsel %vm2602_vm8, %v5506_v46, %v9382_v24  ;;  %v6451_v28 = vsel %vm2602_vm8, %v5395_v11, %v9226_v0  ;;  %v5643_v58 = vld [vmem:[#allocation2 + $0x136] sm:$0xff]  ;;  %v5606_v46 = vld [vmem:[#allocation2 + $0x12d] sm:$0xff] }
 0x5c9   : > { %v9392_v49 = vunpack.i.h.bf16 %v9390_v39  ;;  %v9391_v17 = vunpack.i.l.bf16 %v9390_v39  ;;  %v9397_v14 = vunpack.i.h.bf16 %v9395_v26  ;;  %v9396_v20 = vunpack.i.l.bf16 %v9395_v26  ;;  %v15567_v24 = vld [vmem:[#allocation2 + $0x112] sm:$0xff]  ;;  %8436 = vmatprep.mubr.msk.f32.mxu1 %vm2602_vm8, %v5643_v58 }
 0x5ca   : > { %9679 = vrot.lane.b32.xlu1 %v9678_v13, %s10056_s20  ;;  %9684 = vrot.lane.b32.xlu0 %v9683_v48, %s10058_s23  ;;  %v5605_v13 = vld [vmem:[#allocation2 + $0x125] sm:$0xff] }
 0x5cb   : > { %v6630_v18 = vsel %vm3768_vm11, %v6594_v40, %v9391_v17  ;;  %v6522_v21 = vsel %vm3768_vm11, %v6486_v63, %v9392_v49  ;;  %v6595_v19 = vsel %vm3731_vm10, %v6559_v44, %v9396_v20  ;;  %v6487_v29 = vsel %vm3731_vm10, %v6451_v28, %v9397_v14  ;;  %v5396_v14 = vld [vmem:[#allocation2 + $0x48] sm:$0xff] }
 0x5cc   : > { %v9400_v55 = vpop.permute.xlu1 %9399  ;;  %6866 = vmatprep.mubr.f32.mxu0 %v6630_v18  ;;  %v9405_v7 = vpop.permute.xlu0 %9404  ;;  %v9698_v40 = vpack.i.bf16 %v15567_v24, %v5605_v13  ;;  %v9703_v20 = vpack.i.bf16 %v5568_v60, %v15534_v50  ;;  %v9231_v63 = vunpack.i.l.bf16 %v15405_v30  ;;  %v6452_v11 = vsel %vm2602_vm8, %v5396_v14, %v9227_v32  ;;  %v5644_v60 = vld [vmem:[#allocation2 + $0x13e] sm:$0x3f] }
 0x5cd   : > { %v9402_v12 = vunpack.i.h.bf16 %v9400_v55  ;;  %v9401_v39 = vunpack.i.l.bf16 %v9400_v55  ;;  %6867 = vmatmul.mubr.f32.gmra.mrb[54].mxu0 %v6522_v21  ;;  %v9406_v48 = vunpack.i.l.bf16 %v9405_v7  ;;  %v15563_v49 = vpop.f32.mrb[106].mxu1  ;;  %v5495_v13 = vld [vmem:[#allocation2 + $0x11a] sm:$0xff]  ;;  %8437 = vmatmul.mubr.msk.f32.gmra.mrb[124].mxu1 %vm2602_vm8, %v5644_v60  ;;  %v5508_v14 = vld [vmem:[#allocation2 + $0x63] sm:$0xff] }
 0x5ce   : > { %9689 = vrot.lane.b32.xlu1 %v9688_v34, %s10059_s8  ;;  %9694 = vrot.lane.b32.xlu0 %v9693_v43, %s10058_s23  ;;  %v15570_v0 = vpop.f32.mrb[107].mxu1  ;;  %v5507_v34 = vld [vmem:[#allocation2 + $0x5b] sm:$0xff]  ;;  %v5570_v43 = vld [vmem:[#allocation2 + $0x12c] sm:$0xff]  ;;  %v9713_v58 = vpack.i.bf16 %v5495_v13, %v5606_v46 }
 0x5cf   : > { %v6631_v17 = vsel %vm3768_vm11, %v6595_v19, %v9401_v39  ;;  %v6523_v26 = vsel %vm3768_vm11, %v6487_v29, %v9402_v12  ;;  %v9407_v12 = vunpack.i.h.bf16 %v9405_v7  ;;  %v6560_v50 = vsel %vm2602_vm8, %v5507_v34, %v9406_v48 }
 0x5d0   : > { %v9410_v56 = vpop.permute.xlu1 %9409  ;;  %6871 = vmatprep.mubr.f32.mxu0 %v6631_v17  ;;  %v9415_v55 = vpop.permute.xlu0 %9414  ;;  %v9708_v7 = vpack.i.bf16 %v15553_v1, %v5570_v43 }
 0x5d1   : > { %v9412_v18 = vunpack.i.h.bf16 %v9410_v56  ;;  %v9411_v21 = vunpack.i.l.bf16 %v9410_v56  ;;  %6872 = vmatmul.mubr.f32.gmra.mrb[56].mxu0 %v6523_v26  ;;  %v9417_v39 = vunpack.i.h.bf16 %v9415_v55  ;;  %v9416_v44 = vunpack.i.l.bf16 %v9415_v55  ;;  %v5571_v26 = vld [vmem:[#allocation2 + $0x134] sm:$0xff] }
 0x5d2   : > { %9699 = vrot.lane.b32.xlu1 %v9698_v40, %s10059_s8  ;;  %9704 = vrot.lane.b32.xlu0 %v9703_v20, %s10056_s20  ;;  %v5607_v56 = vld [vmem:[#allocation2 + $0x135] sm:$0xff]  ;;  %v6561_v1 = vsel %vm2602_vm8, %v5508_v14, %v9407_v12 }
 0x5d3   : > { %v6596_v28 = vsel %vm3731_vm10, %v6560_v50, %v9411_v21  ;;  %v6488_v19 = vsel %vm3731_vm10, %v6452_v11, %v9412_v18  ;;  %v5496_v21 = vld [vmem:[#allocation2 + $0x122] sm:$0xff]  ;;  %v5397_v55 = vld [vmem:[#allocation2 + $0x50] sm:$0xff]  ;;  %v9232_v50 = vunpack.i.h.bf16 %v15405_v30 }
 0x5d4   : > { %v9420_v29 = vpop.permute.xlu1 %9419  ;;  %v6632_v32 = vsel %vm3768_vm11, %v6596_v28, %v9416_v44  ;;  %v6524_v17 = vsel %vm3768_vm11, %v6488_v19, %v9417_v39  ;;  %v9425_v20 = vpop.permute.xlu0 %9424  ;;  %v6453_v43 = vsel %vm2602_vm8, %v5397_v55, %v9231_v63  ;;  %v9718_v39 = vpack.i.bf16 %v15567_v24, %v5571_v26  ;;  %v5509_v30 = vld [vmem:[#allocation2 + $0x6b] sm:$0xff]  ;;  %v5458_v26 = vld [vmem:[#allocation2 + $0x119] sm:$0x3f] }
 0x5d5   : > { %v9422_v40 = vunpack.i.h.bf16 %v9420_v29  ;;  %v9421_v48 = vunpack.i.l.bf16 %v9420_v29  ;;  %6876 = vmatprep.mubr.f32.mxu0 %v6632_v32  ;;  %v9427_v18 = vunpack.i.h.bf16 %v9425_v20  ;;  %v9426_v34 = vunpack.i.l.bf16 %v9425_v20  ;;  %v15589_v46 = vpop.f32.mrb[108].mxu1  ;;  %v5569_v32 = vld [vmem:[#allocation2 + $0x12c] sm:$0x3f] }
 0x5d6   : > { %9709 = vrot.lane.b32.xlu1 %v9708_v7, %s10058_s23  ;;  %9714 = vrot.lane.b32.xlu0 %v9713_v58, %s10059_s8  ;;  %v15595_v60 = vpop.f32.mrb[109].mxu1  ;;  %v9723_v19 = vpack.i.bf16 %v5496_v21, %v5607_v56  ;;  %v5494_v7 = vld [vmem:[#allocation2 + $0x11a] sm:$0x3f]  ;;  %v9728_v20 = vpack.i.bf16 %v5458_v26, %v5569_v32  ;;  %v9236_v55 = vunpack.i.l.bf16 %v15407_v35  ;;  %v5399_v26 = vld [vmem:[#allocation2 + $0x60] sm:$0xff] }
 0x5d7   : > { %6877 = vmatmul.mubr.f32.gmra.mrb[58].mxu0 %v6524_v17  ;;  %v6597_v11 = vsel %vm3731_vm10, %v6561_v1, %v9421_v48  ;;  %v6489_v44 = vsel %vm3731_vm10, %v6453_v43, %v9422_v40  ;;  %v5572_v58 = vld [vmem:[#allocation2 + $0x13c] sm:$0x3f] }
 0x5d8   : > { %v9430_v28 = vpop.permute.xlu1 %9429  ;;  %v6633_v13 = vsel %vm3768_vm11, %v6597_v11, %v9426_v34  ;;  %v6525_v12 = vsel %vm3768_vm11, %v6489_v44, %v9427_v18  ;;  %v9435_v29 = vpop.permute.xlu0 %9434  ;;  %v5398_v56 = vld [vmem:[#allocation2 + $0x58] sm:$0xff]  ;;  %v9733_v14 = vpack.i.bf16 %v5494_v7, %v5572_v58  ;;  %v5497_v11 = vld [vmem:[#allocation2 + $0x12a] sm:$0x3f] }
 0x5d9   : > { %v9431_v63 = vunpack.i.l.bf16 %v9430_v28  ;;  %6881 = vmatprep.mubr.f32.mxu0 %v6633_v13  ;;  %v9437_v17 = vunpack.i.h.bf16 %v9435_v29  ;;  %v9436_v24 = vunpack.i.l.bf16 %v9435_v29  ;;  %v6454_v21 = vsel %vm2602_vm8, %v5398_v56, %v9232_v50 }
 0x5da   : > { %9719 = vrot.lane.b32.xlu1 %v9718_v39, %s10058_s23  ;;  %9724 = vrot.lane.b32.xlu0 %v9723_v19, %s10059_s8  ;;  %v9432_v18 = vunpack.i.h.bf16 %v9430_v28  ;;  %v5608_v39 = vld [vmem:[#allocation2 + $0x13d] sm:$0x3f]  ;;  %v9237_v29 = vunpack.i.h.bf16 %v15407_v35 }
 0x5db   : > { %6882 = vmatmul.mubr.f32.gmra.mrb[60].mxu0 %v6525_v12  ;;  %v6562_v40 = vsel %vm2602_vm8, %v5509_v30, %v9431_v63  ;;  %v6490_v12 = vsel %vm3731_vm10, %v6454_v21, %v9437_v17  ;;  %v9738_v58 = vpack.i.bf16 %v5497_v11, %v5608_v39  ;;  %v5510_v30 = vld [vmem:[#allocation2 + $0x73] sm:$0xff]  ;;  %v9241_v11 = vunpack.i.l.bf16 %v15411_v4 }
 0x5dc   : > { %v9440_v48 = vpop.permute.xlu1 %9439  ;;  %v9445_v43 = vpop.permute.xlu0 %9444  ;;  %v6598_v19 = vsel %vm3731_vm10, %v6562_v40, %v9436_v24  ;;  %v6563_v17 = vsel %vm2602_vm8, %v5510_v30, %v9432_v18  ;;  %v6455_v40 = vsel %vm2602_vm8, %v5399_v26, %v9236_v55  ;;  %v5511_v55 = vld [vmem:[#allocation2 + $0x7b] sm:$0xff] }
 0x5dd   : > { %v9442_v34 = vunpack.i.h.bf16 %v9440_v48  ;;  %v9441_v1 = vunpack.i.l.bf16 %v9440_v48  ;;  %v9447_v44 = vunpack.i.h.bf16 %v9445_v43  ;;  %v9446_v13 = vunpack.i.l.bf16 %v9445_v43  ;;  %v15608_v63 = vpop.f32.mrb[110].mxu1  ;;  %v5400_v43 = vld [vmem:[#allocation2 + $0x68] sm:$0xff] }
 0x5de   : > { %9729 = vrot.lane.b32.xlu1 %v9728_v20, %s10056_s20  ;;  %9734 = vrot.lane.b32.xlu0 %v9733_v14, %s10058_s23  ;;  %v15613_v32 = vpop.f32.mrb[111].mxu1 }
 0x5df   : > { %v6634_v50 = vsel %vm3768_vm11, %v6598_v19, %v9441_v1  ;;  %v6526_v28 = vsel %vm3768_vm11, %v6490_v12, %v9442_v34  ;;  %v6599_v35 = vsel %vm3731_vm10, %v6563_v17, %v9446_v13  ;;  %v6491_v14 = vsel %vm3731_vm10, %v6455_v40, %v9447_v44 }
 0x5e0   : > { %v9450_v7 = vpop.permute.xlu1 %9449  ;;  %6886 = vmatprep.mubr.f32.mxu0 %v6634_v50  ;;  %v9455_v24 = vpop.permute.xlu0 %9454  ;;  %v6456_v12 = vsel %vm2602_vm8, %v5400_v43, %v9237_v29 }
 0x5e1   : > { %v9452_v56 = vunpack.i.h.bf16 %v9450_v7  ;;  %v9451_v48 = vunpack.i.l.bf16 %v9450_v7  ;;  %6887 = vmatmul.mubr.f32.gmra.mrb[62].mxu0 %v6526_v28  ;;  %v9456_v20 = vunpack.i.l.bf16 %v9455_v24  ;;  %v9457_v50 = vunpack.i.h.bf16 %v9455_v24 }
 0x5e2   : > { %9739 = vrot.lane.b32.xlu1 %v9738_v58, %s10059_s8 }
 0x5e3   : > { %v6635_v21 = vsel %vm3768_vm11, %v6599_v35, %v9451_v48  ;;  %v6527_v34 = vsel %vm3768_vm11, %v6491_v14, %v9452_v56  ;;  %v6564_v44 = vsel %vm2602_vm8, %v5511_v55, %v9456_v20  ;;  %v5512_v35 = vld [vmem:[#allocation2 + $0x83] sm:$0xff]  ;;  %v5401_v14 = vld [vmem:[#allocation2 + $0x70] sm:$0xff] }
 0x5e4   : > { %v9460_v1 = vpop.permute.xlu1 %9459  ;;  %6891 = vmatprep.mubr.f32.mxu0 %v6635_v21  ;;  %v9465_v19 = vpop.permute.xlu0 %9464 }
 0x5e5   : > { %v9462_v39 = vunpack.i.h.bf16 %v9460_v1  ;;  %v9461_v18 = vunpack.i.l.bf16 %v9460_v1  ;;  %6892 = vmatmul.mubr.f32.gmra.mrb[64].mxu0 %v6527_v34  ;;  %v9467_v13 = vunpack.i.h.bf16 %v9465_v19  ;;  %v9466_v28 = vunpack.i.l.bf16 %v9465_v19 }
 0x5e6   : > { %v15625_v7 = vpop.f32.mrb[112].mxu1  ;;  %v6565_v34 = vsel %vm2602_vm8, %v5512_v35, %v9457_v50  ;;  %v6457_v1 = vsel %vm2602_vm8, %v5401_v14, %v9241_v11  ;;  %v5513_v50 = vld [vmem:[#allocation2 + $0x8b] sm:$0xff] }
 0x5e7   : > { %v6600_v58 = vsel %vm3731_vm10, %v6564_v44, %v9461_v18  ;;  %v6492_v30 = vsel %vm3731_vm10, %v6456_v12, %v9462_v39  ;;  %v15629_v26 = vpop.f32.mrb[113].mxu1  ;;  %v9242_v18 = vunpack.i.h.bf16 %v15411_v4 }
 0x5e8   : > { %v9470_v56 = vpop.permute.xlu1 %9469  ;;  %v6636_v48 = vsel %vm3768_vm11, %v6600_v58, %v9466_v28  ;;  %v6528_v17 = vsel %vm3768_vm11, %v6492_v30, %v9467_v13  ;;  %v9475_v24 = vpop.permute.xlu0 %9474 }
 0x5e9   : > { %v9472_v40 = vunpack.i.h.bf16 %v9470_v56  ;;  %v9471_v29 = vunpack.i.l.bf16 %v9470_v56  ;;  %6896 = vmatprep.mubr.f32.mxu0 %v6636_v48  ;;  %v9477_v20 = vunpack.i.h.bf16 %v9475_v24  ;;  %v9476_v21 = vunpack.i.l.bf16 %v9475_v24  ;;  %v5402_v56 = vld [vmem:[#allocation2 + $0x78] sm:$0xff] }
 0x5ea   : > { %6897 = vmatmul.mubr.f32.gmra.mrb[66].mxu0 %v6528_v17  ;;  %v6458_v17 = vsel %vm2602_vm8, %v5402_v56, %v9242_v18  ;;  %v5514_v18 = vld [vmem:[#allocation2 + $0x93] sm:$0xff] }
 0x5eb   : > { %v6601_v43 = vsel %vm3731_vm10, %v6565_v34, %v9471_v29  ;;  %v6493_v39 = vsel %vm3731_vm10, %v6457_v1, %v9472_v40  ;;  %v9246_v40 = vunpack.i.l.bf16 %v15413_v54 }
 0x5ec   : > { %v9480_v19 = vpop.permute.xlu1 %9479  ;;  %v6637_v55 = vsel %vm3768_vm11, %v6601_v43, %v9476_v21  ;;  %v6529_v12 = vsel %vm3768_vm11, %v6493_v39, %v9477_v20  ;;  %v9485_v28 = vpop.permute.xlu0 %9484 }
 0x5ed   : > { %v9481_v13 = vunpack.i.l.bf16 %v9480_v19  ;;  %6901 = vmatprep.mubr.f32.mxu0 %v6637_v55  ;;  %v9487_v44 = vunpack.i.h.bf16 %v9485_v28  ;;  %v9486_v58 = vunpack.i.l.bf16 %v9485_v28  ;;  %v9482_v29 = vunpack.i.h.bf16 %v9480_v19 }
 0x5ee   : > { %6902 = vmatmul.mubr.f32.gmra.mrb[68].mxu0 %v6529_v12  ;;  %v15640_v30 = vpop.f32.mrb[114].mxu1  ;;  %v9247_v55 = vunpack.i.h.bf16 %v15413_v54 }
 0x5ef   : > { %v6566_v11 = vsel %vm2602_vm8, %v5513_v50, %v9481_v13  ;;  %v15643_v48 = vpop.f32.mrb[115].mxu1  ;;  %v6494_v1 = vsel %vm3731_vm10, %v6458_v17, %v9487_v44  ;;  %v5403_v13 = vld [vmem:[#allocation2 + $0x80] sm:$0xff]  ;;  %v6567_v56 = vsel %vm2602_vm8, %v5514_v18, %v9482_v29  ;;  %v9251_v29 = vunpack.i.l.bf16 %v15417_v57 }
 0x5f0   : > { %v9490_v4 = vpop.permute.xlu1 %9489  ;;  %v9495_v14 = vpop.permute.xlu0 %9494  ;;  %v6602_v34 = vsel %vm3731_vm10, %v6566_v11, %v9486_v58  ;;  %v6459_v58 = vsel %vm2602_vm8, %v5403_v13, %v9246_v40 }
 0x5f1   : > { %v9492_v24 = vunpack.i.h.bf16 %v9490_v4  ;;  %v9491_v35 = vunpack.i.l.bf16 %v9490_v4  ;;  %v9497_v20 = vunpack.i.h.bf16 %v9495_v14  ;;  %v9496_v21 = vunpack.i.l.bf16 %v9495_v14 }
 0x5f3   : > { %v6638_v43 = vsel %vm3768_vm11, %v6602_v34, %v9491_v35  ;;  %v6530_v39 = vsel %vm3768_vm11, %v6494_v1, %v9492_v24  ;;  %v6603_v44 = vsel %vm3731_vm10, %v6567_v56, %v9496_v21  ;;  %v6495_v4 = vsel %vm3731_vm10, %v6459_v58, %v9497_v20  ;;  %v5404_v34 = vld [vmem:[#allocation2 + $0x88] sm:$0xff]  ;;  %v5515_v21 = vld [vmem:[#allocation2 + $0x9b] sm:$0xff] }
 0x5f4   : > { %v9500_v12 = vpop.permute.xlu1 %9499  ;;  %6906 = vmatprep.mubr.f32.mxu0 %v6638_v43  ;;  %v9505_v50 = vpop.permute.xlu0 %9504  ;;  %v6460_v20 = vsel %vm2602_vm8, %v5404_v34, %v9247_v55  ;;  %v5405_v55 = vld [vmem:[#allocation2 + $0x90] sm:$0xff] }
 0x5f5   : > { %v9502_v19 = vunpack.i.h.bf16 %v9500_v12  ;;  %v9501_v28 = vunpack.i.l.bf16 %v9500_v12  ;;  %6907 = vmatmul.mubr.f32.gmra.mrb[70].mxu0 %v6530_v39  ;;  %v9506_v11 = vunpack.i.l.bf16 %v9505_v50  ;;  %v9507_v39 = vunpack.i.h.bf16 %v9505_v50 }
 0x5f6   : > { %v15656_v17 = vpop.f32.mrb[116].mxu1 }
 0x5f7   : > { %v6639_v54 = vsel %vm3768_vm11, %v6603_v44, %v9501_v28  ;;  %v6531_v24 = vsel %vm3768_vm11, %v6495_v4, %v9502_v19  ;;  %v15660_v35 = vpop.f32.mrb[117].mxu1  ;;  %v6568_v13 = vsel %vm2602_vm8, %v5515_v21, %v9506_v11 }
 0x5f8   : > { %v9510_v14 = vpop.permute.xlu1 %9509  ;;  %6911 = vmatprep.mubr.f32.mxu0 %v6639_v54  ;;  %v9515_v43 = vpop.permute.xlu0 %9514 }
 0x5f9   : > { %v9512_v1 = vunpack.i.h.bf16 %v9510_v14  ;;  %v9511_v40 = vunpack.i.l.bf16 %v9510_v14  ;;  %6912 = vmatmul.mubr.f32.gmra.mrb[72].mxu0 %v6531_v24  ;;  %v9517_v12 = vunpack.i.h.bf16 %v9515_v43  ;;  %v9516_v18 = vunpack.i.l.bf16 %v9515_v43  ;;  %v5516_v14 = vld [vmem:[#allocation2 + $0xa3] sm:$0xff] }
 0x5fa   : > { %v6569_v11 = vsel %vm2602_vm8, %v5516_v14, %v9507_v39 }
 0x5fb   : > { %v6604_v19 = vsel %vm3731_vm10, %v6568_v13, %v9511_v40  ;;  %v6496_v28 = vsel %vm3731_vm10, %v6460_v20, %v9512_v1  ;;  %v6461_v40 = vsel %vm2602_vm8, %v5405_v55, %v9251_v29  ;;  %v9252_v20 = vunpack.i.h.bf16 %v15417_v57 }
 0x5fc   : > { %v9520_v56 = vpop.permute.xlu1 %9519  ;;  %v6640_v58 = vsel %vm3768_vm11, %v6604_v19, %v9516_v18  ;;  %v6532_v44 = vsel %vm3768_vm11, %v6496_v28, %v9517_v12  ;;  %v9525_v24 = vpop.permute.xlu0 %9524 }
 0x5fd   : > { %v9522_v4 = vunpack.i.h.bf16 %v9520_v56  ;;  %v9521_v54 = vunpack.i.l.bf16 %v9520_v56  ;;  %6916 = vmatprep.mubr.f32.mxu0 %v6640_v58  ;;  %v9527_v50 = vunpack.i.h.bf16 %v9525_v24  ;;  %v9526_v34 = vunpack.i.l.bf16 %v9525_v24  ;;  %v5517_v58 = vld [vmem:[#allocation2 + $0xab] sm:$0xff] }
 0x5fe   : > { %6917 = vmatmul.mubr.f32.gmra.mrb[74].mxu0 %v6532_v44  ;;  %v15671_v43 = vpop.f32.mrb[118].mxu1  ;;  %v9256_v24 = vunpack.i.l.bf16 %v15419_v9 }
 0x5ff   : > { %v6605_v1 = vsel %vm3731_vm10, %v6569_v11, %v9521_v54  ;;  %v6497_v21 = vsel %vm3731_vm10, %v6461_v40, %v9522_v4  ;;  %v15676_v12 = vpop.f32.mrb[119].mxu1  ;;  %v5406_v54 = vld [vmem:[#allocation2 + $0x98] sm:$0xff] }
 0x600   : > { %v9530_v18 = vpop.permute.xlu1 %9529  ;;  %v6641_v13 = vsel %vm3768_vm11, %v6605_v1, %v9526_v34  ;;  %v6533_v19 = vsel %vm3768_vm11, %v6497_v21, %v9527_v50  ;;  %v9535_v56 = vpop.permute.xlu0 %9534  ;;  %v6462_v57 = vsel %vm2602_vm8, %v5406_v54, %v9252_v20  ;;  %v9257_v20 = vunpack.i.h.bf16 %v15419_v9  ;;  %v5407_v54 = vld [vmem:[#allocation2 + $0xa0] sm:$0xff] }
 0x601   : > { %v9531_v28 = vunpack.i.l.bf16 %v9530_v18  ;;  %6921 = vmatprep.mubr.f32.mxu0 %v6641_v13  ;;  %v9537_v39 = vunpack.i.h.bf16 %v9535_v56  ;;  %v9536_v29 = vunpack.i.l.bf16 %v9535_v56  ;;  %v9532_v14 = vunpack.i.h.bf16 %v9530_v18  ;;  %v5518_v18 = vld [vmem:[#allocation2 + $0xb3] sm:$0xff] }
 0x602   : > { %6922 = vmatmul.mubr.f32.gmra.mrb[76].mxu0 %v6533_v19 }
 0x603   : > { %v6570_v44 = vsel %vm2602_vm8, %v5517_v58, %v9531_v28  ;;  %v6498_v21 = vsel %vm3731_vm10, %v6462_v57, %v9537_v39  ;;  %v6571_v39 = vsel %vm2602_vm8, %v5518_v18, %v9532_v14 }
 0x604   : > { %v9540_v4 = vpop.permute.xlu1 %9539  ;;  %v9545_v11 = vpop.permute.xlu0 %9544  ;;  %v6606_v1 = vsel %vm3731_vm10, %v6570_v44, %v9536_v29  ;;  %v6463_v29 = vsel %vm2602_vm8, %v5407_v54, %v9256_v24 }
 0x605   : > { %v9542_v55 = vunpack.i.h.bf16 %v9540_v4  ;;  %v9541_v34 = vunpack.i.l.bf16 %v9540_v4  ;;  %v9547_v50 = vunpack.i.h.bf16 %v9545_v11  ;;  %v9546_v40 = vunpack.i.l.bf16 %v9545_v11 }
 0x606   : > { %v15685_v13 = vpop.f32.mrb[120].mxu1 }
 0x607   : > { %v6642_v19 = vsel %vm3768_vm11, %v6606_v1, %v9541_v34  ;;  %v6534_v28 = vsel %vm3768_vm11, %v6498_v21, %v9542_v55  ;;  %v15690_v58 = vpop.f32.mrb[121].mxu1  ;;  %v6607_v57 = vsel %vm3731_vm10, %v6571_v39, %v9546_v40  ;;  %v6499_v55 = vsel %vm3731_vm10, %v6463_v29, %v9547_v50  ;;  %v5519_v40 = vld [vmem:[#allocation2 + $0xbb] sm:$0xff] }
 0x608   : > { %v9550_v56 = vpop.permute.xlu1 %9549  ;;  %6926 = vmatprep.mubr.f32.mxu0 %v6642_v19  ;;  %v9555_v61 = vpop.permute.xlu0 %9554  ;;  %v5408_v19 = vld [vmem:[#allocation2 + $0xa8] sm:$0xff] }
 0x609   : > { %v9552_v4 = vunpack.i.h.bf16 %v9550_v56  ;;  %v9551_v11 = vunpack.i.l.bf16 %v9550_v56  ;;  %6927 = vmatmul.mubr.f32.gmra.mrb[78].mxu0 %v6534_v28  ;;  %v9556_v44 = vunpack.i.l.bf16 %v9555_v61  ;;  %v9261_v28 = vunpack.i.l.bf16 %v15423_v45 }
 0x60a   : > { %v6464_v50 = vsel %vm2602_vm8, %v5408_v19, %v9257_v20  ;;  %v9557_v54 = vunpack.i.h.bf16 %v9555_v61  ;;  %v5409_v20 = vld [vmem:[#allocation2 + $0xb0] sm:$0xff] }
 0x60b   : > { %v6643_v9 = vsel %vm3768_vm11, %v6607_v57, %v9551_v11  ;;  %v6535_v34 = vsel %vm3768_vm11, %v6499_v55, %v9552_v4  ;;  %v15698_v21 = vpop.f32.mrb[122].mxu1  ;;  %v6572_v4 = vsel %vm2602_vm8, %v5519_v40, %v9556_v44  ;;  %v9262_v40 = vunpack.i.h.bf16 %v15423_v45 }
 0x60c   : > { %v9560_v1 = vpop.permute.xlu1 %9559  ;;  %6931 = vmatprep.mubr.f32.mxu0 %v6643_v9  ;;  %v9565_v18 = vpop.permute.xlu0 %9564  ;;  %v6573_v44 = vsel %vm2602_vm8, %v5520_v27, %v9557_v54  ;;  %v5521_v27 = vld [vmem:[#allocation2 + $0xcb] sm:$0xff]  ;;  %v5410_v54 = vld [vmem:[#allocation2 + $0xb8] sm:$0xff]  ;;  %v9266_v45 = vunpack.i.l.bf16 %v15425_v2 }
 0x60d   : > { %v9562_v56 = vunpack.i.h.bf16 %v9560_v1  ;;  %v9561_v14 = vunpack.i.l.bf16 %v9560_v1  ;;  %6932 = vmatmul.mubr.f32.gmra.mrb[80].mxu0 %v6535_v34  ;;  %v15701_v24 = vpop.f32.mrb[123].mxu1  ;;  %v9567_v11 = vunpack.i.h.bf16 %v9565_v18  ;;  %v9566_v39 = vunpack.i.l.bf16 %v9565_v18 }
 0x60f   : > { %v6608_v29 = vsel %vm3731_vm10, %v6572_v4, %v9561_v14  ;;  %v6500_v57 = vsel %vm3731_vm10, %v6464_v50, %v9562_v56  ;;  %v6465_v14 = vsel %vm2602_vm8, %v5409_v20, %v9261_v28 }
 0x610   : > { %v9570_v55 = vpop.permute.xlu1 %9569  ;;  %v6644_v9 = vsel %vm3768_vm11, %v6608_v29, %v9566_v39  ;;  %v6536_v1 = vsel %vm3768_vm11, %v6500_v57, %v9567_v11  ;;  %v9575_v41 = vpop.permute.xlu0 %9574 }
 0x611   : > { %v9572_v34 = vunpack.i.h.bf16 %v9570_v55  ;;  %v9571_v10 = vunpack.i.l.bf16 %v9570_v55  ;;  %6936 = vmatprep.mubr.f32.mxu0 %v6644_v9  ;;  %v9577_v61 = vunpack.i.h.bf16 %v9575_v41  ;;  %v9576_v19 = vunpack.i.l.bf16 %v9575_v41 }
 0x612   : > { %6937 = vmatmul.mubr.f32.gmra.mrb[82].mxu0 %v6536_v1  ;;  %v6466_v55 = vsel %vm2602_vm8, %v5410_v54, %v9262_v40  ;;  %v5522_v40 = vld [vmem:[#allocation2 + $0xd3] sm:$0xff] }
 0x613   : > { %v6609_v56 = vsel %vm3731_vm10, %v6573_v44, %v9571_v10  ;;  %v6501_v18 = vsel %vm3731_vm10, %v6465_v14, %v9572_v34 }
 0x614   : > { %v9580_v50 = vpop.permute.xlu1 %9579  ;;  %v6645_v11 = vsel %vm3768_vm11, %v6609_v56, %v9576_v19  ;;  %v6537_v39 = vsel %vm3768_vm11, %v6501_v18, %v9577_v61  ;;  %v9585_v29 = vpop.permute.xlu0 %9584 }
 0x615   : > { %v9581_v4 = vunpack.i.l.bf16 %v9580_v50  ;;  %6941 = vmatprep.mubr.f32.mxu0 %v6645_v11  ;;  %v9587_v41 = vunpack.i.h.bf16 %v9585_v29  ;;  %v9586_v57 = vunpack.i.l.bf16 %v9585_v29  ;;  %v9582_v9 = vunpack.i.h.bf16 %v9580_v50 }
 0x616   : > { %6942 = vmatmul.mubr.f32.gmra.mrb[84].mxu0 %v6537_v39  ;;  %v9267_v11 = vunpack.i.h.bf16 %v15425_v2 }
 0x617   : > { %v6574_v28 = vsel %vm2602_vm8, %v5521_v27, %v9581_v4  ;;  %v6502_v14 = vsel %vm3731_vm10, %v6466_v55, %v9587_v41  ;;  %v5411_v4 = vld [vmem:[#allocation2 + $0xc0] sm:$0xff]  ;;  %v6575_v54 = vsel %vm2602_vm8, %v5522_v40, %v9582_v9 }
 0x618   : > { %v9590_v10 = vpop.permute.xlu1 %9589  ;;  %v9595_v20 = vpop.permute.xlu0 %9594  ;;  %v6610_v44 = vsel %vm3731_vm10, %v6574_v28, %v9586_v57  ;;  %v6467_v57 = vsel %vm2602_vm8, %v5411_v4, %v9266_v45  ;;  %v5523_v9 = vld [vmem:[#allocation2 + $0xdb] sm:$0xff] }
 0x619   : > { %v9592_v1 = vunpack.i.h.bf16 %v9590_v10  ;;  %v9591_v34 = vunpack.i.l.bf16 %v9590_v10  ;;  %v9597_v61 = vunpack.i.h.bf16 %v9595_v20  ;;  %v9596_v19 = vunpack.i.l.bf16 %v9595_v20 }
 0x61a   : > { %v9271_v20 = vunpack.i.l.bf16 %v15429_v38 }
 0x61b   : > { %v6646_v56 = vsel %vm3768_vm11, %v6610_v44, %v9591_v34  ;;  %v6538_v18 = vsel %vm3768_vm11, %v6502_v14, %v9592_v1  ;;  %v6611_v41 = vsel %vm3731_vm10, %v6575_v54, %v9596_v19  ;;  %v6503_v10 = vsel %vm3731_vm10, %v6467_v57, %v9597_v61  ;;  %v5412_v34 = vld [vmem:[#allocation2 + $0xc8] sm:$0xff] }
 0x61c   : > { %v9600_v39 = vpop.permute.xlu1 %9599  ;;  %6946 = vmatprep.mubr.f32.mxu0 %v6646_v56  ;;  %v9605_v27 = vpop.permute.xlu0 %9604  ;;  %v6468_v45 = vsel %vm2602_vm8, %v5412_v34, %v9267_v11  ;;  %v5413_v11 = vld [vmem:[#allocation2 + $0xd0] sm:$0xff] }
 0x61d   : > { %v9602_v50 = vunpack.i.h.bf16 %v9600_v39  ;;  %v9601_v29 = vunpack.i.l.bf16 %v9600_v39  ;;  %6947 = vmatmul.mubr.f32.gmra.mrb[86].mxu0 %v6538_v18  ;;  %v9606_v28 = vunpack.i.l.bf16 %v9605_v27  ;;  %v9607_v18 = vunpack.i.h.bf16 %v9605_v27 }
 0x61f   : > { %v6647_v55 = vsel %vm3768_vm11, %v6611_v41, %v9601_v29  ;;  %v6539_v2 = vsel %vm3768_vm11, %v6503_v10, %v9602_v50  ;;  %v6576_v61 = vsel %vm2602_vm8, %v5523_v9, %v9606_v28 }
 0x620   : > { %v9610_v1 = vpop.permute.xlu1 %9609  ;;  %6951 = vmatprep.mubr.f32.mxu0 %v6647_v55  ;;  %v9615_v56 = vpop.permute.xlu0 %9614  ;;  %v5524_v55 = vld [vmem:[#allocation2 + $0xe3] sm:$0xff] }
 0x621   : > { %v9612_v44 = vunpack.i.h.bf16 %v9610_v1  ;;  %v9611_v14 = vunpack.i.l.bf16 %v9610_v1  ;;  %6952 = vmatmul.mubr.f32.gmra.mrb[88].mxu0 %v6539_v2  ;;  %v9617_v19 = vunpack.i.h.bf16 %v9615_v56  ;;  %v9616_v39 = vunpack.i.l.bf16 %v9615_v56 }
 0x622   : > { %v6577_v28 = vsel %vm2602_vm8, %v5524_v55, %v9607_v18  ;;  %v6469_v1 = vsel %vm2602_vm8, %v5413_v11, %v9271_v20  ;;  %v5525_v18 = vld [vmem:[#allocation2 + $0xeb] sm:$0xff] }
 0x623   : > { %v6612_v40 = vsel %vm3731_vm10, %v6576_v61, %v9611_v14  ;;  %v6504_v4 = vsel %vm3731_vm10, %v6468_v45, %v9612_v44  ;;  %v9272_v14 = vunpack.i.h.bf16 %v15429_v38  ;;  %v9276_v38 = vunpack.i.l.bf16 %v15431_v15 }
 0x624   : > { %v9620_v50 = vpop.permute.xlu1 %9619  ;;  %v6648_v29 = vsel %vm3768_vm11, %v6612_v40, %v9616_v39  ;;  %v6540_v54 = vsel %vm3768_vm11, %v6504_v4, %v9617_v19  ;;  %v9625_v10 = vpop.permute.xlu0 %9624  ;;  %v5414_v4 = vld [vmem:[#allocation2 + $0xd8] sm:$0xff] }
 0x625   : > { %v9622_v57 = vunpack.i.h.bf16 %v9620_v50  ;;  %v9621_v41 = vunpack.i.l.bf16 %v9620_v50  ;;  %6956 = vmatprep.mubr.f32.mxu0 %v6648_v29  ;;  %v9627_v27 = vunpack.i.h.bf16 %v9625_v10  ;;  %v9626_v2 = vunpack.i.l.bf16 %v9625_v10 }
 0x626   : > { %6957 = vmatmul.mubr.f32.gmra.mrb[90].mxu0 %v6540_v54  ;;  %v6470_v29 = vsel %vm2602_vm8, %v5414_v4, %v9272_v14  ;;  %v5526_v14 = vld [vmem:[#allocation2 + $0xf3] sm:$0xff] }
 0x627   : > { %v6613_v34 = vsel %vm3731_vm10, %v6577_v28, %v9621_v41  ;;  %v6505_v44 = vsel %vm3731_vm10, %v6469_v1, %v9622_v57 }
 0x628   : > { %v9630_v56 = vpop.permute.xlu1 %9629  ;;  %v6649_v9 = vsel %vm3768_vm11, %v6613_v34, %v9626_v2  ;;  %v6541_v45 = vsel %vm3768_vm11, %v6505_v44, %v9627_v27  ;;  %v9635_v39 = vpop.permute.xlu0 %9634  ;;  %v9277_v34 = vunpack.i.h.bf16 %v15431_v15 }
 0x629   : > { %v9631_v19 = vunpack.i.l.bf16 %v9630_v56  ;;  %6961 = vmatprep.mubr.f32.mxu0 %v6649_v9  ;;  %v9637_v61 = vunpack.i.h.bf16 %v9635_v39  ;;  %v9636_v40 = vunpack.i.l.bf16 %v9635_v39  ;;  %v9632_v54 = vunpack.i.h.bf16 %v9630_v56  ;;  %v5415_v9 = vld [vmem:[#allocation2 + $0xe0] sm:$0xff] }
 0x62a   : > { %6962 = vmatmul.mubr.f32.gmra.mrb[92].mxu0 %v6541_v45 }
 0x62b   : > { %v6578_v20 = vsel %vm2602_vm8, %v5525_v18, %v9631_v19  ;;  %v6506_v2 = vsel %vm3731_vm10, %v6470_v29, %v9637_v61  ;;  %v6579_v39 = vsel %vm2602_vm8, %v5526_v14, %v9632_v54  ;;  %v5416_v29 = vld [vmem:[#allocation2 + $0xe8] sm:$0xff]  ;;  %v5527_v54 = vld [vmem:[#allocation2 + $0xfb] sm:$0xff] }
 0x62c   : > { %v9640_v50 = vpop.permute.xlu1 %9639  ;;  %v9645_v10 = vpop.permute.xlu0 %9644  ;;  %v6614_v27 = vsel %vm3731_vm10, %v6578_v20, %v9636_v40  ;;  %v6471_v40 = vsel %vm2602_vm8, %v5415_v9, %v9276_v38  ;;  %v6472_v38 = vsel %vm2602_vm8, %v5416_v29, %v9277_v34  ;;  %v5417_v34 = vld [vmem:[#allocation2 + $0xf0] sm:$0xff]  ;;  %v9282_v29 = vunpack.i.h.bf16 %v15435_v8 }
 0x62d   : > { %v9642_v57 = vunpack.i.h.bf16 %v9640_v50  ;;  %v9641_v41 = vunpack.i.l.bf16 %v9640_v50  ;;  %v9647_v55 = vunpack.i.h.bf16 %v9645_v10  ;;  %v9646_v11 = vunpack.i.l.bf16 %v9645_v10 }
 0x62f   : > { %v6650_v28 = vsel %vm3768_vm11, %v6614_v27, %v9641_v41  ;;  %v6542_v1 = vsel %vm3768_vm11, %v6506_v2, %v9642_v57  ;;  %v6615_v61 = vsel %vm3731_vm10, %v6579_v39, %v9646_v11  ;;  %v6507_v20 = vsel %vm3731_vm10, %v6471_v40, %v9647_v55 }
 0x630   : > { %v9650_v44 = vpop.permute.xlu1 %9649  ;;  %6966 = vmatprep.mubr.f32.mxu0 %v6650_v28  ;;  %v9655_v19 = vpop.permute.xlu0 %9654  ;;  %v9281_v57 = vunpack.i.l.bf16 %v15435_v8  ;;  %v9286_v8 = vunpack.i.l.bf16 %v15437_v59 }
 0x631   : > { %v9652_v56 = vunpack.i.h.bf16 %v9650_v44  ;;  %v9651_v45 = vunpack.i.l.bf16 %v9650_v44  ;;  %6967 = vmatmul.mubr.f32.gmra.mrb[94].mxu0 %v6542_v1  ;;  %v9656_v18 = vunpack.i.l.bf16 %v9655_v19  ;;  %v9657_v2 = vunpack.i.h.bf16 %v9655_v19 }
 0x633   : > { %v6651_v4 = vsel %vm3768_vm11, %v6615_v61, %v9651_v45  ;;  %v6543_v15 = vsel %vm3768_vm11, %v6507_v20, %v9652_v56  ;;  %v6580_v55 = vsel %vm2602_vm8, %v5527_v54, %v9656_v18  ;;  %v5528_v61 = vld [vmem:[#allocation2 + $0x103] sm:$0xff] }
 0x634   : > { %v9660_v50 = vpop.permute.xlu1 %9659  ;;  %6971 = vmatprep.mubr.f32.mxu0 %v6651_v4  ;;  %v9665_v27 = vpop.permute.xlu0 %9664  ;;  %v6581_v18 = vsel %vm2602_vm8, %v5528_v61, %v9657_v2  ;;  %v6473_v4 = vsel %vm2602_vm8, %v5417_v34, %v9281_v57  ;;  %v5529_v2 = vld [vmem:[#allocation2 + $0x10b] sm:$0xff] }
 0x635   : > { %v9662_v41 = vunpack.i.h.bf16 %v9660_v50  ;;  %v9661_v10 = vunpack.i.l.bf16 %v9660_v50  ;;  %6972 = vmatmul.mubr.f32.gmra.mrb[96].mxu0 %v6543_v15  ;;  %v9667_v11 = vunpack.i.h.bf16 %v9665_v27  ;;  %v9666_v28 = vunpack.i.l.bf16 %v9665_v27 }
 0x637   : > { %v6616_v1 = vsel %vm3731_vm10, %v6580_v55, %v9661_v10  ;;  %v6508_v44 = vsel %vm3731_vm10, %v6472_v38, %v9662_v41  ;;  %v5418_v55 = vld [vmem:[#allocation2 + $0xf8] sm:$0xff] }
 0x638   : > { %v9670_v14 = vpop.permute.xlu1 %9669  ;;  %v6652_v9 = vsel %vm3768_vm11, %v6616_v1, %v9666_v28  ;;  %v6544_v56 = vsel %vm3768_vm11, %v6508_v44, %v9667_v11  ;;  %v9675_v40 = vpop.permute.xlu0 %9674  ;;  %v6474_v44 = vsel %vm2602_vm8, %v5418_v55, %v9282_v29  ;;  %v5420_v55 = vld [vmem:[#allocation2 + $0x108] sm:$0xff] }
 0x639   : > { %v9672_v45 = vunpack.i.h.bf16 %v9670_v14  ;;  %v9671_v39 = vunpack.i.l.bf16 %v9670_v14  ;;  %6976 = vmatprep.mubr.f32.mxu0 %v6652_v9  ;;  %v9677_v19 = vunpack.i.h.bf16 %v9675_v40  ;;  %v9676_v20 = vunpack.i.l.bf16 %v9675_v40 }
 0x63a   : > { %6977 = vmatmul.mubr.f32.gmra.mrb[98].mxu0 %v6544_v56 }
 0x63b   : > { %v6617_v15 = vsel %vm3731_vm10, %v6581_v18, %v9671_v39  ;;  %v6509_v50 = vsel %vm3731_vm10, %v6473_v4, %v9672_v45  ;;  %v9287_v18 = vunpack.i.h.bf16 %v15437_v59 }
 0x63c   : > { %v9680_v41 = vpop.permute.xlu1 %9679  ;;  %v6653_v10 = vsel %vm3768_vm11, %v6617_v15, %v9676_v20  ;;  %v6545_v27 = vsel %vm3768_vm11, %v6509_v50, %v9677_v19  ;;  %v9685_v38 = vpop.permute.xlu0 %9684  ;;  %v5530_v15 = vld [vmem:[#allocation2 + $0x113] sm:$0xff]  ;;  %v5419_v50 = vld [vmem:[#allocation2 + $0x100] sm:$0xff] }
 0x63d   : > { %v9681_v54 = vunpack.i.l.bf16 %v9680_v41  ;;  %6981 = vmatprep.mubr.f32.mxu0 %v6653_v10  ;;  %v9687_v11 = vunpack.i.h.bf16 %v9685_v38  ;;  %v9686_v28 = vunpack.i.l.bf16 %v9685_v38  ;;  %v9682_v14 = vunpack.i.h.bf16 %v9680_v41 }
 0x63e   : > { %6982 = vmatmul.mubr.f32.gmra.mrb[100].mxu0 %v6545_v27 }
 0x63f   : > { %v6582_v57 = vsel %vm2602_vm8, %v5529_v2, %v9681_v54  ;;  %v6510_v34 = vsel %vm3731_vm10, %v6474_v44, %v9687_v11  ;;  %v6583_v27 = vsel %vm2602_vm8, %v5530_v15, %v9682_v14  ;;  %v6475_v54 = vsel %vm2602_vm8, %v5419_v50, %v9286_v8  ;;  %v5531_v14 = vld [vmem:[#allocation2 + $0x11b] sm:$0xff] }
 0x640   : > { %v9690_v1 = vpop.permute.xlu1 %9689  ;;  %v9695_v45 = vpop.permute.xlu0 %9694  ;;  %v6618_v61 = vsel %vm3731_vm10, %v6582_v57, %v9686_v28  ;;  %v6476_v8 = vsel %vm2602_vm8, %v5420_v55, %v9287_v18  ;;  %v5421_v18 = vld [vmem:[#allocation2 + $0x110] sm:$0xff] }
 0x641   : > { %v9692_v9 = vunpack.i.h.bf16 %v9690_v1  ;;  %v9691_v56 = vunpack.i.l.bf16 %v9690_v1  ;;  %v9697_v39 = vunpack.i.h.bf16 %v9695_v45  ;;  %v9696_v40 = vunpack.i.l.bf16 %v9695_v45 }
 0x642   : > { %v9291_v1 = vunpack.i.l.bf16 %v15441_v25 }
 0x643   : > { %v6654_v19 = vsel %vm3768_vm11, %v6618_v61, %v9691_v56  ;;  %v6546_v20 = vsel %vm3768_vm11, %v6510_v34, %v9692_v9  ;;  %v6619_v11 = vsel %vm3731_vm10, %v6583_v27, %v9696_v40  ;;  %v6511_v28 = vsel %vm3731_vm10, %v6475_v54, %v9697_v39 }
 0x644   : > { %v9700_v4 = vpop.permute.xlu1 %9699  ;;  %6986 = vmatprep.mubr.f32.mxu0 %v6654_v19  ;;  %v9705_v10 = vpop.permute.xlu0 %9704 }
 0x645   : > { %v9702_v29 = vunpack.i.h.bf16 %v9700_v4  ;;  %v9701_v41 = vunpack.i.l.bf16 %v9700_v4  ;;  %6987 = vmatmul.mubr.f32.gmra.mrb[102].mxu0 %v6546_v20  ;;  %v9706_v38 = vunpack.i.l.bf16 %v9705_v10  ;;  %v9707_v45 = vunpack.i.h.bf16 %v9705_v10 }
 0x647   : > { %v6655_v2 = vsel %vm3768_vm11, %v6619_v11, %v9701_v41  ;;  %v6547_v59 = vsel %vm3768_vm11, %v6511_v28, %v9702_v29  ;;  %v6584_v39 = vsel %vm2602_vm8, %v5531_v14, %v9706_v38  ;;  %v5532_v41 = vld [vmem:[#allocation2 + $0x123] sm:$0xff]  ;;  %v6477_v38 = vsel %vm2602_vm8, %v5421_v18, %v9291_v1 }
 0x648   : > { %v9710_v57 = vpop.permute.xlu1 %9709  ;;  %6991 = vmatprep.mubr.f32.mxu0 %v6655_v2  ;;  %v9715_v56 = vpop.permute.xlu0 %9714  ;;  %v6585_v54 = vsel %vm2602_vm8, %v5532_v41, %v9707_v45  ;;  %v5422_v45 = vld [vmem:[#allocation2 + $0x118] sm:$0x3f]  ;;  %v5612_v41 = vld [vmem:[#allocation2 + $0x3e] sm:$0xff]  ;;  %v5613_v18 = vld [vmem:[#allocation2 + $0x46] sm:$0xff] }
 0x649   : > { %v9712_v44 = vunpack.i.h.bf16 %v9710_v57  ;;  %v9711_v9 = vunpack.i.l.bf16 %v9710_v57  ;;  %6992 = vmatmul.mubr.f32.gmra.mrb[104].mxu0 %v6547_v59  ;;  %v9717_v40 = vunpack.i.h.bf16 %v9715_v56  ;;  %v9716_v61 = vunpack.i.l.bf16 %v9715_v56 }
 0x64b   : > { %v6620_v34 = vsel %vm3731_vm10, %v6584_v39, %v9711_v9  ;;  %v6512_v19 = vsel %vm3731_vm10, %v6476_v8, %v9712_v44  ;;  %v5533_v8 = vld [vmem:[#allocation2 + $0x12b] sm:$0x3f] }
 0x64c   : > { %v9720_v20 = vpop.permute.xlu1 %9719  ;;  %v6656_v4 = vsel %vm3768_vm11, %v6620_v34, %v9716_v61  ;;  %v6548_v25 = vsel %vm3768_vm11, %v6512_v19, %v9717_v40  ;;  %v9725_v29 = vpop.permute.xlu0 %9724 }
 0x64d   : > { %v9722_v15 = vunpack.i.h.bf16 %v9720_v20  ;;  %v9721_v50 = vunpack.i.l.bf16 %v9720_v20  ;;  %6996 = vmatprep.mubr.f32.mxu0 %v6656_v4  ;;  %v9727_v10 = vunpack.i.h.bf16 %v9725_v29  ;;  %v9726_v27 = vunpack.i.l.bf16 %v9725_v29  ;;  %v5611_v29 = vld [vmem:[#allocation2 + $0x36] sm:$0xff] }
 0x64e   : > { %6997 = vmatmul.mubr.f32.gmra.mrb[106].mxu0 %v6548_v25 }
 0x64f   : > { %v6621_v11 = vsel %vm3731_vm10, %v6585_v54, %v9721_v50  ;;  %v6513_v28 = vsel %vm3731_vm10, %v6477_v38, %v9722_v15  ;;  %v5609_v15 = vld [vmem:[#allocation2 + $0x26] sm:$0xff]  ;;  %v5610_v50 = vld [vmem:[#allocation2 + $0x2e] sm:$0xff]  ;;  %v5616_v54 = vld [vmem:[#allocation2 + $0x5e] sm:$0xff] }
 0x650   : > { %v9730_v2 = vpop.permute.xlu1 %9729  ;;  %v6657_v59 = vsel %vm3768_vm11, %v6621_v11, %v9726_v27  ;;  %v6549_v57 = vsel %vm3768_vm11, %v6513_v28, %v9727_v10  ;;  %v9735_v9 = vpop.permute.xlu0 %9734  ;;  %v5614_v10 = vld [vmem:[#allocation2 + $0x4e] sm:$0xff]  ;;  %v5615_v27 = vld [vmem:[#allocation2 + $0x56] sm:$0xff]  ;;  %v5617_v38 = vld [vmem:[#allocation2 + $0x66] sm:$0xff] }
 0x651   : > { %v9732_v55 = vunpack.i.h.bf16 %v9730_v2  ;;  %v9731_v44 = vunpack.i.l.bf16 %v9730_v2  ;;  %7001 = vmatprep.mubr.f32.mxu0 %v6657_v59  ;;  %v9737_v56 = vunpack.i.h.bf16 %v9735_v9  ;;  %v9736_v14 = vunpack.i.l.bf16 %v9735_v9  ;;  %v5618_v11 = vld [vmem:[#allocation2 + $0x6e] sm:$0xff]  ;;  %v5619_v28 = vld [vmem:[#allocation2 + $0x76] sm:$0xff]  ;;  %v5620_v2 = vld [vmem:[#allocation2 + $0x7e] sm:$0xff] }
 0x652   : > { %7002 = vmatmul.mubr.f32.gmra.mrb[108].mxu0 %v6549_v57  ;;  %v5621_v59 = vld [vmem:[#allocation2 + $0x86] sm:$0xff]  ;;  %v5622_v57 = vld [vmem:[#allocation2 + $0x8e] sm:$0xff] }
 0x653   : > { %v6586_v1 = vsel %vm2602_vm8, %v5533_v8, %v9731_v44  ;;  %v6478_v40 = vsel %vm2602_vm8, %v5422_v45, %v9732_v55 }
 0x654   : > { %v9740_v61 = vpop.permute.xlu1 %9739  ;;  %v6622_v19 = vsel %vm3731_vm10, %v6586_v1, %v9736_v14  ;;  %v6514_v20 = vsel %vm3731_vm10, %v6478_v40, %v9737_v56 }
 0x655   : > { %v9742_v39 = vunpack.i.h.bf16 %v9740_v61  ;;  %v9741_v34 = vunpack.i.l.bf16 %v9740_v61 }
 0x657   : > { %v6658_v4 = vsel %vm3768_vm11, %v6622_v19, %v9741_v34  ;;  %v6550_v25 = vsel %vm3768_vm11, %v6514_v20, %v9742_v39 }
 0x658   : > { %7006 = vmatprep.mubr.f32.mxu0 %v6658_v4 }
 0x659   : > { %7007 = vmatmul.mubr.f32.gmra.mrb[110].mxu0 %v6550_v25 }
 0x65a   : > { %8385 = vmatprep.mubr.msk.f32.mxu0 %vm2602_vm8, %v5609_v15 }
 0x65d   : > { %8386 = vmatmul.mubr.msk.f32.vlgmr.msra.gmra.mrb[112].mxu0 %vm2602_vm8, %v5610_v50 }
 0x65e   : > { %8388 = vmatprep.mubr.msk.f32.mxu0 %vm2602_vm8, %v5611_v29 }
 0x661   : > { %8389 = vmatmul.mubr.msk.f32.gmra.mrb[114].mxu0 %vm2602_vm8, %v5612_v41 }
 0x662   : > { %8391 = vmatprep.mubr.msk.f32.mxu0 %vm2602_vm8, %v5613_v18 }
 0x665   : > { %8392 = vmatmul.mubr.msk.f32.gmra.mrb[116].mxu0 %vm2602_vm8, %v5614_v10 }
 0x666   : > { %8394 = vmatprep.mubr.msk.f32.mxu0 %vm2602_vm8, %v5615_v27 }
 0x669   : > { %8395 = vmatmul.mubr.msk.f32.gmra.mrb[118].mxu0 %vm2602_vm8, %v5616_v54 }
 0x66a   : > { %8397 = vmatprep.mubr.msk.f32.mxu0 %vm2602_vm8, %v5617_v38 }
 0x66d   : > { %8398 = vmatmul.mubr.msk.f32.gmra.mrb[120].mxu0 %vm2602_vm8, %v5618_v11 }
 0x66e   : > { %8400 = vmatprep.mubr.msk.f32.mxu0 %vm2602_vm8, %v5619_v28 }
 0x671   : > { %8401 = vmatmul.mubr.msk.f32.gmra.mrb[122].mxu0 %vm2602_vm8, %v5620_v2 }
 0x672   : > { %8403 = vmatprep.mubr.msk.f32.mxu0 %vm2602_vm8, %v5621_v59 }
 0x675   : > { %8404 = vmatmul.mubr.msk.f32.gmra.mrb[124].mxu0 %vm2602_vm8, %v5622_v57 }
 0x67c   : > { %v15819_v55 = vpop.f32.mrb[40].mxu0 }
 0x67d   : > { %v6835_v44 = vpop.f32.mrb[41].mxu0 }
 0x682   : > { %v15821_v9 = vpop.f32.mrb[42].mxu0 }
 0x683   : > { %v6840_v56 = vpop.f32.mrb[43].mxu0 }
 0x686   : > { %v15823_v14 = vpop.f32.mrb[44].mxu0 }
 0x687   : > { %v6845_v8 = vpop.f32.mrb[45].mxu0 }
 0x68c   : > { %v15825_v45 = vpop.f32.mrb[46].mxu0 }
 0x68d   : > { %v6850_v1 = vpop.f32.mrb[47].mxu0 }
 0x690   : > { %v15827_v40 = vpop.f32.mrb[48].mxu0 }
 0x691   : > { %v6855_v61 = vpop.f32.mrb[49].mxu0 }
 0x696   : > { %v15829_v39 = vpop.f32.mrb[50].mxu0 }
 0x697   : > { %v6860_v34 = vpop.f32.mrb[51].mxu0 }
 0x69a   : > { %v15831_v19 = vpop.f32.mrb[52].mxu0 }
 0x69b   : > { %v6865_v20 = vpop.f32.mrb[53].mxu0 }
 0x6a0   : > { %v15833_v4 = vpop.f32.mrb[54].mxu0  ;;  %v15837_v29 = vpop.f32.mrb[124].mxu1 }
 0x6a1   : > { %v6870_v25 = vpop.f32.mrb[55].mxu0  ;;  %v15839_v41 = vpop.f32.mrb[125].mxu1 }
 0x6a4   : > { %v15835_v15 = vpop.f32.mrb[56].mxu0 }
 0x6a5   : > { %v6875_v50 = vpop.f32.mrb[57].mxu0 }
 0x6aa   : > { %v15841_v18 = vpop.f32.mrb[58].mxu0 }
 0x6ab   : > { %v6880_v10 = vpop.f32.mrb[59].mxu0 }
 0x6ae   : > { %v15843_v27 = vpop.f32.mrb[60].mxu0 }
 0x6af   : > { %v6885_v54 = vpop.f32.mrb[61].mxu0 }
 0x6b4   : > { %v15845_v38 = vpop.f32.mrb[62].mxu0 }
 0x6b5   : > { %v6890_v11 = vpop.f32.mrb[63].mxu0 }
 0x6b8   : > { %v15847_v28 = vpop.f32.mrb[64].mxu0 }
 0x6b9   : > { %v6895_v2 = vpop.f32.mrb[65].mxu0 }
 0x6bd   : > { %v15849_v59 = vpop.f32.mrb[66].mxu0 }
 0x6be   : > { %v6900_v57 = vpop.f32.mrb[67].mxu0 }
 0x6c1   : > { %v6903_v44 = vpop.f32.mrb[68].mxu0 }
 0x6c2   : > { %v15852_v56 = vadd.f32 %v15541_v51, %v6903_v44  ;;  %v6905_v8 = vpop.f32.mrb[69].mxu0 }
 0x6c8   : > { %v6908_v1 = vpop.f32.mrb[70].mxu0 }
 0x6c9   : > { %v15855_v61 = vadd.f32 %v15538_v3, %v6908_v1  ;;  %v6910_v34 = vpop.f32.mrb[71].mxu0 }
 0x6cc   : > { %v6913_v20 = vpop.f32.mrb[72].mxu0 }
 0x6cd   : > { %v15858_v25 = vadd.f32 %v15570_v0, %v6913_v20  ;;  %v6915_v50 = vpop.f32.mrb[73].mxu0 }
 0x6d1   : > { %v6918_v10 = vpop.f32.mrb[74].mxu0 }
 0x6d2   : > { %v15861_v54 = vadd.f32 %v15563_v49, %v6918_v10  ;;  %v6920_v11 = vpop.f32.mrb[75].mxu0 }
 0x6d5   : > { %v6923_v2 = vpop.f32.mrb[76].mxu0 }
 0x6d6   : > { %v15864_v51 = vadd.f32 %v15595_v60, %v6923_v2  ;;  %v6925_v57 = vpop.f32.mrb[77].mxu0 }
 0x6dc   : > { %v6928_v44 = vpop.f32.mrb[78].mxu0 }
 0x6dd   : > { %v15867_v3 = vadd.f32 %v15589_v46, %v6928_v44  ;;  %v6930_v8 = vpop.f32.mrb[79].mxu0 }
 0x6e0   : > { %v6933_v1 = vpop.f32.mrb[80].mxu0 }
 0x6e1   : > { %v15870_v0 = vadd.f32 %v15613_v32, %v6933_v1  ;;  %v6935_v34 = vpop.f32.mrb[81].mxu0 }
 0x6e5   : > { %v6938_v20 = vpop.f32.mrb[82].mxu0 }
 0x6e6   : > { %v15873_v49 = vadd.f32 %v15608_v63, %v6938_v20  ;;  %v6940_v50 = vpop.f32.mrb[83].mxu0 }
 0x6e9   : > { %v6943_v10 = vpop.f32.mrb[84].mxu0 }
 0x6ea   : > { %v15876_v60 = vadd.f32 %v15629_v26, %v6943_v10  ;;  %v6945_v11 = vpop.f32.mrb[85].mxu0 }
 0x6f0   : > { %v6948_v2 = vpop.f32.mrb[86].mxu0 }
 0x6f1   : > { %v15879_v46 = vadd.f32 %v15625_v7, %v6948_v2  ;;  %v6950_v57 = vpop.f32.mrb[87].mxu0 }
 0x6f4   : > { %v6953_v44 = vpop.f32.mrb[88].mxu0 }
 0x6f5   : > { %v15882_v32 = vadd.f32 %v15643_v48, %v6953_v44  ;;  %v6955_v8 = vpop.f32.mrb[89].mxu0 }
 0x6f9   : > { %v6958_v1 = vpop.f32.mrb[90].mxu0 }
 0x6fa   : > { %v15885_v63 = vadd.f32 %v15640_v30, %v6958_v1  ;;  %v6960_v34 = vpop.f32.mrb[91].mxu0 }
 0x6fd   : > { %v6963_v20 = vpop.f32.mrb[92].mxu0 }
 0x6fe   : > { %v15888_v26 = vadd.f32 %v15660_v35, %v6963_v20  ;;  %v6965_v50 = vpop.f32.mrb[93].mxu0 }
 0x704   : > { %v6968_v10 = vpop.f32.mrb[94].mxu0 }
 0x705   : > { %v15891_v7 = vadd.f32 %v15656_v17, %v6968_v10  ;;  %v6970_v11 = vpop.f32.mrb[95].mxu0 }
 0x708   : > { %v6973_v2 = vpop.f32.mrb[96].mxu0 }
 0x709   : > { %v15894_v48 = vadd.f32 %v15676_v12, %v6973_v2  ;;  %v6975_v57 = vpop.f32.mrb[97].mxu0 }
 0x70d   : > { %v6978_v44 = vpop.f32.mrb[98].mxu0 }
 0x70e   : > { %v15897_v30 = vadd.f32 %v15671_v43, %v6978_v44  ;;  %v6980_v8 = vpop.f32.mrb[99].mxu0 }
 0x711   : > { %v6983_v1 = vpop.f32.mrb[100].mxu0 }
 0x712   : > { %v15900_v35 = vadd.f32 %v15690_v58, %v6983_v1  ;;  %v6985_v34 = vpop.f32.mrb[101].mxu0 }
 0x718   : > { %v6988_v20 = vpop.f32.mrb[102].mxu0 }
 0x719   : > { %v15903_v17 = vadd.f32 %v15685_v13, %v6988_v20  ;;  %v6990_v50 = vpop.f32.mrb[103].mxu0 }
 0x71c   : > { %v6993_v10 = vpop.f32.mrb[104].mxu0 }
 0x71d   : > { %v15906_v12 = vadd.f32 %v15701_v24, %v6993_v10  ;;  %v6995_v11 = vpop.f32.mrb[105].mxu0 }
 0x721   : > { %v6998_v2 = vpop.f32.mrb[106].mxu0 }
 0x722   : > { %v15909_v43 = vadd.f32 %v15698_v21, %v6998_v2  ;;  %v7000_v57 = vpop.f32.mrb[107].mxu0 }
 0x725   : > { %v7003_v44 = vpop.f32.mrb[108].mxu0 }
 0x726   : > { %v15912_v58 = vadd.f32 %v15839_v41, %v7003_v44  ;;  %v7005_v8 = vpop.f32.mrb[109].mxu0 }
 0x72c   : > { %v7008_v1 = vpop.f32.mrb[110].mxu0 }
 0x72d   : > { %v15915_v13 = vadd.f32 %v15837_v29, %v7008_v1  ;;  %v7010_v34 = vpop.f32.mrb[111].mxu0 }
 0x730   : > { %v8387_v20 = vpop.f32.mrb[112].mxu0 }
 0x731   : > { %v7084_v24 = vadd.f32 %v8387_v20, %v15821_v9  ;;  %v7078_v50 = vpop.f32.mrb[113].mxu0 }
 0x732   : > { %v7079_v10 = vadd.f32 %v7078_v50, %v15819_v55 }
 0x733   : > { %7295 = vrot.lane.b32.xlu1 %v7084_v24, %s10058_s23 }
 0x734   : > { %v8390_v21 = vpop.f32.mrb[114].mxu0  ;;  %7293 = vrot.lane.b32.xlu0 %v7079_v10, %s10058_s23 }
 0x735   : > { %v7094_v41 = vadd.f32 %v8390_v21, %v15825_v45  ;;  %v7088_v11 = vpop.f32.mrb[115].mxu0  ;;  %v17162_v21 = vld [vmem:[#allocation92_spill] sm:$0xff] }
 0x736   : > { %v7089_v2 = vadd.f32 %v7088_v11, %v15823_v14 }
 0x737   : > { %7299 = vrot.lane.b32.xlu1 %v7094_v41, %s10058_s23  ;;  %v17163_v41 = vld [vmem:[#allocation156_spill] sm:$0xff] }
 0x738   : > { %v8393_v29 = vpop.f32.mrb[116].mxu0  ;;  %7297 = vrot.lane.b32.xlu0 %v7089_v2, %s10058_s23 }
 0x739   : > { %v7104_v9 = vadd.f32 %v8393_v29, %v15829_v39  ;;  %v7098_v57 = vpop.f32.mrb[117].mxu0  ;;  %v17164_v29 = vld [vmem:[#allocation189_spill] sm:$0xff] }
 0x73a   : > { %v7099_v55 = vadd.f32 %v7098_v57, %v15827_v40 }
 0x73b   : > { %7303 = vrot.lane.b32.xlu1 %v7104_v9, %s10058_s23  ;;  %v17165_v9 = vld [vmem:[#allocation93_spill] sm:$0xff] }
 0x73c   : > { %v8396_v44 = vpop.f32.mrb[118].mxu0  ;;  %7301 = vrot.lane.b32.xlu0 %v7099_v55, %s10058_s23 }
 0x73d   : > { %v7114_v45 = vadd.f32 %v8396_v44, %v15833_v4  ;;  %v7108_v8 = vpop.f32.mrb[119].mxu0  ;;  %v17166_v44 = vld [vmem:[#allocation124_spill] sm:$0xff] }
 0x73e   : > { %v7109_v14 = vadd.f32 %v7108_v8, %v15831_v19 }
 0x73f   : > { %7307 = vrot.lane.b32.xlu1 %v7114_v45, %s10058_s23  ;;  %v17167_v45 = vld [vmem:[#allocation190_spill] sm:$0xff] }
 0x740   : > { %v8399_v1 = vpop.f32.mrb[120].mxu0  ;;  %7305 = vrot.lane.b32.xlu0 %v7109_v14, %s10058_s23 }
 0x741   : > { %v7124_v39 = vadd.f32 %v8399_v1, %v15841_v18  ;;  %v7118_v34 = vpop.f32.mrb[121].mxu0 }
 0x742   : > { %v7119_v40 = vadd.f32 %v7118_v34, %v15835_v15 }
 0x743   : > { %7311 = vrot.lane.b32.xlu1 %v7124_v39, %s10058_s23 }
 0x744   : > { %v8402_v20 = vpop.f32.mrb[122].mxu0  ;;  %7309 = vrot.lane.b32.xlu0 %v7119_v40, %s10058_s23 }
 0x745   : > { %v7134_v4 = vadd.f32 %v8402_v20, %v15845_v38  ;;  %v7128_v24 = vpop.f32.mrb[123].mxu0  ;;  %v17147_v38 = vld [vmem:[#allocation66_spill] sm:$0xff] }
 0x746   : > { %v7129_v19 = vadd.f32 %v7128_v24, %v15843_v27  ;;  %v17146_v27 = vld [vmem:[#allocation68_spill] sm:$0xff] }
 0x747   : > { %7315 = vrot.lane.b32.xlu1 %v7134_v4, %s10058_s23 }
 0x748   : > { %v8405_v50 = vpop.f32.mrb[124].mxu0  ;;  %7313 = vrot.lane.b32.xlu0 %v7129_v19, %s10058_s23 }
 0x749   : > { %v7144_v18 = vadd.f32 %v8405_v50, %v15849_v59  ;;  %v7138_v10 = vpop.f32.mrb[125].mxu0  ;;  %v17149_v59 = vld [vmem:[#allocation70_spill] sm:$0xff] }
 0x74a   : > { %v7139_v15 = vadd.f32 %v7138_v10, %v15847_v28  ;;  %v17148_v28 = vld [vmem:[#allocation72_spill] sm:$0xff] }
 0x74b   : > { %7319 = vrot.lane.b32.xlu1 %v7144_v18, %s10058_s23 }
 0x74c   : > { %7317 = vrot.lane.b32.xlu0 %v7139_v15, %s10058_s23 }
 0x74f   : > { %7323 = vrot.lane.b32.xlu1 %v15855_v61, %s10058_s23  ;;  %v17151_v61 = vld [vmem:[#allocation74_spill] sm:$0xff] }
 0x750   : > { %7321 = vrot.lane.b32.xlu0 %v15852_v56, %s10058_s23  ;;  %v17150_v56 = vld [vmem:[#allocation86_spill] sm:$0xff] }
 0x753   : > { %7327 = vrot.lane.b32.xlu1 %v15861_v54, %s10058_s23  ;;  %v17153_v54 = vld [vmem:[#allocation87_spill] sm:$0xff] }
 0x754   : > { %7325 = vrot.lane.b32.xlu0 %v15858_v25, %s10058_s23  ;;  %v17152_v25 = vld [vmem:[#allocation78_spill] sm:$0xff] }
 0x757   : > { %7331 = vrot.lane.b32.xlu1 %v15867_v3, %s10058_s23 }
 0x758   : > { %7329 = vrot.lane.b32.xlu0 %v15864_v51, %s10058_s23 }
 0x75b   : > { %7335 = vrot.lane.b32.xlu1 %v15873_v49, %s10058_s23  ;;  %v17155_v49 = vld [vmem:[#allocation89_spill] sm:$0xff] }
 0x75c   : > { %7333 = vrot.lane.b32.xlu0 %v15870_v0, %s10058_s23  ;;  %v17154_v0 = vld [vmem:[#allocation80_spill] sm:$0xff] }
 0x75f   : > { %7339 = vrot.lane.b32.xlu1 %v15879_v46, %s10058_s23 }
 0x760   : > { %7337 = vrot.lane.b32.xlu0 %v15876_v60, %s10058_s23 }
 0x763   : > { %7343 = vrot.lane.b32.xlu1 %v15885_v63, %s10058_s23  ;;  %v17157_v63 = vld [vmem:[#allocation81_spill] sm:$0xff] }
 0x764   : > { %7341 = vrot.lane.b32.xlu0 %v15882_v32, %s10058_s23  ;;  %v17156_v32 = vld [vmem:[#allocation187_spill] sm:$0xff] }
 0x767   : > { %7347 = vrot.lane.b32.xlu1 %v15891_v7, %s10058_s23 }
 0x768   : > { %7345 = vrot.lane.b32.xlu0 %v15888_v26, %s10058_s23 }
 0x76b   : > { %7351 = vrot.lane.b32.xlu1 %v15897_v30, %s10058_s23  ;;  %v17159_v30 = vld [vmem:[#allocation91_spill] sm:$0xff] }
 0x76c   : > { %7349 = vrot.lane.b32.xlu0 %v15894_v48, %s10058_s23  ;;  %v17158_v48 = vld [vmem:[#allocation82_spill] sm:$0xff] }
 0x76f   : > { %7355 = vrot.lane.b32.xlu1 %v15903_v17, %s10058_s23 }
 0x770   : > { %7353 = vrot.lane.b32.xlu0 %v15900_v35, %s10058_s23 }
 0x773   : > { %7359 = vrot.lane.b32.xlu1 %v15909_v43, %s10058_s23  ;;  %v17161_v43 = vld [vmem:[#allocation83_spill] sm:$0xff] }
 0x774   : > { %7357 = vrot.lane.b32.xlu0 %v15906_v12, %s10058_s23  ;;  %v17160_v12 = vld [vmem:[#allocation155_spill] sm:$0xff] }
 0x777   : > { %7363 = vrot.lane.b32.xlu1 %v15915_v13, %s10058_s23 }
 0x778   : > { %7361 = vrot.lane.b32.xlu0 %v15912_v58, %s10058_s23 }
 0x77b   : > { %7547 = vrot.lane.b32.xlu1 %v13738_v53, %s10058_s23 }
 0x77c   : > { %7545 = vrot.lane.b32.xlu0 %v13726_v62, %s10058_s23 }
 0x77f   : > { %7551 = vrot.lane.b32.xlu1 %v13758_v16, %s10058_s23 }
 0x780   : > { %7549 = vrot.lane.b32.xlu0 %v13748_v37, %s10058_s23 }
 0x783   : > { %7555 = vrot.lane.b32.xlu1 %v13786_v47, %s10058_s23 }
 0x784   : > { %7553 = vrot.lane.b32.xlu0 %v13769_v6, %s10058_s23 }
 0x787   : > { %7559 = vrot.lane.b32.xlu1 %v13806_v33, %s10058_s23 }
 0x788   : > { %7557 = vrot.lane.b32.xlu0 %v13796_v5, %s10058_s23 }
 0x78b   : > { %7563 = vrot.lane.b32.xlu1 %v13826_v42, %s10058_s23 }
 0x78c   : > { %7561 = vrot.lane.b32.xlu0 %v13816_v22, %s10058_s23 }
 0x78f   : > { %7567 = vrot.lane.b32.xlu1 %v13846_v52, %s10058_s23 }
 0x790   : > { %7565 = vrot.lane.b32.xlu0 %v13836_v23, %s10058_s23 }
 0x793   : > { %7571 = vrot.lane.b32.xlu1 %v13866_v31, %s10058_s23 }
 0x794   : > { %7569 = vrot.lane.b32.xlu0 %v13856_v36, %s10058_s23 }
 0x797   : > { %7575 = vrot.lane.b32.xlu1 %v17146_v27, %s10058_s23 }
 0x798   : > { %7573 = vrot.lane.b32.xlu0 %v17147_v38, %s10058_s23 }
 0x79b   : > { %7579 = vrot.lane.b32.xlu1 %v17148_v28, %s10058_s23 }
 0x79c   : > { %7577 = vrot.lane.b32.xlu0 %v17149_v59, %s10058_s23 }
 0x79f   : > { %7583 = vrot.lane.b32.xlu1 %v17150_v56, %s10058_s23 }
 0x7a0   : > { %7581 = vrot.lane.b32.xlu0 %v17151_v61, %s10058_s23 }
 0x7a3   : > { %7587 = vrot.lane.b32.xlu1 %v17152_v25, %s10058_s23 }
 0x7a4   : > { %7585 = vrot.lane.b32.xlu0 %v17153_v54, %s10058_s23  ;;  %v17172_v54 = vld [vmem:[#allocation49_spill] sm:$0xff] }
 0x7a5   : > { %v7296_v51 = vpop.permute.xlu1 %7295 }
 0x7a6   : > { %v7294_v3 = vpop.permute.xlu0 %7293 }
 0x7a7   : > { %7591 = vrot.lane.b32.xlu1 %v17154_v0, %s10058_s23 }
 0x7a8   : > { %7589 = vrot.lane.b32.xlu0 %v17155_v49, %s10058_s23 }
 0x7a9   : > { %v7300_v60 = vpop.permute.xlu1 %7299 }
 0x7aa   : > { %v7298_v46 = vpop.permute.xlu0 %7297 }
 0x7ab   : > { %7595 = vrot.lane.b32.xlu1 %v17156_v32, %s10058_s23 }
 0x7ac   : > { %7593 = vrot.lane.b32.xlu0 %v17157_v63, %s10058_s23  ;;  %v17171_v63 = vld [vmem:[#allocation46_spill] sm:$0xff] }
 0x7ad   : > { %v7304_v26 = vpop.permute.xlu1 %7303  ;;  %v7403_v32 = vadd.f32 %v7298_v46, %v17171_v63 }
 0x7ae   : > { %v7302_v7 = vpop.permute.xlu0 %7301  ;;  %v7406_v25 = vadd.f32 %v7304_v26, %v17172_v54  ;;  %v17176_v54 = vld [vmem:[#allocation53_spill] sm:$0xff] }
 0x7af   : > { %7599 = vrot.lane.b32.xlu1 %v17158_v48, %s10058_s23 }
 0x7b0   : > { %7597 = vrot.lane.b32.xlu0 %v17159_v30, %s10058_s23  ;;  %v17170_v30 = vld [vmem:[#allocation47_spill] sm:$0xff] }
 0x7b1   : > { %v7308_v35 = vpop.permute.xlu1 %7307  ;;  %v7404_v48 = vadd.f32 %v7300_v60, %v17170_v30  ;;  %v17175_v30 = vld [vmem:[#allocation50_spill] sm:$0xff] }
 0x7b2   : > { %v7306_v17 = vpop.permute.xlu0 %7305 }
 0x7b3   : > { %7603 = vrot.lane.b32.xlu1 %v17160_v12, %s10058_s23  ;;  %v7407_v46 = vadd.f32 %v7306_v17, %v17175_v30 }
 0x7b4   : > { %7601 = vrot.lane.b32.xlu0 %v17161_v43, %s10058_s23 }
 0x7b5   : > { %v7312_v58 = vpop.permute.xlu1 %7311 }
 0x7b6   : > { %v7310_v13 = vpop.permute.xlu0 %7309 }
 0x7b7   : > { %7607 = vrot.lane.b32.xlu1 %v17162_v21, %s10058_s23 }
 0x7b8   : > { %7605 = vrot.lane.b32.xlu0 %v17163_v41, %s10058_s23  ;;  %v17169_v41 = vld [vmem:[#allocation44_spill] sm:$0xff] }
 0x7b9   : > { %v7316_v11 = vpop.permute.xlu1 %7315  ;;  %v7401_v21 = vadd.f32 %v7294_v3, %v17169_v41 }
 0x7ba   : > { %v16053_v2 = vpop.permute.xlu0 %7313 }
 0x7bb   : > { %7611 = vrot.lane.b32.xlu1 %v17164_v29, %s10058_s23 }
 0x7bc   : > { %7609 = vrot.lane.b32.xlu0 %v17165_v9, %s10058_s23  ;;  %v17168_v9 = vld [vmem:[#allocation45_spill] sm:$0xff] }
 0x7bd   : > { %v16059_v57 = vpop.permute.xlu1 %7319  ;;  %v7402_v29 = vadd.f32 %v7296_v51, %v17168_v9  ;;  %v17173_v51 = vld [vmem:[#allocation48_spill] sm:$0xff] }
 0x7be   : > { %v16061_v55 = vpop.permute.xlu0 %7317  ;;  %v7405_v3 = vadd.f32 %v7302_v7, %v17173_v51  ;;  %v17177_v7 = vld [vmem:[#allocation52_spill] sm:$0xff] }
 0x7bf   : > { %7615 = vrot.lane.b32.xlu1 %v17166_v44, %s10058_s23  ;;  %9887 = vtanh.f32 %v7402_v29  ;;  %v17174_v29 = vld [vmem:[#allocation51_spill] sm:$0xff]  ;;  %v7409_v51 = vadd.f32 %v7310_v13, %v17177_v7 }
 0x7c0   : > { %7613 = vrot.lane.b32.xlu0 %v17167_v45, %s10058_s23  ;;  %9889 = vtanh.f32 %v7401_v21  ;;  %v7408_v60 = vadd.f32 %v7308_v35, %v17174_v29  ;;  %v17178_v29 = vld [vmem:[#allocation55_spill] sm:$0xff] }
 0x7c1   : > { %v16067_v8 = vpop.permute.xlu1 %7323  ;;  %9891 = vtanh.f32 %v7404_v48  ;;  %v7412_v30 = vadd.f32 %v7316_v11, %v17178_v29  ;;  %v17181_v11 = vld [vmem:[#allocation56_spill] sm:$0xff] }
 0x7c2   : > { %v16069_v14 = vpop.permute.xlu0 %7321  ;;  %9893 = vtanh.f32 %v7403_v32  ;;  %v7410_v32 = vadd.f32 %v7312_v58, %v17176_v54 }
 0x7c3   : > { %9895 = vtanh.f32 %v7406_v25 }
 0x7c4   : > { %9897 = vtanh.f32 %v7405_v3 }
 0x7c5   : > { %v16071_v1 = vpop.permute.xlu1 %7327  ;;  %9899 = vtanh.f32 %v7408_v60  ;;  %v17179_v60 = vld [vmem:[#allocation54_spill] sm:$0xff] }
 0x7c6   : > { %v16073_v39 = vpop.permute.xlu0 %7325  ;;  %9901 = vtanh.f32 %v7407_v46 }
 0x7c7   : > { %9903 = vtanh.f32 %v7410_v32  ;;  %v7413_v32 = vadd.f32 %v16061_v55, %v17181_v11  ;;  %v17186_v11 = vld [vmem:[#allocation63_spill] sm:$0xff] }
 0x7c8   : > { %9905 = vtanh.f32 %v7409_v51 }
 0x7c9   : > { %v16075_v34 = vpop.permute.xlu1 %7331  ;;  %v9888_v63 = vpop.eup %9887  ;;  %9907 = vtanh.f32 %v7412_v30 }
 0x7ca   : > { %v16077_v40 = vpop.permute.xlu0 %7329  ;;  %v9890_v61 = vpop.eup %9889 }
 0x7cb   : > { %v9892_v25 = vpop.eup %9891 }
 0x7cc   : > { %v9894_v35 = vpop.eup %9893 }
 0x7cd   : > { %v16079_v20 = vpop.permute.xlu1 %7335  ;;  %v9896_v58 = vpop.eup %9895 }
 0x7ce   : > { %v16081_v4 = vpop.permute.xlu0 %7333 }
 0x7d1   : > { %v16083_v24 = vpop.permute.xlu1 %7339 }
 0x7d2   : > { %v16085_v19 = vpop.permute.xlu0 %7337 }
 0x7d5   : > { %v16087_v50 = vpop.permute.xlu1 %7343 }
 0x7d6   : > { %v16089_v18 = vpop.permute.xlu0 %7341 }
 0x7d9   : > { %v16091_v10 = vpop.permute.xlu1 %7347 }
 0x7da   : > { %v16093_v15 = vpop.permute.xlu0 %7345 }
 0x7dd   : > { %v16095_v45 = vpop.permute.xlu1 %7351 }
 0x7de   : > { %v16097_v44 = vpop.permute.xlu0 %7349 }
 0x7e1   : > { %v16101_v43 = vpop.permute.xlu1 %7355 }
 0x7e2   : > { %v16103_v12 = vpop.permute.xlu0 %7353 }
 0x7e5   : > { %v16107_v49 = vpop.permute.xlu1 %7359 }
 0x7e6   : > { %v16109_v0 = vpop.permute.xlu0 %7357 }
 0x7e9   : > { %v16113_v41 = vpop.permute.xlu1 %7363 }
 0x7ea   : > { %v16115_v9 = vpop.permute.xlu0 %7361 }
 0x7ed   : > { %v7548_v21 = vpop.permute.xlu1 %7547 }
 0x7ee   : > { %v7654_v56 = vmul.f32 %v9888_v63, %v7548_v21  ;;  %v7546_v48 = vpop.permute.xlu0 %7545 }
 0x7ef   : > { %v7653_v26 = vmul.f32 %v9890_v61, %v7546_v48  ;;  %v7411_v61 = vadd.f32 %v16053_v2, %v17179_v60 }
 0x7f0   : > { %7727 = vrot.lane.b32.xlu1 %v7654_v56, %s10058_s23  ;;  %v9898_v56 = vpop.eup %9897 }
 0x7f1   : > { %v7552_v59 = vpop.permute.xlu1 %7551  ;;  %7725 = vrot.lane.b32.xlu0 %v7653_v26, %s10058_s23  ;;  %9909 = vtanh.f32 %v7411_v61  ;;  %v9900_v2 = vpop.eup %9899 }
 0x7f2   : > { %v7656_v17 = vmul.f32 %v9892_v25, %v7552_v59  ;;  %v7550_v3 = vpop.permute.xlu0 %7549  ;;  %v17180_v59 = vld [vmem:[#allocation57_spill] sm:$0xff]  ;;  %v9902_v7 = vpop.eup %9901 }
 0x7f3   : > { %v7655_v63 = vmul.f32 %v9894_v35, %v7550_v3  ;;  %v7414_v48 = vadd.f32 %v16059_v57, %v17180_v59  ;;  %v17182_v35 = vld [vmem:[#allocation59_spill] sm:$0xff]  ;;  %v17183_v57 = vld [vmem:[#allocation58_spill] sm:$0xff]  ;;  %v9904_v55 = vpop.eup %9903 }
 0x7f4   : > { %7731 = vrot.lane.b32.xlu1 %v7656_v17, %s10058_s23  ;;  %v7416_v17 = vadd.f32 %v16067_v8, %v17182_v35  ;;  %v7415_v29 = vadd.f32 %v16069_v14, %v17183_v57  ;;  %v17185_v8 = vld [vmem:[#allocation60_spill] sm:$0xff] }
 0x7f5   : > { %v7556_v13 = vpop.permute.xlu1 %7555  ;;  %7729 = vrot.lane.b32.xlu0 %v7655_v63, %s10058_s23  ;;  %9911 = vtanh.f32 %v7414_v48  ;;  %v9906_v63 = vpop.eup %9905 }
 0x7f6   : > { %v7658_v46 = vmul.f32 %v9896_v58, %v7556_v13  ;;  %v7554_v21 = vpop.permute.xlu0 %7553  ;;  %9913 = vtanh.f32 %v7413_v32  ;;  %v17184_v58 = vld [vmem:[#allocation61_spill] sm:$0xff]  ;;  %v9908_v14 = vpop.eup %9907  ;;  %v7420_v32 = vadd.f32 %v16075_v34, %v17186_v11  ;;  %v17189_v34 = vld [vmem:[#allocation64_spill] sm:$0xff] }
 0x7f7   : > { %v7657_v54 = vmul.f32 %v9898_v56, %v7554_v21  ;;  %9915 = vtanh.f32 %v7416_v17  ;;  %v7418_v13 = vadd.f32 %v16071_v1, %v17184_v58  ;;  %v17187_v1 = vld [vmem:[#allocation62_spill] sm:$0xff]  ;;  %v17188_v17 = vld [vmem:[#allocation65_spill] sm:$0xff] }
 0x7f8   : > { %7735 = vrot.lane.b32.xlu1 %v7658_v46, %s10058_s23  ;;  %9917 = vtanh.f32 %v7415_v29  ;;  %v7417_v46 = vadd.f32 %v16073_v39, %v17185_v8  ;;  %v7421_v29 = vadd.f32 %v16081_v4, %v17189_v34  ;;  %v17196_v34 = vld [vmem:[#allocation88_spill] sm:$0xff] }
 0x7f9   : > { %v7560_v26 = vpop.permute.xlu1 %7559  ;;  %7733 = vrot.lane.b32.xlu0 %v7657_v54, %s10058_s23  ;;  %9919 = vtanh.f32 %v7418_v13 }
 0x7fa   : > { %v7660_v51 = vmul.f32 %v9900_v2, %v7560_v26  ;;  %v7558_v25 = vpop.permute.xlu0 %7557  ;;  %9921 = vtanh.f32 %v7417_v46  ;;  %v7419_v26 = vadd.f32 %v16077_v40, %v17187_v1 }
 0x7fb   : > { %v7659_v3 = vmul.f32 %v9902_v7, %v7558_v25  ;;  %v9910_v59 = vpop.eup %9909  ;;  %9923 = vtanh.f32 %v7420_v32 }
 0x7fc   : > { %7739 = vrot.lane.b32.xlu1 %v7660_v51, %s10058_s23  ;;  %9925 = vtanh.f32 %v7419_v26 }
 0x7fd   : > { %v7564_v30 = vpop.permute.xlu1 %7563  ;;  %7737 = vrot.lane.b32.xlu0 %v7659_v3, %s10058_s23  ;;  %v7422_v3 = vadd.f32 %v16079_v20, %v17188_v17  ;;  %v17191_v20 = vld [vmem:[#allocation67_spill] sm:$0xff] }
 0x7fe   : > { %v7662_v60 = vmul.f32 %v9904_v55, %v7564_v30  ;;  %v7562_v61 = vpop.permute.xlu0 %7561 }
 0x7ff   : > { %v7661_v56 = vmul.f32 %v9906_v63, %v7562_v61  ;;  %v9912_v39 = vpop.eup %9911  ;;  %9927 = vtanh.f32 %v7422_v3  ;;  %v17190_v61 = vld [vmem:[#allocation69_spill] sm:$0xff] }
 0x800   : > { %7743 = vrot.lane.b32.xlu1 %v7662_v60, %s10058_s23  ;;  %v9914_v51 = vpop.eup %9913  ;;  %v7424_v58 = vadd.f32 %v16083_v24, %v17190_v61  ;;  %9929 = vtanh.f32 %v7421_v29  ;;  %v17193_v24 = vld [vmem:[#allocation71_spill] sm:$0xff]  ;;  %v7430_v29 = vadd.f32 %v16095_v45, %v17196_v34 }
 0x801   : > { %v7568_v21 = vpop.permute.xlu1 %7567  ;;  %7741 = vrot.lane.b32.xlu0 %v7661_v56, %s10058_s23  ;;  %v9916_v40 = vpop.eup %9915  ;;  %v7423_v56 = vadd.f32 %v16085_v19, %v17191_v20  ;;  %v7425_v11 = vadd.f32 %v16089_v18, %v17193_v24  ;;  %v17199_v45 = vld [vmem:[#allocation79_spill] sm:$0xff] }
 0x802   : > { %v7664_v48 = vmul.f32 %v9908_v14, %v7568_v21  ;;  %v7566_v54 = vpop.permute.xlu0 %7565  ;;  %v9918_v30 = vpop.eup %9917  ;;  %9931 = vtanh.f32 %v7424_v58  ;;  %v17198_v58 = vld [vmem:[#allocation154_spill] sm:$0xff] }
 0x803   : > { %v7663_v2 = vmul.f32 %v9910_v59, %v7566_v54  ;;  %v9920_v4 = vpop.eup %9919  ;;  %v17192_v59 = vld [vmem:[#allocation73_spill] sm:$0xff]  ;;  %9933 = vtanh.f32 %v7423_v56  ;;  %v7431_v56 = vadd.f32 %v16103_v12, %v17199_v45  ;;  %v7473_v45 = vsub.f32 1.0, %v13726_v62 }
 0x804   : > { %7747 = vrot.lane.b32.xlu1 %v7664_v48, %s10058_s23  ;;  %v9922_v46 = vpop.eup %9921  ;;  %v7426_v48 = vadd.f32 %v16087_v50, %v17192_v59  ;;  %v17195_v50 = vld [vmem:[#allocation75_spill] sm:$0xff] }
 0x805   : > { %v7572_v7 = vpop.permute.xlu1 %7571  ;;  %7745 = vrot.lane.b32.xlu0 %v7663_v2, %s10058_s23  ;;  %v9924_v19 = vpop.eup %9923 }
 0x806   : > { %v7666_v25 = vmul.f32 %v9912_v39, %v7572_v7  ;;  %v7570_v35 = vpop.permute.xlu0 %7569  ;;  %v9926_v2 = vpop.eup %9925  ;;  %9935 = vtanh.f32 %v7426_v48  ;;  %v17194_v39 = vld [vmem:[#allocation76_spill] sm:$0xff] }
 0x807   : > { %v7665_v57 = vmul.f32 %v9914_v51, %v7570_v35  ;;  %v7428_v7 = vadd.f32 %v16091_v10, %v17194_v39  ;;  %9937 = vtanh.f32 %v7425_v11  ;;  %v17197_v10 = vld [vmem:[#allocation77_spill] sm:$0xff] }
 0x808   : > { %7751 = vrot.lane.b32.xlu1 %v7666_v25, %s10058_s23  ;;  %v7427_v25 = vadd.f32 %v16093_v15, %v17195_v50 }
 0x809   : > { %v7576_v55 = vpop.permute.xlu1 %7575  ;;  %7749 = vrot.lane.b32.xlu0 %v7665_v57, %s10058_s23  ;;  %v9928_v18 = vpop.eup %9927  ;;  %9939 = vtanh.f32 %v7428_v7 }
 0x80a   : > { %v7668_v63 = vmul.f32 %v9916_v40, %v7576_v55  ;;  %v7574_v60 = vpop.permute.xlu0 %7573  ;;  %v9930_v17 = vpop.eup %9929  ;;  %9941 = vtanh.f32 %v7427_v25  ;;  %v7429_v55 = vadd.f32 %v16097_v44, %v17197_v10 }
 0x80b   : > { %v7667_v13 = vmul.f32 %v9918_v30, %v7574_v60  ;;  %9943 = vtanh.f32 %v7430_v29 }
 0x80c   : > { %7755 = vrot.lane.b32.xlu1 %v7668_v63, %s10058_s23  ;;  %v9932_v15 = vpop.eup %9931  ;;  %9945 = vtanh.f32 %v7429_v55 }
 0x80d   : > { %v7580_v8 = vpop.permute.xlu1 %7579  ;;  %7753 = vrot.lane.b32.xlu0 %v7667_v13, %s10058_s23  ;;  %v9934_v63 = vpop.eup %9933  ;;  %v7432_v13 = vadd.f32 %v16101_v43, %v17198_v58  ;;  %v17201_v43 = vld [vmem:[#allocation90_spill] sm:$0xff] }
 0x80e   : > { %v7670_v14 = vmul.f32 %v9920_v4, %v7580_v8  ;;  %v7578_v21 = vpop.permute.xlu0 %7577 }
 0x80f   : > { %v7669_v54 = vmul.f32 %v9922_v46, %v7578_v21  ;;  %9947 = vtanh.f32 %v7432_v13  ;;  %v17200_v21 = vld [vmem:[#allocation188_spill] sm:$0xff] }
 0x810   : > { %7759 = vrot.lane.b32.xlu1 %v7670_v14, %s10058_s23  ;;  %v9936_v44 = vpop.eup %9935  ;;  %v7434_v59 = vadd.f32 %v16107_v49, %v17200_v21  ;;  %9949 = vtanh.f32 %v7431_v56  ;;  %v17203_v49 = vld [vmem:[#allocation123_spill] sm:$0xff]  ;;  %v10005_v56 = vld [vmem:[%s11352_s27 + $0x1b] sm:$0xff]  ;;  %v7475_v21 = vsub.f32 1.0, %v13748_v37  ;;  %v7477_v37 = vsub.f32 1.0, %v13769_v6 }
 0x811   : > { %v7584_v32 = vpop.permute.xlu1 %7583  ;;  %7757 = vrot.lane.b32.xlu0 %v7669_v54, %s10058_s23  ;;  %v9938_v8 = vpop.eup %9937  ;;  %v7433_v54 = vadd.f32 %v16109_v0, %v17201_v43  ;;  %v7435_v39 = vadd.f32 %v16115_v9, %v17203_v49  ;;  %v10010_v49 = vld [vmem:[%s11352_s27 + $0x33] sm:$0xff]  ;;  %v7479_v6 = vsub.f32 1.0, %v13796_v5  ;;  %v7481_v5 = vsub.f32 1.0, %v13816_v22 }
 0x812   : > { %v7672_v1 = vmul.f32 %v9924_v19, %v7584_v32  ;;  %v7582_v26 = vpop.permute.xlu0 %7581  ;;  %9951 = vtanh.f32 %v7434_v59  ;;  %v7483_v22 = vsub.f32 1.0, %v13836_v23  ;;  %v7485_v23 = vsub.f32 1.0, %v13856_v36 }
 0x813   : > { %v7671_v51 = vmul.f32 %v9926_v2, %v7582_v26  ;;  %v9940_v12 = vpop.eup %9939  ;;  %v17202_v2 = vld [vmem:[#allocation122_spill] sm:$0xff]  ;;  %9953 = vtanh.f32 %v7433_v54  ;;  %v7478_v54 = vsub.f32 1.0, %v13786_v47  ;;  %v7480_v47 = vsub.f32 1.0, %v13806_v33 }
 0x814   : > { %7763 = vrot.lane.b32.xlu1 %v7672_v1, %s10058_s23  ;;  %v9942_v11 = vpop.eup %9941  ;;  %v7436_v1 = vadd.f32 %v16113_v41, %v17202_v2  ;;  %v10009_v2 = vld [vmem:[%s11352_s27 + $0x3b] sm:$0xff]  ;;  %v7482_v33 = vsub.f32 1.0, %v13826_v42  ;;  %v7484_v42 = vsub.f32 1.0, %v13846_v52  ;;  %v7486_v52 = vsub.f32 1.0, %v13866_v31 }
 0x815   : > { %v7588_v35 = vpop.permute.xlu1 %7587  ;;  %7761 = vrot.lane.b32.xlu0 %v7671_v51, %s10058_s23  ;;  %v9944_v0 = vpop.eup %9943  ;;  %v7488_v31 = vsub.f32 1.0, %v17146_v27  ;;  %v7487_v36 = vsub.f32 1.0, %v17147_v38  ;;  %v7490_v27 = vsub.f32 1.0, %v17148_v28 }
 0x816   : > { %v7674_v3 = vmul.f32 %v9928_v18, %v7588_v35  ;;  %v7586_v57 = vpop.permute.xlu0 %7585  ;;  %v9946_v51 = vpop.eup %9945  ;;  %9955 = vtanh.f32 %v7436_v1  ;;  %v7514_v1 = vmul.f32 %v10009_v2, %v7478_v54  ;;  %v10020_v54 = vld [vmem:[%s11352_s27 + $0x83] sm:$0xff] }
 0x817   : > { %v7673_v40 = vmul.f32 %v9930_v17, %v7586_v57  ;;  %9957 = vtanh.f32 %v7435_v39  ;;  %v7513_v39 = vmul.f32 %v10010_v49, %v7477_v37  ;;  %v17205_v2 = vld [vmem:[#allocation86_spill] sm:$0xff] }
 0x818   : > { %7767 = vrot.lane.b32.xlu1 %v7674_v3, %s10058_s23  ;;  %v7492_v28 = vsub.f32 1.0, %v17205_v2  ;;  %v17206_v49 = vld [vmem:[#allocation74_spill] sm:$0xff] }
 0x819   : > { %v7592_v30 = vpop.permute.xlu1 %7591  ;;  %7765 = vrot.lane.b32.xlu0 %v7673_v40, %s10058_s23  ;;  %v9948_v41 = vpop.eup %9947 }
 0x81a   : > { %v7676_v60 = vmul.f32 %v9932_v15, %v7592_v30  ;;  %v7590_v61 = vpop.permute.xlu0 %7589  ;;  %v9950_v17 = vpop.eup %9949 }
 0x81b   : > { %v7675_v20 = vmul.f32 %v9934_v63, %v7590_v61 }
 0x81c   : > { %7771 = vrot.lane.b32.xlu1 %v7676_v60, %s10058_s23  ;;  %v9952_v34 = vpop.eup %9951 }
 0x81d   : > { %v7596_v4 = vpop.permute.xlu1 %7595  ;;  %7769 = vrot.lane.b32.xlu0 %v7675_v20, %s10058_s23  ;;  %v9954_v40 = vpop.eup %9953  ;;  %v7474_v20 = vsub.f32 1.0, %v13738_v53  ;;  %v10007_v53 = vld [vmem:[%s11352_s27 + $0x2b] sm:$0xff] }
 0x81e   : > { %v7678_v46 = vmul.f32 %v9936_v44, %v7596_v4  ;;  %v7594_v14 = vpop.permute.xlu0 %7593  ;;  %v7476_v4 = vsub.f32 1.0, %v13758_v16 }
 0x81f   : > { %v7677_v48 = vmul.f32 %v9938_v8, %v7594_v14  ;;  %v7510_v44 = vmul.f32 %v10005_v56, %v7474_v20 }
 0x820   : > { %7775 = vrot.lane.b32.xlu1 %v7678_v46, %s10058_s23  ;;  %v9956_v30 = vpop.eup %9955  ;;  %v10006_v46 = vld [vmem:[%s11352_s27 + $0x13] sm:$0xff]  ;;  %v7512_v62 = vmul.f32 %v10007_v53, %v7476_v4 }
 0x821   : > { %v7600_v24 = vpop.permute.xlu1 %7599  ;;  %7773 = vrot.lane.b32.xlu0 %v7677_v48, %s10058_s23  ;;  %v9958_v60 = vpop.eup %9957  ;;  %v7509_v14 = vmul.f32 %v10006_v46, %v7473_v45  ;;  %v10018_v46 = vld [vmem:[%s11352_s27 + $0x73] sm:$0xff] }
 0x822   : > { %v7680_v19 = vmul.f32 %v9940_v12, %v7600_v24  ;;  %v7598_v32 = vpop.permute.xlu0 %7597  ;;  %v10008_v12 = vld [vmem:[%s11352_s27 + $0x23] sm:$0xff] }
 0x823   : > { %v7679_v26 = vmul.f32 %v9942_v11, %v7598_v32  ;;  %v7511_v24 = vmul.f32 %v10008_v12, %v7475_v21  ;;  %v17204_v12 = vld [vmem:[#allocation70_spill] sm:$0xff] }
 0x824   : > { %7779 = vrot.lane.b32.xlu1 %v7680_v19, %s10058_s23  ;;  %v7489_v38 = vsub.f32 1.0, %v17204_v12 }
 0x825   : > { %v7604_v7 = vpop.permute.xlu1 %7603  ;;  %7777 = vrot.lane.b32.xlu0 %v7679_v26, %s10058_s23 }
 0x826   : > { %v7682_v50 = vmul.f32 %v9944_v0, %v7604_v7  ;;  %v7602_v25 = vpop.permute.xlu0 %7601 }
 0x827   : > { %v7681_v18 = vmul.f32 %v9946_v51, %v7602_v25 }
 0x828   : > { %7783 = vrot.lane.b32.xlu1 %v7682_v50, %s10058_s23  ;;  %v10011_v50 = vld [vmem:[%s11352_s27 + $0x4b] sm:$0xff] }
 0x829   : > { %v7608_v35 = vpop.permute.xlu1 %7607  ;;  %7781 = vrot.lane.b32.xlu0 %v7681_v18, %s10058_s23  ;;  %v7516_v25 = vmul.f32 %v10011_v50, %v7480_v47  ;;  %v10022_v47 = vld [vmem:[%s11352_s27 + $0x93] sm:$0xff] }
 0x82a   : > { %v7684_v9 = vmul.f32 %v9948_v41, %v7608_v35  ;;  %v7606_v3 = vpop.permute.xlu0 %7605  ;;  %v10012_v41 = vld [vmem:[%s11352_s27 + $0x43] sm:$0xff] }
 0x82b   : > { %v7683_v57 = vmul.f32 %v9950_v17, %v7606_v3  ;;  %v7515_v35 = vmul.f32 %v10012_v41, %v7479_v6  ;;  %v10024_v41 = vld [vmem:[%s11352_s27 + $0xa3] sm:$0xff] }
 0x82c   : > { %7787 = vrot.lane.b32.xlu1 %v7684_v9, %s10058_s23 }
 0x82d   : > { %v7612_v29 = vpop.permute.xlu1 %7611  ;;  %7785 = vrot.lane.b32.xlu0 %v7683_v57, %s10058_s23  ;;  %v10013_v57 = vld [vmem:[%s11352_s27 + $0x5b] sm:$0xff] }
 0x82e   : > { %v7686_v10 = vmul.f32 %v9952_v34, %v7612_v29  ;;  %v7610_v55 = vpop.permute.xlu0 %7609  ;;  %v7518_v34 = vmul.f32 %v10013_v57, %v7482_v33 }
 0x82f   : > { %v7685_v15 = vmul.f32 %v9954_v40, %v7610_v55  ;;  %v10014_v40 = vld [vmem:[%s11352_s27 + $0x53] sm:$0xff] }
 0x830   : > { %7791 = vrot.lane.b32.xlu1 %v7686_v10, %s10058_s23  ;;  %v7517_v10 = vmul.f32 %v10014_v40, %v7481_v5  ;;  %v17208_v5 = vld [vmem:[#allocation87_spill] sm:$0xff] }
 0x831   : > { %v7616_v63 = vpop.permute.xlu1 %7615  ;;  %7789 = vrot.lane.b32.xlu0 %v7685_v15, %s10058_s23 }
 0x832   : > { %v7688_v61 = vmul.f32 %v9956_v30, %v7616_v63  ;;  %v7614_v58 = vpop.permute.xlu0 %7613  ;;  %v10015_v63 = vld [vmem:[%s11352_s27 + $0x6b] sm:$0xff] }
 0x833   : > { %v7687_v13 = vmul.f32 %v9958_v60, %v7614_v58  ;;  %v7520_v60 = vmul.f32 %v10015_v63, %v7484_v42  ;;  %v10016_v58 = vld [vmem:[%s11352_s27 + $0x63] sm:$0xff] }
 0x834   : > { %7795 = vrot.lane.b32.xlu1 %v7688_v61, %s10058_s23 }
 0x835   : > { %7793 = vrot.lane.b32.xlu0 %v7687_v13, %s10058_s23  ;;  %v7519_v13 = vmul.f32 %v10016_v58, %v7483_v22  ;;  %v10026_v22 = vld [vmem:[%s11352_s27 + $0xb3] sm:$0xff] }
 0x862   : > { %v7728_v8 = vpop.permute.xlu1 %7727 }
 0x863   : > { %v7834_v59 = vadd.f32 %v7728_v8, %v7510_v44  ;;  %v7726_v48 = vpop.permute.xlu0 %7725  ;;  %v10017_v44 = vld [vmem:[%s11352_s27 + $0x7b] sm:$0xff] }
 0x864   : > { %v7833_v43 = vadd.f32 %v7726_v48, %v7509_v14  ;;  %v7522_v4 = vmul.f32 %v10017_v44, %v7486_v52  ;;  %v7521_v14 = vmul.f32 %v10018_v46, %v7485_v23  ;;  %v17212_v44 = vld [vmem:[#allocation81_spill] sm:$0xff] }
 0x865   : > { %7870 = vst.msk [vmem:[%s13777_s7 + $0x8] sm:$0xff] %vm2602_vm8, %v7834_v59 }
 0x866   : > { %7869 = vst.msk [vmem:[%s13777_s7] sm:$0xff] %vm2602_vm8, %v7833_v43  ;;  %v7732_v16 = vpop.permute.xlu1 %7731  ;;  %v10019_v43 = vld [vmem:[%s11352_s27 + $0x8b] sm:$0xff] }
 0x867   : > { %v7836_v11 = vadd.f32 %v7732_v16, %v7512_v62  ;;  %v7730_v19 = vpop.permute.xlu0 %7729  ;;  %v7524_v53 = vmul.f32 %v10019_v43, %v7488_v31  ;;  %v7523_v16 = vmul.f32 %v10020_v54, %v7487_v36  ;;  %v10030_v43 = vld [vmem:[%s11352_s27 + $0xd3] sm:$0xff] }
 0x868   : > { %v7835_v32 = vadd.f32 %v7730_v19, %v7511_v24  ;;  %v10021_v19 = vld [vmem:[%s11352_s27 + $0x9b] sm:$0xff] }
 0x869   : > { %7872 = vst.msk [vmem:[%s13777_s7 + $0x18] sm:$0xff] %vm2602_vm8, %v7836_v11 }
 0x86a   : > { %7871 = vst.msk [vmem:[%s13777_s7 + $0x10] sm:$0xff] %vm2602_vm8, %v7835_v32  ;;  %v7736_v26 = vpop.permute.xlu1 %7735  ;;  %v7526_v32 = vmul.f32 %v10021_v19, %v7490_v27  ;;  %v17214_v27 = vld [vmem:[#allocation91_spill] sm:$0xff] }
 0x86b   : > { %v7838_v0 = vadd.f32 %v7736_v26, %v7514_v1  ;;  %v7734_v7 = vpop.permute.xlu0 %7733  ;;  %v7525_v26 = vmul.f32 %v10022_v47, %v7489_v38  ;;  %v10031_v38 = vld [vmem:[%s11352_s27 + $0xeb] sm:$0xff] }
 0x86c   : > { %v7837_v51 = vadd.f32 %v7734_v7, %v7513_v39  ;;  %v7491_v39 = vsub.f32 1.0, %v17206_v49 }
 0x86d   : > { %7874 = vst.msk [vmem:[%s13777_s7 + $0x28] sm:$0xff] %vm2602_vm8, %v7838_v0 }
 0x86e   : > { %7873 = vst.msk [vmem:[%s13777_s7 + $0x20] sm:$0xff] %vm2602_vm8, %v7837_v51  ;;  %v7740_v18 = vpop.permute.xlu1 %7739  ;;  %v10023_v51 = vld [vmem:[%s11352_s27 + $0xab] sm:$0xff] }
 0x86f   : > { %v7840_v17 = vadd.f32 %v7740_v18, %v7516_v25  ;;  %v7738_v9 = vpop.permute.xlu0 %7737  ;;  %v7528_v50 = vmul.f32 %v10023_v51, %v7492_v28  ;;  %v17207_v25 = vld [vmem:[#allocation78_spill] sm:$0xff]  ;;  %v17216_v28 = vld [vmem:[#allocation83_spill] sm:$0xff] }
 0x870   : > { %v7839_v3 = vadd.f32 %v7738_v9, %v7515_v35  ;;  %v7494_v33 = vsub.f32 1.0, %v17207_v25  ;;  %v7527_v35 = vmul.f32 %v10024_v41, %v7491_v39  ;;  %v10033_v39 = vld [vmem:[%s11352_s27 + $0xfb] sm:$0xff] }
 0x871   : > { %7876 = vst.msk [vmem:[%s13777_s7 + $0x38] sm:$0xff] %vm2602_vm8, %v7840_v17  ;;  %v7493_v17 = vsub.f32 1.0, %v17208_v5 }
 0x872   : > { %7875 = vst.msk [vmem:[%s13777_s7 + $0x30] sm:$0xff] %vm2602_vm8, %v7839_v3  ;;  %v7744_v29 = vpop.permute.xlu1 %7743 }
 0x873   : > { %v7842_v55 = vadd.f32 %v7744_v29, %v7518_v34  ;;  %v7742_v15 = vpop.permute.xlu0 %7741  ;;  %v10025_v34 = vld [vmem:[%s11352_s27 + $0xbb] sm:$0xff]  ;;  %v17209_v29 = vld [vmem:[#allocation80_spill] sm:$0xff] }
 0x874   : > { %v7841_v30 = vadd.f32 %v7742_v15, %v7517_v10  ;;  %v7530_v42 = vmul.f32 %v10025_v34, %v7494_v33  ;;  %v7496_v40 = vsub.f32 1.0, %v17209_v29  ;;  %v17210_v15 = vld [vmem:[#allocation89_spill] sm:$0xff]  ;;  %v17218_v33 = vld [vmem:[#allocation156_spill] sm:$0xff] }
 0x875   : > { %7878 = vst.msk [vmem:[%s13777_s7 + $0x48] sm:$0xff] %vm2602_vm8, %v7842_v55  ;;  %v7529_v55 = vmul.f32 %v10026_v22, %v7493_v17  ;;  %v10035_v17 = vld [vmem:[%s11352_s27 + $0x10b] sm:$0xff] }
 0x876   : > { %7877 = vst.msk [vmem:[%s13777_s7 + $0x40] sm:$0xff] %vm2602_vm8, %v7841_v30  ;;  %v7748_v61 = vpop.permute.xlu1 %7747  ;;  %v7495_v30 = vsub.f32 1.0, %v17210_v15 }
 0x877   : > { %v7844_v20 = vadd.f32 %v7748_v61, %v7520_v60  ;;  %v7746_v45 = vpop.permute.xlu0 %7745  ;;  %v10027_v61 = vld [vmem:[%s11352_s27 + $0xcb] sm:$0xff] }
 0x878   : > { %v7843_v56 = vadd.f32 %v7746_v45, %v7519_v13  ;;  %v7532_v58 = vmul.f32 %v10027_v61, %v7496_v40  ;;  %v17211_v13 = vld [vmem:[#allocation187_spill] sm:$0xff]  ;;  %v17220_v40 = vld [vmem:[#allocation93_spill] sm:$0xff] }
 0x879   : > { %7880 = vst.msk [vmem:[%s13777_s7 + $0x58] sm:$0xff] %vm2602_vm8, %v7844_v20  ;;  %v7498_v23 = vsub.f32 1.0, %v17211_v13  ;;  %v10028_v45 = vld [vmem:[%s11352_s27 + $0xc3] sm:$0xff] }
 0x87a   : > { %7879 = vst.msk [vmem:[%s13777_s7 + $0x50] sm:$0xff] %vm2602_vm8, %v7843_v56  ;;  %v7752_v8 = vpop.permute.xlu1 %7751  ;;  %v7531_v56 = vmul.f32 %v10028_v45, %v7495_v30  ;;  %v10037_v30 = vld [vmem:[%s11352_s27 + $0x11b] sm:$0xff] }
 0x87b   : > { %v7846_v21 = vadd.f32 %v7752_v8, %v7522_v4  ;;  %v7750_v59 = vpop.permute.xlu0 %7749  ;;  %v7497_v4 = vsub.f32 1.0, %v17212_v44 }
 0x87c   : > { %v7845_v48 = vadd.f32 %v7750_v59, %v7521_v14  ;;  %v10029_v14 = vld [vmem:[%s11352_s27 + $0xdb] sm:$0xff] }
 0x87d   : > { %7882 = vst.msk [vmem:[%s13777_s7 + $0x68] sm:$0xff] %vm2602_vm8, %v7846_v21  ;;  %v7534_v36 = vmul.f32 %v10029_v14, %v7498_v23  ;;  %v17213_v21 = vld [vmem:[#allocation82_spill] sm:$0xff] }
 0x87e   : > { %7881 = vst.msk [vmem:[%s13777_s7 + $0x60] sm:$0xff] %vm2602_vm8, %v7845_v48  ;;  %v7756_v62 = vpop.permute.xlu1 %7755  ;;  %v7500_v59 = vsub.f32 1.0, %v17213_v21  ;;  %v17222_v23 = vld [vmem:[#allocation190_spill] sm:$0xff] }
 0x87f   : > { %v7848_v24 = vadd.f32 %v7756_v62, %v7524_v53  ;;  %v7754_v37 = vpop.permute.xlu0 %7753  ;;  %v7533_v53 = vmul.f32 %v10030_v43, %v7497_v4  ;;  %v7499_v62 = vsub.f32 1.0, %v17214_v27  ;;  %v10039_v4 = vld [vmem:[%s11352_s27 + $0x12b] sm:$0x3f] }
 0x880   : > { %v7847_v11 = vadd.f32 %v7754_v37, %v7523_v16  ;;  %v17215_v37 = vld [vmem:[#allocation155_spill] sm:$0xff] }
 0x881   : > { %7884 = vst.msk [vmem:[%s13777_s7 + $0x78] sm:$0xff] %vm2602_vm8, %v7848_v24  ;;  %v7536_v24 = vmul.f32 %v10031_v38, %v7500_v59 }
 0x882   : > { %7883 = vst.msk [vmem:[%s13777_s7 + $0x70] sm:$0xff] %vm2602_vm8, %v7847_v11  ;;  %v7760_v1 = vpop.permute.xlu1 %7759  ;;  %v7502_v11 = vsub.f32 1.0, %v17215_v37 }
 0x883   : > { %v7850_v6 = vadd.f32 %v7760_v1, %v7526_v32  ;;  %v7758_v0 = vpop.permute.xlu0 %7757  ;;  %v10032_v32 = vld [vmem:[%s11352_s27 + $0xe3] sm:$0xff]  ;;  %v7501_v1 = vsub.f32 1.0, %v17216_v28 }
 0x884   : > { %v7849_v7 = vadd.f32 %v7758_v0, %v7525_v26  ;;  %v7535_v2 = vmul.f32 %v10032_v32, %v7499_v62  ;;  %v17217_v0 = vld [vmem:[#allocation92_spill] sm:$0xff] }
 0x885   : > { %7886 = vst.msk [vmem:[%s13777_s7 + $0x88] sm:$0xff] %vm2602_vm8, %v7850_v6  ;;  %v7538_v6 = vmul.f32 %v10033_v39, %v7502_v11 }
 0x886   : > { %7885 = vst.msk [vmem:[%s13777_s7 + $0x80] sm:$0xff] %vm2602_vm8, %v7849_v7  ;;  %v7764_v18 = vpop.permute.xlu1 %7763  ;;  %v7504_v7 = vsub.f32 1.0, %v17217_v0 }
 0x887   : > { %v7852_v9 = vadd.f32 %v7764_v18, %v7528_v50  ;;  %v7762_v3 = vpop.permute.xlu0 %7761  ;;  %v10034_v50 = vld [vmem:[%s11352_s27 + $0xf3] sm:$0xff]  ;;  %v7503_v18 = vsub.f32 1.0, %v17218_v33 }
 0x888   : > { %v7851_v57 = vadd.f32 %v7762_v3, %v7527_v35  ;;  %v7537_v25 = vmul.f32 %v10034_v50, %v7501_v1  ;;  %v17219_v3 = vld [vmem:[#allocation189_spill] sm:$0xff] }
 0x889   : > { %7888 = vst.msk [vmem:[%s13777_s7 + $0x98] sm:$0xff] %vm2602_vm8, %v7852_v9  ;;  %v7540_v9 = vmul.f32 %v10035_v17, %v7504_v7 }
 0x88a   : > { %7887 = vst.msk [vmem:[%s13777_s7 + $0x90] sm:$0xff] %vm2602_vm8, %v7851_v57  ;;  %v7768_v10 = vpop.permute.xlu1 %7767  ;;  %v7506_v57 = vsub.f32 1.0, %v17219_v3 }
 0x88b   : > { %v7854_v63 = vadd.f32 %v7768_v10, %v7530_v42  ;;  %v7766_v60 = vpop.permute.xlu0 %7765  ;;  %v10036_v42 = vld [vmem:[%s11352_s27 + $0x103] sm:$0xff]  ;;  %v7505_v10 = vsub.f32 1.0, %v17220_v40 }
 0x88c   : > { %v7853_v52 = vadd.f32 %v7766_v60, %v7529_v55  ;;  %v7539_v29 = vmul.f32 %v10036_v42, %v7503_v18  ;;  %v17221_v60 = vld [vmem:[#allocation124_spill] sm:$0xff] }
 0x88d   : > { %7890 = vst.msk [vmem:[%s13777_s7 + $0xa8] sm:$0xff] %vm2602_vm8, %v7854_v63  ;;  %v7542_v63 = vmul.f32 %v10037_v30, %v7506_v57 }
 0x88e   : > { %7889 = vst.msk [vmem:[%s13777_s7 + $0xa0] sm:$0xff] %vm2602_vm8, %v7853_v52  ;;  %v7772_v20 = vpop.permute.xlu1 %7771  ;;  %v7508_v52 = vsub.f32 1.0, %v17221_v60 }
 0x88f   : > { %v7856_v31 = vadd.f32 %v7772_v20, %v7532_v58  ;;  %v7770_v8 = vpop.permute.xlu0 %7769  ;;  %v10038_v58 = vld [vmem:[%s11352_s27 + $0x113] sm:$0xff]  ;;  %v7507_v20 = vsub.f32 1.0, %v17222_v23 }
 0x890   : > { %v7855_v46 = vadd.f32 %v7770_v8, %v7531_v56  ;;  %v7541_v13 = vmul.f32 %v10038_v58, %v7505_v10 }
 0x891   : > { %7892 = vst.msk [vmem:[%s13777_s7 + $0xb8] sm:$0xff] %vm2602_vm8, %v7856_v31  ;;  %v7544_v31 = vmul.f32 %v10039_v4, %v7508_v52 }
 0x892   : > { %7891 = vst.msk [vmem:[%s13777_s7 + $0xb0] sm:$0xff] %vm2602_vm8, %v7855_v46  ;;  %v7776_v48 = vpop.permute.xlu1 %7775  ;;  %v10040_v46 = vld [vmem:[%s11352_s27 + $0x123] sm:$0xff] }
 0x893   : > { %v7858_v54 = vadd.f32 %v7776_v48, %v7534_v36  ;;  %v7774_v16 = vpop.permute.xlu0 %7773  ;;  %v7543_v14 = vmul.f32 %v10040_v46, %v7507_v20 }
 0x894   : > { %v7857_v12 = vadd.f32 %v7774_v16, %v7533_v53 }
 0x895   : > { %7894 = vst.msk [vmem:[%s13777_s7 + $0xc8] sm:$0xff] %vm2602_vm8, %v7858_v54 }
 0x896   : > { %7893 = vst.msk [vmem:[%s13777_s7 + $0xc0] sm:$0xff] %vm2602_vm8, %v7857_v12  ;;  %v7780_v19 = vpop.permute.xlu1 %7779 }
 0x897   : > { %v7860_v47 = vadd.f32 %v7780_v19, %v7536_v24  ;;  %v7778_v26 = vpop.permute.xlu0 %7777 }
 0x898   : > { %v7859_v49 = vadd.f32 %v7778_v26, %v7535_v2 }
 0x899   : > { %7896 = vst.msk [vmem:[%s13777_s7 + $0xd8] sm:$0xff] %vm2602_vm8, %v7860_v47 }
 0x89a   : > { %7895 = vst.msk [vmem:[%s13777_s7 + $0xd0] sm:$0xff] %vm2602_vm8, %v7859_v49  ;;  %v7784_v51 = vpop.permute.xlu1 %7783 }
 0x89b   : > { %v7862_v41 = vadd.f32 %v7784_v51, %v7538_v6  ;;  %v7782_v35 = vpop.permute.xlu0 %7781 }
 0x89c   : > { %v7861_v5 = vadd.f32 %v7782_v35, %v7537_v25 }
 0x89d   : > { %7898 = vst.msk [vmem:[%s13777_s7 + $0xe8] sm:$0xff] %vm2602_vm8, %v7862_v41 }
 0x89e   : > { %7897 = vst.msk [vmem:[%s13777_s7 + $0xe0] sm:$0xff] %vm2602_vm8, %v7861_v5  ;;  %v7788_v34 = vpop.permute.xlu1 %7787 }
 0x89f   : > { %v7864_v22 = vadd.f32 %v7788_v34, %v7540_v9  ;;  %v7786_v55 = vpop.permute.xlu0 %7785 }
 0x8a0   : > { %v7863_v15 = vadd.f32 %v7786_v55, %v7539_v29 }
 0x8a1   : > { %7900 = vst.msk [vmem:[%s13777_s7 + $0xf8] sm:$0xff] %vm2602_vm8, %v7864_v22 }
 0x8a2   : > { %7899 = vst.msk [vmem:[%s13777_s7 + $0xf0] sm:$0xff] %vm2602_vm8, %v7863_v15  ;;  %v7792_v61 = vpop.permute.xlu1 %7791 }
 0x8a3   : > { %v7866_v45 = vadd.f32 %v7792_v61, %v7542_v63  ;;  %v7790_v56 = vpop.permute.xlu0 %7789 }
 0x8a4   : > { %v7865_v44 = vadd.f32 %v7790_v56, %v7541_v13 }
 0x8a5   : > { %7902 = vst.msk [vmem:[%s13777_s7 + $0x108] sm:$0xff] %vm2602_vm8, %v7866_v45 }
 0x8a6   : > { %7901 = vst.msk [vmem:[%s13777_s7 + $0x100] sm:$0xff] %vm2602_vm8, %v7865_v44  ;;  %v7796_v8 = vpop.permute.xlu1 %7795 }
 0x8a7   : > { %v7868_v36 = vadd.f32 %v7796_v8, %v7544_v31  ;;  %v7794_v21 = vpop.permute.xlu0 %7793 }
 0x8a8   : > { %v7867_v59 = vadd.f32 %v7794_v21, %v7543_v14 }
 0x8a9   : > { %7904 = vst.msk [vmem:[%s13777_s7 + $0x118] sm:$0x3f] %vm5382_vm15, %v7868_v36 }
 0x8aa   : > { %7903 = vst.msk [vmem:[%s13777_s7 + $0x110] sm:$0xff] %vm2602_vm8, %v7867_v59 }
 0x8ab PF: > { %s16_s21 = sadd.s32 1, %s10047_s21  }
 0x8ac   : > { %p13_p4 = scmp.ge.s32.totalorder %s16_s21, 4  }
 0x8ae   :  { %15 = sbr.rel (!%p13_p4) target bundleno = 1 (0x1), region = 77 }

</bundles_post_ra>
